<compile_context>
chip_gen: v7x
topology: tpu7x:2x2x1
jax: 0.10.0
libtpu: 0.0.40
codegen_flags: <defaults>
</compile_context>

<pallas_src>
import jax
import jax.numpy as jnp
from jax.experimental import pallas as pl
from jax.experimental.pallas import tpu as pltpu

CMID = 128   # hidden channel count from the module definition
KTAPS = 9    # 3x3 conv taps


# ----------------------------- Pallas kernel --------------------------------
def _make_kernel(n, h, w):
    hw = h * w
    m = n * hw
    center = 4  # tap (dy=1, dx=1): no shift, no border mask needed

    def kernel(mask_ref, p1_ref, w1_ref, b1_ref, w2_ref, b2_ref, w3_ref,
               b3_ref, o_ref, acc_ref):
        # ---- conv1: one (M, 18) @ (18, 128) bf16 MXU matmul (BN1 scale in w1)
        h1 = jnp.dot(p1_ref[0], w1_ref[0], preferred_element_type=jnp.float32)
        h1 = jnp.maximum(h1 + b1_ref[0], 0.0)                  # (M, 128) f32

        # ---- conv2: 9 accumulating per-tap bf16 matmuls (no im2col scratch).
        # Centre tap first initialises the f32 accumulator.
        acc_ref[...] = jnp.dot(h1.astype(jnp.bfloat16), w2_ref[0, center],
                               preferred_element_type=jnp.float32)
        for dy in range(3):
            for dx in range(3):
                k = dy * 3 + dx
                if k == center:
                    continue
                d = (dy - 1) * w + (dx - 1)        # row shift in (n, y, x) order
                shifted = pltpu.roll(h1, (-d) % m, axis=0)
                # class-invariant border mask (VMEM-resident, no per-step iota)
                win = (shifted * mask_ref[k]).astype(jnp.bfloat16)
                acc_ref[...] += jnp.dot(win, w2_ref[0, k],
                                        preferred_element_type=jnp.float32)
        h2 = jnp.maximum(acc_ref[...] + b2_ref[0], 0.0)        # (M, 128) f32

        # ---- conv3 1x1 (128 -> 1): VPU multiply + lane reduce over an
        # (N, HW, 128) view so the lane-dense (N, HW) slab is produced directly
        # (no (M, 1) intermediate and no sublane->lane relayout tail).
        out = jnp.sum(h2.reshape(n, hw, CMID) * w3_ref[0], axis=-1) + b3_ref[0]
        o_ref[0] = out                                         # (N, HW) store

    return kernel


def _border_masks(n, h, w):
    """(9, N*H*W, 128) f32: 1 where the (dy,dx) tap reads inside the image."""
    hw = h * w
    m = n * hw
    row = jnp.arange(m, dtype=jnp.int32)
    xi = row % w
    yi = (row // w) % h
    masks = []
    for dy in range(3):
        for dx in range(3):
            sy, sx = dy - 1, dx - 1
            valid = ((xi + sx >= 0) & (xi + sx < w) &
                     (yi + sy >= 0) & (yi + sy < h))
            masks.append(valid)
    mask = jnp.stack(masks, axis=0).astype(jnp.float32)        # (9, M)
    return jnp.broadcast_to(mask[:, :, None], (KTAPS, m, CMID))


def rein_output_layer_forward(x1, x2, params):
    """x1, x2: (N, numClass, H, W) float32 (NCHW).  Returns (N, numClass, H, W)."""
    w1, b1, w2, b2, w3, b3 = params
    N, C, H, W = x1.shape
    assert x2.shape == x1.shape and w1.shape[0] == C
    HW = H * W
    M = N * HW

    # conv1 im2col built in the wrapper (layout-only: pad + shifted copies).
    # Rows ordered (n, y, x); columns ordered (tap, cin).  bf16 to halve DMA.
    xin = jnp.stack([x1, x2], axis=-1)                            # (N,C,H,W,2)
    xpad = jnp.pad(xin, ((0, 0), (0, 0), (1, 1), (1, 1), (0, 0)))
    taps = [xpad[:, :, dy:dy + H, dx:dx + W, :]
            for dy in range(3) for dx in range(3)]
    patches = jnp.stack(taps, axis=4)                             # (N,C,H,W,9,2)
    patches = jnp.transpose(patches, (1, 0, 2, 3, 4, 5))          # (C,N,H,W,9,2)
    patches = patches.reshape(C, M, 2 * KTAPS).astype(jnp.bfloat16)

    masks = _border_masks(N, H, W)                                # (9, M, 128)

    # Cost hint: conv1 + conv2 + conv3 MACs; dominant bytes are patches/w2/masks.
    flops = 2 * C * M * CMID * (2 * KTAPS + KTAPS * CMID + 1)
    bytes_accessed = (patches.size * 2 + masks.size * 4
                      + w1.size * 2 + w2.size * 2
                      + (b1.size + b2.size + w3.size + b3.size) * 4
                      + C * M * 4)

    kernel = _make_kernel(N, H, W)
    out_cnl = pl.pallas_call(
        kernel,
        out_shape=jax.ShapeDtypeStruct((C, N, HW), jnp.float32),
        grid_spec=pltpu.PrefetchScalarGridSpec(
            num_scalar_prefetch=0,
            grid=(C,),                                            # batch folded in
            in_specs=[
                # class-invariant masks: constant index_map -> DMA'd once
                pl.BlockSpec((KTAPS, M, CMID), lambda c: (0, 0, 0)),
                pl.BlockSpec((1, M, 2 * KTAPS), lambda c: (c, 0, 0)),       # patches bf16
                pl.BlockSpec((1, 2 * KTAPS, CMID), lambda c: (c, 0, 0)),    # w1 bf16
                pl.BlockSpec((1, 1, CMID), lambda c: (c, 0, 0)),            # b1 f32
                pl.BlockSpec((1, KTAPS, CMID, CMID), lambda c: (c, 0, 0, 0)),  # w2 bf16
                pl.BlockSpec((1, 1, CMID), lambda c: (c, 0, 0)),            # b2 f32
                pl.BlockSpec((1, 1, CMID), lambda c: (c, 0, 0)),            # w3 f32
                pl.BlockSpec((1, 1, 1), lambda c: (c, 0, 0)),               # b3 f32
            ],
            out_specs=pl.BlockSpec((1, N, HW), lambda c: (c, 0, 0)),
            scratch_shapes=[pltpu.VMEM((M, CMID), jnp.float32)],  # conv2 f32 acc
        ),
        compiler_params=pltpu.CompilerParams(
            dimension_semantics=("parallel",)),     # class axis shards across TCs
        cost_estimate=pl.CostEstimate(flops=flops, transcendentals=0,
                                      bytes_accessed=bytes_accessed),
    )(masks, patches, w1, b1, w2, b2, w3, b3)

    # (C, N, H*W) -> (N, C, H, W)
    return jnp.transpose(out_cnl, (1, 0, 2)).reshape(N, C, H, W)


# ----------------------- parameter setup & reference ------------------------
def make_params(key, num_class):
    """Deterministic synthetic parameters (PyTorch layouts), plus kernel layouts."""
    ks = jax.random.split(key, 10)
    # PyTorch conv weight layout: (Cout, Cin, kh, kw), stacked per class.
    w1_oihw = 0.1 * jax.random.normal(ks[0], (num_class, CMID, 2, 3, 3), jnp.float32)
    w2_oihw = 0.05 * jax.random.normal(ks[1], (num_class, CMID, CMID, 3, 3), jnp.float32)
    w3_oihw = 0.1 * jax.random.normal(ks[2], (num_class, 1, CMID, 1, 1), jnp.float32)
    b3 = 0.1 * jax.random.normal(ks[3], (num_class, 1), jnp.float32)

    # BatchNorm (inference mode): gamma, beta, running mean / var.
    g1 = 1.0 + 0.1 * jax.random.normal(ks[4], (num_class, CMID), jnp.float32)
    be1 = 0.1 * jax.random.normal(ks[5], (num_class, CMID), jnp.float32)
    m1 = 0.1 * jax.random.normal(ks[6], (num_class, CMID), jnp.float32)
    v1 = 0.5 + 0.5 * jax.random.uniform(ks[7], (num_class, CMID), jnp.float32)
    g2 = 1.0 + 0.1 * jax.random.normal(ks[8], (num_class, CMID), jnp.float32)
    be2 = 0.1 * jax.random.normal(ks[9], (num_class, CMID), jnp.float32)
    m2 = jnp.zeros((num_class, CMID), jnp.float32)
    v2 = jnp.ones((num_class, CMID), jnp.float32)

    eps = 1e-5
    s1 = g1 / jnp.sqrt(v1 + eps)
    bb1 = be1 - m1 * s1
    s2 = g2 / jnp.sqrt(v2 + eps)
    bb2 = be2 - m2 * s2

    # Kernel layouts: BN scales folded into weights; taps ordered (dy, dx).
    w1_k = jnp.transpose(w1_oihw, (0, 3, 4, 2, 1))            # (C,3,3,2,128)
    w1_k = (w1_k * s1[:, None, None, None, :]).reshape(num_class, 2 * KTAPS, CMID)
    w1_k = w1_k.astype(jnp.bfloat16)                          # MXU operand
    w2_k = jnp.transpose(w2_oihw, (0, 3, 4, 2, 1))            # (C,3,3,128,128)
    w2_k = (w2_k * s2[:, None, None, None, :]).reshape(num_class, KTAPS, CMID, CMID)
    # TODO(synk): on real weights re-validate bf16 w2 with the folded BN scale;
    # keep w2 in f32 (and only cast the im2col operand) if rounding amplifies.
    w2_k = w2_k.astype(jnp.bfloat16)                          # MXU operand
    w3_k = w3_oihw.reshape(num_class, 1, CMID)                # (C,1,128) over cin

    kernel_params = (w1_k,
                     bb1.reshape(num_class, 1, CMID),
                     w2_k,
                     bb2.reshape(num_class, 1, CMID),
                     w3_k,
                     b3.reshape(num_class, 1, 1))
    ref_params = (w1_oihw, s1, bb1, w2_oihw, s2, bb2, w3_oihw, b3)
    return kernel_params, ref_params


def reference_forward(x1, x2, ref_params):
    (w1, s1, b1, w2, s2, b2, w3, b3) = ref_params
    C = w1.shape[0]
    dn = ("NCHW", "OIHW", "NCHW")
    outs = []
    for i in range(C):
        xin = jnp.concatenate([x1[:, i:i + 1], x2[:, i:i + 1]], axis=1)
        h = jax.lax.conv_general_dilated(xin, w1[i], (1, 1), "SAME",
                                         dimension_numbers=dn)
        h = jnp.maximum(h * s1[i][None, :, None, None]
                        + b1[i][None, :, None, None], 0.0)
        h = jax.lax.conv_general_dilated(h, w2[i], (1, 1), "SAME",
                                         dimension_numbers=dn)
        h = jnp.maximum(h * s2[i][None, :, None, None]
                        + b2[i][None, :, None, None], 0.0)
        h = jax.lax.conv_general_dilated(h, w3[i], (1, 1), "SAME",
                                         dimension_numbers=dn)
        h = h + b3[i][None, :, None, None]
        outs.append(h)
    return jnp.concatenate(outs, axis=1)


if __name__ == "__main__":
    N, NUM_CLASS, H, W = 2, 4, 16, 16

    key = jax.random.PRNGKey(0)
    kx1, kx2, kp = jax.random.split(key, 3)
    x1 = jax.random.normal(kx1, (N, NUM_CLASS, H, W), jnp.float32)
    x2 = jax.random.normal(kx2, (N, NUM_CLASS, H, W), jnp.float32)

    kernel_params, ref_params = make_params(kp, NUM_CLASS)

    fwd = jax.jit(rein_output_layer_forward)
    out = jax.block_until_ready(fwd(x1, x2, kernel_params))

    ref = jax.block_until_ready(reference_forward(x1, x2, ref_params))

    assert out.shape == (N, NUM_CLASS, H, W), out.shape
    # conv1/conv2 run with bf16 MXU operands (f32 accumulate), so tolerance is
    # loosened vs a pure-f32 reference; real bugs would show O(0.1..1) errors.
    if not jnp.allclose(out, ref, rtol=5e-2, atol=5e-2):
        max_err = float(jnp.max(jnp.abs(out - ref)))
        raise AssertionError(f"mismatch vs reference, max abs err = {max_err}")

    print("KERNEL_OK")
</pallas_src>

<mosaic_0001>
module attributes {stable_mosaic.version = 11 : i64} {
  func.func @kernel(%arg0: i32, %arg1: memref<9x512x128xf32, #tpu.memory_space<vmem>>, %arg2: memref<1x512x18xbf16, #tpu.memory_space<vmem>>, %arg3: memref<1x18x128xbf16, #tpu.memory_space<vmem>>, %arg4: memref<1x1x128xf32, #tpu.memory_space<vmem>>, %arg5: memref<1x9x128x128xbf16, #tpu.memory_space<vmem>>, %arg6: memref<1x1x128xf32, #tpu.memory_space<vmem>>, %arg7: memref<1x1x128xf32, #tpu.memory_space<vmem>>, %arg8: memref<1x1x1xf32, #tpu.memory_space<vmem>>, %arg9: memref<1x2x256xf32, #tpu.memory_space<vmem>>, %arg10: memref<512x128xf32, #tpu.memory_space<vmem>>) attributes {dimension_semantics = [#tpu.dimension_semantics<parallel>], iteration_bounds = array<i64: 4>, scalar_prefetch = 0 : i64, scratch_operands = 1 : i64, tpu.core_type = #tpu.core_type<tc>, window_params = [{pipeline_mode = #tpu.pipeline_mode<synchronous>, transform_indices = @transform_0, window_bounds = array<i64: 9, 512, 128>}, {transform_indices = @transform_1, window_bounds = array<i64: 1, 512, 18>}, {transform_indices = @transform_2, window_bounds = array<i64: 1, 18, 128>}, {transform_indices = @transform_3, window_bounds = array<i64: 1, 1, 128>}, {transform_indices = @transform_4, window_bounds = array<i64: 1, 9, 128, 128>}, {transform_indices = @transform_5, window_bounds = array<i64: 1, 1, 128>}, {transform_indices = @transform_6, window_bounds = array<i64: 1, 1, 128>}, {transform_indices = @transform_7, window_bounds = array<i64: 1, 1, 1>}, {transform_indices = @transform_8, window_bounds = array<i64: 1, 2, 256>}]} {
    %c0 = arith.constant 0 : index
    %c0_0 = arith.constant 0 : index
    %c0_1 = arith.constant 0 : index
    %0 = vector.load %arg2[%c0, %c0_0, %c0_1] : memref<1x512x18xbf16, #tpu.memory_space<vmem>>, vector<1x512x18xbf16>
    %1 = vector.shape_cast %0 : vector<1x512x18xbf16> to vector<512x18xbf16>
    %c0_2 = arith.constant 0 : index
    %c0_3 = arith.constant 0 : index
    %c0_4 = arith.constant 0 : index
    %2 = vector.load %arg3[%c0_2, %c0_3, %c0_4] : memref<1x18x128xbf16, #tpu.memory_space<vmem>>, vector<1x18x128xbf16>
    %3 = vector.shape_cast %2 : vector<1x18x128xbf16> to vector<18x128xbf16>
    %cst = arith.constant dense<0.000000e+00> : vector<512x128xf32>
    %4 = tpu.matmul %1, %3, %cst {dimension_numbers = #tpu.dot_dimension_numbers<[1], [0], [0], [1], [0, 0, 1, 1], [], []>} : vector<512x18xbf16>, vector<18x128xbf16>, vector<512x128xf32> -> vector<512x128xf32>
    %c0_5 = arith.constant 0 : index
    %c0_6 = arith.constant 0 : index
    %c0_7 = arith.constant 0 : index
    %5 = vector.load %arg4[%c0_5, %c0_6, %c0_7] : memref<1x1x128xf32, #tpu.memory_space<vmem>>, vector<1x1x128xf32>
    %6 = vector.shape_cast %5 : vector<1x1x128xf32> to vector<1x128xf32>
    %7 = vector.broadcast %6 : vector<1x128xf32> to vector<512x128xf32>
    %8 = arith.addf %4, %7 : vector<512x128xf32>
    %cst_8 = arith.constant 0.000000e+00 : f32
    %9 = vector.broadcast %cst_8 : f32 to vector<512x128xf32>
    %10 = arith.maximumf %8, %9 : vector<512x128xf32>
    %11 = arith.truncf %10 : vector<512x128xf32> to vector<512x128xbf16>
    %c0_9 = arith.constant 0 : index
    %c4 = arith.constant 4 : index
    %c0_10 = arith.constant 0 : index
    %c0_11 = arith.constant 0 : index
    %12 = vector.load %arg5[%c0_9, %c4, %c0_10, %c0_11] : memref<1x9x128x128xbf16, #tpu.memory_space<vmem>>, vector<1x1x128x128xbf16>
    %13 = vector.shape_cast %12 : vector<1x1x128x128xbf16> to vector<128x128xbf16>
    %cst_12 = arith.constant dense<0.000000e+00> : vector<512x128xf32>
    %14 = tpu.matmul %11, %13, %cst_12 {dimension_numbers = #tpu.dot_dimension_numbers<[1], [0], [0], [1], [0, 0, 1, 1], [], []>} : vector<512x128xbf16>, vector<128x128xbf16>, vector<512x128xf32> -> vector<512x128xf32>
    %c0_13 = arith.constant 0 : index
    %c0_14 = arith.constant 0 : index
    %15 = vector.load %arg10[%c0_13, %c0_14] : memref<512x128xf32, #tpu.memory_space<vmem>>, vector<512x128xf32>
    tpu.vector_store %arg10[%c0_13, %c0_14], %14 {strides = array<i32>} : memref<512x128xf32, #tpu.memory_space<vmem>>, vector<512x128xf32>,
    %c17_i32 = arith.constant 17 : i32
    %16 = tpu.dynamic_rotate %10 by %c17_i32 dim 0 : vector<512x128xf32>, i32 -> vector<512x128xf32>
    %c0_15 = arith.constant 0 : index
    %c0_16 = arith.constant 0 : index
    %c0_17 = arith.constant 0 : index
    %17 = vector.load %arg1[%c0_15, %c0_16, %c0_17] : memref<9x512x128xf32, #tpu.memory_space<vmem>>, vector<1x512x128xf32>
    %18 = vector.shape_cast %17 : vector<1x512x128xf32> to vector<512x128xf32>
    %19 = arith.mulf %16, %18 : vector<512x128xf32>
    %20 = arith.truncf %19 : vector<512x128xf32> to vector<512x128xbf16>
    %c0_18 = arith.constant 0 : index
    %c0_19 = arith.constant 0 : index
    %21 = vector.load %arg10[%c0_18, %c0_19] : memref<512x128xf32, #tpu.memory_space<vmem>>, vector<512x128xf32>
    %c0_20 = arith.constant 0 : index
    %c0_21 = arith.constant 0 : index
    %c0_22 = arith.constant 0 : index
    %c0_23 = arith.constant 0 : index
    %22 = vector.load %arg5[%c0_20, %c0_21, %c0_22, %c0_23] : memref<1x9x128x128xbf16, #tpu.memory_space<vmem>>, vector<1x1x128x128xbf16>
    %23 = vector.shape_cast %22 : vector<1x1x128x128xbf16> to vector<128x128xbf16>
    %cst_24 = arith.constant dense<0.000000e+00> : vector<512x128xf32>
    %24 = tpu.matmul %20, %23, %cst_24 {dimension_numbers = #tpu.dot_dimension_numbers<[1], [0], [0], [1], [0, 0, 1, 1], [], []>} : vector<512x128xbf16>, vector<128x128xbf16>, vector<512x128xf32> -> vector<512x128xf32>
    %25 = arith.addf %21, %24 : vector<512x128xf32>
    %c0_25 = arith.constant 0 : index
    %c0_26 = arith.constant 0 : index
    %26 = vector.load %arg10[%c0_25, %c0_26] : memref<512x128xf32, #tpu.memory_space<vmem>>, vector<512x128xf32>
    tpu.vector_store %arg10[%c0_25, %c0_26], %25 {strides = array<i32>} : memref<512x128xf32, #tpu.memory_space<vmem>>, vector<512x128xf32>,
    %c16_i32 = arith.constant 16 : i32
    %27 = tpu.dynamic_rotate %10 by %c16_i32 dim 0 : vector<512x128xf32>, i32 -> vector<512x128xf32>
    %c1 = arith.constant 1 : index
    %c0_27 = arith.constant 0 : index
    %c0_28 = arith.constant 0 : index
    %28 = vector.load %arg1[%c1, %c0_27, %c0_28] : memref<9x512x128xf32, #tpu.memory_space<vmem>>, vector<1x512x128xf32>
    %29 = vector.shape_cast %28 : vector<1x512x128xf32> to vector<512x128xf32>
    %30 = arith.mulf %27, %29 : vector<512x128xf32>
    %31 = arith.truncf %30 : vector<512x128xf32> to vector<512x128xbf16>
    %c0_29 = arith.constant 0 : index
    %c0_30 = arith.constant 0 : index
    %32 = vector.load %arg10[%c0_29, %c0_30] : memref<512x128xf32, #tpu.memory_space<vmem>>, vector<512x128xf32>
    %c0_31 = arith.constant 0 : index
    %c1_32 = arith.constant 1 : index
    %c0_33 = arith.constant 0 : index
    %c0_34 = arith.constant 0 : index
    %33 = vector.load %arg5[%c0_31, %c1_32, %c0_33, %c0_34] : memref<1x9x128x128xbf16, #tpu.memory_space<vmem>>, vector<1x1x128x128xbf16>
    %34 = vector.shape_cast %33 : vector<1x1x128x128xbf16> to vector<128x128xbf16>
    %cst_35 = arith.constant dense<0.000000e+00> : vector<512x128xf32>
    %35 = tpu.matmul %31, %34, %cst_35 {dimension_numbers = #tpu.dot_dimension_numbers<[1], [0], [0], [1], [0, 0, 1, 1], [], []>} : vector<512x128xbf16>, vector<128x128xbf16>, vector<512x128xf32> -> vector<512x128xf32>
    %36 = arith.addf %32, %35 : vector<512x128xf32>
    %c0_36 = arith.constant 0 : index
    %c0_37 = arith.constant 0 : index
    %37 = vector.load %arg10[%c0_36, %c0_37] : memref<512x128xf32, #tpu.memory_space<vmem>>, vector<512x128xf32>
    tpu.vector_store %arg10[%c0_36, %c0_37], %36 {strides = array<i32>} : memref<512x128xf32, #tpu.memory_space<vmem>>, vector<512x128xf32>,
    %c15_i32 = arith.constant 15 : i32
    %38 = tpu.dynamic_rotate %10 by %c15_i32 dim 0 : vector<512x128xf32>, i32 -> vector<512x128xf32>
    %c2 = arith.constant 2 : index
    %c0_38 = arith.constant 0 : index
    %c0_39 = arith.constant 0 : index
    %39 = vector.load %arg1[%c2, %c0_38, %c0_39] : memref<9x512x128xf32, #tpu.memory_space<vmem>>, vector<1x512x128xf32>
    %40 = vector.shape_cast %39 : vector<1x512x128xf32> to vector<512x128xf32>
    %41 = arith.mulf %38, %40 : vector<512x128xf32>
    %42 = arith.truncf %41 : vector<512x128xf32> to vector<512x128xbf16>
    %c0_40 = arith.constant 0 : index
    %c0_41 = arith.constant 0 : index
    %43 = vector.load %arg10[%c0_40, %c0_41] : memref<512x128xf32, #tpu.memory_space<vmem>>, vector<512x128xf32>
    %c0_42 = arith.constant 0 : index
    %c2_43 = arith.constant 2 : index
    %c0_44 = arith.constant 0 : index
    %c0_45 = arith.constant 0 : index
    %44 = vector.load %arg5[%c0_42, %c2_43, %c0_44, %c0_45] : memref<1x9x128x128xbf16, #tpu.memory_space<vmem>>, vector<1x1x128x128xbf16>
    %45 = vector.shape_cast %44 : vector<1x1x128x128xbf16> to vector<128x128xbf16>
    %cst_46 = arith.constant dense<0.000000e+00> : vector<512x128xf32>
    %46 = tpu.matmul %42, %45, %cst_46 {dimension_numbers = #tpu.dot_dimension_numbers<[1], [0], [0], [1], [0, 0, 1, 1], [], []>} : vector<512x128xbf16>, vector<128x128xbf16>, vector<512x128xf32> -> vector<512x128xf32>
    %47 = arith.addf %43, %46 : vector<512x128xf32>
    %c0_47 = arith.constant 0 : index
    %c0_48 = arith.constant 0 : index
    %48 = vector.load %arg10[%c0_47, %c0_48] : memref<512x128xf32, #tpu.memory_space<vmem>>, vector<512x128xf32>
    tpu.vector_store %arg10[%c0_47, %c0_48], %47 {strides = array<i32>} : memref<512x128xf32, #tpu.memory_space<vmem>>, vector<512x128xf32>,
    %c1_i32 = arith.constant 1 : i32
    %49 = tpu.dynamic_rotate %10 by %c1_i32 dim 0 : vector<512x128xf32>, i32 -> vector<512x128xf32>
    %c3 = arith.constant 3 : index
    %c0_49 = arith.constant 0 : index
    %c0_50 = arith.constant 0 : index
    %50 = vector.load %arg1[%c3, %c0_49, %c0_50] : memref<9x512x128xf32, #tpu.memory_space<vmem>>, vector<1x512x128xf32>
    %51 = vector.shape_cast %50 : vector<1x512x128xf32> to vector<512x128xf32>
    %52 = arith.mulf %49, %51 : vector<512x128xf32>
    %53 = arith.truncf %52 : vector<512x128xf32> to vector<512x128xbf16>
    %c0_51 = arith.constant 0 : index
    %c0_52 = arith.constant 0 : index
    %54 = vector.load %arg10[%c0_51, %c0_52] : memref<512x128xf32, #tpu.memory_space<vmem>>, vector<512x128xf32>
    %c0_53 = arith.constant 0 : index
    %c3_54 = arith.constant 3 : index
    %c0_55 = arith.constant 0 : index
    %c0_56 = arith.constant 0 : index
    %55 = vector.load %arg5[%c0_53, %c3_54, %c0_55, %c0_56] : memref<1x9x128x128xbf16, #tpu.memory_space<vmem>>, vector<1x1x128x128xbf16>
    %56 = vector.shape_cast %55 : vector<1x1x128x128xbf16> to vector<128x128xbf16>
    %cst_57 = arith.constant dense<0.000000e+00> : vector<512x128xf32>
    %57 = tpu.matmul %53, %56, %cst_57 {dimension_numbers = #tpu.dot_dimension_numbers<[1], [0], [0], [1], [0, 0, 1, 1], [], []>} : vector<512x128xbf16>, vector<128x128xbf16>, vector<512x128xf32> -> vector<512x128xf32>
    %58 = arith.addf %54, %57 : vector<512x128xf32>
    %c0_58 = arith.constant 0 : index
    %c0_59 = arith.constant 0 : index
    %59 = vector.load %arg10[%c0_58, %c0_59] : memref<512x128xf32, #tpu.memory_space<vmem>>, vector<512x128xf32>
    tpu.vector_store %arg10[%c0_58, %c0_59], %58 {strides = array<i32>} : memref<512x128xf32, #tpu.memory_space<vmem>>, vector<512x128xf32>,
    %c511_i32 = arith.constant 511 : i32
    %60 = tpu.dynamic_rotate %10 by %c511_i32 dim 0 : vector<512x128xf32>, i32 -> vector<512x128xf32>
    %c5 = arith.constant 5 : index
    %c0_60 = arith.constant 0 : index
    %c0_61 = arith.constant 0 : index
    %61 = vector.load %arg1[%c5, %c0_60, %c0_61] : memref<9x512x128xf32, #tpu.memory_space<vmem>>, vector<1x512x128xf32>
    %62 = vector.shape_cast %61 : vector<1x512x128xf32> to vector<512x128xf32>
    %63 = arith.mulf %60, %62 : vector<512x128xf32>
    %64 = arith.truncf %63 : vector<512x128xf32> to vector<512x128xbf16>
    %c0_62 = arith.constant 0 : index
    %c0_63 = arith.constant 0 : index
    %65 = vector.load %arg10[%c0_62, %c0_63] : memref<512x128xf32, #tpu.memory_space<vmem>>, vector<512x128xf32>
    %c0_64 = arith.constant 0 : index
    %c5_65 = arith.constant 5 : index
    %c0_66 = arith.constant 0 : index
    %c0_67 = arith.constant 0 : index
    %66 = vector.load %arg5[%c0_64, %c5_65, %c0_66, %c0_67] : memref<1x9x128x128xbf16, #tpu.memory_space<vmem>>, vector<1x1x128x128xbf16>
    %67 = vector.shape_cast %66 : vector<1x1x128x128xbf16> to vector<128x128xbf16>
    %cst_68 = arith.constant dense<0.000000e+00> : vector<512x128xf32>
    %68 = tpu.matmul %64, %67, %cst_68 {dimension_numbers = #tpu.dot_dimension_numbers<[1], [0], [0], [1], [0, 0, 1, 1], [], []>} : vector<512x128xbf16>, vector<128x128xbf16>, vector<512x128xf32> -> vector<512x128xf32>
    %69 = arith.addf %65, %68 : vector<512x128xf32>
    %c0_69 = arith.constant 0 : index
    %c0_70 = arith.constant 0 : index
    %70 = vector.load %arg10[%c0_69, %c0_70] : memref<512x128xf32, #tpu.memory_space<vmem>>, vector<512x128xf32>
    tpu.vector_store %arg10[%c0_69, %c0_70], %69 {strides = array<i32>} : memref<512x128xf32, #tpu.memory_space<vmem>>, vector<512x128xf32>,
    %c497_i32 = arith.constant 497 : i32
    %71 = tpu.dynamic_rotate %10 by %c497_i32 dim 0 : vector<512x128xf32>, i32 -> vector<512x128xf32>
    %c6 = arith.constant 6 : index
    %c0_71 = arith.constant 0 : index
    %c0_72 = arith.constant 0 : index
    %72 = vector.load %arg1[%c6, %c0_71, %c0_72] : memref<9x512x128xf32, #tpu.memory_space<vmem>>, vector<1x512x128xf32>
    %73 = vector.shape_cast %72 : vector<1x512x128xf32> to vector<512x128xf32>
    %74 = arith.mulf %71, %73 : vector<512x128xf32>
    %75 = arith.truncf %74 : vector<512x128xf32> to vector<512x128xbf16>
    %c0_73 = arith.constant 0 : index
    %c0_74 = arith.constant 0 : index
    %76 = vector.load %arg10[%c0_73, %c0_74] : memref<512x128xf32, #tpu.memory_space<vmem>>, vector<512x128xf32>
    %c0_75 = arith.constant 0 : index
    %c6_76 = arith.constant 6 : index
    %c0_77 = arith.constant 0 : index
    %c0_78 = arith.constant 0 : index
    %77 = vector.load %arg5[%c0_75, %c6_76, %c0_77, %c0_78] : memref<1x9x128x128xbf16, #tpu.memory_space<vmem>>, vector<1x1x128x128xbf16>
    %78 = vector.shape_cast %77 : vector<1x1x128x128xbf16> to vector<128x128xbf16>
    %cst_79 = arith.constant dense<0.000000e+00> : vector<512x128xf32>
    %79 = tpu.matmul %75, %78, %cst_79 {dimension_numbers = #tpu.dot_dimension_numbers<[1], [0], [0], [1], [0, 0, 1, 1], [], []>} : vector<512x128xbf16>, vector<128x128xbf16>, vector<512x128xf32> -> vector<512x128xf32>
    %80 = arith.addf %76, %79 : vector<512x128xf32>
    %c0_80 = arith.constant 0 : index
    %c0_81 = arith.constant 0 : index
    %81 = vector.load %arg10[%c0_80, %c0_81] : memref<512x128xf32, #tpu.memory_space<vmem>>, vector<512x128xf32>
    tpu.vector_store %arg10[%c0_80, %c0_81], %80 {strides = array<i32>} : memref<512x128xf32, #tpu.memory_space<vmem>>, vector<512x128xf32>,
    %c496_i32 = arith.constant 496 : i32
    %82 = tpu.dynamic_rotate %10 by %c496_i32 dim 0 : vector<512x128xf32>, i32 -> vector<512x128xf32>
    %c7 = arith.constant 7 : index
    %c0_82 = arith.constant 0 : index
    %c0_83 = arith.constant 0 : index
    %83 = vector.load %arg1[%c7, %c0_82, %c0_83] : memref<9x512x128xf32, #tpu.memory_space<vmem>>, vector<1x512x128xf32>
    %84 = vector.shape_cast %83 : vector<1x512x128xf32> to vector<512x128xf32>
    %85 = arith.mulf %82, %84 : vector<512x128xf32>
    %86 = arith.truncf %85 : vector<512x128xf32> to vector<512x128xbf16>
    %c0_84 = arith.constant 0 : index
    %c0_85 = arith.constant 0 : index
    %87 = vector.load %arg10[%c0_84, %c0_85] : memref<512x128xf32, #tpu.memory_space<vmem>>, vector<512x128xf32>
    %c0_86 = arith.constant 0 : index
    %c7_87 = arith.constant 7 : index
    %c0_88 = arith.constant 0 : index
    %c0_89 = arith.constant 0 : index
    %88 = vector.load %arg5[%c0_86, %c7_87, %c0_88, %c0_89] : memref<1x9x128x128xbf16, #tpu.memory_space<vmem>>, vector<1x1x128x128xbf16>
    %89 = vector.shape_cast %88 : vector<1x1x128x128xbf16> to vector<128x128xbf16>
    %cst_90 = arith.constant dense<0.000000e+00> : vector<512x128xf32>
    %90 = tpu.matmul %86, %89, %cst_90 {dimension_numbers = #tpu.dot_dimension_numbers<[1], [0], [0], [1], [0, 0, 1, 1], [], []>} : vector<512x128xbf16>, vector<128x128xbf16>, vector<512x128xf32> -> vector<512x128xf32>
    %91 = arith.addf %87, %90 : vector<512x128xf32>
    %c0_91 = arith.constant 0 : index
    %c0_92 = arith.constant 0 : index
    %92 = vector.load %arg10[%c0_91, %c0_92] : memref<512x128xf32, #tpu.memory_space<vmem>>, vector<512x128xf32>
    tpu.vector_store %arg10[%c0_91, %c0_92], %91 {strides = array<i32>} : memref<512x128xf32, #tpu.memory_space<vmem>>, vector<512x128xf32>,
    %c495_i32 = arith.constant 495 : i32
    %93 = tpu.dynamic_rotate %10 by %c495_i32 dim 0 : vector<512x128xf32>, i32 -> vector<512x128xf32>
    %c8 = arith.constant 8 : index
    %c0_93 = arith.constant 0 : index
    %c0_94 = arith.constant 0 : index
    %94 = vector.load %arg1[%c8, %c0_93, %c0_94] : memref<9x512x128xf32, #tpu.memory_space<vmem>>, vector<1x512x128xf32>
    %95 = vector.shape_cast %94 : vector<1x512x128xf32> to vector<512x128xf32>
    %96 = arith.mulf %93, %95 : vector<512x128xf32>
    %97 = arith.truncf %96 : vector<512x128xf32> to vector<512x128xbf16>
    %c0_95 = arith.constant 0 : index
    %c0_96 = arith.constant 0 : index
    %98 = vector.load %arg10[%c0_95, %c0_96] : memref<512x128xf32, #tpu.memory_space<vmem>>, vector<512x128xf32>
    %c0_97 = arith.constant 0 : index
    %c8_98 = arith.constant 8 : index
    %c0_99 = arith.constant 0 : index
    %c0_100 = arith.constant 0 : index
    %99 = vector.load %arg5[%c0_97, %c8_98, %c0_99, %c0_100] : memref<1x9x128x128xbf16, #tpu.memory_space<vmem>>, vector<1x1x128x128xbf16>
    %100 = vector.shape_cast %99 : vector<1x1x128x128xbf16> to vector<128x128xbf16>
    %cst_101 = arith.constant dense<0.000000e+00> : vector<512x128xf32>
    %101 = tpu.matmul %97, %100, %cst_101 {dimension_numbers = #tpu.dot_dimension_numbers<[1], [0], [0], [1], [0, 0, 1, 1], [], []>} : vector<512x128xbf16>, vector<128x128xbf16>, vector<512x128xf32> -> vector<512x128xf32>
    %102 = arith.addf %98, %101 : vector<512x128xf32>
    %c0_102 = arith.constant 0 : index
    %c0_103 = arith.constant 0 : index
    %103 = vector.load %arg10[%c0_102, %c0_103] : memref<512x128xf32, #tpu.memory_space<vmem>>, vector<512x128xf32>
    tpu.vector_store %arg10[%c0_102, %c0_103], %102 {strides = array<i32>} : memref<512x128xf32, #tpu.memory_space<vmem>>, vector<512x128xf32>,
    %c0_104 = arith.constant 0 : index
    %c0_105 = arith.constant 0 : index
    %104 = vector.load %arg10[%c0_104, %c0_105] : memref<512x128xf32, #tpu.memory_space<vmem>>, vector<512x128xf32>
    %c0_106 = arith.constant 0 : index
    %c0_107 = arith.constant 0 : index
    %c0_108 = arith.constant 0 : index
    %105 = vector.load %arg6[%c0_106, %c0_107, %c0_108] : memref<1x1x128xf32, #tpu.memory_space<vmem>>, vector<1x1x128xf32>
    %106 = vector.shape_cast %105 : vector<1x1x128xf32> to vector<1x128xf32>
    %107 = vector.broadcast %106 : vector<1x128xf32> to vector<512x128xf32>
    %108 = arith.addf %104, %107 : vector<512x128xf32>
    %cst_109 = arith.constant 0.000000e+00 : f32
    %109 = vector.broadcast %cst_109 : f32 to vector<512x128xf32>
    %110 = arith.maximumf %108, %109 : vector<512x128xf32>
    %111 = vector.shape_cast %110 : vector<512x128xf32> to vector<2x256x128xf32>
    %c0_110 = arith.constant 0 : index
    %c0_111 = arith.constant 0 : index
    %c0_112 = arith.constant 0 : index
    %112 = vector.load %arg7[%c0_110, %c0_111, %c0_112] : memref<1x1x128xf32, #tpu.memory_space<vmem>>, vector<1x1x128xf32>
    %113 = vector.shape_cast %112 : vector<1x1x128xf32> to vector<1x128xf32>
    %114 = vector.shape_cast %113 : vector<1x128xf32> to vector<1x1x128xf32>
    %115 = vector.broadcast %114 : vector<1x1x128xf32> to vector<2x256x128xf32>
    %116 = arith.mulf %111, %115 : vector<2x256x128xf32>
    %cst_113 = arith.constant dense<0.000000e+00> : vector<2x256xf32>
    %117 = vector.multi_reduction <add>, %116, %cst_113 [2] : vector<2x256x128xf32> to vector<2x256xf32>
    %c0_114 = arith.constant 0 : index
    %c0_115 = arith.constant 0 : index
    %c0_116 = arith.constant 0 : index
    %118 = vector.load %arg8[%c0_114, %c0_115, %c0_116] : memref<1x1x1xf32, #tpu.memory_space<vmem>>, vector<1x1x1xf32>
    %119 = vector.shape_cast %118 : vector<1x1x1xf32> to vector<1x1xf32>
    %120 = vector.broadcast %119 : vector<1x1xf32> to vector<2x256xf32>
    %121 = arith.addf %117, %120 : vector<2x256xf32>
    %c0_117 = arith.constant 0 : index
    %c0_118 = arith.constant 0 : index
    %c0_119 = arith.constant 0 : index
    %122 = vector.load %arg9[%c0_117, %c0_118, %c0_119] : memref<1x2x256xf32, #tpu.memory_space<vmem>>, vector<1x2x256xf32>
    %123 = vector.shape_cast %122 : vector<1x2x256xf32> to vector<2x256xf32>
    %124 = vector.shape_cast %121 : vector<2x256xf32> to vector<1x2x256xf32>
    tpu.vector_store %arg9[%c0_117, %c0_118, %c0_119], %124 {strides = array<i32>} : memref<1x2x256xf32, #tpu.memory_space<vmem>>, vector<1x2x256xf32>,
    return
  }
  func.func @transform_0(%arg0: i32) -> (i32, i32, i32) {
    %c0_i32 = arith.constant 0 : i32
    %c0_i32_0 = arith.constant 0 : i32
    %c0_i32_1 = arith.constant 0 : i32
    %c0_i32_2 = arith.constant 0 : i32
    return %c0_i32, %c0_i32_0, %c0_i32_1 : i32, i32, i32
  }
  func.func @transform_1(%arg0: i32) -> (i32, i32, i32) {
    %c0_i32 = arith.constant 0 : i32
    %c0_i32_0 = arith.constant 0 : i32
    %c0_i32_1 = arith.constant 0 : i32
    return %arg0, %c0_i32, %c0_i32_0 : i32, i32, i32
  }
  func.func @transform_2(%arg0: i32) -> (i32, i32, i32) {
    %c0_i32 = arith.constant 0 : i32
    %c0_i32_0 = arith.constant 0 : i32
    %c0_i32_1 = arith.constant 0 : i32
    return %arg0, %c0_i32, %c0_i32_0 : i32, i32, i32
  }
  func.func @transform_3(%arg0: i32) -> (i32, i32, i32) {
    %c0_i32 = arith.constant 0 : i32
    %c0_i32_0 = arith.constant 0 : i32
    %c0_i32_1 = arith.constant 0 : i32
    return %arg0, %c0_i32, %c0_i32_0 : i32, i32, i32
  }
  func.func @transform_4(%arg0: i32) -> (i32, i32, i32, i32) {
    %c0_i32 = arith.constant 0 : i32
    %c0_i32_0 = arith.constant 0 : i32
    %c0_i32_1 = arith.constant 0 : i32
    %c0_i32_2 = arith.constant 0 : i32
    return %arg0, %c0_i32, %c0_i32_0, %c0_i32_1 : i32, i32, i32, i32
  }
  func.func @transform_5(%arg0: i32) -> (i32, i32, i32) {
    %c0_i32 = arith.constant 0 : i32
    %c0_i32_0 = arith.constant 0 : i32
    %c0_i32_1 = arith.constant 0 : i32
    return %arg0, %c0_i32, %c0_i32_0 : i32, i32, i32
  }
  func.func @transform_6(%arg0: i32) -> (i32, i32, i32) {
    %c0_i32 = arith.constant 0 : i32
    %c0_i32_0 = arith.constant 0 : i32
    %c0_i32_1 = arith.constant 0 : i32
    return %arg0, %c0_i32, %c0_i32_0 : i32, i32, i32
  }
  func.func @transform_7(%arg0: i32) -> (i32, i32, i32) {
    %c0_i32 = arith.constant 0 : i32
    %c0_i32_0 = arith.constant 0 : i32
    %c0_i32_1 = arith.constant 0 : i32
    return %arg0, %c0_i32, %c0_i32_0 : i32, i32, i32
  }
  func.func @transform_8(%arg0: i32) -> (i32, i32, i32) {
    %c0_i32 = arith.constant 0 : i32
    %c0_i32_0 = arith.constant 0 : i32
    %c0_i32_1 = arith.constant 0 : i32
    return %arg0, %c0_i32, %c0_i32_0 : i32, i32, i32
  }
}

</mosaic_0001>

<bundles_post_ra>
// kernel: rein_output_layer_forward.1
= control target key start
LH: loop header
LB: loop body
LE: loop exit
PB: predicated region body
PF: predicated region fallthrough
CT: control target
= control target key end

     0   :  { %s14185_s27 = smov 0   ;;  %s18827_s0 = inlined_call_operand.vmem [shape: f32[9,512,128], index: 0, kind: input, shape index: {}]   ;;  %s18828_s1 = inlined_call_operand.vmem [shape: bf16[4,512,18], index: 1, kind: input, shape index: {}]   ;;  %s18829_s2 = inlined_call_operand.vmem [shape: bf16[4,18,128], index: 2, kind: input, shape index: {}]   ;;  %s18830_s3 = inlined_call_operand.vmem [shape: f32[4,1,128], index: 3, kind: input, shape index: {}]   ;;  %s18831_s4 = inlined_call_operand.vmem [shape: bf16[4,9,128,128], index: 4, kind: input, shape index: {}]   ;;  %s18832_s5 = inlined_call_operand.vmem [shape: f32[4,1,128], index: 5, kind: input, shape index: {}]   ;;  %s18833_s6 = inlined_call_operand.vmem [shape: f32[4,1,128], index: 6, kind: input, shape index: {}]   ;;  %s18834_s7 = inlined_call_operand.vmem [shape: f32[4,1,1], index: 7, kind: input, shape index: {}]   ;;  %s18835_s8 = inlined_call_operand.vmem [shape: f32[4,2,256], index: 8, kind: output, shape index: {}]  }
   0x1 LB: > { %s11548_s28 = sadd.s32 4294967295, %s14132_s27   ;;  %p11552_p0 = scmp.ge.s32.totalorder %s14132_s27, 1  ;;  %s14132_s27 = sphi %s14185_s27, %s18_s27  }
   0x2   : > { %p314_p1 = scmp.lt.s32.totalorder %s14132_s27, 5 }
   0x4   : > { %p315_p2 = pnand %p11552_p0, %p314_p1 }
   0x6   : > { %318 = sbr.rel (%p315_p2) target bundleno = 1444 (0x5a4), region = 52 }
   0xd   : > { %p370_p3 = scmp.lt.s32.totalorder %s11548_s28, 3  ;;  %vm646_vm0 = vcmask 146432   ;;  %vm743_vm1 = vcmask 1040384   ;;  %vm11083_vm4 = vcmask 130112   ;;  %vm11090_vm5 = vcmask 195712  }
   0xe   : > { %vm11097_vm6 = vcmask 261312   ;;  %vm11104_vm7 = vcmask 326912   ;;  %vm11111_vm8 = vcmask 392512   ;;  %vm11118_vm9 = vcmask 458112  }
   0xf   : > { %s19656_s28 = smov (!%p370_p3, %s11548_s28), 3  ;;  %vm11125_vm10 = vcmask 523712   ;;  %vm11132_vm11 = vcmask 589312   ;;  %vm11139_vm12 = vcmask 654912   ;;  %vm11146_vm13 = vcmask 720512  }
  0x10   : > { %s12280_s29 = sshll.u32 %s19656_s28, 8  ;;  %s13993_s30 = smul.u32 12, %s19656_s28  ;;  %vm11153_vm14 = vcmask 786112   ;;  %vm11160_vm15 = vcmask 851712  }
  0x11   : > { %s14200_s11 = scalar_lea.vmem %s18828_s1, %s12280_s29  ;;  %s13994_s15 = smul.u32 576, %s19656_s28 }
  0x12   : > { %s379_s14 = scalar_lea.vmem %s18829_s2, %s13993_s30  ;;  %v14013_v0 = vld [vmem:[%s14200_s11] sm:$0xff]   ;;  %v14014_v4 = vld [vmem:[%s14200_s11 + $0x8] sm:$0xff]   ;;  %v14015_v5 = vld [vmem:[%s14200_s11 + $0x10] sm:$0xff]   ;;  %s14300_s21 = scalar_lea.vmem %s18830_s3, %s19656_s28 }
  0x13   : > { %v14011_v1 = vld [vmem:[%s379_s14] sm:$0xff]   ;;  %v14012_v2 = vld [vmem:[%s379_s14 + $0x8] ss:$0 sps:$4 sm:$0x11]   ;;  %12680 = vmatprep.mubr.msk.bf16.mxu0 %vm646_vm0, %v14013_v0  ;;  %v14016_v6 = vld [vmem:[%s14200_s11 + $0x18] sm:$0xff]   ;;  %s14221_s18 = scalar_lea.vmem %s18831_s4, %s13994_s15  ;;  %s396_s16 = scalar_lea.vmem %s18834_s7, %s19656_s28 }
  0x14   : > { %12676 = vmatprep.subr.bf16.mxu0 %v14011_v1  ;;  %v745_v3 = vsel %vm743_vm1, %v14012_v2, 0  ;;  %v14017_v7 = vld [vmem:[%s14200_s11 + $0x20] sm:$0xff]   ;;  %v14018_v8 = vld [vmem:[%s14200_s11 + $0x28] sm:$0xff]   ;;  %v14019_v9 = vld [vmem:[%s14200_s11 + $0x30] sm:$0xff]   ;;  %s390_s13 = scalar_lea.vmem %s18832_s5, %s19656_s28  ;;  %s12281_s17 = sshll.u32 %s19656_s28, 2 }
  0x15   : > { %12677 = vmatpush3.bf16.msra.mxu0 %v14011_v1  ;;  %v14039_v10 = vld [vmem:[%s14221_s18 + $0x100] sm:$0xff]   ;;  %v14020_v11 = vld [vmem:[%s14200_s11 + $0x38] sm:$0xff]   ;;  %v14044_v13 = vld [vmem:[%s14221_s18 + $0x108] sm:$0xff]   ;;  %s401_s20 = scalar_lea.vmem %s18835_s8, %s12281_s17 }
  0x16   : > { %13992 = vmatprep.subr.msk.bf16.mxu0 %vm743_vm1, %v14012_v2  ;;  %v14021_v12 = vld [vmem:[%s14200_s11 + $0x40] sm:$0xff]   ;;  %v14047_v14 = vld [vmem:[%s14221_s18 + $0x110] sm:$0xff]   ;;  %v14048_v15 = vld [vmem:[%s14221_s18 + $0x118] sm:$0xff]   ;;  %v18836_v2 = vlaneseq  ;;  %vm11174_vm1 = vcmask 982912  }
  0x17   : > { %v14022_v16 = vld [vmem:[%s14200_s11 + $0x48] sm:$0xff]   ;;  %v14023_v17 = vld [vmem:[%s14200_s11 + $0x50] sm:$0xff]   ;;  %v14049_v18 = vld [vmem:[%s14221_s18 + $0x120] sm:$0xff]  }
  0x18   : > { %v14052_v19 = vld [vmem:[%s14221_s18 + $0xc0] sm:$0xff]   ;;  %v14053_v20 = vld [vmem:[%s14221_s18 + $0xc8] sm:$0xff]   ;;  %v14055_v22 = vld [vmem:[%s14221_s18 + $0xd0] sm:$0xff]  }
  0x19   : > { %12679 = vmatpush3.bf16.msra.mxu0 %v745_v3  ;;  %v14050_v21 = vld [vmem:[%s14221_s18 + $0x128] sm:$0xff]   ;;  %13464 = vmatprep.subr.bf16.mxu1 %v14052_v19  ;;  %v14024_v23 = vld [vmem:[%s14200_s11 + $0x58] sm:$0xff]   ;;  %v14025_v24 = vld [vmem:[%s14200_s11 + $0x60] sm:$0xff]  }
  0x1a   : > { %12744 = vmatprep.subr.bf16.mxu0 %v14039_v10  ;;  %13472 = vmatpush3.bf16.msra.mxu1 %v14052_v19  ;;  %v14051_v25 = vld [vmem:[%s14221_s18 + $0x130] sm:$0xff]   ;;  %v14054_v26 = vld [vmem:[%s14221_s18 + $0x138] sm:$0xff]   ;;  %v14026_v27 = vld [vmem:[%s14200_s11 + $0x68] sm:$0xff]  }
  0x1b   : > { %13465 = vmatprep.subr.bf16.mxu1 %v14053_v20  ;;  %v14027_v28 = vld [vmem:[%s14200_s11 + $0x70] sm:$0xff]   ;;  %v14028_v29 = vld [vmem:[%s14200_s11 + $0x78] sm:$0xff]   ;;  %v14029_v30 = vld [vmem:[%s14200_s11 + $0x80] sm:$0xff]  }
  0x1c   : > { %12681 = vmatmul.mubr.msk.bf16.vlgmr.msra.gmra.mrb[0].mxu0 %vm646_vm0, %v14014_v4  ;;  %v14030_v31 = vld [vmem:[%s14200_s11 + $0x88] sm:$0xff]   ;;  %v14031_v32 = vld [vmem:[%s14200_s11 + $0x90] sm:$0xff]   ;;  %v14032_v33 = vld [vmem:[%s14200_s11 + $0x98] sm:$0xff]  }
  0x1d   : > { %12684 = vmatprep.mubr.msk.bf16.mxu0 %vm646_vm0, %v14015_v5  ;;  %12745 = vmatpush3.bf16.msra.mxu0 %v14039_v10  ;;  %v14033_v34 = vld [vmem:[%s14200_s11 + $0xa0] sm:$0xff]   ;;  %v14034_v35 = vld [vmem:[%s14200_s11 + $0xa8] sm:$0xff]   ;;  %v14035_v36 = vld [vmem:[%s14200_s11 + $0xb0] sm:$0xff]  }
  0x1e   : > { %12746 = vmatprep.subr.bf16.mxu0 %v14044_v13  ;;  %13473 = vmatpush3.bf16.msra.mxu1 %v14053_v20  ;;  %v14036_v37 = vld [vmem:[%s14200_s11 + $0xb8] sm:$0xff]   ;;  %v14037_v38 = vld [vmem:[%s14200_s11 + $0xc0] sm:$0xff]   ;;  %v14038_v41 = vld [vmem:[%s14200_s11 + $0xc8] sm:$0xff]  }
  0x1f   : > { %13466 = vmatprep.subr.bf16.mxu1 %v14055_v22  ;;  %v14056_v39 = vld [vmem:[%s14221_s18 + $0xd8] sm:$0xff]   ;;  %v14057_v40 = vld [vmem:[%s14221_s18 + $0xe0] sm:$0xff]   ;;  %v14040_v42 = vld [vmem:[%s14200_s11 + $0xd0] sm:$0xff]  }
  0x20   : > { %v14058_v43 = vld [vmem:[%s14221_s18 + $0xe8] sm:$0xff]   ;;  %v14060_v44 = vld [vmem:[%s14221_s18 + $0xf0] sm:$0xff]   ;;  %v14059_v45 = vld [vmem:[%s14221_s18] sm:$0xff]  }
  0x21   : > { %12747 = vmatpush3.bf16.msra.mxu0 %v14044_v13  ;;  %v14041_v46 = vld [vmem:[%s14200_s11 + $0xd8] sm:$0xff]   ;;  %v14042_v47 = vld [vmem:[%s14200_s11 + $0xe0] sm:$0xff]   ;;  %v14043_v50 = vld [vmem:[%s14200_s11 + $0xe8] sm:$0xff]  }
  0x22   : > { %12748 = vmatprep.subr.bf16.mxu0 %v14047_v14  ;;  %13474 = vmatpush3.bf16.msra.mxu1 %v14055_v22  ;;  %v14061_v48 = vld [vmem:[%s14221_s18 + $0xf8] sm:$0xff]   ;;  %v14287_v49 = vld [vmem:[%s14221_s18 + $0x140] sm:$0xff]   ;;  %v14045_v51 = vld [vmem:[%s14200_s11 + $0xf0] sm:$0xff]  }
  0x23   : > { %13467 = vmatprep.subr.bf16.mxu1 %v14056_v39  ;;  %v14046_v52 = vld [vmem:[%s14200_s11 + $0xf8] sm:$0xff]   ;;  %v14303_v53 = vld [vmem:[%s14300_s21] ss:$0 sm:$0xff] }
  0x24   : > { %12685 = vmatmul.mubr.msk.bf16.gmra.mrb[4].mxu0 %vm646_vm0, %v14016_v6  ;;  %v11838_v22 = vld [vmem:[%s18827_s0 + $0x620] sm:$0xff] }
  0x25   : > { %12688 = vmatprep.mubr.msk.bf16.mxu0 %vm646_vm0, %v14017_v7  ;;  %12749 = vmatpush3.bf16.msra.mxu0 %v14047_v14  ;;  %v14328_v14 = vshrl.u32 %v18836_v2, 7 }
  0x26   : > { %12750 = vmatprep.subr.bf16.mxu0 %v14048_v15  ;;  %13475 = vmatpush3.bf16.msra.mxu1 %v14056_v39  ;;  %v11840_v39 = vld [vmem:[%s18827_s0 + $0x630] sm:$0xff] }
  0x27   : > { %13468 = vmatprep.subr.bf16.mxu1 %v14057_v40  ;;  %19168 = vst [vmem:[#allocation6_spill] sm:$0xff] %v14328_v14  ;;  %vm1616_vm2 = vcmp.lt.s32.totalorder %v14328_v14, 1  ;;  %vm3157_vm3 = vcmp.lt.s32.totalorder %v14328_v14, 7 }
  0x29   : > { %12751 = vmatpush3.bf16.msra.mxu0 %v14048_v15 }
  0x2a   : > { %12752 = vmatprep.subr.bf16.mxu0 %v14049_v18  ;;  %13476 = vmatpush3.bf16.msra.mxu1 %v14057_v40  ;;  %v14067_v40 = vld [vmem:[%s14221_s18 + $0x18] sm:$0xff]  }
  0x2b   : > { %13469 = vmatprep.subr.bf16.mxu1 %v14058_v43 }
  0x2c   : > { %12689 = vmatmul.mubr.msk.bf16.gmra.mrb[8].mxu0 %vm646_vm0, %v14018_v8  ;;  %v14063_v8 = vld [vmem:[%s14221_s18 + $0x8] sm:$0xff]  }
  0x2d   : > { %12692 = vmatprep.mubr.msk.bf16.mxu0 %vm646_vm0, %v14019_v9  ;;  %12753 = vmatpush3.bf16.msra.mxu0 %v14049_v18  ;;  %v14065_v18 = vld [vmem:[%s14221_s18 + $0x10] sm:$0xff]  }
  0x2e   : > { %12754 = vmatprep.subr.bf16.mxu0 %v14050_v21  ;;  %13477 = vmatpush3.bf16.msra.mxu1 %v14058_v43 }
  0x2f   : > { %13470 = vmatprep.subr.bf16.mxu1 %v14060_v44 }
  0x31   : > { %12755 = vmatpush3.bf16.msra.mxu0 %v14050_v21 }
  0x32   : > { %12756 = vmatprep.subr.bf16.mxu0 %v14051_v25  ;;  %13478 = vmatpush3.bf16.msra.mxu1 %v14060_v44 }
  0x33   : > { %13471 = vmatprep.subr.bf16.mxu1 %v14061_v48 }
  0x34   : > { %12693 = vmatmul.mubr.msk.bf16.gmra.mrb[12].mxu0 %vm646_vm0, %v14020_v11 }
  0x35   : > { %12696 = vmatprep.mubr.msk.bf16.mxu0 %vm646_vm0, %v14021_v12  ;;  %12757 = vmatpush3.bf16.msra.mxu0 %v14051_v25 }
  0x36   : > { %12758 = vmatprep.subr.bf16.mxu0 %v14054_v26  ;;  %13479 = vmatpush3.bf16.msra.mxu1 %v14061_v48 }
  0x37   : > { %13144 = vmatprep.subr.bf16.mxu1 %v14287_v49 }
  0x39   : > { %12759 = vmatpush3.bf16.msra.mxu0 %v14054_v26  ;;  %v11841_v26 = vld [vmem:[%s18827_s0 + $0x638] sm:$0xff] }
  0x3a   : > { %12824 = vmatprep.subr.bf16.mxu0 %v14059_v45 }
  0x3c   : > { %12697 = vmatmul.mubr.msk.bf16.gmra.mrb[16].mxu0 %vm646_vm0, %v14022_v16 }
  0x3d   : > { %12700 = vmatprep.mubr.msk.bf16.mxu0 %vm646_vm0, %v14023_v17 }
  0x44   : > { %12701 = vmatmul.mubr.msk.bf16.gmra.mrb[20].mxu0 %vm646_vm0, %v14024_v23  ;;  %v12012_v23 = vld [vmem:[%s18827_s0 + $0xc10] sm:$0xff] }
  0x45   : > { %12704 = vmatprep.mubr.msk.bf16.mxu0 %vm646_vm0, %v14025_v24 }
  0x4c   : > { %12705 = vmatmul.mubr.msk.bf16.gmra.mrb[24].mxu0 %vm646_vm0, %v14026_v27 }
  0x4d   : > { %12708 = vmatprep.mubr.msk.bf16.mxu0 %vm646_vm0, %v14027_v28 }
  0x54   : > { %12709 = vmatmul.mubr.msk.bf16.gmra.mrb[28].mxu0 %vm646_vm0, %v14028_v29 }
  0x55   : > { %12712 = vmatprep.mubr.msk.bf16.mxu0 %vm646_vm0, %v14029_v30 }
  0x5c   : > { %12713 = vmatmul.mubr.msk.bf16.gmra.mrb[32].mxu0 %vm646_vm0, %v14030_v31 }
  0x5d   : > { %12716 = vmatprep.mubr.msk.bf16.mxu0 %vm646_vm0, %v14031_v32  ;;  %v11839_v32 = vld [vmem:[%s18827_s0 + $0x628] sm:$0xff] }
  0x64   : > { %12717 = vmatmul.mubr.msk.bf16.gmra.mrb[36].mxu0 %vm646_vm0, %v14032_v33  ;;  %v12013_v33 = vld [vmem:[%s18827_s0 + $0xc18] sm:$0xff] }
  0x65   : > { %12720 = vmatprep.mubr.msk.bf16.mxu0 %vm646_vm0, %v14033_v34 }
  0x6c   : > { %12721 = vmatmul.mubr.msk.bf16.gmra.mrb[40].mxu0 %vm646_vm0, %v14034_v35 }
  0x6d   : > { %12724 = vmatprep.mubr.msk.bf16.mxu0 %vm646_vm0, %v14035_v36 }
  0x74   : > { %12725 = vmatmul.mubr.msk.bf16.gmra.mrb[44].mxu0 %vm646_vm0, %v14036_v37 }
  0x75   : > { %12728 = vmatprep.mubr.msk.bf16.mxu0 %vm646_vm0, %v14037_v38 }
  0x7c   : > { %12729 = vmatmul.mubr.msk.bf16.gmra.mrb[48].mxu0 %vm646_vm0, %v14038_v41 }
  0x7d   : > { %12732 = vmatprep.mubr.msk.bf16.mxu0 %vm646_vm0, %v14040_v42 }
  0x84   : > { %12733 = vmatmul.mubr.msk.bf16.gmra.mrb[52].mxu0 %vm646_vm0, %v14041_v46 }
  0x85   : > { %12736 = vmatprep.mubr.msk.bf16.mxu0 %vm646_vm0, %v14042_v47 }
  0x8c   : > { %12737 = vmatmul.mubr.msk.bf16.gmra.mrb[56].mxu0 %vm646_vm0, %v14043_v50 }
  0x8d   : > { %12740 = vmatprep.mubr.msk.bf16.mxu0 %vm646_vm0, %v14045_v51 }
  0x94   : > { %12741 = vmatmul.mubr.msk.bf16.gmra.mrb[60].mxu0 %vm646_vm0, %v14046_v52  ;;  %vm11167_vm0 = vcmask 917312  }
  0xef   : > { %v12682_v54 = vpop.f32.mrb[0].mxu0 }
  0xf0   : > { %v781_v55 = vpop.f32.mrb[1].mxu0  ;;  %v790_v58 = vadd.f32 %v12682_v54, %v14303_v53 }
  0xf1   : > { %v782_v56 = vadd.f32 %v14303_v53, %v781_v55  ;;  %v12683_v57 = vpop.f32.mrb[2].mxu0 }
  0xf2   : > { %v793_v59 = vadd.f32 %v12683_v57, %v14303_v53  ;;  %v784_v60 = vpop.f32.mrb[3].mxu0  ;;  %v14315_v1 = vmax.f32 %v790_v58, 0.0 }
  0xf3   : > { %v785_v61 = vadd.f32 %v14303_v53, %v784_v60  ;;  %v14311_v63 = vmax.f32 %v782_v56, 0.0 }
  0xf4   : > { %v14309_v62 = vmax.f32 %v793_v59, 0.0  ;;  %v14069_v59 = vld [vmem:[%s14221_s18 + $0x20] sm:$0xff]  }
  0xf5   : > { %19166 = vst [vmem:[#allocation4_spill] sm:$0xff] %v14311_v63  ;;  %v14313_v0 = vmax.f32 %v785_v61, 0.0 }
  0xf6   : > { %19165 = vst [vmem:[#allocation3_spill] sm:$0xff] %v14309_v62  ;;  %v1101_v7 = vpack.c.bf16 %v14309_v62, %v14315_v1  ;;  %v18837_v20 = vrot.slane %v14309_v62, 7 }
  0xf7   : > { %19167 = vst [vmem:[#allocation5_spill] sm:$0xff] %v14313_v0  ;;  %v12686_v3 = vpop.f32.mrb[4].mxu0  ;;  %v1100_v4 = vpack.c.bf16 %v14313_v0, %v14311_v63 }
  0xf8   : > { %v806_v5 = vadd.f32 %v12686_v3, %v14303_v53  ;;  %v797_v6 = vpop.f32.mrb[5].mxu0 }
  0xf9   : > { %v798_v9 = vadd.f32 %v14303_v53, %v797_v6  ;;  %v12687_v10 = vpop.f32.mrb[6].mxu0  ;;  %12760 = vmatprep.mubr.bf16.mxu0 %v1100_v4  ;;  %v11842_v4 = vld [vmem:[%s18827_s0 + $0x640] sm:$0xff] }
  0xfa   : > { %v14324_v11 = vmax.f32 %v806_v5, 0.0  ;;  %v809_v12 = vadd.f32 %v12687_v10, %v14303_v53  ;;  %v800_v13 = vpop.f32.mrb[7].mxu0  ;;  %12761 = vmatmul.mubr.bf16.vlgmr.msra.gmra.mrb[64].mxu0 %v1101_v7  ;;  %v11845_v7 = vld [vmem:[%s18827_s0 + $0x658] sm:$0xff] }
  0xfb   : > { %v14330_v15 = vmax.f32 %v798_v9, 0.0  ;;  %v801_v16 = vadd.f32 %v14303_v53, %v800_v13  ;;  %12825 = vmatpush3.bf16.msra.mxu0 %v14059_v45 }
  0xfc   : > { %v14333_v17 = vmax.f32 %v809_v12, 0.0  ;;  %12826 = vmatprep.subr.bf16.mxu0 %v14063_v8  ;;  %v1556_v24 = vrot.slane %v14324_v11, 7 }
  0xfd   : > { %19169 = vst [vmem:[#allocation7_spill] sm:$0xff] %v14330_v15  ;;  %v14336_v19 = vmax.f32 %v801_v16, 0.0  ;;  %v1554_v21 = vrot.slane %v14330_v15, 7 }
  0xfe   : > { %v1557_v25 = vrot.slane %v14333_v17, 7  ;;  %v1103_v29 = vpack.c.bf16 %v14333_v17, %v14324_v11 }
  0xff   : > { %19170 = vst [vmem:[#allocation8_spill] sm:$0xff] %v14336_v19  ;;  %v12690_v27 = vpop.f32.mrb[8].mxu0  ;;  %v1102_v28 = vpack.c.bf16 %v14336_v19, %v14330_v15  ;;  %v1555_v30 = vrot.slane %v14336_v19, 7  ;;  %v14361_v31 = vsel %vm1616_vm2, %v18837_v20, %v1554_v21  ;;  %12827 = vmatpush3.bf16.msra.mxu0 %v14063_v8  ;;  %v14064_v8 = vld [vmem:[%s14221_s18 + $0x148] sm:$0xff]  }
 0x100   : > { %v822_v34 = vadd.f32 %v12690_v27, %v14303_v53  ;;  %v813_v35 = vpop.f32.mrb[9].mxu0  ;;  %v3998_v36 = vmul.f32 %v11838_v22, %v14361_v31  ;;  %v14372_v37 = vmul.f32 %v12012_v23, %v14361_v31  ;;  %v14376_v38 = vsel %vm1616_vm2, %v1556_v24, %v1557_v25  ;;  %12828 = vmatprep.subr.bf16.mxu0 %v14065_v18 }
 0x101   : > { %v814_v41 = vadd.f32 %v14303_v53, %v813_v35  ;;  %v12691_v42 = vpop.f32.mrb[10].mxu0  ;;  %12764 = vmatprep.mubr.bf16.mxu0 %v1102_v28  ;;  %v14385_v43 = vsel %vm1616_vm2, %v1554_v21, %v1555_v30  ;;  %v14389_v44 = vsel %vm1616_vm2, %v1555_v30, %v1556_v24  ;;  %v4001_v45 = vmul.f32 %v11841_v26, %v14376_v38  ;;  %v11844_v21 = vld [vmem:[%s18827_s0 + $0x650] sm:$0xff]  ;;  %v14071_v26 = vld [vmem:[%s14221_s18 + $0x28] sm:$0xff]  }
 0x102   : > { %19171 = vst [vmem:[#allocation9_spill] sm:$0xff] %v14372_v37  ;;  %v14392_v46 = vmax.f32 %v822_v34, 0.0  ;;  %v825_v47 = vadd.f32 %v12691_v42, %v14303_v53  ;;  %v816_v48 = vpop.f32.mrb[11].mxu0  ;;  %12765 = vmatmul.mubr.bf16.gmra.mrb[68].mxu0 %v1103_v29  ;;  %v3999_v50 = vmul.f32 %v11839_v32, %v14385_v43  ;;  %v14397_v51 = vmul.f32 %v12013_v33, %v14385_v43  ;;  %v14066_v32 = vld [vmem:[%s14221_s18 + $0x150] sm:$0xff]  }
 0x103   : > { %v14399_v52 = vmax.f32 %v814_v41, 0.0  ;;  %v817_v54 = vadd.f32 %v14303_v53, %v816_v48  ;;  %v4000_v55 = vmul.f32 %v11840_v39, %v14389_v44  ;;  %12829 = vmatpush3.bf16.msra.mxu0 %v14065_v18  ;;  %v11843_v18 = vld [vmem:[%s18827_s0 + $0x648] sm:$0xff]  ;;  %v14073_v48 = vld [vmem:[%s14221_s18 + $0x30] sm:$0xff]  }
 0x104   : > { %19172 = vst [vmem:[#allocation10_spill] sm:$0xff] %v14397_v51  ;;  %v14403_v56 = vmax.f32 %v825_v47, 0.0  ;;  %v4060_v57 = vpack.c.bf16 %v3999_v50, %v3998_v36  ;;  %12830 = vmatprep.subr.bf16.mxu0 %v14067_v40  ;;  %v1560_v5 = vrot.slane %v14392_v46, 7 }
 0x105   : > { %v14408_v60 = vmax.f32 %v817_v54, 0.0  ;;  %v4061_v61 = vpack.c.bf16 %v4001_v45, %v4000_v55  ;;  %v1558_v3 = vrot.slane %v14399_v52, 7  ;;  %v11846_v55 = vld [vmem:[%s18827_s0 + $0x660] sm:$0xff] }
 0x106   : > { %13084 = vmatprep.mubr.bf16.mxu1 %v4060_v57  ;;  %v1561_v6 = vrot.slane %v14403_v56, 7  ;;  %v1105_v12 = vpack.c.bf16 %v14403_v56, %v14392_v46 }
 0x107   : > { %v12694_v9 = vpop.f32.mrb[12].mxu0  ;;  %13085 = vmatmul.mubr.bf16.vlgmr.msra.gmra.mrb[0].mxu1 %v4061_v61  ;;  %v1104_v10 = vpack.c.bf16 %v14408_v60, %v14399_v52  ;;  %v1559_v13 = vrot.slane %v14408_v60, 7  ;;  %v14427_v16 = vsel %vm1616_vm2, %v1557_v25, %v1558_v3  ;;  %12831 = vmatpush3.bf16.msra.mxu0 %v14067_v40  ;;  %v11849_v61 = vld [vmem:[%s18827_s0 + $0x678] sm:$0xff] }
 0x108   : > { %v838_v22 = vadd.f32 %v12694_v9, %v14303_v53  ;;  %13145 = vmatpush3.bf16.msra.mxu1 %v14287_v49  ;;  %v829_v23 = vpop.f32.mrb[13].mxu0  ;;  %v4002_v24 = vmul.f32 %v11842_v4, %v14427_v16  ;;  %v14440_v25 = vsel %vm1616_vm2, %v1560_v5, %v1561_v6  ;;  %12832 = vmatprep.subr.bf16.mxu0 %v14069_v59 }
 0x109   : > { %v830_v27 = vadd.f32 %v14303_v53, %v829_v23  ;;  %v12695_v28 = vpop.f32.mrb[14].mxu0  ;;  %12768 = vmatprep.mubr.bf16.mxu0 %v1104_v10  ;;  %v14446_v29 = vsel %vm1616_vm2, %v1558_v3, %v1559_v13  ;;  %v14450_v49 = vsel %vm1616_vm2, %v1559_v13, %v1560_v5  ;;  %v4005_v30 = vmul.f32 %v11845_v7, %v14440_v25  ;;  %v14068_v3 = vld [vmem:[%s14221_s18 + $0x158] sm:$0xff]   ;;  %v11847_v10 = vld [vmem:[%s18827_s0 + $0x668] sm:$0xff] }
 0x10a   : > { %v14454_v33 = vmax.f32 %v838_v22, 0.0  ;;  %v841_v34 = vadd.f32 %v12695_v28, %v14303_v53  ;;  %v832_v35 = vpop.f32.mrb[15].mxu0  ;;  %12769 = vmatmul.mubr.bf16.gmra.mrb[72].mxu0 %v1105_v12  ;;  %v4003_v36 = vmul.f32 %v11843_v18, %v14446_v29  ;;  %v4004_v39 = vmul.f32 %v11844_v21, %v14450_v49  ;;  %13146 = vmatprep.subr.bf16.mxu1 %v14064_v8  ;;  %v11848_v12 = vld [vmem:[%s18827_s0 + $0x670] sm:$0xff] }
 0x10b   : > { %v14459_v40 = vmax.f32 %v830_v27, 0.0  ;;  %v833_v41 = vadd.f32 %v14303_v53, %v832_v35  ;;  %12833 = vmatpush3.bf16.msra.mxu0 %v14069_v59 }
 0x10c   : > { %v14462_v42 = vmax.f32 %v841_v34, 0.0  ;;  %v4062_v45 = vpack.c.bf16 %v4003_v36, %v4002_v24  ;;  %v4063_v47 = vpack.c.bf16 %v4005_v30, %v4004_v39  ;;  %13147 = vmatpush3.bf16.msra.mxu1 %v14064_v8  ;;  %12834 = vmatprep.subr.bf16.mxu0 %v14071_v26  ;;  %v1564_v57 = vrot.slane %v14454_v33, 7  ;;  %v14070_v30 = vld [vmem:[%s14221_s18 + $0x160] sm:$0xff]  }
 0x10d   : > { %v14465_v50 = vmax.f32 %v833_v41, 0.0  ;;  %v1562_v54 = vrot.slane %v14459_v40, 7  ;;  %13148 = vmatprep.subr.bf16.mxu1 %v14066_v32 }
 0x10e   : > { %13088 = vmatprep.mubr.bf16.mxu1 %v4062_v45  ;;  %v1565_v59 = vrot.slane %v14462_v42, 7  ;;  %v1107_v7 = vpack.c.bf16 %v14462_v42, %v14454_v33 }
 0x10f   : > { %v12698_v4 = vpop.f32.mrb[16].mxu0  ;;  %13089 = vmatmul.mubr.bf16.gmra.mrb[4].mxu1 %v4063_v47  ;;  %v1106_v5 = vpack.c.bf16 %v14465_v50, %v14459_v40  ;;  %v1563_v8 = vrot.slane %v14465_v50, 7  ;;  %v14484_v9 = vsel %vm1616_vm2, %v1561_v6, %v1562_v54  ;;  %12835 = vmatpush3.bf16.msra.mxu0 %v14071_v26  ;;  %v14075_v6 = vld [vmem:[%s14221_s18 + $0x38] sm:$0xff]   ;;  %v1687_v47 = vld [vmem:[%s18827_s0 + $0x30] sm:$0xff] }
 0x110   : > { %v854_v13 = vadd.f32 %v12698_v4, %v14303_v53  ;;  %v845_v18 = vpop.f32.mrb[17].mxu0  ;;  %v4006_v21 = vmul.f32 %v11846_v55, %v14484_v9  ;;  %v14496_v22 = vsel %vm1616_vm2, %v1564_v57, %v1565_v59  ;;  %13149 = vmatpush3.bf16.msra.mxu1 %v14066_v32  ;;  %12836 = vmatprep.subr.bf16.mxu0 %v14073_v48  ;;  %v1688_v4 = vld [vmem:[%s18827_s0 + $0x38] sm:$0xff] }
 0x111   : > { %v846_v23 = vadd.f32 %v14303_v53, %v845_v18  ;;  %v12699_v24 = vpop.f32.mrb[18].mxu0  ;;  %12772 = vmatprep.mubr.bf16.mxu0 %v1106_v5  ;;  %v14502_v27 = vsel %vm1616_vm2, %v1562_v54, %v1563_v8  ;;  %v14506_v26 = vsel %vm1616_vm2, %v1563_v8, %v1564_v57  ;;  %v4009_v28 = vmul.f32 %v11849_v61, %v14496_v22  ;;  %v14524_v61 = vld [vmem:[%s14221_s18 + $0x40] sm:$0xff]  }
 0x112   : > { %v14510_v34 = vmax.f32 %v854_v13, 0.0  ;;  %v857_v32 = vadd.f32 %v12699_v24, %v14303_v53  ;;  %v848_v35 = vpop.f32.mrb[19].mxu0  ;;  %12773 = vmatmul.mubr.bf16.gmra.mrb[76].mxu0 %v1107_v7  ;;  %v4007_v36 = vmul.f32 %v11847_v10, %v14502_v27  ;;  %v4008_v39 = vmul.f32 %v11848_v12, %v14506_v26  ;;  %13150 = vmatprep.subr.bf16.mxu1 %v14068_v3  ;;  %v11850_v7 = vld [vmem:[%s18827_s0 + $0x680] sm:$0xff]  ;;  %v11853_v12 = vld [vmem:[%s18827_s0 + $0x698] sm:$0xff]  ;;  %v14072_v13 = vld [vmem:[%s14221_s18 + $0x168] sm:$0xff]  }
 0x113   : > { %v14515_v41 = vmax.f32 %v846_v23, 0.0  ;;  %v849_v45 = vadd.f32 %v14303_v53, %v848_v35  ;;  %12837 = vmatpush3.bf16.msra.mxu0 %v14073_v48  ;;  %v14544_v18 = vmul.f32 %v1687_v47, %v14361_v31  ;;  %v11852_v31 = vld [vmem:[%s18827_s0 + $0x690] sm:$0xff]  ;;  %v14560_v35 = vmul.f32 %v1688_v4, %v14385_v43 }
 0x114   : > { %v14521_v54 = vmax.f32 %v857_v32, 0.0  ;;  %v4064_v55 = vpack.c.bf16 %v4007_v36, %v4006_v21  ;;  %v4065_v57 = vpack.c.bf16 %v4009_v28, %v4008_v39  ;;  %13151 = vmatpush3.bf16.msra.mxu1 %v14068_v3  ;;  %12838 = vmatprep.subr.bf16.mxu0 %v14075_v6  ;;  %v1568_v8 = vrot.slane %v14510_v34, 7  ;;  %v11851_v32 = vld [vmem:[%s18827_s0 + $0x688] sm:$0xff]  ;;  %v14074_v4 = vld [vmem:[%s14221_s18 + $0x170] sm:$0xff]  }
 0x115   : > { %v14529_v5 = vmax.f32 %v849_v45, 0.0  ;;  %v1566_v48 = vrot.slane %v14515_v41, 7  ;;  %13152 = vmatprep.subr.bf16.mxu1 %v14070_v30 }
 0x116   : > { %13092 = vmatprep.mubr.bf16.mxu1 %v4064_v55  ;;  %v1109_v3 = vpack.c.bf16 %v14521_v54, %v14510_v34  ;;  %v1569_v10 = vrot.slane %v14521_v54, 7 }
 0x117   : > { %v12702_v21 = vpop.f32.mrb[20].mxu0  ;;  %13093 = vmatmul.mubr.bf16.gmra.mrb[8].mxu1 %v4065_v57  ;;  %v1108_v23 = vpack.c.bf16 %v14529_v5, %v14515_v41  ;;  %v1567_v24 = vrot.slane %v14529_v5, 7  ;;  %v14551_v28 = vsel %vm1616_vm2, %v1565_v59, %v1566_v48  ;;  %12839 = vmatpush3.bf16.msra.mxu0 %v14075_v6 }
 0x118   : > { %19173 = vst [vmem:[#allocation11_spill] sm:$0xff] %v14551_v28  ;;  %v870_v36 = vadd.f32 %v12702_v21, %v14303_v53  ;;  %v861_v39 = vpop.f32.mrb[21].mxu0  ;;  %v4010_v45 = vmul.f32 %v11850_v7, %v14551_v28  ;;  %v14566_v59 = vsel %vm1616_vm2, %v1568_v8, %v1569_v10  ;;  %13153 = vmatpush3.bf16.msra.mxu1 %v14070_v30 }
 0x119   : > { %19174 = vst [vmem:[#allocation12_spill] sm:$0xff] %v14566_v59  ;;  %12904 = vmatprep.subr.bf16.mxu0 %v14524_v61  ;;  %v862_v47 = vadd.f32 %v14303_v53, %v861_v39  ;;  %v12703_v55 = vpop.f32.mrb[22].mxu0  ;;  %12776 = vmatprep.mubr.bf16.mxu0 %v1108_v23  ;;  %v14572_v43 = vsel %vm1616_vm2, %v1566_v48, %v1567_v24 }
 0x11a   : > { %v14576_v6 = vsel %vm1616_vm2, %v1567_v24, %v1568_v8  ;;  %v4013_v57 = vmul.f32 %v11853_v12, %v14566_v59  ;;  %v14580_v7 = vmax.f32 %v870_v36, 0.0  ;;  %v873_v30 = vadd.f32 %v12703_v55, %v14303_v53  ;;  %v864_v21 = vpop.f32.mrb[23].mxu0  ;;  %12777 = vmatmul.mubr.bf16.gmra.mrb[80].mxu0 %v1109_v3  ;;  %13154 = vmatprep.subr.bf16.mxu1 %v14072_v13 }
 0x11b   : > { %19175 = vst [vmem:[#allocation13_spill] sm:$0xff] %v14576_v6  ;;  %v4011_v39 = vmul.f32 %v11851_v32, %v14572_v43  ;;  %v4012_v23 = vmul.f32 %v11852_v31, %v14576_v6  ;;  %v14585_v48 = vmax.f32 %v862_v47, 0.0  ;;  %v865_v8 = vadd.f32 %v14303_v53, %v864_v21  ;;  %v11854_v32 = vld [vmem:[%s18827_s0 + $0x6a0] sm:$0xff] }
 0x11c   : > { %19176 = vst [vmem:[#allocation14_spill] sm:$0xff] %v14580_v7  ;;  %v14590_v24 = vmax.f32 %v873_v30, 0.0  ;;  %13155 = vmatpush3.bf16.msra.mxu1 %v14072_v13  ;;  %v1572_v31 = vrot.slane %v14580_v7, 7  ;;  %v19258_v6 = vrot.slane %v14315_v1, 1 }
 0x11d   : > { %19177 = vst [vmem:[#allocation15_spill] sm:$0xff] %v14585_v48  ;;  %v4066_v36 = vpack.c.bf16 %v4011_v39, %v4010_v45  ;;  %v4067_v2 = vpack.c.bf16 %v4013_v57, %v4012_v23  ;;  %v14592_v55 = vmax.f32 %v865_v8, 0.0  ;;  %v1570_v3 = vrot.slane %v14585_v48, 7  ;;  %13156 = vmatprep.subr.bf16.mxu1 %v14074_v4  ;;  %v11857_v45 = vld [vmem:[%s18827_s0 + $0x6b8] sm:$0xff]  ;;  %v11855_v23 = vld [vmem:[%s18827_s0 + $0x6a8] sm:$0xff]  ;;  %v11856_v8 = vld [vmem:[%s18827_s0 + $0x6b0] sm:$0xff] }
 0x11e   : > { %19178 = vst [vmem:[#allocation16_spill] sm:$0xff] %v14590_v24  ;;  %v1573_v47 = vrot.slane %v14590_v24, 7  ;;  %v14076_v57 = vld [vmem:[%s14221_s18 + $0x178] sm:$0xff]   ;;  %v1111_v58 = vpack.c.bf16 %v14590_v24, %v14580_v7 }
 0x11f   : > { %19179 = vst [vmem:[#allocation17_spill] sm:$0xff] %v14592_v55  ;;  %13096 = vmatprep.mubr.bf16.mxu1 %v4066_v36  ;;  %v12706_v13 = vpop.f32.mrb[24].mxu0  ;;  %v1110_v30 = vpack.c.bf16 %v14592_v55, %v14585_v48  ;;  %v1571_v21 = vrot.slane %v14592_v55, 7  ;;  %v14609_v39 = vsel %vm1616_vm2, %v1569_v10, %v1570_v3 }
 0x120   : > { %13097 = vmatmul.mubr.bf16.gmra.mrb[12].mxu1 %v4067_v2  ;;  %19180 = vst [vmem:[#allocation18_spill] sm:$0xff] %v14609_v39  ;;  %v886_v2 = vadd.f32 %v12706_v13, %v14303_v53  ;;  %v877_v36 = vpop.f32.mrb[25].mxu0  ;;  %v4014_v12 = vmul.f32 %v11854_v32, %v14609_v39  ;;  %v14623_v10 = vsel %vm1616_vm2, %v1572_v31, %v1573_v47  ;;  %v14636_v32 = vld [vmem:[%s14221_s18 + $0x180] sm:$0xff]  }
 0x121   : > { %19181 = vst [vmem:[#allocation19_spill] sm:$0xff] %v14623_v10  ;;  %13157 = vmatpush3.bf16.msra.mxu1 %v14074_v4  ;;  %v878_v20 = vadd.f32 %v14303_v53, %v877_v36  ;;  %v12707_v37 = vpop.f32.mrb[26].mxu0  ;;  %12780 = vmatprep.mubr.bf16.mxu0 %v1110_v30  ;;  %v14628_v51 = vsel %vm1616_vm2, %v1570_v3, %v1571_v21 }
 0x122   : > { %19182 = vst [vmem:[#allocation20_spill] sm:$0xff] %v14628_v51  ;;  %v14632_v13 = vsel %vm1616_vm2, %v1571_v21, %v1572_v31  ;;  %v4017_v24 = vmul.f32 %v11857_v45, %v14623_v10  ;;  %v14638_v39 = vmax.f32 %v886_v2, 0.0  ;;  %v889_v4 = vadd.f32 %v12707_v37, %v14303_v53  ;;  %v880_v28 = vpop.f32.mrb[27].mxu0  ;;  %12781 = vmatmul.mubr.bf16.gmra.mrb[84].mxu0 %v1111_v58  ;;  %v11858_v58 = vld [vmem:[%s18827_s0 + $0x6c0] sm:$0xff] }
 0x123   : > { %19183 = vst [vmem:[#allocation21_spill] sm:$0xff] %v14632_v13  ;;  %v4015_v30 = vmul.f32 %v11855_v23, %v14628_v51  ;;  %v4016_v36 = vmul.f32 %v11856_v8, %v14632_v13  ;;  %13158 = vmatprep.subr.bf16.mxu1 %v14076_v57  ;;  %v14643_v3 = vmax.f32 %v878_v20, 0.0  ;;  %v881_v31 = vadd.f32 %v14303_v53, %v880_v28 }
 0x124   : > { %19184 = vst [vmem:[#allocation22_spill] sm:$0xff] %v14638_v39  ;;  %v14646_v21 = vmax.f32 %v889_v4, 0.0  ;;  %v1576_v20 = vrot.slane %v14638_v39, 7  ;;  %v11859_v4 = vld [vmem:[%s18827_s0 + $0x6c8] sm:$0xff] }
 0x125   : > { %19185 = vst [vmem:[#allocation23_spill] sm:$0xff] %v14643_v3  ;;  %v4068_v45 = vpack.c.bf16 %v4015_v30, %v4014_v12  ;;  %v4069_v10 = vpack.c.bf16 %v4017_v24, %v4016_v36  ;;  %13159 = vmatpush3.bf16.msra.mxu1 %v14076_v57  ;;  %v14648_v2 = vmax.f32 %v881_v31, 0.0  ;;  %v1574_v37 = vrot.slane %v14643_v3, 7  ;;  %v11861_v12 = vld [vmem:[%s18827_s0 + $0x6d8] sm:$0xff]  ;;  %v11860_v30 = vld [vmem:[%s18827_s0 + $0x6d0] sm:$0xff] }
 0x126   : > { %19186 = vst [vmem:[#allocation24_spill] sm:$0xff] %v14646_v21  ;;  %13224 = vmatprep.subr.bf16.mxu1 %v14636_v32  ;;  %v1577_v28 = vrot.slane %v14646_v21, 7  ;;  %v1113_v31 = vpack.c.bf16 %v14646_v21, %v14638_v39 }
 0x127   : > { %19187 = vst [vmem:[#allocation25_spill] sm:$0xff] %v14648_v2  ;;  %13100 = vmatprep.mubr.bf16.mxu1 %v4068_v45  ;;  %v12710_v24 = vpop.f32.mrb[28].mxu0  ;;  %v1112_v57 = vpack.c.bf16 %v14648_v2, %v14643_v3  ;;  %v1575_v23 = vrot.slane %v14648_v2, 7  ;;  %v14665_v8 = vsel %vm1616_vm2, %v1573_v47, %v1574_v37 }
 0x128   : > { %13101 = vmatmul.mubr.bf16.gmra.mrb[16].mxu1 %v4069_v10  ;;  %19188 = vst [vmem:[#allocation26_spill] sm:$0xff] %v14665_v8  ;;  %v902_v36 = vadd.f32 %v12710_v24, %v14303_v53  ;;  %v893_v10 = vpop.f32.mrb[29].mxu0  ;;  %v4018_v45 = vmul.f32 %v11858_v58, %v14665_v8  ;;  %v14679_v47 = vsel %vm1616_vm2, %v1576_v20, %v1577_v28 }
 0x129   : > { %19189 = vst [vmem:[#allocation27_spill] sm:$0xff] %v14679_v47  ;;  %v894_v13 = vadd.f32 %v14303_v53, %v893_v10  ;;  %v12711_v51 = vpop.f32.mrb[30].mxu0  ;;  %12784 = vmatprep.mubr.bf16.mxu0 %v1112_v57  ;;  %v14684_v2 = vsel %vm1616_vm2, %v1574_v37, %v1575_v23  ;;  %v14688_v24 = vsel %vm1616_vm2, %v1575_v23, %v1576_v20 }
 0x12a   : > { %19190 = vst [vmem:[#allocation28_spill] sm:$0xff] %v14684_v2  ;;  %19191 = vst [vmem:[#allocation29_spill] sm:$0xff] %v14688_v24  ;;  %v4021_v21 = vmul.f32 %v11861_v12, %v14679_v47  ;;  %v14691_v39 = vmax.f32 %v902_v36, 0.0  ;;  %v905_v58 = vadd.f32 %v12711_v51, %v14303_v53  ;;  %v896_v8 = vpop.f32.mrb[31].mxu0  ;;  %12785 = vmatmul.mubr.bf16.gmra.mrb[88].mxu0 %v1113_v31  ;;  %v11862_v51 = vld [vmem:[%s18827_s0 + $0x6e0] sm:$0xff] }
 0x12b   : > { %v4019_v10 = vmul.f32 %v11859_v4, %v14684_v2  ;;  %v4020_v57 = vmul.f32 %v11860_v30, %v14688_v24  ;;  %v14696_v3 = vmax.f32 %v894_v13, 0.0  ;;  %v897_v37 = vadd.f32 %v14303_v53, %v896_v8  ;;  %v11865_v8 = vld [vmem:[%s18827_s0 + $0x6f8] sm:$0xff] }
 0x12c   : > { %19192 = vst [vmem:[#allocation30_spill] sm:$0xff] %v14691_v39  ;;  %v14699_v7 = vmax.f32 %v905_v58, 0.0  ;;  %v1580_v4 = vrot.slane %v14691_v39, 7  ;;  %v11864_v58 = vld [vmem:[%s18827_s0 + $0x6f0] sm:$0xff] }
 0x12d   : > { %19193 = vst [vmem:[#allocation31_spill] sm:$0xff] %v14696_v3  ;;  %v4070_v20 = vpack.c.bf16 %v4019_v10, %v4018_v45  ;;  %v4071_v23 = vpack.c.bf16 %v4021_v21, %v4020_v57  ;;  %v14701_v59 = vmax.f32 %v897_v37, 0.0  ;;  %v1578_v12 = vrot.slane %v14696_v3, 7  ;;  %v11863_v45 = vld [vmem:[%s18827_s0 + $0x6e8] sm:$0xff] }
 0x12e   : > { %19194 = vst [vmem:[#allocation32_spill] sm:$0xff] %v14699_v7  ;;  %v1581_v13 = vrot.slane %v14699_v7, 7  ;;  %v1115_v37 = vpack.c.bf16 %v14699_v7, %v14691_v39 }
 0x12f   : > { %19195 = vst [vmem:[#allocation33_spill] sm:$0xff] %v14701_v59  ;;  %13104 = vmatprep.mubr.bf16.mxu1 %v4070_v20  ;;  %v12714_v30 = vpop.f32.mrb[32].mxu0  ;;  %v1114_v21 = vpack.c.bf16 %v14701_v59, %v14696_v3  ;;  %v1579_v36 = vrot.slane %v14701_v59, 7  ;;  %v14717_v31 = vsel %vm1616_vm2, %v1577_v28, %v1578_v12 }
 0x130   : > { %13105 = vmatmul.mubr.bf16.gmra.mrb[20].mxu1 %v4071_v23  ;;  %19196 = vst [vmem:[#allocation34_spill] sm:$0xff] %v14717_v31  ;;  %v918_v10 = vadd.f32 %v12714_v30, %v14303_v53  ;;  %v909_v57 = vpop.f32.mrb[33].mxu0  ;;  %v4022_v20 = vmul.f32 %v11862_v51, %v14717_v31  ;;  %v14731_v28 = vsel %vm1616_vm2, %v1580_v4, %v1581_v13 }
 0x131   : > { %19197 = vst [vmem:[#allocation35_spill] sm:$0xff] %v14731_v28  ;;  %v910_v23 = vadd.f32 %v14303_v53, %v909_v57  ;;  %v12715_v47 = vpop.f32.mrb[34].mxu0  ;;  %12788 = vmatprep.mubr.bf16.mxu0 %v1114_v21  ;;  %v14736_v24 = vsel %vm1616_vm2, %v1578_v12, %v1579_v36  ;;  %v14740_v30 = vsel %vm1616_vm2, %v1579_v36, %v1580_v4 }
 0x132   : > { %19198 = vst [vmem:[#allocation36_spill] sm:$0xff] %v14736_v24  ;;  %19199 = vst [vmem:[#allocation37_spill] sm:$0xff] %v14740_v30  ;;  %v4025_v7 = vmul.f32 %v11865_v8, %v14731_v28  ;;  %v14743_v39 = vmax.f32 %v918_v10, 0.0  ;;  %v921_v51 = vadd.f32 %v12715_v47, %v14303_v53  ;;  %v912_v31 = vpop.f32.mrb[35].mxu0  ;;  %12789 = vmatmul.mubr.bf16.gmra.mrb[92].mxu0 %v1115_v37  ;;  %v11866_v47 = vld [vmem:[%s18827_s0 + $0x700] sm:$0xff] }
 0x133   : > { %v4023_v57 = vmul.f32 %v11863_v45, %v14736_v24  ;;  %v4024_v21 = vmul.f32 %v11864_v58, %v14740_v30  ;;  %v14748_v2 = vmax.f32 %v910_v23, 0.0  ;;  %v913_v12 = vadd.f32 %v14303_v53, %v912_v31  ;;  %v11869_v31 = vld [vmem:[%s18827_s0 + $0x718] sm:$0xff]  ;;  %v11867_v23 = vld [vmem:[%s18827_s0 + $0x708] sm:$0xff] }
 0x134   : > { %19200 = vst [vmem:[#allocation38_spill] sm:$0xff] %v14743_v39  ;;  %v14751_v59 = vmax.f32 %v921_v51, 0.0  ;;  %v1584_v45 = vrot.slane %v14743_v39, 7  ;;  %v11868_v51 = vld [vmem:[%s18827_s0 + $0x710] sm:$0xff] }
 0x135   : > { %19201 = vst [vmem:[#allocation39_spill] sm:$0xff] %v14748_v2  ;;  %v4072_v4 = vpack.c.bf16 %v4023_v57, %v4022_v20  ;;  %v4073_v36 = vpack.c.bf16 %v4025_v7, %v4024_v21  ;;  %v14753_v3 = vmax.f32 %v913_v12, 0.0  ;;  %v1582_v8 = vrot.slane %v14748_v2, 7 }
 0x136   : > { %19202 = vst [vmem:[#allocation40_spill] sm:$0xff] %v14751_v59  ;;  %v1585_v58 = vrot.slane %v14751_v59, 7  ;;  %v1117_v12 = vpack.c.bf16 %v14751_v59, %v14743_v39 }
 0x137   : > { %19203 = vst [vmem:[#allocation41_spill] sm:$0xff] %v14753_v3  ;;  %13108 = vmatprep.mubr.bf16.mxu1 %v4072_v4  ;;  %v12718_v10 = vpop.f32.mrb[36].mxu0  ;;  %v1116_v7 = vpack.c.bf16 %v14753_v3, %v14748_v2  ;;  %v1583_v37 = vrot.slane %v14753_v3, 7  ;;  %v14769_v20 = vsel %vm1616_vm2, %v1581_v13, %v1582_v8 }
 0x138   : > { %13109 = vmatmul.mubr.bf16.gmra.mrb[24].mxu1 %v4073_v36  ;;  %19204 = vst [vmem:[#allocation42_spill] sm:$0xff] %v14769_v20  ;;  %v934_v57 = vadd.f32 %v12718_v10, %v14303_v53  ;;  %v925_v21 = vpop.f32.mrb[37].mxu0  ;;  %v4026_v4 = vmul.f32 %v11866_v47, %v14769_v20  ;;  %v14783_v13 = vsel %vm1616_vm2, %v1584_v45, %v1585_v58 }
 0x139   : > { %19205 = vst [vmem:[#allocation43_spill] sm:$0xff] %v14783_v13  ;;  %v926_v36 = vadd.f32 %v14303_v53, %v925_v21  ;;  %v12719_v28 = vpop.f32.mrb[38].mxu0  ;;  %12792 = vmatprep.mubr.bf16.mxu0 %v1116_v7  ;;  %v14788_v30 = vsel %vm1616_vm2, %v1582_v8, %v1583_v37  ;;  %v14792_v10 = vsel %vm1616_vm2, %v1583_v37, %v1584_v45 }
 0x13a   : > { %19206 = vst [vmem:[#allocation44_spill] sm:$0xff] %v14788_v30  ;;  %19207 = vst [vmem:[#allocation45_spill] sm:$0xff] %v14792_v10  ;;  %v4029_v59 = vmul.f32 %v11869_v31, %v14783_v13  ;;  %v14795_v39 = vmax.f32 %v934_v57, 0.0  ;;  %v937_v47 = vadd.f32 %v12719_v28, %v14303_v53  ;;  %v928_v20 = vpop.f32.mrb[39].mxu0  ;;  %12793 = vmatmul.mubr.bf16.gmra.mrb[96].mxu0 %v1117_v12  ;;  %v11870_v28 = vld [vmem:[%s18827_s0 + $0x720] sm:$0xff] }
 0x13b   : > { %v4027_v21 = vmul.f32 %v11867_v23, %v14788_v30  ;;  %v4028_v7 = vmul.f32 %v11868_v51, %v14792_v10  ;;  %v14800_v24 = vmax.f32 %v926_v36, 0.0  ;;  %v929_v8 = vadd.f32 %v14303_v53, %v928_v20  ;;  %v11873_v20 = vld [vmem:[%s18827_s0 + $0x738] sm:$0xff]  ;;  %v11871_v36 = vld [vmem:[%s18827_s0 + $0x728] sm:$0xff] }
 0x13c   : > { %19208 = vst [vmem:[#allocation46_spill] sm:$0xff] %v14795_v39  ;;  %v14803_v3 = vmax.f32 %v937_v47, 0.0  ;;  %v1588_v23 = vrot.slane %v14795_v39, 7  ;;  %v11872_v47 = vld [vmem:[%s18827_s0 + $0x730] sm:$0xff] }
 0x13d   : > { %19209 = vst [vmem:[#allocation47_spill] sm:$0xff] %v14800_v24  ;;  %v4074_v45 = vpack.c.bf16 %v4027_v21, %v4026_v4  ;;  %v4075_v37 = vpack.c.bf16 %v4029_v59, %v4028_v7  ;;  %v14805_v2 = vmax.f32 %v929_v8, 0.0  ;;  %v1586_v31 = vrot.slane %v14800_v24, 7 }
 0x13e   : > { %19210 = vst [vmem:[#allocation48_spill] sm:$0xff] %v14803_v3  ;;  %v1589_v51 = vrot.slane %v14803_v3, 7  ;;  %v1119_v8 = vpack.c.bf16 %v14803_v3, %v14795_v39 }
 0x13f   : > { %19211 = vst [vmem:[#allocation49_spill] sm:$0xff] %v14805_v2  ;;  %13112 = vmatprep.mubr.bf16.mxu1 %v4074_v45  ;;  %v12722_v57 = vpop.f32.mrb[40].mxu0  ;;  %v1118_v59 = vpack.c.bf16 %v14805_v2, %v14800_v24  ;;  %v1587_v12 = vrot.slane %v14805_v2, 7  ;;  %v14821_v4 = vsel %vm1616_vm2, %v1585_v58, %v1586_v31 }
 0x140   : > { %13113 = vmatmul.mubr.bf16.gmra.mrb[28].mxu1 %v4075_v37  ;;  %19212 = vst [vmem:[#allocation50_spill] sm:$0xff] %v14821_v4  ;;  %v950_v21 = vadd.f32 %v12722_v57, %v14303_v53  ;;  %v941_v7 = vpop.f32.mrb[41].mxu0  ;;  %v4030_v45 = vmul.f32 %v11870_v28, %v14821_v4  ;;  %v14835_v58 = vsel %vm1616_vm2, %v1588_v23, %v1589_v51 }
 0x141   : > { %19213 = vst [vmem:[#allocation51_spill] sm:$0xff] %v14835_v58  ;;  %v942_v37 = vadd.f32 %v14303_v53, %v941_v7  ;;  %v12723_v13 = vpop.f32.mrb[42].mxu0  ;;  %12796 = vmatprep.mubr.bf16.mxu0 %v1118_v59  ;;  %v14840_v10 = vsel %vm1616_vm2, %v1586_v31, %v1587_v12  ;;  %v14844_v57 = vsel %vm1616_vm2, %v1587_v12, %v1588_v23 }
 0x142   : > { %19214 = vst [vmem:[#allocation52_spill] sm:$0xff] %v14840_v10  ;;  %19215 = vst [vmem:[#allocation53_spill] sm:$0xff] %v14844_v57  ;;  %v4033_v3 = vmul.f32 %v11873_v20, %v14835_v58  ;;  %v14847_v39 = vmax.f32 %v950_v21, 0.0  ;;  %v953_v28 = vadd.f32 %v12723_v13, %v14303_v53  ;;  %v944_v4 = vpop.f32.mrb[43].mxu0  ;;  %12797 = vmatmul.mubr.bf16.gmra.mrb[100].mxu0 %v1119_v8  ;;  %v11874_v13 = vld [vmem:[%s18827_s0 + $0x740] sm:$0xff] }
 0x143   : > { %v4031_v7 = vmul.f32 %v11871_v36, %v14840_v10  ;;  %v4032_v59 = vmul.f32 %v11872_v47, %v14844_v57  ;;  %v14852_v30 = vmax.f32 %v942_v37, 0.0  ;;  %v945_v31 = vadd.f32 %v14303_v53, %v944_v4  ;;  %v11877_v4 = vld [vmem:[%s18827_s0 + $0x758] sm:$0xff]  ;;  %v11875_v37 = vld [vmem:[%s18827_s0 + $0x748] sm:$0xff] }
 0x144   : > { %19216 = vst [vmem:[#allocation54_spill] sm:$0xff] %v14847_v39  ;;  %v14855_v2 = vmax.f32 %v953_v28, 0.0  ;;  %v1592_v36 = vrot.slane %v14847_v39, 7  ;;  %v11876_v28 = vld [vmem:[%s18827_s0 + $0x750] sm:$0xff] }
 0x145   : > { %19217 = vst [vmem:[#allocation55_spill] sm:$0xff] %v14852_v30  ;;  %v4076_v23 = vpack.c.bf16 %v4031_v7, %v4030_v45  ;;  %v4077_v12 = vpack.c.bf16 %v4033_v3, %v4032_v59  ;;  %v14857_v24 = vmax.f32 %v945_v31, 0.0  ;;  %v1590_v20 = vrot.slane %v14852_v30, 7 }
 0x146   : > { %19218 = vst [vmem:[#allocation56_spill] sm:$0xff] %v14855_v2  ;;  %v1593_v47 = vrot.slane %v14855_v2, 7  ;;  %v1121_v31 = vpack.c.bf16 %v14855_v2, %v14847_v39 }
 0x147   : > { %19219 = vst [vmem:[#allocation57_spill] sm:$0xff] %v14857_v24  ;;  %13116 = vmatprep.mubr.bf16.mxu1 %v4076_v23  ;;  %v12726_v21 = vpop.f32.mrb[44].mxu0  ;;  %v1120_v3 = vpack.c.bf16 %v14857_v24, %v14852_v30  ;;  %v1591_v8 = vrot.slane %v14857_v24, 7  ;;  %v14873_v45 = vsel %vm1616_vm2, %v1589_v51, %v1590_v20 }
 0x148   : > { %13117 = vmatmul.mubr.bf16.gmra.mrb[32].mxu1 %v4077_v12  ;;  %19220 = vst [vmem:[#allocation58_spill] sm:$0xff] %v14873_v45  ;;  %v966_v7 = vadd.f32 %v12726_v21, %v14303_v53  ;;  %v957_v59 = vpop.f32.mrb[45].mxu0  ;;  %v4034_v23 = vmul.f32 %v11874_v13, %v14873_v45  ;;  %v14887_v51 = vsel %vm1616_vm2, %v1592_v36, %v1593_v47 }
 0x149   : > { %19221 = vst [vmem:[#allocation59_spill] sm:$0xff] %v14887_v51  ;;  %v958_v12 = vadd.f32 %v14303_v53, %v957_v59  ;;  %v12727_v58 = vpop.f32.mrb[46].mxu0  ;;  %12800 = vmatprep.mubr.bf16.mxu0 %v1120_v3  ;;  %v14892_v57 = vsel %vm1616_vm2, %v1590_v20, %v1591_v8  ;;  %v14896_v21 = vsel %vm1616_vm2, %v1591_v8, %v1592_v36 }
 0x14a   : > { %19222 = vst [vmem:[#allocation60_spill] sm:$0xff] %v14892_v57  ;;  %19223 = vst [vmem:[#allocation61_spill] sm:$0xff] %v14896_v21  ;;  %v4037_v2 = vmul.f32 %v11877_v4, %v14887_v51  ;;  %v14899_v39 = vmax.f32 %v966_v7, 0.0  ;;  %v969_v13 = vadd.f32 %v12727_v58, %v14303_v53  ;;  %v960_v45 = vpop.f32.mrb[47].mxu0  ;;  %12801 = vmatmul.mubr.bf16.gmra.mrb[104].mxu0 %v1121_v31  ;;  %v11878_v58 = vld [vmem:[%s18827_s0 + $0x760] sm:$0xff] }
 0x14b   : > { %v4035_v59 = vmul.f32 %v11875_v37, %v14892_v57  ;;  %v4036_v3 = vmul.f32 %v11876_v28, %v14896_v21  ;;  %v14904_v10 = vmax.f32 %v958_v12, 0.0  ;;  %v961_v20 = vadd.f32 %v14303_v53, %v960_v45  ;;  %v11881_v45 = vld [vmem:[%s18827_s0 + $0x778] sm:$0xff]  ;;  %v11879_v12 = vld [vmem:[%s18827_s0 + $0x768] sm:$0xff] }
 0x14c   : > { %19224 = vst [vmem:[#allocation62_spill] sm:$0xff] %v14899_v39  ;;  %v14907_v24 = vmax.f32 %v969_v13, 0.0  ;;  %v1596_v37 = vrot.slane %v14899_v39, 7  ;;  %v11880_v13 = vld [vmem:[%s18827_s0 + $0x770] sm:$0xff] }
 0x14d   : > { %19225 = vst [vmem:[#allocation63_spill] sm:$0xff] %v14904_v10  ;;  %v4078_v36 = vpack.c.bf16 %v4035_v59, %v4034_v23  ;;  %v4079_v8 = vpack.c.bf16 %v4037_v2, %v4036_v3  ;;  %v14909_v30 = vmax.f32 %v961_v20, 0.0  ;;  %v1594_v4 = vrot.slane %v14904_v10, 7 }
 0x14e   : > { %19226 = vst [vmem:[#allocation64_spill] sm:$0xff] %v14907_v24  ;;  %v1597_v28 = vrot.slane %v14907_v24, 7  ;;  %v1123_v20 = vpack.c.bf16 %v14907_v24, %v14899_v39 }
 0x14f   : > { %19227 = vst [vmem:[#allocation65_spill] sm:$0xff] %v14909_v30  ;;  %13120 = vmatprep.mubr.bf16.mxu1 %v4078_v36  ;;  %v12730_v7 = vpop.f32.mrb[48].mxu0  ;;  %v1122_v2 = vpack.c.bf16 %v14909_v30, %v14904_v10  ;;  %v1595_v31 = vrot.slane %v14909_v30, 7  ;;  %v14925_v23 = vsel %vm1616_vm2, %v1593_v47, %v1594_v4 }
 0x150   : > { %13121 = vmatmul.mubr.bf16.gmra.mrb[36].mxu1 %v4079_v8  ;;  %19228 = vst [vmem:[#allocation66_spill] sm:$0xff] %v14925_v23  ;;  %v982_v59 = vadd.f32 %v12730_v7, %v14303_v53  ;;  %v973_v3 = vpop.f32.mrb[49].mxu0  ;;  %v4038_v36 = vmul.f32 %v11878_v58, %v14925_v23  ;;  %v14939_v47 = vsel %vm1616_vm2, %v1596_v37, %v1597_v28 }
 0x151   : > { %19229 = vst [vmem:[#allocation67_spill] sm:$0xff] %v14939_v47  ;;  %v974_v8 = vadd.f32 %v14303_v53, %v973_v3  ;;  %v12731_v51 = vpop.f32.mrb[50].mxu0  ;;  %12804 = vmatprep.mubr.bf16.mxu0 %v1122_v2  ;;  %v14944_v21 = vsel %vm1616_vm2, %v1594_v4, %v1595_v31  ;;  %v14948_v7 = vsel %vm1616_vm2, %v1595_v31, %v1596_v37 }
 0x152   : > { %19230 = vst [vmem:[#allocation68_spill] sm:$0xff] %v14944_v21  ;;  %19231 = vst [vmem:[#allocation69_spill] sm:$0xff] %v14948_v7  ;;  %v4041_v24 = vmul.f32 %v11881_v45, %v14939_v47  ;;  %v14951_v39 = vmax.f32 %v982_v59, 0.0  ;;  %v985_v58 = vadd.f32 %v12731_v51, %v14303_v53  ;;  %v976_v23 = vpop.f32.mrb[51].mxu0  ;;  %12805 = vmatmul.mubr.bf16.gmra.mrb[108].mxu0 %v1123_v20  ;;  %v11882_v51 = vld [vmem:[%s18827_s0 + $0x780] sm:$0xff] }
 0x153   : > { %v4039_v3 = vmul.f32 %v11879_v12, %v14944_v21  ;;  %v4040_v2 = vmul.f32 %v11880_v13, %v14948_v7  ;;  %v14956_v57 = vmax.f32 %v974_v8, 0.0  ;;  %v977_v4 = vadd.f32 %v14303_v53, %v976_v23  ;;  %v11885_v23 = vld [vmem:[%s18827_s0 + $0x798] sm:$0xff]  ;;  %v11883_v8 = vld [vmem:[%s18827_s0 + $0x788] sm:$0xff] }
 0x154   : > { %19232 = vst [vmem:[#allocation70_spill] sm:$0xff] %v14951_v39  ;;  %v14959_v30 = vmax.f32 %v985_v58, 0.0  ;;  %v1600_v12 = vrot.slane %v14951_v39, 7  ;;  %v11884_v58 = vld [vmem:[%s18827_s0 + $0x790] sm:$0xff] }
 0x155   : > { %19233 = vst [vmem:[#allocation71_spill] sm:$0xff] %v14956_v57  ;;  %v4080_v37 = vpack.c.bf16 %v4039_v3, %v4038_v36  ;;  %v4081_v31 = vpack.c.bf16 %v4041_v24, %v4040_v2  ;;  %v14961_v10 = vmax.f32 %v977_v4, 0.0  ;;  %v1598_v45 = vrot.slane %v14956_v57, 7 }
 0x156   : > { %19234 = vst [vmem:[#allocation72_spill] sm:$0xff] %v14959_v30  ;;  %v1601_v13 = vrot.slane %v14959_v30, 7  ;;  %v1125_v4 = vpack.c.bf16 %v14959_v30, %v14951_v39 }
 0x157   : > { %19235 = vst [vmem:[#allocation73_spill] sm:$0xff] %v14961_v10  ;;  %13124 = vmatprep.mubr.bf16.mxu1 %v4080_v37  ;;  %v12734_v59 = vpop.f32.mrb[52].mxu0  ;;  %v1124_v24 = vpack.c.bf16 %v14961_v10, %v14956_v57  ;;  %v1599_v20 = vrot.slane %v14961_v10, 7  ;;  %v14977_v36 = vsel %vm1616_vm2, %v1597_v28, %v1598_v45 }
 0x158   : > { %13125 = vmatmul.mubr.bf16.gmra.mrb[40].mxu1 %v4081_v31  ;;  %19236 = vst [vmem:[#allocation74_spill] sm:$0xff] %v14977_v36  ;;  %v998_v3 = vadd.f32 %v12734_v59, %v14303_v53  ;;  %v989_v2 = vpop.f32.mrb[53].mxu0  ;;  %v4042_v37 = vmul.f32 %v11882_v51, %v14977_v36  ;;  %v14991_v28 = vsel %vm1616_vm2, %v1600_v12, %v1601_v13 }
 0x159   : > { %19237 = vst [vmem:[#allocation75_spill] sm:$0xff] %v14991_v28  ;;  %v990_v31 = vadd.f32 %v14303_v53, %v989_v2  ;;  %v12735_v47 = vpop.f32.mrb[54].mxu0  ;;  %12808 = vmatprep.mubr.bf16.mxu0 %v1124_v24  ;;  %v14996_v7 = vsel %vm1616_vm2, %v1598_v45, %v1599_v20  ;;  %v15000_v59 = vsel %vm1616_vm2, %v1599_v20, %v1600_v12  ;;  %v15011_v45 = vld [vmem:[%s14300_s21] ss:$0 sm:$0xff] }
 0x15a   : > { %19238 = vst [vmem:[#allocation76_spill] sm:$0xff] %v14996_v7  ;;  %19239 = vst [vmem:[#allocation77_spill] sm:$0xff] %v15000_v59  ;;  %v4045_v30 = vmul.f32 %v11885_v23, %v14991_v28  ;;  %v15003_v39 = vmax.f32 %v998_v3, 0.0  ;;  %v1001_v51 = vadd.f32 %v12735_v47, %v14303_v53  ;;  %v992_v36 = vpop.f32.mrb[55].mxu0  ;;  %12809 = vmatmul.mubr.bf16.gmra.mrb[112].mxu0 %v1125_v4  ;;  %v11886_v47 = vld [vmem:[%s18827_s0 + $0x7a0] sm:$0xff] }
 0x15b   : > { %v4043_v2 = vmul.f32 %v11883_v8, %v14996_v7  ;;  %v4044_v24 = vmul.f32 %v11884_v58, %v15000_v59  ;;  %v15008_v21 = vmax.f32 %v990_v31, 0.0  ;;  %v993_v10 = vadd.f32 %v15011_v45, %v992_v36  ;;  %v11889_v36 = vld [vmem:[%s18827_s0 + $0x7b8] sm:$0xff]  ;;  %v11887_v31 = vld [vmem:[%s18827_s0 + $0x7a8] sm:$0xff] }
 0x15c   : > { %19240 = vst [vmem:[#allocation78_spill] sm:$0xff] %v15003_v39  ;;  %v15014_v12 = vmax.f32 %v1001_v51, 0.0  ;;  %v1604_v8 = vrot.slane %v15003_v39, 7  ;;  %v11888_v51 = vld [vmem:[%s18827_s0 + $0x7b0] sm:$0xff] }
 0x15d   : > { %19241 = vst [vmem:[#allocation79_spill] sm:$0xff] %v15008_v21  ;;  %v4082_v20 = vpack.c.bf16 %v4043_v2, %v4042_v37  ;;  %v4083_v23 = vpack.c.bf16 %v4045_v30, %v4044_v24  ;;  %v15016_v3 = vmax.f32 %v993_v10, 0.0  ;;  %v1602_v53 = vrot.slane %v15008_v21, 7 }
 0x15e   : > { %19242 = vst [vmem:[#allocation80_spill] sm:$0xff] %v15014_v12  ;;  %v1605_v58 = vrot.slane %v15014_v12, 7 }
 0x15f   : > { %19243 = vst [vmem:[#allocation81_spill] sm:$0xff] %v15016_v3  ;;  %13128 = vmatprep.mubr.bf16.mxu1 %v4082_v20  ;;  %v12738_v4 = vpop.f32.mrb[56].mxu0  ;;  %v1126_v30 = vpack.c.bf16 %v15016_v3, %v15008_v21  ;;  %v1603_v10 = vrot.slane %v15016_v3, 7  ;;  %v15032_v37 = vsel %vm1616_vm2, %v1601_v13, %v1602_v53  ;;  %v1127_v20 = vpack.c.bf16 %v15014_v12, %v15003_v39 }
 0x160   : > { %13129 = vmatmul.mubr.bf16.gmra.mrb[44].mxu1 %v4083_v23  ;;  %19244 = vst [vmem:[#allocation82_spill] sm:$0xff] %v15032_v37  ;;  %v1014_v2 = vadd.f32 %v15011_v45, %v12738_v4  ;;  %v1005_v24 = vpop.f32.mrb[57].mxu0  ;;  %v4046_v23 = vmul.f32 %v11886_v47, %v15032_v37  ;;  %v15046_v13 = vsel %vm1616_vm2, %v1604_v8, %v1605_v58 }
 0x161   : > { %19245 = vst [vmem:[#allocation83_spill] sm:$0xff] %v15046_v13  ;;  %v1006_v28 = vadd.f32 %v15011_v45, %v1005_v24  ;;  %v12739_v59 = vpop.f32.mrb[58].mxu0  ;;  %12812 = vmatprep.mubr.bf16.mxu0 %v1126_v30  ;;  %v15051_v7 = vsel %vm1616_vm2, %v1602_v53, %v1603_v10  ;;  %v15055_v4 = vsel %vm1616_vm2, %v1603_v10, %v1604_v8 }
 0x162   : > { %19246 = vst [vmem:[#allocation84_spill] sm:$0xff] %v15051_v7  ;;  %19247 = vst [vmem:[#allocation85_spill] sm:$0xff] %v15055_v4  ;;  %v4049_v12 = vmul.f32 %v11889_v36, %v15046_v13  ;;  %v15058_v39 = vmax.f32 %v1014_v2, 0.0  ;;  %v1017_v47 = vadd.f32 %v15011_v45, %v12739_v59  ;;  %v1008_v37 = vpop.f32.mrb[59].mxu0  ;;  %12813 = vmatmul.mubr.bf16.gmra.mrb[116].mxu0 %v1127_v20  ;;  %v11893_v20 = vld [vmem:[%s18827_s0 + $0x7d8] sm:$0xff] }
 0x163   : > { %v4047_v24 = vmul.f32 %v11887_v31, %v15051_v7  ;;  %v4048_v30 = vmul.f32 %v11888_v51, %v15055_v4  ;;  %v15063_v3 = vmax.f32 %v1006_v28, 0.0  ;;  %v1009_v53 = vadd.f32 %v15011_v45, %v1008_v37  ;;  %v11890_v31 = vld [vmem:[%s18827_s0 + $0x7c0] sm:$0xff]  ;;  %v11892_v37 = vld [vmem:[%s18827_s0 + $0x7d0] sm:$0xff] }
 0x164   : > { %19248 = vst [vmem:[#allocation86_spill] sm:$0xff] %v15058_v39  ;;  %v15066_v21 = vmax.f32 %v1017_v47, 0.0  ;;  %v1552_v28 = vrot.slane %v14315_v1, 7  ;;  %v1608_v2 = vrot.slane %v15058_v39, 7 }
 0x165   : > { %19249 = vst [vmem:[#allocation87_spill] sm:$0xff] %v15063_v3  ;;  %v4084_v8 = vpack.c.bf16 %v4047_v24, %v4046_v23  ;;  %v4085_v10 = vpack.c.bf16 %v4049_v12, %v4048_v30  ;;  %v15069_v36 = vmax.f32 %v1009_v53, 0.0  ;;  %v1606_v59 = vrot.slane %v15063_v3, 7 }
 0x166   : > { %19250 = vst [vmem:[#allocation88_spill] sm:$0xff] %v15066_v21  ;;  %v1609_v12 = vrot.slane %v15066_v21, 7  ;;  %v3094_v23 = vrot.slane %v14313_v0, 1  ;;  %v1129_v13 = vpack.c.bf16 %v15066_v21, %v15058_v39 }
 0x167   : > { %19251 = vst [vmem:[#allocation89_spill] sm:$0xff] %v15069_v36  ;;  %13132 = vmatprep.mubr.bf16.mxu1 %v4084_v8  ;;  %v12742_v47 = vpop.f32.mrb[60].mxu0  ;;  %v1128_v24 = vpack.c.bf16 %v15069_v36, %v15063_v3  ;;  %v1607_v30 = vrot.slane %v15069_v36, 7  ;;  %v15089_v53 = vsel %vm1616_vm2, %v1605_v58, %v1606_v59  ;;  %v11891_v8 = vld [vmem:[%s18827_s0 + $0x7c8] sm:$0xff] }
 0x168   : > { %13133 = vmatmul.mubr.bf16.gmra.mrb[48].mxu1 %v4085_v10  ;;  %19252 = vst [vmem:[#allocation90_spill] sm:$0xff] %v15089_v53  ;;  %v1030_v10 = vadd.f32 %v15011_v45, %v12742_v47  ;;  %v1021_v51 = vpop.f32.mrb[61].mxu0  ;;  %v4050_v4 = vmul.f32 %v11890_v31, %v15089_v53  ;;  %v15104_v58 = vsel %vm1616_vm2, %v1608_v2, %v1609_v12 }
 0x169   : > { %19253 = vst [vmem:[#allocation91_spill] sm:$0xff] %v15104_v58  ;;  %v1022_v7 = vadd.f32 %v15011_v45, %v1021_v51  ;;  %v12743_v36 = vpop.f32.mrb[62].mxu0  ;;  %12816 = vmatprep.mubr.bf16.mxu0 %v1128_v24  ;;  %v15109_v3 = vsel %vm1616_vm2, %v1606_v59, %v1607_v30  ;;  %v15113_v47 = vsel %vm1616_vm2, %v1607_v30, %v1608_v2 }
 0x16a   : > { %19254 = vst [vmem:[#allocation92_spill] sm:$0xff] %v15109_v3  ;;  %19255 = vst [vmem:[#allocation93_spill] sm:$0xff] %v15113_v47  ;;  %v4053_v21 = vmul.f32 %v11893_v20, %v15104_v58  ;;  %v15116_v39 = vmax.f32 %v1030_v10, 0.0  ;;  %v1033_v31 = vadd.f32 %v15011_v45, %v12743_v36  ;;  %v1024_v53 = vpop.f32.mrb[63].mxu0  ;;  %12817 = vmatmul.mubr.bf16.gmra.mrb[120].mxu0 %v1129_v13  ;;  %v19260_v20 = vrot.slane %v14311_v63, 1  ;;  %v11922_v13 = vld [vmem:[%s18827_s0 + $0xa00] sm:$0xff] }
 0x16b   : > { %v4051_v51 = vmul.f32 %v11891_v8, %v15109_v3  ;;  %v4052_v24 = vmul.f32 %v11892_v37, %v15113_v47  ;;  %v15121_v57 = vmax.f32 %v1022_v7, 0.0  ;;  %v1025_v59 = vadd.f32 %v15011_v45, %v1024_v53  ;;  %v11923_v7 = vld [vmem:[%s18827_s0 + $0xa08] sm:$0xff] }
 0x16c   : > { %19256 = vst [vmem:[#allocation94_spill] sm:$0xff] %v15116_v39  ;;  %v15128_v2 = vsel %vm3157_vm3, %v3094_v23, %v19258_v6  ;;  %v15134_v36 = vsel %vm3157_vm3, %v19260_v20, %v3094_v23  ;;  %v15142_v45 = vmax.f32 %v1033_v31, 0.0  ;;  %v1550_v6 = vrot.slane %v14311_v63, 7  ;;  %v1681_v63 = vld [vmem:[%s18827_s0] sm:$0xff] }
 0x16d   : > { %19257 = vst [vmem:[#allocation95_spill] sm:$0xff] %v15121_v57  ;;  %19259 = vst [vmem:[#allocation96_spill] sm:$0xff] %v15128_v2  ;;  %v4086_v37 = vpack.c.bf16 %v4051_v51, %v4050_v4  ;;  %v4087_v30 = vpack.c.bf16 %v4053_v21, %v4052_v24  ;;  %v15145_v53 = vmax.f32 %v1025_v59, 0.0  ;;  %v1610_v8 = vrot.slane %v15121_v57, 7  ;;  %v1682_v21 = vld [vmem:[%s18827_s0 + $0x8] sm:$0xff]  ;;  %v11894_v4 = vld [vmem:[%s18827_s0 + $0x7e0] sm:$0xff] }
 0x16e   : > { %19261 = vst [vmem:[#allocation97_spill] sm:$0xff] %v15134_v36  ;;  %19262 = vst [vmem:[#allocation98_spill] sm:$0xff] %v15142_v45  ;;  %v19264_v23 = vrot.slane %v14309_v62, 7  ;;  %v1612_v20 = vrot.slane %v15116_v39, 7  ;;  %v1613_v31 = vrot.slane %v15142_v45, 7  ;;  %v11897_v51 = vld [vmem:[%s18827_s0 + $0x7f8] sm:$0xff]  ;;  %v4701_v24 = vmul.f32 %v11922_v13, %v15134_v36 }
 0x16f   : > { %19263 = vst [vmem:[#allocation99_spill] sm:$0xff] %v15145_v53  ;;  %13136 = vmatprep.mubr.bf16.mxu1 %v4086_v37  ;;  %v4702_v59 = vmul.f32 %v11923_v7, %v15128_v2  ;;  %v1130_v37 = vpack.c.bf16 %v15145_v53, %v15121_v57  ;;  %v15175_v58 = vsel %vm1616_vm2, %v1609_v12, %v1610_v8  ;;  %v11895_v13 = vld [vmem:[%s18827_s0 + $0x7e8] sm:$0xff]  ;;  %v11896_v7 = vld [vmem:[%s18827_s0 + $0x7f0] sm:$0xff]  ;;  %v3097_v36 = vrot.slane %v14330_v15, 1 }
 0x170   : > { %v15152_v10 = vsel %vm1616_vm2, %v1552_v28, %v19264_v23  ;;  %13137 = vmatmul.mubr.bf16.gmra.mrb[52].mxu1 %v4087_v30  ;;  %v1611_v23 = vrot.slane %v15145_v53, 7  ;;  %19266 = vst [vmem:[#allocation101_spill] sm:$0xff] %v15175_v58  ;;  %v19267_v30 = vrot.slane %v14313_v0, 7  ;;  %v1131_v12 = vpack.c.bf16 %v15142_v45, %v15116_v39  ;;  %v1683_v45 = vld [vmem:[%s18827_s0 + $0x10] sm:$0xff] }
 0x171   : > { %19265 = vst [vmem:[#allocation100_spill] sm:$0xff] %v15152_v10  ;;  %v15194_v47 = vsel %vm1616_vm2, %v1612_v20, %v1613_v31  ;;  %v15198_v3 = vsel %vm1616_vm2, %v1613_v31, %v1550_v6  ;;  %12820 = vmatprep.mubr.bf16.mxu0 %v1130_v37  ;;  %v4054_v37 = vmul.f32 %v11894_v4, %v15175_v58  ;;  %v1684_v4 = vld [vmem:[%s18827_s0 + $0x18] sm:$0xff] }
 0x172   : > { %v15187_v2 = vsel %vm1616_vm2, %v19267_v30, %v1552_v28  ;;  %19269 = vst [vmem:[#allocation103_spill] sm:$0xff] %v15194_v47  ;;  %19270 = vst [vmem:[#allocation104_spill] sm:$0xff] %v15198_v3  ;;  %v15202_v53 = vsel %vm1616_vm2, %v1611_v23, %v1612_v20  ;;  %v1746_v28 = vmul.f32 %v1682_v21, %v15194_v47  ;;  %12821 = vmatmul.mubr.bf16.gmra.mrb[124].mxu0 %v1131_v12  ;;  %v1686_v21 = vld [vmem:[%s18827_s0 + $0x28] sm:$0xff] }
 0x173   : > { %19268 = vst [vmem:[#allocation102_spill] sm:$0xff] %v15187_v2  ;;  %19271 = vst [vmem:[#allocation105_spill] sm:$0xff] %v15202_v53  ;;  %v15207_v30 = vsel %vm1616_vm2, %v1610_v8, %v1611_v23  ;;  %v4057_v15 = vmul.f32 %v11897_v51, %v15194_v47  ;;  %v1745_v31 = vmul.f32 %v1681_v63, %v15202_v53  ;;  %v1685_v8 = vld [vmem:[%s18827_s0 + $0x20] sm:$0xff]  ;;  %v3096_v51 = vrot.slane %v14309_v62, 1 }
 0x174   : > { %v4055_v20 = vmul.f32 %v11895_v13, %v15207_v30  ;;  %v4056_v39 = vmul.f32 %v11896_v7, %v15202_v53  ;;  %v19272_v23 = vrot.slane %v14313_v0, 7  ;;  %v3098_v13 = vrot.slane %v14336_v19, 1 }
 0x175   : > { %v1809_v7 = vpack.c.bf16 %v1746_v28, %v1745_v31  ;;  %v1747_v53 = vmul.f32 %v1683_v45, %v15198_v3  ;;  %v1749_v58 = vmul.f32 %v1685_v8, %v15187_v2  ;;  %v1750_v62 = vmul.f32 %v1686_v21, %v15152_v10  ;;  %v19305_v3 = vld [vmem:[#allocation19_spill] sm:$0xff] }
 0x176   : > { %v15228_v63 = vsel %vm1616_vm2, %v1550_v6, %v19272_v23  ;;  %v4088_v12 = vpack.c.bf16 %v4055_v20, %v4054_v37  ;;  %v4089_v47 = vpack.c.bf16 %v4057_v15, %v4056_v39  ;;  %v3099_v0 = vrot.slane %v14324_v11, 1  ;;  %v11925_v15 = vld [vmem:[%s18827_s0 + $0xa18] sm:$0xff]  ;;  %v14079_v37 = vld [vmem:[%s14221_s18 + $0x48] sm:$0xff]  }
 0x177   : > { %19273 = vst [vmem:[#allocation106_spill] sm:$0xff] %v15228_v63  ;;  %12840 = vmatprep.mubr.bf16.mxu0 %v1809_v7  ;;  %v4765_v6 = vpack.c.bf16 %v4702_v59, %v4701_v24  ;;  %v1748_v23 = vmul.f32 %v1684_v4, %v15228_v63  ;;  %v15241_v19 = vsel %vm3157_vm3, %v3096_v51, %v3097_v36  ;;  %v11926_v24 = vld [vmem:[%s18827_s0 + $0xa20] sm:$0xff]  ;;  %v11927_v59 = vld [vmem:[%s18827_s0 + $0xa28] sm:$0xff]  ;;  %v3100_v7 = vrot.slane %v14333_v17, 1 }
 0x178   : > { %13140 = vmatprep.mubr.bf16.mxu1 %v4088_v12  ;;  %19274 = vst [vmem:[#allocation107_spill] sm:$0xff] %v15241_v19  ;;  %v15248_v39 = vsel %vm3157_vm3, %v3098_v13, %v3099_v0  ;;  %v15252_v45 = vsel %vm3157_vm3, %v3097_v36, %v3098_v13  ;;  %v11924_v36 = vld [vmem:[%s18827_s0 + $0xa10] sm:$0xff]  ;;  %v1811_v20 = vpack.c.bf16 %v1750_v62, %v1749_v58  ;;  %v1690_v4 = vld [vmem:[%s18827_s0 + $0x48] sm:$0xff]  ;;  %v3101_v13 = vrot.slane %v14399_v52, 1 }
 0x179   : > { %13141 = vmatmul.mubr.bf16.gmra.mrb[56].mxu1 %v4089_v47  ;;  %19275 = vst [vmem:[#allocation108_spill] sm:$0xff] %v15248_v39  ;;  %19276 = vst [vmem:[#allocation109_spill] sm:$0xff] %v15252_v45  ;;  %v1810_v28 = vpack.c.bf16 %v1748_v23, %v1747_v53  ;;  %v19277_v47 = vrot.slane %v14315_v1, 1  ;;  %v4704_v8 = vmul.f32 %v11925_v15, %v15241_v19  ;;  %v3102_v58 = vrot.slane %v14408_v60, 1  ;;  %v19304_v19 = vld [vmem:[#allocation21_spill] sm:$0xff] }
 0x17a   : > { %13160 = vmatprep.mubr.bf16.mxu1 %v4765_v6  ;;  %v4705_v21 = vmul.f32 %v11926_v24, %v15252_v45  ;;  %v4706_v53 = vmul.f32 %v11927_v59, %v15248_v39  ;;  %v1754_v23 = vmul.f32 %v1690_v4, %v14376_v38  ;;  %v3103_v15 = vrot.slane %v14392_v46, 1  ;;  %v14080_v24 = vld [vmem:[%s14221_s18 + $0x188] sm:$0xff]   ;;  %v14081_v59 = vld [vmem:[%s14221_s18 + $0x50] sm:$0xff]   ;;  %v14083_v4 = vld [vmem:[%s14221_s18 + $0x58] sm:$0xff]  }
 0x17b   : > { %v15264_v31 = vsel %vm3157_vm3, %v19277_v47, %v3096_v51  ;;  %12841 = vmatmul.mubr.bf16.vlgmr.msra.gmra.mrb[64].mxu0 %v1810_v28  ;;  %v1689_v51 = vld [vmem:[%s18827_s0 + $0x40] sm:$0xff]  ;;  %v11929_v47 = vld [vmem:[%s18827_s0 + $0xa38] sm:$0xff]  ;;  %vm11181_vm2 = vcmask 1048512  }
 0x17c   : > { %19278 = vst [vmem:[#allocation110_spill] sm:$0xff] %v15264_v31  ;;  %12844 = vmatprep.mubr.bf16.mxu0 %v1811_v20  ;;  %12905 = vmatpush3.bf16.msra.mxu0 %v14524_v61  ;;  %v4703_v62 = vmul.f32 %v11924_v36, %v15264_v31  ;;  %v1753_v6 = vmul.f32 %v1689_v51, %v14389_v44  ;;  %v11928_v51 = vld [vmem:[%s18827_s0 + $0xa30] sm:$0xff]  ;;  %v19295_v45 = vld [vmem:[#allocation11_spill] sm:$0xff] }
 0x17d   : > { %12906 = vmatprep.subr.bf16.mxu0 %v14079_v37  ;;  %v4767_v28 = vpack.c.bf16 %v4706_v53, %v4705_v21  ;;  %v15291_v61 = vsel %vm3157_vm3, %v3100_v7, %v3101_v13  ;;  %v15298_v36 = vsel %vm3157_vm3, %v3102_v58, %v3103_v15  ;;  %v15302_v20 = vsel %vm3157_vm3, %v3101_v13, %v3102_v58  ;;  %v11931_v21 = vld [vmem:[%s18827_s0 + $0xa48] sm:$0xff]  ;;  %v1692_v58 = vld [vmem:[%s18827_s0 + $0x58] sm:$0xff] }
 0x17e   : > { %v4766_v12 = vpack.c.bf16 %v4704_v8, %v4703_v62  ;;  %19279 = vst [vmem:[#allocation111_spill] sm:$0xff] %v15291_v61  ;;  %19280 = vst [vmem:[#allocation112_spill] sm:$0xff] %v15298_v36  ;;  %v11930_v8 = vld [vmem:[%s18827_s0 + $0xa40] sm:$0xff]  ;;  %v15313_v53 = vsel %vm3157_vm3, %v3099_v0, %v3100_v7  ;;  %v1813_v13 = vpack.c.bf16 %v1754_v23, %v1753_v6  ;;  %v1694_v6 = vld [vmem:[%s18827_s0 + $0x68] sm:$0xff]  ;;  %v3105_v23 = vrot.slane %v14459_v40, 1 }
 0x17f   : > { %19281 = vst [vmem:[#allocation113_spill] sm:$0xff] %v15302_v20  ;;  %19282 = vst [vmem:[#allocation114_spill] sm:$0xff] %v15313_v53  ;;  %v4708_v62 = vmul.f32 %v11929_v47, %v15291_v61  ;;  %v4709_v0 = vmul.f32 %v11930_v8, %v15302_v20  ;;  %v4710_v7 = vmul.f32 %v11931_v21, %v15298_v36  ;;  %v3104_v8 = vrot.slane %v14403_v56, 1  ;;  %v14084_v36 = vld [vmem:[%s14221_s18 + $0x198] sm:$0xff]   ;;  %v14085_v20 = vld [vmem:[%s14221_s18 + $0x60] sm:$0xff]  }
 0x180   : > { %12907 = vmatpush3.bf16.msra.mxu0 %v14079_v37  ;;  %v19283_v37 = vpack.c.bf16 %v14560_v35, %v14544_v18  ;;  %v4707_v18 = vmul.f32 %v11928_v51, %v15313_v53  ;;  %v1691_v35 = vld [vmem:[%s18827_s0 + $0x50] sm:$0xff]  ;;  %v1756_v47 = vmul.f32 %v1692_v58, %v14446_v29  ;;  %v3107_v51 = vrot.slane %v14454_v33, 1  ;;  %v1696_v61 = vld [vmem:[%s18827_s0 + $0x78] sm:$0xff] }
 0x181   : > { %13161 = vmatmul.mubr.bf16.vlgmr.msra.gmra.mrb[60].mxu1 %v4766_v12  ;;  %12908 = vmatprep.subr.bf16.mxu0 %v14081_v59  ;;  %v1693_v12 = vld [vmem:[%s18827_s0 + $0x60] sm:$0xff]  ;;  %v4769_v53 = vpack.c.bf16 %v4710_v7, %v4709_v0  ;;  %v15351_v58 = vsel %vm3157_vm3, %v3104_v8, %v3105_v23  ;;  %v11935_v7 = vld [vmem:[%s18827_s0 + $0xa68] sm:$0xff] }
 0x182   : > { %13225 = vmatpush3.bf16.msra.mxu1 %v14636_v32  ;;  %13164 = vmatprep.mubr.bf16.mxu1 %v4767_v28  ;;  %v14082_v32 = vld [vmem:[%s14221_s18 + $0x190] sm:$0xff]   ;;  %v3106_v28 = vrot.slane %v14465_v50, 1  ;;  %v4768_v21 = vpack.c.bf16 %v4708_v62, %v4707_v18  ;;  %19284 = vst [vmem:[#allocation115_spill] sm:$0xff] %v15351_v58  ;;  %v11934_v0 = vld [vmem:[%s18827_s0 + $0xa60] sm:$0xff]  ;;  %v15372_v18 = vsel %vm3157_vm3, %v3103_v15, %v3104_v8  ;;  %v3109_v8 = vrot.slane %v14515_v41, 1 }
 0x183   : > { %13226 = vmatprep.subr.bf16.mxu1 %v14080_v24  ;;  %12845 = vmatmul.mubr.bf16.gmra.mrb[68].mxu0 %v19283_v37  ;;  %v1757_v37 = vmul.f32 %v1693_v12, %v14450_v49  ;;  %19287 = vst [vmem:[#allocation118_spill] sm:$0xff] %v15372_v18 }
 0x184   : > { %12848 = vmatprep.mubr.bf16.mxu0 %v1813_v13  ;;  %12909 = vmatpush3.bf16.msra.mxu0 %v14081_v59  ;;  %v1758_v13 = vmul.f32 %v1694_v6, %v14440_v25  ;;  %v1755_v59 = vmul.f32 %v1691_v35, %v14427_v16  ;;  %v15358_v62 = vsel %vm3157_vm3, %v3106_v28, %v3107_v51  ;;  %v14087_v35 = vld [vmem:[%s14221_s18 + $0x68] sm:$0xff]  }
 0x185   : > { %12910 = vmatprep.subr.bf16.mxu0 %v14083_v4  ;;  %19285 = vst [vmem:[#allocation116_spill] sm:$0xff] %v15358_v62  ;;  %v15362_v12 = vsel %vm3157_vm3, %v3105_v23, %v3106_v28  ;;  %v11932_v23 = vld [vmem:[%s18827_s0 + $0xa50] sm:$0xff] }
 0x186   : > { %13227 = vmatpush3.bf16.msra.mxu1 %v14080_v24  ;;  %v11933_v24 = vld [vmem:[%s18827_s0 + $0xa58] sm:$0xff]  ;;  %19286 = vst [vmem:[#allocation117_spill] sm:$0xff] %v15362_v12  ;;  %v1814_v6 = vpack.c.bf16 %v1756_v47, %v1755_v59  ;;  %v1815_v28 = vpack.c.bf16 %v1758_v13, %v1757_v37  ;;  %v4713_v15 = vmul.f32 %v11934_v0, %v15362_v12  ;;  %v1698_v47 = vld [vmem:[%s18827_s0 + $0x88] sm:$0xff]  ;;  %v1695_v13 = vld [vmem:[%s18827_s0 + $0x70] sm:$0xff]  ;;  %v3110_v59 = vrot.slane %v14529_v5, 1 }
 0x187   : > { %13228 = vmatprep.subr.bf16.mxu1 %v14082_v32  ;;  %v4711_v37 = vmul.f32 %v11932_v23, %v15372_v18  ;;  %v3108_v0 = vrot.slane %v14462_v42, 1  ;;  %v3111_v23 = vrot.slane %v14510_v34, 1  ;;  %v1759_v18 = vmul.f32 %v1695_v13, %v14484_v9 }
 0x188   : > { %12911 = vmatpush3.bf16.msra.mxu0 %v14083_v4  ;;  %v4714_v4 = vmul.f32 %v11935_v7, %v15358_v62  ;;  %v14088_v62 = vld [vmem:[%s14221_s18 + $0x1a8] sm:$0xff]  }
 0x189   : > { %13165 = vmatmul.mubr.bf16.gmra.mrb[0].mxu1 %v4768_v21  ;;  %v4712_v21 = vmul.f32 %v11933_v24, %v15351_v58  ;;  %12912 = vmatprep.subr.bf16.mxu0 %v14085_v20  ;;  %v1760_v24 = vmul.f32 %v1696_v61, %v14502_v27  ;;  %v15406_v61 = vsel %vm3157_vm3, %v3108_v0, %v3109_v8  ;;  %v19294_v58 = vld [vmem:[#allocation14_spill] sm:$0xff] }
 0x18a   : > { %13168 = vmatprep.mubr.bf16.mxu1 %v4769_v53  ;;  %13229 = vmatpush3.bf16.msra.mxu1 %v14082_v32  ;;  %v14086_v53 = vld [vmem:[%s14221_s18 + $0x1a0] sm:$0xff]   ;;  %v4771_v12 = vpack.c.bf16 %v4714_v4, %v4713_v15  ;;  %19288 = vst [vmem:[#allocation119_spill] sm:$0xff] %v15406_v61  ;;  %v11939_v4 = vld [vmem:[%s18827_s0 + $0xa88] sm:$0xff] }
 0x18b   : > { %13230 = vmatprep.subr.bf16.mxu1 %v14084_v36  ;;  %12849 = vmatmul.mubr.bf16.gmra.mrb[72].mxu0 %v1814_v6  ;;  %v1697_v32 = vld [vmem:[%s18827_s0 + $0x80] sm:$0xff]  ;;  %v4770_v7 = vpack.c.bf16 %v4712_v21, %v4711_v37  ;;  %v15417_v21 = vsel %vm3157_vm3, %v3109_v8, %v3110_v59  ;;  %v11936_v8 = vld [vmem:[%s18827_s0 + $0xa70] sm:$0xff] }
 0x18c   : > { %12852 = vmatprep.mubr.bf16.mxu0 %v1815_v28  ;;  %12913 = vmatpush3.bf16.msra.mxu0 %v14085_v20  ;;  %v1761_v6 = vmul.f32 %v1697_v32, %v14506_v26  ;;  %v1762_v28 = vmul.f32 %v1698_v47, %v14496_v22  ;;  %v15413_v20 = vsel %vm3157_vm3, %v3110_v59, %v3111_v23  ;;  %v11938_v15 = vld [vmem:[%s18827_s0 + $0xa80] sm:$0xff]  ;;  %v14089_v37 = vld [vmem:[%s14221_s18 + $0x70] sm:$0xff]  }
 0x18d   : > { %12914 = vmatprep.subr.bf16.mxu0 %v14087_v35  ;;  %19289 = vst [vmem:[#allocation120_spill] sm:$0xff] %v15413_v20  ;;  %19290 = vst [vmem:[#allocation121_spill] sm:$0xff] %v15417_v21  ;;  %v1816_v32 = vpack.c.bf16 %v1760_v24, %v1759_v18  ;;  %v15427_v47 = vsel %vm3157_vm3, %v3107_v51, %v3108_v0  ;;  %v4717_v18 = vmul.f32 %v11938_v15, %v15417_v21  ;;  %v1701_v24 = vld [vmem:[%s18827_s0 + $0xa0] sm:$0xff] }
 0x18e   : > { %13231 = vmatpush3.bf16.msra.mxu1 %v14084_v36  ;;  %v11937_v36 = vld [vmem:[%s18827_s0 + $0xa78] sm:$0xff]  ;;  %19291 = vst [vmem:[#allocation122_spill] sm:$0xff] %v15427_v47  ;;  %v1817_v13 = vpack.c.bf16 %v1762_v28, %v1761_v6  ;;  %v4718_v51 = vmul.f32 %v11939_v4, %v15413_v20  ;;  %v3113_v0 = vrot.slane %v14585_v48, 1  ;;  %v4715_v6 = vmul.f32 %v11936_v8, %v15427_v47  ;;  %v1699_v28 = vld [vmem:[%s18827_s0 + $0x90] sm:$0xff] }
 0x18f   : > { %13232 = vmatprep.subr.bf16.mxu1 %v14086_v53  ;;  %v4716_v59 = vmul.f32 %v11937_v36, %v15406_v61  ;;  %v3114_v36 = vrot.slane %v14592_v55, 1  ;;  %v3112_v4 = vrot.slane %v14521_v54, 1  ;;  %v19292_v20 = vld [vmem:[#allocation13_spill] sm:$0xff]  ;;  %v19293_v61 = vld [vmem:[#allocation12_spill] sm:$0xff]  ;;  %v3115_v8 = vrot.slane %v19294_v58, 1  ;;  %v14092_v47 = vld [vmem:[%s14221_s18 + $0x1b8] sm:$0xff]  }
 0x190   : > { %12915 = vmatpush3.bf16.msra.mxu0 %v14087_v35  ;;  %v1700_v35 = vld [vmem:[%s18827_s0 + $0x98] sm:$0xff]  ;;  %v1765_v21 = vmul.f32 %v1701_v24, %v19292_v20  ;;  %v4773_v39 = vpack.c.bf16 %v4718_v51, %v4717_v18  ;;  %v1763_v31 = vmul.f32 %v1699_v28, %v19295_v45  ;;  %v11942_v51 = vld [vmem:[%s18827_s0 + $0xaa0] sm:$0xff]  ;;  %v11943_v24 = vld [vmem:[%s18827_s0 + $0xaa8] sm:$0xff] }
 0x191   : > { %13169 = vmatmul.mubr.bf16.gmra.mrb[4].mxu1 %v4770_v7  ;;  %v14091_v7 = vld [vmem:[%s14221_s18 + $0x78] sm:$0xff]   ;;  %v1764_v15 = vmul.f32 %v1700_v35, %v14572_v43  ;;  %12916 = vmatprep.subr.bf16.mxu0 %v14089_v37  ;;  %v15462_v35 = vsel %vm3157_vm3, %v3112_v4, %v3113_v0  ;;  %v15476_v18 = vsel %vm3157_vm3, %v3113_v0, %v3114_v36  ;;  %v11940_v28 = vld [vmem:[%s18827_s0 + $0xa90] sm:$0xff]  ;;  %v19317_v55 = vld [vmem:[#allocation27_spill] sm:$0xff] }
 0x192   : > { %13172 = vmatprep.mubr.bf16.mxu1 %v4771_v12  ;;  %13233 = vmatpush3.bf16.msra.mxu1 %v14086_v53  ;;  %v14090_v12 = vld [vmem:[%s14221_s18 + $0x1b0] sm:$0xff]   ;;  %v1702_v53 = vld [vmem:[%s18827_s0 + $0xa8] sm:$0xff]  ;;  %19296 = vst [vmem:[#allocation13_spill] sm:$0xff] %v15462_v35  ;;  %19298 = vst [vmem:[#allocation11_spill] sm:$0xff] %v15476_v18 }
 0x193   : > { %13234 = vmatprep.subr.bf16.mxu1 %v14088_v62  ;;  %12853 = vmatmul.mubr.bf16.gmra.mrb[76].mxu0 %v1816_v32  ;;  %v4772_v32 = vpack.c.bf16 %v4716_v59, %v4715_v6  ;;  %v15468_v59 = vld [vmem:[%s14221_s18 + $0x80] sm:$0xff]   ;;  %v15486_v6 = vsel %vm3157_vm3, %v3111_v23, %v3112_v4  ;;  %v19306_v58 = vld [vmem:[#allocation22_spill] sm:$0xff] }
 0x194   : > { %12856 = vmatprep.mubr.bf16.mxu0 %v1817_v13  ;;  %v1766_v13 = vmul.f32 %v1702_v53, %v19293_v61  ;;  %12917 = vmatpush3.bf16.msra.mxu0 %v14089_v37  ;;  %v15472_v37 = vsel %vm3157_vm3, %v3114_v36, %v3115_v8  ;;  %v1818_v53 = vpack.c.bf16 %v1764_v15, %v1763_v31  ;;  %v19300_v15 = vld [vmem:[#allocation23_spill] sm:$0xff] }
 0x195   : > { %12918 = vmatprep.subr.bf16.mxu0 %v14091_v7  ;;  %19297 = vst [vmem:[#allocation12_spill] sm:$0xff] %v15472_v37  ;;  %19299 = vst [vmem:[#allocation123_spill] sm:$0xff] %v15486_v6  ;;  %v4721_v31 = vmul.f32 %v11942_v51, %v15476_v18  ;;  %v4722_v23 = vmul.f32 %v11943_v24, %v15472_v37  ;;  %v3117_v4 = vrot.slane %v19300_v15, 1  ;;  %v19302_v24 = vld [vmem:[#allocation20_spill] sm:$0xff] }
 0x196   : > { %13235 = vmatpush3.bf16.msra.mxu1 %v14088_v62  ;;  %v11941_v62 = vld [vmem:[%s18827_s0 + $0xa98] sm:$0xff]  ;;  %v1819_v0 = vpack.c.bf16 %v1766_v13, %v1765_v21  ;;  %v1706_v21 = vld [vmem:[%s18827_s0 + $0xc8] sm:$0xff]  ;;  %v1703_v13 = vld [vmem:[%s18827_s0 + $0xb0] sm:$0xff] }
 0x197   : > { %13236 = vmatprep.subr.bf16.mxu1 %v14090_v12  ;;  %v4720_v36 = vmul.f32 %v11941_v62, %v15462_v35  ;;  %v19301_v62 = vld [vmem:[#allocation25_spill] sm:$0xff]  ;;  %v19303_v37 = vld [vmem:[#allocation16_spill] sm:$0xff]  ;;  %v1770_v15 = vmul.f32 %v1706_v21, %v19305_v3  ;;  %v19318_v3 = vld [vmem:[#allocation30_spill] sm:$0xff] }
 0x198   : > { %12919 = vmatpush3.bf16.msra.mxu0 %v14091_v7  ;;  %v4719_v7 = vmul.f32 %v11940_v28, %v15486_v6  ;;  %v3118_v51 = vrot.slane %v19301_v62, 1  ;;  %v3116_v18 = vrot.slane %v19303_v37, 1  ;;  %v4775_v28 = vpack.c.bf16 %v4722_v23, %v4721_v31  ;;  %v19307_v6 = vld [vmem:[#allocation18_spill] sm:$0xff]  ;;  %v11946_v31 = vld [vmem:[%s18827_s0 + $0xac0] sm:$0xff]  ;;  %v11947_v23 = vld [vmem:[%s18827_s0 + $0xac8] sm:$0xff] }
 0x199   : > { %13173 = vmatmul.mubr.bf16.gmra.mrb[8].mxu1 %v4772_v32  ;;  %v1704_v32 = vld [vmem:[%s18827_s0 + $0xb8] sm:$0xff]  ;;  %12984 = vmatprep.subr.bf16.mxu0 %v15468_v59  ;;  %v1767_v48 = vmul.f32 %v1703_v13, %v19307_v6  ;;  %v11944_v21 = vld [vmem:[%s18827_s0 + $0xab0] sm:$0xff] }
 0x19a   : > { %13176 = vmatprep.mubr.bf16.mxu1 %v4773_v39  ;;  %13237 = vmatpush3.bf16.msra.mxu1 %v14090_v12  ;;  %v15496_v39 = vld [vmem:[%s14221_s18 + $0x1c0] sm:$0xff]   ;;  %v4774_v35 = vpack.c.bf16 %v4720_v36, %v4719_v7  ;;  %v15522_v62 = vsel %vm3157_vm3, %v3116_v18, %v3117_v4  ;;  %v1708_v13 = vld [vmem:[%s18827_s0 + $0xd8] sm:$0xff] }
 0x19b   : > { %13238 = vmatprep.subr.bf16.mxu1 %v14092_v47  ;;  %12857 = vmatmul.mubr.bf16.gmra.mrb[80].mxu0 %v1818_v53  ;;  %v1705_v12 = vld [vmem:[%s18827_s0 + $0xc0] sm:$0xff]  ;;  %v1768_v53 = vmul.f32 %v1704_v32, %v19302_v24  ;;  %19308 = vst [vmem:[#allocation20_spill] sm:$0xff] %v15522_v62  ;;  %v15533_v32 = vsel %vm3157_vm3, %v3117_v4, %v3118_v51 }
 0x19c   : > { %12860 = vmatprep.mubr.bf16.mxu0 %v1819_v0  ;;  %v1769_v63 = vmul.f32 %v1705_v12, %v19304_v19  ;;  %v3119_v0 = vrot.slane %v19306_v58, 1  ;;  %19310 = vst [vmem:[#allocation125_spill] sm:$0xff] %v15533_v32  ;;  %v19316_v58 = vld [vmem:[#allocation29_spill] sm:$0xff]  ;;  %v19319_v19 = vld [vmem:[#allocation26_spill] sm:$0xff] }
 0x19d   : > { %v1820_v12 = vpack.c.bf16 %v1768_v53, %v1767_v48 }
 0x19e   : > { %13239 = vmatpush3.bf16.msra.mxu1 %v14092_v47  ;;  %v11945_v47 = vld [vmem:[%s18827_s0 + $0xab8] sm:$0xff]  ;;  %v15529_v36 = vsel %vm3157_vm3, %v3118_v51, %v3119_v0  ;;  %v1821_v4 = vpack.c.bf16 %v1770_v15, %v1769_v63  ;;  %v4725_v51 = vmul.f32 %v11946_v31, %v15533_v32  ;;  %v19312_v63 = vld [vmem:[#allocation31_spill] sm:$0xff] }
 0x19f   : > { %13304 = vmatprep.subr.bf16.mxu1 %v15496_v39  ;;  %19309 = vst [vmem:[#allocation124_spill] sm:$0xff] %v15529_v36  ;;  %v4724_v7 = vmul.f32 %v11945_v47, %v15522_v62  ;;  %v4726_v48 = vmul.f32 %v11947_v23, %v15529_v36  ;;  %v3121_v15 = vrot.slane %v19312_v63, 1  ;;  %v19313_v47 = vld [vmem:[#allocation33_spill] sm:$0xff]  ;;  %v19314_v23 = vld [vmem:[#allocation28_spill] sm:$0xff]  ;;  %v3123_v63 = vrot.slane %v19318_v3, 1 }
 0x1a0   : > { %v3122_v31 = vrot.slane %v19313_v47, 1  ;;  %v19315_v36 = vld [vmem:[#allocation24_spill] sm:$0xff]  ;;  %v19328_v47 = vld [vmem:[#allocation37_spill] sm:$0xff] }
 0x1a1   : > { %13177 = vmatmul.mubr.bf16.gmra.mrb[12].mxu1 %v4774_v35  ;;  %v15543_v35 = vsel %vm3157_vm3, %v3115_v8, %v3116_v18  ;;  %v1709_v8 = vld [vmem:[%s18827_s0 + $0xe0] sm:$0xff]  ;;  %v1710_v18 = vld [vmem:[%s18827_s0 + $0xe8] sm:$0xff]  ;;  %v3120_v32 = vrot.slane %v19315_v36, 1 }
 0x1a2   : > { %13180 = vmatprep.mubr.bf16.mxu1 %v4775_v28  ;;  %19311 = vst [vmem:[#allocation126_spill] sm:$0xff] %v15543_v35  ;;  %v4723_v53 = vmul.f32 %v11944_v21, %v15543_v35  ;;  %v1707_v28 = vld [vmem:[%s18827_s0 + $0xd0] sm:$0xff]  ;;  %v1773_v37 = vmul.f32 %v1709_v8, %v19316_v58  ;;  %v1774_v6 = vmul.f32 %v1710_v18, %v19317_v55  ;;  %v19330_v58 = vld [vmem:[#allocation38_spill] sm:$0xff] }
 0x1a3   : > { %12861 = vmatmul.mubr.bf16.gmra.mrb[84].mxu0 %v1820_v12  ;;  %v1772_v12 = vmul.f32 %v1708_v13, %v19314_v23  ;;  %v1771_v21 = vmul.f32 %v1707_v28, %v19319_v19  ;;  %v15574_v35 = vsel %vm3157_vm3, %v3120_v32, %v3121_v15  ;;  %v11949_v13 = vld [vmem:[%s18827_s0 + $0xad8] sm:$0xff]  ;;  %v15585_v8 = vsel %vm3157_vm3, %v3121_v15, %v3122_v31  ;;  %v19329_v19 = vld [vmem:[#allocation35_spill] sm:$0xff] }
 0x1a4   : > { %12864 = vmatprep.mubr.bf16.mxu0 %v1821_v4  ;;  %v4776_v62 = vpack.c.bf16 %v4724_v7, %v4723_v53  ;;  %v4777_v4 = vpack.c.bf16 %v4726_v48, %v4725_v51  ;;  %19320 = vst [vmem:[#allocation127_spill] sm:$0xff] %v15574_v35  ;;  %v15581_v7 = vsel %vm3157_vm3, %v3122_v31, %v3123_v63  ;;  %19322 = vst [vmem:[#allocation129_spill] sm:$0xff] %v15585_v8  ;;  %v11950_v51 = vld [vmem:[%s18827_s0 + $0xae0] sm:$0xff]  ;;  %v11951_v48 = vld [vmem:[%s18827_s0 + $0xae8] sm:$0xff] }
 0x1a5   : > { %19321 = vst [vmem:[#allocation128_spill] sm:$0xff] %v15581_v7  ;;  %v1822_v18 = vpack.c.bf16 %v1772_v12, %v1771_v21  ;;  %v11948_v53 = vld [vmem:[%s18827_s0 + $0xad0] sm:$0xff]  ;;  %v1823_v15 = vpack.c.bf16 %v1774_v6, %v1773_v37  ;;  %v4728_v28 = vmul.f32 %v11949_v13, %v15574_v35  ;;  %v1712_v31 = vld [vmem:[%s18827_s0 + $0xf8] sm:$0xff]  ;;  %v4729_v3 = vmul.f32 %v11950_v51, %v15585_v8  ;;  %v19324_v37 = vld [vmem:[#allocation39_spill] sm:$0xff] }
 0x1a6   : > { %v4730_v12 = vmul.f32 %v11951_v48, %v15581_v7  ;;  %v3125_v6 = vrot.slane %v19324_v37, 1  ;;  %v1711_v21 = vld [vmem:[%s18827_s0 + $0xf0] sm:$0xff]  ;;  %v19326_v48 = vld [vmem:[#allocation36_spill] sm:$0xff]  ;;  %v3127_v37 = vrot.slane %v19330_v58, 1  ;;  %v19331_v23 = vld [vmem:[#allocation34_spill] sm:$0xff] }
 0x1a7   : > { %v19325_v13 = vld [vmem:[#allocation41_spill] sm:$0xff]  ;;  %v19327_v7 = vld [vmem:[#allocation32_spill] sm:$0xff] }
 0x1a8   : > { %v3126_v51 = vrot.slane %v19325_v13, 1  ;;  %v3124_v8 = vrot.slane %v19327_v7, 1  ;;  %v19340_v13 = vld [vmem:[#allocation45_spill] sm:$0xff] }
 0x1a9   : > { %13181 = vmatmul.mubr.bf16.gmra.mrb[16].mxu1 %v4776_v62  ;;  %v15595_v62 = vsel %vm3157_vm3, %v3119_v0, %v3120_v32  ;;  %v1713_v0 = vld [vmem:[%s18827_s0 + $0x100] sm:$0xff]  ;;  %v1714_v32 = vld [vmem:[%s18827_s0 + $0x108] sm:$0xff] }
 0x1aa   : > { %13184 = vmatprep.mubr.bf16.mxu1 %v4777_v4  ;;  %19323 = vst [vmem:[#allocation130_spill] sm:$0xff] %v15595_v62  ;;  %v4727_v4 = vmul.f32 %v11948_v53, %v15595_v62  ;;  %v1777_v36 = vmul.f32 %v1713_v0, %v19328_v47  ;;  %v1778_v55 = vmul.f32 %v1714_v32, %v19329_v19  ;;  %v19342_v47 = vld [vmem:[#allocation46_spill] sm:$0xff] }
 0x1ab   : > { %12865 = vmatmul.mubr.bf16.gmra.mrb[88].mxu0 %v1822_v18  ;;  %v1776_v18 = vmul.f32 %v1712_v31, %v19326_v48  ;;  %v1775_v53 = vmul.f32 %v1711_v21, %v19331_v23  ;;  %v15626_v62 = vsel %vm3157_vm3, %v3124_v8, %v3125_v6  ;;  %v11953_v31 = vld [vmem:[%s18827_s0 + $0xaf8] sm:$0xff]  ;;  %v15637_v0 = vsel %vm3157_vm3, %v3125_v6, %v3126_v51  ;;  %v19341_v23 = vld [vmem:[#allocation43_spill] sm:$0xff] }
 0x1ac   : > { %12868 = vmatprep.mubr.bf16.mxu0 %v1823_v15  ;;  %v4778_v35 = vpack.c.bf16 %v4728_v28, %v4727_v4  ;;  %v4779_v15 = vpack.c.bf16 %v4730_v12, %v4729_v3  ;;  %19332 = vst [vmem:[#allocation131_spill] sm:$0xff] %v15626_v62  ;;  %v15633_v28 = vsel %vm3157_vm3, %v3126_v51, %v3127_v37  ;;  %19334 = vst [vmem:[#allocation133_spill] sm:$0xff] %v15637_v0  ;;  %v11954_v3 = vld [vmem:[%s18827_s0 + $0xb00] sm:$0xff]  ;;  %v11955_v12 = vld [vmem:[%s18827_s0 + $0xb08] sm:$0xff] }
 0x1ad   : > { %19333 = vst [vmem:[#allocation132_spill] sm:$0xff] %v15633_v28  ;;  %v1824_v32 = vpack.c.bf16 %v1776_v18, %v1775_v53  ;;  %v11952_v4 = vld [vmem:[%s18827_s0 + $0xaf0] sm:$0xff]  ;;  %v1825_v6 = vpack.c.bf16 %v1778_v55, %v1777_v36  ;;  %v4732_v21 = vmul.f32 %v11953_v31, %v15626_v62  ;;  %v1716_v51 = vld [vmem:[%s18827_s0 + $0x118] sm:$0xff]  ;;  %v4733_v58 = vmul.f32 %v11954_v3, %v15637_v0  ;;  %v19336_v55 = vld [vmem:[#allocation47_spill] sm:$0xff] }
 0x1ae   : > { %v4734_v18 = vmul.f32 %v11955_v12, %v15633_v28  ;;  %v3129_v36 = vrot.slane %v19336_v55, 1  ;;  %v1715_v53 = vld [vmem:[%s18827_s0 + $0x110] sm:$0xff]  ;;  %v19338_v12 = vld [vmem:[#allocation44_spill] sm:$0xff]  ;;  %v3131_v55 = vrot.slane %v19342_v47, 1  ;;  %v19343_v48 = vld [vmem:[#allocation42_spill] sm:$0xff] }
 0x1af   : > { %v19337_v31 = vld [vmem:[#allocation49_spill] sm:$0xff]  ;;  %v19339_v28 = vld [vmem:[#allocation40_spill] sm:$0xff] }
 0x1b0   : > { %v3130_v3 = vrot.slane %v19337_v31, 1  ;;  %v3128_v0 = vrot.slane %v19339_v28, 1  ;;  %v19352_v31 = vld [vmem:[#allocation53_spill] sm:$0xff] }
 0x1b1   : > { %13185 = vmatmul.mubr.bf16.gmra.mrb[20].mxu1 %v4778_v35  ;;  %v15647_v35 = vsel %vm3157_vm3, %v3123_v63, %v3124_v8  ;;  %v1717_v63 = vld [vmem:[%s18827_s0 + $0x120] sm:$0xff]  ;;  %v1718_v8 = vld [vmem:[%s18827_s0 + $0x128] sm:$0xff] }
 0x1b2   : > { %13188 = vmatprep.mubr.bf16.mxu1 %v4779_v15  ;;  %19335 = vst [vmem:[#allocation134_spill] sm:$0xff] %v15647_v35  ;;  %v4731_v15 = vmul.f32 %v11952_v4, %v15647_v35  ;;  %v1781_v7 = vmul.f32 %v1717_v63, %v19340_v13  ;;  %v1782_v19 = vmul.f32 %v1718_v8, %v19341_v23  ;;  %v19354_v13 = vld [vmem:[#allocation54_spill] sm:$0xff] }
 0x1b3   : > { %12869 = vmatmul.mubr.bf16.gmra.mrb[92].mxu0 %v1824_v32  ;;  %v1780_v32 = vmul.f32 %v1716_v51, %v19338_v12  ;;  %v1779_v4 = vmul.f32 %v1715_v53, %v19343_v48  ;;  %v15678_v35 = vsel %vm3157_vm3, %v3128_v0, %v3129_v36  ;;  %v11957_v51 = vld [vmem:[%s18827_s0 + $0xb18] sm:$0xff]  ;;  %v15689_v63 = vsel %vm3157_vm3, %v3129_v36, %v3130_v3  ;;  %v19353_v48 = vld [vmem:[#allocation51_spill] sm:$0xff] }
 0x1b4   : > { %12872 = vmatprep.mubr.bf16.mxu0 %v1825_v6  ;;  %v4780_v62 = vpack.c.bf16 %v4732_v21, %v4731_v15  ;;  %v4781_v6 = vpack.c.bf16 %v4734_v18, %v4733_v58  ;;  %19344 = vst [vmem:[#allocation135_spill] sm:$0xff] %v15678_v35  ;;  %v15685_v21 = vsel %vm3157_vm3, %v3130_v3, %v3131_v55  ;;  %19346 = vst [vmem:[#allocation137_spill] sm:$0xff] %v15689_v63  ;;  %v11958_v58 = vld [vmem:[%s18827_s0 + $0xb20] sm:$0xff]  ;;  %v11959_v18 = vld [vmem:[%s18827_s0 + $0xb28] sm:$0xff] }
 0x1b5   : > { %19345 = vst [vmem:[#allocation136_spill] sm:$0xff] %v15685_v21  ;;  %v1826_v8 = vpack.c.bf16 %v1780_v32, %v1779_v4  ;;  %v11956_v15 = vld [vmem:[%s18827_s0 + $0xb10] sm:$0xff]  ;;  %v1827_v36 = vpack.c.bf16 %v1782_v19, %v1781_v7  ;;  %v4736_v53 = vmul.f32 %v11957_v51, %v15678_v35  ;;  %v1720_v3 = vld [vmem:[%s18827_s0 + $0x138] sm:$0xff]  ;;  %v4737_v47 = vmul.f32 %v11958_v58, %v15689_v63  ;;  %v19348_v19 = vld [vmem:[#allocation55_spill] sm:$0xff] }
 0x1b6   : > { %v4738_v32 = vmul.f32 %v11959_v18, %v15685_v21  ;;  %v3133_v7 = vrot.slane %v19348_v19, 1  ;;  %v1719_v4 = vld [vmem:[%s18827_s0 + $0x130] sm:$0xff]  ;;  %v19350_v18 = vld [vmem:[#allocation52_spill] sm:$0xff]  ;;  %v3135_v19 = vrot.slane %v19354_v13, 1  ;;  %v19355_v12 = vld [vmem:[#allocation50_spill] sm:$0xff] }
 0x1b7   : > { %v19349_v51 = vld [vmem:[#allocation57_spill] sm:$0xff]  ;;  %v19351_v21 = vld [vmem:[#allocation48_spill] sm:$0xff] }
 0x1b8   : > { %v3134_v58 = vrot.slane %v19349_v51, 1  ;;  %v3132_v63 = vrot.slane %v19351_v21, 1  ;;  %v19364_v51 = vld [vmem:[#allocation61_spill] sm:$0xff] }
 0x1b9   : > { %13189 = vmatmul.mubr.bf16.gmra.mrb[24].mxu1 %v4780_v62  ;;  %v15699_v62 = vsel %vm3157_vm3, %v3127_v37, %v3128_v0  ;;  %v1721_v37 = vld [vmem:[%s18827_s0 + $0x140] sm:$0xff]  ;;  %v1722_v0 = vld [vmem:[%s18827_s0 + $0x148] sm:$0xff] }
 0x1ba   : > { %13192 = vmatprep.mubr.bf16.mxu1 %v4781_v6  ;;  %19347 = vst [vmem:[#allocation138_spill] sm:$0xff] %v15699_v62  ;;  %v4735_v6 = vmul.f32 %v11956_v15, %v15699_v62  ;;  %v1785_v28 = vmul.f32 %v1721_v37, %v19352_v31  ;;  %v1786_v23 = vmul.f32 %v1722_v0, %v19353_v48  ;;  %v19366_v31 = vld [vmem:[#allocation62_spill] sm:$0xff] }
 0x1bb   : > { %12873 = vmatmul.mubr.bf16.gmra.mrb[96].mxu0 %v1826_v8  ;;  %v1784_v8 = vmul.f32 %v1720_v3, %v19350_v18  ;;  %v1783_v15 = vmul.f32 %v1719_v4, %v19355_v12  ;;  %v15730_v62 = vsel %vm3157_vm3, %v3132_v63, %v3133_v7  ;;  %v11961_v3 = vld [vmem:[%s18827_s0 + $0xb38] sm:$0xff]  ;;  %v15741_v37 = vsel %vm3157_vm3, %v3133_v7, %v3134_v58  ;;  %v19365_v12 = vld [vmem:[#allocation59_spill] sm:$0xff] }
 0x1bc   : > { %12876 = vmatprep.mubr.bf16.mxu0 %v1827_v36  ;;  %v4782_v35 = vpack.c.bf16 %v4736_v53, %v4735_v6  ;;  %v4783_v36 = vpack.c.bf16 %v4738_v32, %v4737_v47  ;;  %19356 = vst [vmem:[#allocation139_spill] sm:$0xff] %v15730_v62  ;;  %v15737_v53 = vsel %vm3157_vm3, %v3134_v58, %v3135_v19  ;;  %19358 = vst [vmem:[#allocation141_spill] sm:$0xff] %v15741_v37  ;;  %v11962_v47 = vld [vmem:[%s18827_s0 + $0xb40] sm:$0xff]  ;;  %v11963_v32 = vld [vmem:[%s18827_s0 + $0xb48] sm:$0xff] }
 0x1bd   : > { %19357 = vst [vmem:[#allocation140_spill] sm:$0xff] %v15737_v53  ;;  %v1828_v0 = vpack.c.bf16 %v1784_v8, %v1783_v15  ;;  %v11960_v6 = vld [vmem:[%s18827_s0 + $0xb30] sm:$0xff]  ;;  %v1829_v7 = vpack.c.bf16 %v1786_v23, %v1785_v28  ;;  %v4740_v4 = vmul.f32 %v11961_v3, %v15730_v62  ;;  %v1724_v58 = vld [vmem:[%s18827_s0 + $0x158] sm:$0xff]  ;;  %v4741_v13 = vmul.f32 %v11962_v47, %v15741_v37  ;;  %v19360_v23 = vld [vmem:[#allocation63_spill] sm:$0xff] }
 0x1be   : > { %v4742_v8 = vmul.f32 %v11963_v32, %v15737_v53  ;;  %v3137_v28 = vrot.slane %v19360_v23, 1  ;;  %v1723_v15 = vld [vmem:[%s18827_s0 + $0x150] sm:$0xff]  ;;  %v19362_v32 = vld [vmem:[#allocation60_spill] sm:$0xff]  ;;  %v3139_v23 = vrot.slane %v19366_v31, 1  ;;  %v19367_v18 = vld [vmem:[#allocation58_spill] sm:$0xff] }
 0x1bf   : > { %v19361_v3 = vld [vmem:[#allocation65_spill] sm:$0xff]  ;;  %v19363_v53 = vld [vmem:[#allocation56_spill] sm:$0xff] }
 0x1c0   : > { %v3138_v47 = vrot.slane %v19361_v3, 1  ;;  %v3136_v37 = vrot.slane %v19363_v53, 1  ;;  %v19376_v3 = vld [vmem:[#allocation69_spill] sm:$0xff] }
 0x1c1   : > { %13193 = vmatmul.mubr.bf16.gmra.mrb[28].mxu1 %v4782_v35  ;;  %v15751_v35 = vsel %vm3157_vm3, %v3131_v55, %v3132_v63  ;;  %v1725_v55 = vld [vmem:[%s18827_s0 + $0x160] sm:$0xff]  ;;  %v1726_v63 = vld [vmem:[%s18827_s0 + $0x168] sm:$0xff] }
 0x1c2   : > { %13196 = vmatprep.mubr.bf16.mxu1 %v4783_v36  ;;  %19359 = vst [vmem:[#allocation142_spill] sm:$0xff] %v15751_v35  ;;  %v4739_v36 = vmul.f32 %v11960_v6, %v15751_v35  ;;  %v1789_v21 = vmul.f32 %v1725_v55, %v19364_v51  ;;  %v1790_v48 = vmul.f32 %v1726_v63, %v19365_v12  ;;  %v19378_v51 = vld [vmem:[#allocation70_spill] sm:$0xff] }
 0x1c3   : > { %12877 = vmatmul.mubr.bf16.gmra.mrb[100].mxu0 %v1828_v0  ;;  %v1788_v0 = vmul.f32 %v1724_v58, %v19362_v32  ;;  %v1787_v6 = vmul.f32 %v1723_v15, %v19367_v18  ;;  %v15782_v35 = vsel %vm3157_vm3, %v3136_v37, %v3137_v28  ;;  %v11965_v58 = vld [vmem:[%s18827_s0 + $0xb58] sm:$0xff]  ;;  %v15793_v55 = vsel %vm3157_vm3, %v3137_v28, %v3138_v47  ;;  %v19377_v18 = vld [vmem:[#allocation67_spill] sm:$0xff] }
 0x1c4   : > { %12880 = vmatprep.mubr.bf16.mxu0 %v1829_v7  ;;  %v4784_v62 = vpack.c.bf16 %v4740_v4, %v4739_v36  ;;  %v4785_v7 = vpack.c.bf16 %v4742_v8, %v4741_v13  ;;  %19368 = vst [vmem:[#allocation143_spill] sm:$0xff] %v15782_v35  ;;  %v15789_v4 = vsel %vm3157_vm3, %v3138_v47, %v3139_v23  ;;  %19370 = vst [vmem:[#allocation145_spill] sm:$0xff] %v15793_v55  ;;  %v11966_v13 = vld [vmem:[%s18827_s0 + $0xb60] sm:$0xff]  ;;  %v11967_v8 = vld [vmem:[%s18827_s0 + $0xb68] sm:$0xff] }
 0x1c5   : > { %19369 = vst [vmem:[#allocation144_spill] sm:$0xff] %v15789_v4  ;;  %v1830_v63 = vpack.c.bf16 %v1788_v0, %v1787_v6  ;;  %v11964_v36 = vld [vmem:[%s18827_s0 + $0xb50] sm:$0xff]  ;;  %v1831_v28 = vpack.c.bf16 %v1790_v48, %v1789_v21  ;;  %v4744_v15 = vmul.f32 %v11965_v58, %v15782_v35  ;;  %v1728_v47 = vld [vmem:[%s18827_s0 + $0x178] sm:$0xff]  ;;  %v4745_v31 = vmul.f32 %v11966_v13, %v15793_v55  ;;  %v19372_v48 = vld [vmem:[#allocation71_spill] sm:$0xff] }
 0x1c6   : > { %v4746_v0 = vmul.f32 %v11967_v8, %v15789_v4  ;;  %v3141_v21 = vrot.slane %v19372_v48, 1  ;;  %v1727_v6 = vld [vmem:[%s18827_s0 + $0x170] sm:$0xff]  ;;  %v19374_v8 = vld [vmem:[#allocation68_spill] sm:$0xff]  ;;  %v3143_v48 = vrot.slane %v19378_v51, 1  ;;  %v19379_v32 = vld [vmem:[#allocation66_spill] sm:$0xff] }
 0x1c7   : > { %v19373_v58 = vld [vmem:[#allocation73_spill] sm:$0xff]  ;;  %v19375_v4 = vld [vmem:[#allocation64_spill] sm:$0xff] }
 0x1c8   : > { %v3142_v13 = vrot.slane %v19373_v58, 1  ;;  %v3140_v55 = vrot.slane %v19375_v4, 1  ;;  %v19388_v58 = vld [vmem:[#allocation77_spill] sm:$0xff] }
 0x1c9   : > { %13197 = vmatmul.mubr.bf16.gmra.mrb[32].mxu1 %v4784_v62  ;;  %v15803_v62 = vsel %vm3157_vm3, %v3135_v19, %v3136_v37  ;;  %v1729_v19 = vld [vmem:[%s18827_s0 + $0x180] sm:$0xff]  ;;  %v1730_v37 = vld [vmem:[%s18827_s0 + $0x188] sm:$0xff] }
 0x1ca   : > { %13200 = vmatprep.mubr.bf16.mxu1 %v4785_v7  ;;  %19371 = vst [vmem:[#allocation146_spill] sm:$0xff] %v15803_v62  ;;  %v4743_v7 = vmul.f32 %v11964_v36, %v15803_v62  ;;  %v1793_v53 = vmul.f32 %v1729_v19, %v19376_v3  ;;  %v1794_v12 = vmul.f32 %v1730_v37, %v19377_v18  ;;  %v19390_v3 = vld [vmem:[#allocation78_spill] sm:$0xff] }
 0x1cb   : > { %12881 = vmatmul.mubr.bf16.gmra.mrb[104].mxu0 %v1830_v63  ;;  %v1792_v63 = vmul.f32 %v1728_v47, %v19374_v8  ;;  %v1791_v36 = vmul.f32 %v1727_v6, %v19379_v32  ;;  %v15834_v62 = vsel %vm3157_vm3, %v3140_v55, %v3141_v21  ;;  %v11969_v47 = vld [vmem:[%s18827_s0 + $0xb78] sm:$0xff]  ;;  %v15845_v19 = vsel %vm3157_vm3, %v3141_v21, %v3142_v13  ;;  %v19389_v32 = vld [vmem:[#allocation75_spill] sm:$0xff] }
 0x1cc   : > { %12884 = vmatprep.mubr.bf16.mxu0 %v1831_v28  ;;  %v4786_v35 = vpack.c.bf16 %v4744_v15, %v4743_v7  ;;  %v4787_v28 = vpack.c.bf16 %v4746_v0, %v4745_v31  ;;  %19380 = vst [vmem:[#allocation147_spill] sm:$0xff] %v15834_v62  ;;  %v15841_v15 = vsel %vm3157_vm3, %v3142_v13, %v3143_v48  ;;  %19382 = vst [vmem:[#allocation149_spill] sm:$0xff] %v15845_v19  ;;  %v11970_v31 = vld [vmem:[%s18827_s0 + $0xb80] sm:$0xff]  ;;  %v11971_v0 = vld [vmem:[%s18827_s0 + $0xb88] sm:$0xff] }
 0x1cd   : > { %19381 = vst [vmem:[#allocation148_spill] sm:$0xff] %v15841_v15  ;;  %v1832_v37 = vpack.c.bf16 %v1792_v63, %v1791_v36  ;;  %v11968_v7 = vld [vmem:[%s18827_s0 + $0xb70] sm:$0xff]  ;;  %v1833_v21 = vpack.c.bf16 %v1794_v12, %v1793_v53  ;;  %v4748_v6 = vmul.f32 %v11969_v47, %v15834_v62  ;;  %v1732_v13 = vld [vmem:[%s18827_s0 + $0x198] sm:$0xff]  ;;  %v4749_v51 = vmul.f32 %v11970_v31, %v15845_v19  ;;  %v19384_v12 = vld [vmem:[#allocation79_spill] sm:$0xff] }
 0x1ce   : > { %v4750_v63 = vmul.f32 %v11971_v0, %v15841_v15  ;;  %v3145_v53 = vrot.slane %v19384_v12, 1  ;;  %v1731_v36 = vld [vmem:[%s18827_s0 + $0x190] sm:$0xff]  ;;  %v19386_v0 = vld [vmem:[#allocation76_spill] sm:$0xff]  ;;  %v3147_v12 = vrot.slane %v19390_v3, 1  ;;  %v19391_v8 = vld [vmem:[#allocation74_spill] sm:$0xff] }
 0x1cf   : > { %v19385_v47 = vld [vmem:[#allocation81_spill] sm:$0xff]  ;;  %v19387_v15 = vld [vmem:[#allocation72_spill] sm:$0xff] }
 0x1d0   : > { %v3146_v31 = vrot.slane %v19385_v47, 1  ;;  %v3144_v19 = vrot.slane %v19387_v15, 1  ;;  %v19400_v47 = vld [vmem:[#allocation85_spill] sm:$0xff] }
 0x1d1   : > { %13201 = vmatmul.mubr.bf16.gmra.mrb[36].mxu1 %v4786_v35  ;;  %v15855_v35 = vsel %vm3157_vm3, %v3139_v23, %v3140_v55  ;;  %v1733_v23 = vld [vmem:[%s18827_s0 + $0x1a0] sm:$0xff]  ;;  %v1734_v55 = vld [vmem:[%s18827_s0 + $0x1a8] sm:$0xff] }
 0x1d2   : > { %13204 = vmatprep.mubr.bf16.mxu1 %v4787_v28  ;;  %19383 = vst [vmem:[#allocation150_spill] sm:$0xff] %v15855_v35  ;;  %v4747_v28 = vmul.f32 %v11968_v7, %v15855_v35  ;;  %v1797_v4 = vmul.f32 %v1733_v23, %v19388_v58  ;;  %v1798_v18 = vmul.f32 %v1734_v55, %v19389_v32  ;;  %v19402_v58 = vld [vmem:[#allocation86_spill] sm:$0xff] }
 0x1d3   : > { %12885 = vmatmul.mubr.bf16.gmra.mrb[108].mxu0 %v1832_v37  ;;  %v1796_v37 = vmul.f32 %v1732_v13, %v19386_v0  ;;  %v1795_v7 = vmul.f32 %v1731_v36, %v19391_v8  ;;  %v15886_v35 = vsel %vm3157_vm3, %v3144_v19, %v3145_v53  ;;  %v11973_v13 = vld [vmem:[%s18827_s0 + $0xb98] sm:$0xff]  ;;  %v15897_v23 = vsel %vm3157_vm3, %v3145_v53, %v3146_v31  ;;  %v19401_v8 = vld [vmem:[#allocation83_spill] sm:$0xff] }
 0x1d4   : > { %12888 = vmatprep.mubr.bf16.mxu0 %v1833_v21  ;;  %v4788_v62 = vpack.c.bf16 %v4748_v6, %v4747_v28  ;;  %v4789_v21 = vpack.c.bf16 %v4750_v63, %v4749_v51  ;;  %19392 = vst [vmem:[#allocation151_spill] sm:$0xff] %v15886_v35  ;;  %v15893_v6 = vsel %vm3157_vm3, %v3146_v31, %v3147_v12  ;;  %19394 = vst [vmem:[#allocation153_spill] sm:$0xff] %v15897_v23  ;;  %v11974_v51 = vld [vmem:[%s18827_s0 + $0xba0] sm:$0xff]  ;;  %v11975_v63 = vld [vmem:[%s18827_s0 + $0xba8] sm:$0xff] }
 0x1d5   : > { %19393 = vst [vmem:[#allocation152_spill] sm:$0xff] %v15893_v6  ;;  %v1834_v55 = vpack.c.bf16 %v1796_v37, %v1795_v7  ;;  %v11972_v28 = vld [vmem:[%s18827_s0 + $0xb90] sm:$0xff]  ;;  %v1835_v53 = vpack.c.bf16 %v1798_v18, %v1797_v4  ;;  %v4752_v36 = vmul.f32 %v11973_v13, %v15886_v35  ;;  %v1736_v31 = vld [vmem:[%s18827_s0 + $0x1b8] sm:$0xff]  ;;  %v4753_v3 = vmul.f32 %v11974_v51, %v15897_v23  ;;  %v19396_v18 = vld [vmem:[#allocation87_spill] sm:$0xff] }
 0x1d6   : > { %v4754_v37 = vmul.f32 %v11975_v63, %v15893_v6  ;;  %v3149_v4 = vrot.slane %v19396_v18, 1  ;;  %v1735_v7 = vld [vmem:[%s18827_s0 + $0x1b0] sm:$0xff]  ;;  %v19398_v63 = vld [vmem:[#allocation84_spill] sm:$0xff]  ;;  %v3151_v18 = vrot.slane %v19402_v58, 1  ;;  %v19403_v0 = vld [vmem:[#allocation82_spill] sm:$0xff] }
 0x1d7   : > { %v19397_v13 = vld [vmem:[#allocation89_spill] sm:$0xff]  ;;  %v19399_v6 = vld [vmem:[#allocation80_spill] sm:$0xff] }
 0x1d8   : > { %v3150_v51 = vrot.slane %v19397_v13, 1  ;;  %v3148_v23 = vrot.slane %v19399_v6, 1  ;;  %v19412_v6 = vld [vmem:[#allocation91_spill] sm:$0xff] }
 0x1d9   : > { %13205 = vmatmul.mubr.bf16.gmra.mrb[40].mxu1 %v4788_v62  ;;  %v15907_v62 = vsel %vm3157_vm3, %v3143_v48, %v3144_v19  ;;  %v1737_v48 = vld [vmem:[%s18827_s0 + $0x1c0] sm:$0xff]  ;;  %v1738_v19 = vld [vmem:[%s18827_s0 + $0x1c8] sm:$0xff] }
 0x1da   : > { %13208 = vmatprep.mubr.bf16.mxu1 %v4789_v21  ;;  %19395 = vst [vmem:[#allocation154_spill] sm:$0xff] %v15907_v62  ;;  %v4751_v21 = vmul.f32 %v11972_v28, %v15907_v62  ;;  %v1801_v15 = vmul.f32 %v1737_v48, %v19400_v47  ;;  %v1802_v32 = vmul.f32 %v1738_v19, %v19401_v8  ;;  %v19413_v8 = vld [vmem:[#allocation94_spill] sm:$0xff] }
 0x1db   : > { %12889 = vmatmul.mubr.bf16.gmra.mrb[112].mxu0 %v1834_v55  ;;  %v1800_v55 = vmul.f32 %v1736_v31, %v19398_v63  ;;  %v1799_v28 = vmul.f32 %v1735_v7, %v19403_v0  ;;  %v15938_v62 = vsel %vm3157_vm3, %v3148_v23, %v3149_v4  ;;  %v11977_v31 = vld [vmem:[%s18827_s0 + $0xbb8] sm:$0xff]  ;;  %v15949_v48 = vsel %vm3157_vm3, %v3149_v4, %v3150_v51 }
 0x1dc   : > { %12892 = vmatprep.mubr.bf16.mxu0 %v1835_v53  ;;  %v4790_v35 = vpack.c.bf16 %v4752_v36, %v4751_v21  ;;  %v4791_v53 = vpack.c.bf16 %v4754_v37, %v4753_v3  ;;  %19404 = vst [vmem:[#allocation84_spill] sm:$0xff] %v15938_v62  ;;  %v15945_v36 = vsel %vm3157_vm3, %v3150_v51, %v3151_v18  ;;  %19406 = vst [vmem:[#allocation156_spill] sm:$0xff] %v15949_v48  ;;  %v11978_v3 = vld [vmem:[%s18827_s0 + $0xbc0] sm:$0xff]  ;;  %v11979_v37 = vld [vmem:[%s18827_s0 + $0xbc8] sm:$0xff] }
 0x1dd   : > { %19405 = vst [vmem:[#allocation155_spill] sm:$0xff] %v15945_v36  ;;  %v1836_v19 = vpack.c.bf16 %v1800_v55, %v1799_v28  ;;  %v11976_v21 = vld [vmem:[%s18827_s0 + $0xbb0] sm:$0xff]  ;;  %v1837_v4 = vpack.c.bf16 %v1802_v32, %v1801_v15  ;;  %v4756_v7 = vmul.f32 %v11977_v31, %v15938_v62  ;;  %v1740_v51 = vld [vmem:[%s18827_s0 + $0x1d8] sm:$0xff]  ;;  %v4757_v58 = vmul.f32 %v11978_v3, %v15949_v48  ;;  %v19408_v28 = vld [vmem:[#allocation99_spill] sm:$0xff] }
 0x1de   : > { %v4758_v55 = vmul.f32 %v11979_v37, %v15945_v36  ;;  %v3153_v32 = vrot.slane %v15121_v57, 1  ;;  %v3154_v31 = vrot.slane %v19408_v28, 1  ;;  %v19409_v3 = vld [vmem:[#allocation92_spill] sm:$0xff]  ;;  %v19411_v62 = vld [vmem:[#allocation93_spill] sm:$0xff]  ;;  %v3155_v57 = vrot.slane %v19413_v8, 1  ;;  %v19414_v47 = vld [vmem:[#allocation90_spill] sm:$0xff] }
 0x1df   : > { %v1804_v37 = vmul.f32 %v1740_v51, %v19409_v3  ;;  %v11981_v51 = vld [vmem:[%s18827_s0 + $0xbd8] sm:$0xff] }
 0x1e1   : > { %13209 = vmatmul.mubr.bf16.gmra.mrb[44].mxu1 %v4790_v35  ;;  %v15959_v35 = vsel %vm3157_vm3, %v3147_v12, %v3148_v23  ;;  %v1741_v12 = vld [vmem:[%s18827_s0 + $0x1e0] sm:$0xff]  ;;  %v1742_v23 = vld [vmem:[%s18827_s0 + $0x1e8] sm:$0xff] }
 0x1e2   : > { %13212 = vmatprep.mubr.bf16.mxu1 %v4791_v53  ;;  %19407 = vst [vmem:[#allocation157_spill] sm:$0xff] %v15959_v35  ;;  %v4755_v15 = vmul.f32 %v11976_v21, %v15959_v35  ;;  %v1739_v53 = vld [vmem:[%s18827_s0 + $0x1d0] sm:$0xff]  ;;  %v1805_v13 = vmul.f32 %v1741_v12, %v19411_v62  ;;  %v1806_v0 = vmul.f32 %v1742_v23, %v19412_v6 }
 0x1e3   : > { %12893 = vmatmul.mubr.bf16.gmra.mrb[116].mxu0 %v1836_v19  ;;  %v19410_v19 = vld [vmem:[#allocation88_spill] sm:$0xff]  ;;  %v1803_v21 = vmul.f32 %v1739_v53, %v19414_v47  ;;  %v16001_v12 = vsel %vm3157_vm3, %v3153_v32, %v3154_v31 }
 0x1e4   : > { %12896 = vmatprep.mubr.bf16.mxu0 %v1837_v4  ;;  %v3152_v36 = vrot.slane %v19410_v19, 1  ;;  %v4792_v48 = vpack.c.bf16 %v4756_v7, %v4755_v15  ;;  %v4793_v4 = vpack.c.bf16 %v4758_v55, %v4757_v58  ;;  %v15997_v7 = vsel %vm3157_vm3, %v3154_v31, %v3155_v57  ;;  %19417 = vst [vmem:[#allocation93_spill] sm:$0xff] %v16001_v12  ;;  %v11982_v58 = vld [vmem:[%s18827_s0 + $0xbe0] sm:$0xff]  ;;  %v11983_v55 = vld [vmem:[%s18827_s0 + $0xbe8] sm:$0xff]  ;;  %v11980_v15 = vld [vmem:[%s18827_s0 + $0xbd0] sm:$0xff] }
 0x1e5   : > { %19416 = vst [vmem:[#allocation88_spill] sm:$0xff] %v15997_v7  ;;  %v1838_v23 = vpack.c.bf16 %v1804_v37, %v1803_v21  ;;  %v1744_v31 = vld [vmem:[%s18827_s0 + $0x1f8] sm:$0xff]  ;;  %v4761_v28 = vmul.f32 %v11982_v58, %v16001_v12  ;;  %v4762_v37 = vmul.f32 %v11983_v55, %v15997_v7  ;;  %v19420_v7 = vld [vmem:[#allocation101_spill] sm:$0xff] }
 0x1e6   : > { %v15990_v35 = vsel %vm3157_vm3, %v3152_v36, %v3153_v32  ;;  %v1839_v32 = vpack.c.bf16 %v1806_v0, %v1805_v13  ;;  %v1743_v13 = vld [vmem:[%s18827_s0 + $0x1f0] sm:$0xff]  ;;  %v1808_v21 = vmul.f32 %v1744_v31, %v15207_v30 }
 0x1e7   : > { %19415 = vst [vmem:[#allocation92_spill] sm:$0xff] %v15990_v35  ;;  %v4760_v53 = vmul.f32 %v11981_v51, %v15990_v35  ;;  %v11658_v51 = vld [vmem:[%s18827_s0 + $0x200] sm:$0xff]  ;;  %v1807_v12 = vmul.f32 %v1743_v13, %v19420_v7  ;;  %v11984_v31 = vld [vmem:[%s18827_s0 + $0xbf0] sm:$0xff] }
 0x1e9   : > { %13213 = vmatmul.mubr.bf16.gmra.mrb[48].mxu1 %v4792_v48  ;;  %v16011_v48 = vsel %vm3157_vm3, %v3151_v18, %v3152_v36  ;;  %v11659_v18 = vld [vmem:[%s18827_s0 + $0x208] sm:$0xff]  ;;  %v19419_v36 = vld [vmem:[#allocation98_spill] sm:$0xff] }
 0x1ea   : > { %13216 = vmatprep.mubr.bf16.mxu1 %v4793_v4  ;;  %19418 = vst [vmem:[#allocation91_spill] sm:$0xff] %v16011_v48  ;;  %v3156_v4 = vrot.slane %v19419_v36, 1  ;;  %v4759_v0 = vmul.f32 %v11980_v15, %v16011_v48  ;;  %v2452_v55 = vmul.f32 %v11659_v18, %v19419_v36  ;;  %v19422_v15 = vld [vmem:[#allocation4_spill] sm:$0xff]  ;;  %v11661_v18 = vld [vmem:[%s18827_s0 + $0x218] sm:$0xff] }
 0x1eb   : > { %12897 = vmatmul.mubr.bf16.gmra.mrb[120].mxu0 %v1838_v23  ;;  %v4795_v23 = vpack.c.bf16 %v4762_v37, %v4761_v28  ;;  %v19423_v48 = vrot.slane %v19422_v15, 1  ;;  %v11985_v28 = vld [vmem:[%s18827_s0 + $0xbf8] sm:$0xff]  ;;  %v1840_v37 = vpack.c.bf16 %v1808_v21, %v1807_v12  ;;  %v11660_v12 = vld [vmem:[%s18827_s0 + $0x210] sm:$0xff] }
 0x1ec   : > { %12900 = vmatprep.mubr.bf16.mxu0 %v1839_v32  ;;  %v4794_v58 = vpack.c.bf16 %v4760_v53, %v4759_v0  ;;  %v16038_v32 = vsel %vm3157_vm3, %v3155_v57, %v3156_v4  ;;  %v2451_v53 = vmul.f32 %v11658_v51, %v19413_v8  ;;  %v12010_v57 = vld [vmem:[%s18827_s0 + $0xc00] sm:$0xff]  ;;  %v19425_v21 = vld [vmem:[#allocation5_spill] sm:$0xff] }
 0x1ed   : > { %19421 = vst [vmem:[#allocation90_spill] sm:$0xff] %v16038_v32  ;;  %v16044_v35 = vsel %vm3157_vm3, %v3156_v4, %v19423_v48  ;;  %v12011_v48 = vld [vmem:[%s18827_s0 + $0xc08] sm:$0xff]  ;;  %v4763_v0 = vmul.f32 %v11984_v31, %v16038_v32  ;;  %v5408_v51 = vmul.f32 %v12010_v57, %v15187_v2  ;;  %v11662_v31 = vld [vmem:[%s18827_s0 + $0x220] sm:$0xff]  ;;  %v14098_v2 = vld [vmem:[%s14221_s18 + $0x1d0] sm:$0xff]   ;;  %vm11420_vm3 = vcmask 1041409  }
 0x1ee   : > { %19424 = vst [vmem:[#allocation101_spill] sm:$0xff] %v16044_v35  ;;  %v2515_v4 = vpack.c.bf16 %v2452_v55, %v2451_v53  ;;  %v4764_v13 = vmul.f32 %v11985_v28, %v16044_v35  ;;  %v2454_v55 = vmul.f32 %v11661_v18, %v19425_v21  ;;  %v19426_v53 = vld [vmem:[#allocation3_spill] sm:$0xff]  ;;  %v2455_v14 = vmul.f32 %v11662_v31, %v14315_v1  ;;  %v12015_v18 = vld [vmem:[%s18827_s0 + $0xc28] sm:$0xff] }
 0x1ef   : > { %v19465_v8 = vld [vmem:[#allocation51_spill] sm:$0xff] }
 0x1f0   : > { %v4796_v28 = vpack.c.bf16 %v4764_v13, %v4763_v0  ;;  %v14095_v0 = vld [vmem:[%s14221_s18 + $0x88] sm:$0xff]  }
 0x1f1   : > { %13217 = vmatmul.mubr.bf16.gmra.mrb[52].mxu1 %v4794_v58  ;;  %v5409_v58 = vmul.f32 %v12011_v48, %v15152_v10  ;;  %v2453_v48 = vmul.f32 %v11660_v12, %v19422_v15  ;;  %v12014_v10 = vld [vmem:[%s18827_s0 + $0xc20] sm:$0xff]  ;;  %v11667_v12 = vld [vmem:[%s18827_s0 + $0x248] sm:$0xff] }
 0x1f2   : > { %13220 = vmatprep.mubr.bf16.mxu1 %v4795_v23  ;;  %v11663_v23 = vld [vmem:[%s18827_s0 + $0x228] sm:$0xff] }
 0x1f3   : > { %12901 = vmatmul.mubr.bf16.gmra.mrb[124].mxu0 %v1840_v37  ;;  %v2456_v57 = vmul.f32 %v11663_v23, %v19426_v53  ;;  %v5472_v37 = vpack.c.bf16 %v5409_v58, %v5408_v51  ;;  %v11665_v51 = vld [vmem:[%s18827_s0 + $0x238] sm:$0xff]  ;;  %v5412_v58 = vmul.f32 %v12014_v10, %v14389_v44  ;;  %v5413_v23 = vmul.f32 %v12015_v18, %v14376_v38  ;;  %v14096_v44 = vld [vmem:[%s14221_s18 + $0x1c8] sm:$0xff]   ;;  %v14097_v10 = vld [vmem:[%s14221_s18 + $0x90] sm:$0xff]  }
 0x1f4   : > { %12920 = vmatprep.mubr.bf16.mxu0 %v2515_v4  ;;  %v2516_v4 = vpack.c.bf16 %v2454_v55, %v2453_v48  ;;  %v19427_v55 = vld [vmem:[#allocation8_spill] sm:$0xff]  ;;  %v2460_v38 = vmul.f32 %v11667_v12, %v14333_v17  ;;  %v19428_v48 = vld [vmem:[#allocation7_spill] sm:$0xff]  ;;  %v19429_v18 = vld [vmem:[#allocation10_spill] sm:$0xff] }
 0x1f5   : > { %v2517_v13 = vpack.c.bf16 %v2456_v57, %v2455_v14  ;;  %v11664_v14 = vld [vmem:[%s18827_s0 + $0x230] sm:$0xff]  ;;  %v2458_v31 = vmul.f32 %v11665_v51, %v19427_v55  ;;  %v5474_v57 = vpack.c.bf16 %v5413_v23, %v5412_v58  ;;  %v12018_v12 = vld [vmem:[%s18827_s0 + $0xc40] sm:$0xff]  ;;  %v12019_v58 = vld [vmem:[%s18827_s0 + $0xc48] sm:$0xff] }
 0x1f9   : > { %13221 = vmatmul.mubr.bf16.gmra.mrb[56].mxu1 %v4796_v28  ;;  %v11666_v28 = vld [vmem:[%s18827_s0 + $0x240] sm:$0xff] }
 0x1fa   : > { %13240 = vmatprep.mubr.bf16.mxu1 %v5472_v37  ;;  %v2457_v37 = vmul.f32 %v11664_v14, %v19428_v48  ;;  %v2459_v51 = vmul.f32 %v11666_v28, %v14324_v11  ;;  %v12016_v14 = vld [vmem:[%s18827_s0 + $0xc30] sm:$0xff] }
 0x1fb   : > { %12921 = vmatmul.mubr.bf16.vlgmr.msra.gmra.mrb[64].mxu0 %v2516_v4  ;;  %v19430_v4 = vld [vmem:[#allocation9_spill] sm:$0xff] }
 0x1fc   : > { %12924 = vmatprep.mubr.bf16.mxu0 %v2517_v13  ;;  %12985 = vmatpush3.bf16.msra.mxu0 %v15468_v59  ;;  %v12017_v59 = vld [vmem:[%s18827_s0 + $0xc38] sm:$0xff]  ;;  %v19431_v13 = vpack.c.bf16 %v19429_v18, %v19430_v4  ;;  %v2518_v23 = vpack.c.bf16 %v2458_v31, %v2457_v37  ;;  %v2519_v4 = vpack.c.bf16 %v2460_v38, %v2459_v51  ;;  %v11671_v31 = vld [vmem:[%s18827_s0 + $0x268] sm:$0xff]  ;;  %v11668_v38 = vld [vmem:[%s18827_s0 + $0x250] sm:$0xff] }
 0x1fd   : > { %12986 = vmatprep.subr.bf16.mxu0 %v14095_v0  ;;  %v14099_v18 = vld [vmem:[%s14221_s18 + $0x98] sm:$0xff]   ;;  %v5415_v28 = vmul.f32 %v12017_v59, %v14446_v29  ;;  %v5414_v29 = vmul.f32 %v12016_v14, %v14427_v16  ;;  %v2464_v37 = vmul.f32 %v11671_v31, %v14403_v56  ;;  %v14101_v16 = vld [vmem:[%s14221_s18 + $0xa0] sm:$0xff]  }
 0x1fe   : > { %v14100_v59 = vld [vmem:[%s14221_s18 + $0x1d8] sm:$0xff]   ;;  %v14102_v31 = vld [vmem:[%s14221_s18 + $0x1e0] sm:$0xff]  }
 0x200   : > { %12987 = vmatpush3.bf16.msra.mxu0 %v14095_v0  ;;  %v5417_v0 = vmul.f32 %v12019_v58, %v14440_v25  ;;  %v5475_v25 = vpack.c.bf16 %v5415_v28, %v5414_v29  ;;  %v14103_v28 = vld [vmem:[%s14221_s18 + $0xa8] sm:$0xff]  }
 0x201   : > { %13241 = vmatmul.mubr.bf16.vlgmr.msra.gmra.mrb[60].mxu1 %v19431_v13  ;;  %v11669_v13 = vld [vmem:[%s18827_s0 + $0x258] sm:$0xff]  ;;  %12988 = vmatprep.subr.bf16.mxu0 %v14097_v10 }
 0x202   : > { %13305 = vmatpush3.bf16.msra.mxu1 %v15496_v39  ;;  %13244 = vmatprep.mubr.bf16.mxu1 %v5474_v57  ;;  %v5416_v39 = vmul.f32 %v12018_v12, %v14450_v49  ;;  %v2462_v57 = vmul.f32 %v11669_v13, %v14408_v60  ;;  %v11670_v49 = vld [vmem:[%s18827_s0 + $0x260] sm:$0xff]  ;;  %v2461_v12 = vmul.f32 %v11668_v38, %v14399_v52  ;;  %v11672_v38 = vld [vmem:[%s18827_s0 + $0x270] sm:$0xff] }
 0x203   : > { %13306 = vmatprep.subr.bf16.mxu1 %v14096_v44  ;;  %12925 = vmatmul.mubr.bf16.gmra.mrb[68].mxu0 %v2518_v23  ;;  %v2463_v58 = vmul.f32 %v11670_v49, %v14392_v46  ;;  %v12023_v23 = vld [vmem:[%s18827_s0 + $0xc68] sm:$0xff] }
 0x204   : > { %12928 = vmatprep.mubr.bf16.mxu0 %v2519_v4  ;;  %12989 = vmatpush3.bf16.msra.mxu0 %v14097_v10  ;;  %v5476_v51 = vpack.c.bf16 %v5417_v0, %v5416_v39  ;;  %v12021_v10 = vld [vmem:[%s18827_s0 + $0xc58] sm:$0xff]  ;;  %v2520_v14 = vpack.c.bf16 %v2462_v57, %v2461_v12  ;;  %v12020_v4 = vld [vmem:[%s18827_s0 + $0xc50] sm:$0xff]  ;;  %v5421_v29 = vmul.f32 %v12023_v23, %v14496_v22 }
 0x205   : > { %12990 = vmatprep.subr.bf16.mxu0 %v14099_v18  ;;  %v2521_v13 = vpack.c.bf16 %v2464_v37, %v2463_v58  ;;  %v5419_v39 = vmul.f32 %v12021_v10, %v14502_v27  ;;  %v11673_v0 = vld [vmem:[%s18827_s0 + $0x278] sm:$0xff]  ;;  %v5418_v27 = vmul.f32 %v12020_v4, %v14484_v9  ;;  %v14105_v9 = vld [vmem:[%s14221_s18 + $0xb0] sm:$0xff]   ;;  %v12027_v10 = vld [vmem:[%s18827_s0 + $0xc88] sm:$0xff] }
 0x206   : > { %13307 = vmatpush3.bf16.msra.mxu1 %v14096_v44  ;;  %v12022_v44 = vld [vmem:[%s18827_s0 + $0xc60] sm:$0xff]  ;;  %v2466_v57 = vmul.f32 %v11673_v0, %v14465_v50  ;;  %v14107_v23 = vld [vmem:[%s14221_s18 + $0xb8] sm:$0xff]   ;;  %v5425_v0 = vmul.f32 %v12027_v10, %v19293_v61  ;;  %v19432_v10 = vld [vmem:[#allocation21_spill] sm:$0xff] }
 0x207   : > { %13308 = vmatprep.subr.bf16.mxu1 %v14098_v2  ;;  %v5477_v22 = vpack.c.bf16 %v5419_v39, %v5418_v27  ;;  %v14106_v39 = vld [vmem:[%s14221_s18 + $0x1f0] sm:$0xff]   ;;  %v14108_v27 = vld [vmem:[%s14221_s18 + $0x1f8] sm:$0xff]  }
 0x208   : > { %12991 = vmatpush3.bf16.msra.mxu0 %v14099_v18  ;;  %v5420_v18 = vmul.f32 %v12022_v44, %v14506_v26  ;;  %v11674_v26 = vld [vmem:[%s18827_s0 + $0x280] sm:$0xff]  ;;  %v12024_v44 = vld [vmem:[%s18827_s0 + $0xc70] sm:$0xff] }
 0x209   : > { %13245 = vmatmul.mubr.bf16.gmra.mrb[0].mxu1 %v5475_v25  ;;  %12992 = vmatprep.subr.bf16.mxu0 %v14101_v16  ;;  %v14104_v25 = vld [vmem:[%s14221_s18 + $0x1e8] sm:$0xff]   ;;  %v2467_v12 = vmul.f32 %v11674_v26, %v14454_v33 }
 0x20a   : > { %13248 = vmatprep.mubr.bf16.mxu1 %v5476_v51  ;;  %13309 = vmatpush3.bf16.msra.mxu1 %v14098_v2  ;;  %v11675_v2 = vld [vmem:[%s18827_s0 + $0x288] sm:$0xff]  ;;  %v5478_v37 = vpack.c.bf16 %v5421_v29, %v5420_v18  ;;  %v2465_v51 = vmul.f32 %v11672_v38, %v14459_v40  ;;  %v11676_v18 = vld [vmem:[%s18827_s0 + $0x290] sm:$0xff] }
 0x20b   : > { %13310 = vmatprep.subr.bf16.mxu1 %v14100_v59  ;;  %12929 = vmatmul.mubr.bf16.gmra.mrb[72].mxu0 %v2520_v14  ;;  %v2468_v49 = vmul.f32 %v11675_v2, %v14462_v42 }
 0x20c   : > { %12932 = vmatprep.mubr.bf16.mxu0 %v2521_v13  ;;  %12993 = vmatpush3.bf16.msra.mxu0 %v14101_v16  ;;  %v12025_v16 = vld [vmem:[%s18827_s0 + $0xc78] sm:$0xff]  ;;  %v2522_v58 = vpack.c.bf16 %v2466_v57, %v2465_v51 }
 0x20d   : > { %12994 = vmatprep.subr.bf16.mxu0 %v14103_v28  ;;  %v2523_v14 = vpack.c.bf16 %v2468_v49, %v2467_v12  ;;  %v5423_v4 = vmul.f32 %v12025_v16, %v14572_v43  ;;  %v11677_v13 = vld [vmem:[%s18827_s0 + $0x298] sm:$0xff]  ;;  %v5422_v43 = vmul.f32 %v12024_v44, %v19295_v45  ;;  %v2469_v45 = vmul.f32 %v11676_v18, %v14515_v41  ;;  %v12031_v49 = vld [vmem:[%s18827_s0 + $0xca8] sm:$0xff]  ;;  %v16235_v12 = vld [vmem:[%s14221_s18 + $0xc0] sm:$0xff]  }
 0x20e   : > { %13311 = vmatpush3.bf16.msra.mxu1 %v14100_v59  ;;  %v12026_v59 = vld [vmem:[%s18827_s0 + $0xc80] sm:$0xff]  ;;  %v2470_v29 = vmul.f32 %v11677_v13, %v14529_v5  ;;  %v12029_v57 = vld [vmem:[%s18827_s0 + $0xc98] sm:$0xff]  ;;  %v11680_v13 = vld [vmem:[%s18827_s0 + $0x2b0] sm:$0xff] }
 0x20f   : > { %13312 = vmatprep.subr.bf16.mxu1 %v14102_v31  ;;  %v5479_v61 = vpack.c.bf16 %v5423_v4, %v5422_v43  ;;  %v5427_v51 = vmul.f32 %v12029_v57, %v19302_v24  ;;  %v11681_v16 = vld [vmem:[%s18827_s0 + $0x2b8] sm:$0xff]  ;;  %v19433_v44 = vld [vmem:[#allocation19_spill] sm:$0xff]  ;;  %v11683_v24 = vld [vmem:[%s18827_s0 + $0x2c8] sm:$0xff] }
 0x210   : > { %12995 = vmatpush3.bf16.msra.mxu0 %v14103_v28  ;;  %v5424_v28 = vmul.f32 %v12026_v59, %v19292_v20  ;;  %v11678_v20 = vld [vmem:[%s18827_s0 + $0x2a0] sm:$0xff]  ;;  %v19436_v43 = vld [vmem:[#allocation16_spill] sm:$0xff] }
 0x211   : > { %13249 = vmatmul.mubr.bf16.gmra.mrb[4].mxu1 %v5477_v22  ;;  %12996 = vmatprep.subr.bf16.mxu0 %v14105_v9  ;;  %v2471_v26 = vmul.f32 %v11678_v20, %v14510_v34  ;;  %v12030_v22 = vld [vmem:[%s18827_s0 + $0xca0] sm:$0xff]  ;;  %v2476_v18 = vmul.f32 %v11683_v24, %v19436_v43 }
 0x212   : > { %13252 = vmatprep.mubr.bf16.mxu1 %v5478_v37  ;;  %13313 = vmatpush3.bf16.msra.mxu1 %v14102_v31  ;;  %v11679_v31 = vld [vmem:[%s18827_s0 + $0x2a8] sm:$0xff]  ;;  %v5480_v38 = vpack.c.bf16 %v5425_v0, %v5424_v28  ;;  %v16239_v59 = vld [vmem:[%s14221_s18 + $0x200] sm:$0xff]  }
 0x213   : > { %13314 = vmatprep.subr.bf16.mxu1 %v14104_v25  ;;  %12933 = vmatmul.mubr.bf16.gmra.mrb[76].mxu0 %v2522_v58  ;;  %v2472_v2 = vmul.f32 %v11679_v31, %v14521_v54  ;;  %v5428_v58 = vmul.f32 %v12030_v22, %v19432_v10  ;;  %v11682_v0 = vld [vmem:[%s18827_s0 + $0x2c0] sm:$0xff]  ;;  %v12032_v22 = vld [vmem:[%s18827_s0 + $0xcb0] sm:$0xff] }
 0x214   : > { %12936 = vmatprep.mubr.bf16.mxu0 %v2523_v14  ;;  %12997 = vmatpush3.bf16.msra.mxu0 %v14105_v9  ;;  %v12028_v9 = vld [vmem:[%s18827_s0 + $0xc90] sm:$0xff]  ;;  %v19434_v14 = vld [vmem:[#allocation18_spill] sm:$0xff]  ;;  %v19437_v20 = vld [vmem:[#allocation15_spill] sm:$0xff] }
 0x215   : > { %12998 = vmatprep.subr.bf16.mxu0 %v14107_v23  ;;  %v2525_v37 = vpack.c.bf16 %v2472_v2, %v2471_v26  ;;  %v5426_v4 = vmul.f32 %v12028_v9, %v19434_v14  ;;  %v12033_v2 = vld [vmem:[%s18827_s0 + $0xcb8] sm:$0xff]  ;;  %v12034_v57 = vld [vmem:[%s18827_s0 + $0xcc0] sm:$0xff]  ;;  %v11684_v14 = vld [vmem:[%s18827_s0 + $0x2d0] sm:$0xff] }
 0x216   : > { %13315 = vmatpush3.bf16.msra.mxu1 %v14104_v25  ;;  %v2524_v25 = vpack.c.bf16 %v2470_v29, %v2469_v45  ;;  %v19441_v10 = vld [vmem:[#allocation27_spill] sm:$0xff] }
 0x217   : > { %13316 = vmatprep.subr.bf16.mxu1 %v14106_v39  ;;  %v5481_v31 = vpack.c.bf16 %v5427_v51, %v5426_v4  ;;  %v19440_v51 = vld [vmem:[#allocation29_spill] sm:$0xff] }
 0x218   : > { %12999 = vmatpush3.bf16.msra.mxu0 %v14107_v23  ;;  %v5429_v23 = vmul.f32 %v12031_v49, %v19433_v44  ;;  %v11687_v44 = vld [vmem:[%s18827_s0 + $0x2e8] sm:$0xff]  ;;  %v19443_v4 = vld [vmem:[#allocation25_spill] sm:$0xff] }
 0x219   : > { %13253 = vmatmul.mubr.bf16.gmra.mrb[8].mxu1 %v5479_v61  ;;  %13064 = vmatprep.subr.bf16.mxu0 %v16235_v12  ;;  %v2473_v61 = vmul.f32 %v11680_v13, %v19437_v20 }
 0x21a   : > { %13256 = vmatprep.mubr.bf16.mxu1 %v5480_v38  ;;  %13317 = vmatpush3.bf16.msra.mxu1 %v14106_v39  ;;  %v19435_v39 = vld [vmem:[#allocation17_spill] sm:$0xff]  ;;  %v5482_v29 = vpack.c.bf16 %v5429_v23, %v5428_v58  ;;  %v19438_v38 = vld [vmem:[#allocation14_spill] sm:$0xff] }
 0x21b   : > { %13318 = vmatprep.subr.bf16.mxu1 %v14108_v27  ;;  %12937 = vmatmul.mubr.bf16.gmra.mrb[80].mxu0 %v2524_v25  ;;  %v2474_v28 = vmul.f32 %v11681_v16, %v19435_v39  ;;  %v2475_v45 = vmul.f32 %v11682_v0, %v19438_v38  ;;  %v19439_v25 = vld [vmem:[#allocation28_spill] sm:$0xff]  ;;  %v5432_v16 = vmul.f32 %v12034_v57, %v19440_v51  ;;  %v19442_v23 = vld [vmem:[#allocation26_spill] sm:$0xff] }
 0x21c   : > { %12940 = vmatprep.mubr.bf16.mxu0 %v2525_v37  ;;  %v5431_v9 = vmul.f32 %v12033_v2, %v19439_v25  ;;  %v11685_v37 = vld [vmem:[%s18827_s0 + $0x2d8] sm:$0xff]  ;;  %v5430_v24 = vmul.f32 %v12032_v22, %v19442_v23  ;;  %v12039_v22 = vld [vmem:[%s18827_s0 + $0xce8] sm:$0xff]  ;;  %v12036_v25 = vld [vmem:[%s18827_s0 + $0xcd0] sm:$0xff] }
 0x21d   : > { %v2526_v26 = vpack.c.bf16 %v2474_v28, %v2473_v61  ;;  %v2527_v49 = vpack.c.bf16 %v2476_v18, %v2475_v45  ;;  %v2478_v13 = vmul.f32 %v11685_v37, %v19443_v4  ;;  %v11686_v28 = vld [vmem:[%s18827_s0 + $0x2e0] sm:$0xff]  ;;  %v12037_v45 = vld [vmem:[%s18827_s0 + $0xcd8] sm:$0xff]  ;;  %v19447_v37 = vld [vmem:[#allocation36_spill] sm:$0xff] }
 0x21e   : > { %13319 = vmatpush3.bf16.msra.mxu1 %v14108_v27  ;;  %v12035_v27 = vld [vmem:[%s18827_s0 + $0xcc8] sm:$0xff]  ;;  %v5483_v0 = vpack.c.bf16 %v5431_v9, %v5430_v24  ;;  %v19445_v61 = vld [vmem:[#allocation23_spill] sm:$0xff]  ;;  %v19446_v57 = vld [vmem:[#allocation22_spill] sm:$0xff]  ;;  %v5435_v51 = vmul.f32 %v12037_v45, %v19447_v37 }
 0x21f   : > { %13384 = vmatprep.subr.bf16.mxu1 %v16239_v59  ;;  %v5433_v58 = vmul.f32 %v12035_v27, %v19441_v10  ;;  %v2477_v2 = vmul.f32 %v11684_v14, %v19445_v61  ;;  %v2479_v27 = vmul.f32 %v11686_v28, %v19446_v57  ;;  %v19448_v10 = vld [vmem:[#allocation37_spill] sm:$0xff]  ;;  %v11691_v24 = vld [vmem:[%s18827_s0 + $0x308] sm:$0xff]  ;;  %v19450_v14 = vld [vmem:[#allocation34_spill] sm:$0xff] }
 0x220   : > { %v11688_v28 = vld [vmem:[%s18827_s0 + $0x2f0] sm:$0xff]  ;;  %v19452_v45 = vld [vmem:[#allocation32_spill] sm:$0xff] }
 0x221   : > { %13257 = vmatmul.mubr.bf16.gmra.mrb[12].mxu1 %v5481_v31  ;;  %v19444_v31 = vld [vmem:[#allocation24_spill] sm:$0xff] }
 0x222   : > { %13260 = vmatprep.mubr.bf16.mxu1 %v5482_v29  ;;  %v2480_v18 = vmul.f32 %v11687_v44, %v19444_v31  ;;  %v5484_v29 = vpack.c.bf16 %v5433_v58, %v5432_v16  ;;  %v11689_v16 = vld [vmem:[%s18827_s0 + $0x2f8] sm:$0xff]  ;;  %v19449_v44 = vld [vmem:[#allocation35_spill] sm:$0xff] }
 0x223   : > { %12941 = vmatmul.mubr.bf16.gmra.mrb[84].mxu0 %v2526_v26  ;;  %v12038_v26 = vld [vmem:[%s18827_s0 + $0xce0] sm:$0xff]  ;;  %v5437_v23 = vmul.f32 %v12039_v22, %v19449_v44 }
 0x224   : > { %12944 = vmatprep.mubr.bf16.mxu0 %v2527_v49  ;;  %v2528_v49 = vpack.c.bf16 %v2478_v13, %v2477_v2  ;;  %v2529_v9 = vpack.c.bf16 %v2480_v18, %v2479_v27  ;;  %v5436_v58 = vmul.f32 %v12038_v26, %v19448_v10  ;;  %v5434_v13 = vmul.f32 %v12036_v25, %v19450_v14  ;;  %v19453_v22 = vld [vmem:[#allocation31_spill] sm:$0xff]  ;;  %v12041_v25 = vld [vmem:[%s18827_s0 + $0xcf8] sm:$0xff] }
 0x225   : > { %v2484_v27 = vmul.f32 %v11691_v24, %v19452_v45  ;;  %v11693_v14 = vld [vmem:[%s18827_s0 + $0x318] sm:$0xff] }
 0x226   : > { %v5485_v2 = vpack.c.bf16 %v5435_v51, %v5434_v13  ;;  %v5486_v26 = vpack.c.bf16 %v5437_v23, %v5436_v58  ;;  %v12043_v51 = vld [vmem:[%s18827_s0 + $0xd08] sm:$0xff]  ;;  %v12040_v58 = vld [vmem:[%s18827_s0 + $0xcf0] sm:$0xff] }
 0x227   : > { %v19455_v23 = vld [vmem:[#allocation44_spill] sm:$0xff]  ;;  %v19456_v13 = vld [vmem:[#allocation45_spill] sm:$0xff] }
 0x228   : > { %v5439_v24 = vmul.f32 %v12041_v25, %v19455_v23  ;;  %v19459_v25 = vld [vmem:[#allocation41_spill] sm:$0xff]  ;;  %v19460_v23 = vld [vmem:[#allocation40_spill] sm:$0xff] }
 0x229   : > { %13261 = vmatmul.mubr.bf16.gmra.mrb[16].mxu1 %v5483_v0  ;;  %v19451_v0 = vld [vmem:[#allocation33_spill] sm:$0xff] }
 0x22a   : > { %13264 = vmatprep.mubr.bf16.mxu1 %v5484_v29  ;;  %v2482_v18 = vmul.f32 %v11689_v16, %v19451_v0  ;;  %v11690_v29 = vld [vmem:[%s18827_s0 + $0x300] sm:$0xff] }
 0x22b   : > { %12945 = vmatmul.mubr.bf16.gmra.mrb[88].mxu0 %v2528_v49  ;;  %v2481_v49 = vmul.f32 %v11688_v28, %v19453_v22  ;;  %v12042_v16 = vld [vmem:[%s18827_s0 + $0xd00] sm:$0xff] }
 0x22c   : > { %12948 = vmatprep.mubr.bf16.mxu0 %v2529_v9  ;;  %v19454_v9 = vld [vmem:[#allocation30_spill] sm:$0xff]  ;;  %v5440_v28 = vmul.f32 %v12042_v16, %v19456_v13 }
 0x22d   : > { %v2483_v37 = vmul.f32 %v11690_v29, %v19454_v9  ;;  %v2530_v10 = vpack.c.bf16 %v2482_v18, %v2481_v49  ;;  %v19457_v29 = vld [vmem:[#allocation43_spill] sm:$0xff]  ;;  %v11695_v18 = vld [vmem:[%s18827_s0 + $0x328] sm:$0xff] }
 0x22f   : > { %v2531_v44 = vpack.c.bf16 %v2484_v27, %v2483_v37  ;;  %v11692_v27 = vld [vmem:[%s18827_s0 + $0x310] sm:$0xff]  ;;  %v2486_v37 = vmul.f32 %v11693_v14, %v19459_v25  ;;  %v12046_v14 = vld [vmem:[%s18827_s0 + $0xd20] sm:$0xff] }
 0x231   : > { %13265 = vmatmul.mubr.bf16.gmra.mrb[20].mxu1 %v5485_v2  ;;  %v5441_v2 = vmul.f32 %v12043_v51, %v19457_v29  ;;  %v2488_v51 = vmul.f32 %v11695_v18, %v19460_v23  ;;  %v19461_v29 = vld [vmem:[#allocation39_spill] sm:$0xff] }
 0x232   : > { %13268 = vmatprep.mubr.bf16.mxu1 %v5486_v26  ;;  %v19458_v26 = vld [vmem:[#allocation42_spill] sm:$0xff]  ;;  %v2485_v15 = vmul.f32 %v11692_v27, %v19461_v29 }
 0x233   : > { %12949 = vmatmul.mubr.bf16.gmra.mrb[92].mxu0 %v2530_v10  ;;  %v5438_v49 = vmul.f32 %v12040_v58, %v19458_v26  ;;  %v11694_v10 = vld [vmem:[%s18827_s0 + $0x320] sm:$0xff]  ;;  %v5488_v13 = vpack.c.bf16 %v5441_v2, %v5440_v28  ;;  %v12045_v58 = vld [vmem:[%s18827_s0 + $0xd18] sm:$0xff]  ;;  %v12044_v28 = vld [vmem:[%s18827_s0 + $0xd10] sm:$0xff] }
 0x234   : > { %12952 = vmatprep.mubr.bf16.mxu0 %v2531_v44  ;;  %v19462_v44 = vld [vmem:[#allocation38_spill] sm:$0xff]  ;;  %v2532_v18 = vpack.c.bf16 %v2486_v37, %v2485_v15  ;;  %v11699_v15 = vld [vmem:[%s18827_s0 + $0x348] sm:$0xff] }
 0x235   : > { %v5487_v16 = vpack.c.bf16 %v5439_v24, %v5438_v49  ;;  %v2487_v26 = vmul.f32 %v11694_v10, %v19462_v44  ;;  %v12047_v24 = vld [vmem:[%s18827_s0 + $0xd28] sm:$0xff]  ;;  %v11697_v10 = vld [vmem:[%s18827_s0 + $0x338] sm:$0xff] }
 0x236   : > { %v19463_v49 = vld [vmem:[#allocation52_spill] sm:$0xff]  ;;  %v5445_v36 = vmul.f32 %v12047_v24, %v19465_v8  ;;  %v19466_v37 = vld [vmem:[#allocation50_spill] sm:$0xff] }
 0x237   : > { %v2533_v2 = vpack.c.bf16 %v2488_v51, %v2487_v26  ;;  %v5443_v27 = vmul.f32 %v12045_v58, %v19463_v49  ;;  %v11696_v51 = vld [vmem:[%s18827_s0 + $0x330] sm:$0xff]  ;;  %v19468_v49 = vld [vmem:[#allocation48_spill] sm:$0xff] }
 0x238   : > { %v19467_v58 = vld [vmem:[#allocation49_spill] sm:$0xff]  ;;  %v2492_v8 = vmul.f32 %v11699_v15, %v19468_v49 }
 0x239   : > { %13269 = vmatmul.mubr.bf16.gmra.mrb[24].mxu1 %v5487_v16  ;;  %v19464_v16 = vld [vmem:[#allocation53_spill] sm:$0xff]  ;;  %v2490_v26 = vmul.f32 %v11697_v10, %v19467_v58  ;;  %v12050_v10 = vld [vmem:[%s18827_s0 + $0xd40] sm:$0xff] }
 0x23a   : > { %13272 = vmatprep.mubr.bf16.mxu1 %v5488_v13  ;;  %v5444_v21 = vmul.f32 %v12046_v14, %v19464_v16  ;;  %v5442_v13 = vmul.f32 %v12044_v28, %v19466_v37  ;;  %v19469_v16 = vld [vmem:[#allocation47_spill] sm:$0xff]  ;;  %v12049_v28 = vld [vmem:[%s18827_s0 + $0xd38] sm:$0xff] }
 0x23b   : > { %12953 = vmatmul.mubr.bf16.gmra.mrb[96].mxu0 %v2532_v18  ;;  %v11698_v18 = vld [vmem:[%s18827_s0 + $0x340] sm:$0xff]  ;;  %v2489_v44 = vmul.f32 %v11696_v51, %v19469_v16 }
 0x23c   : > { %12956 = vmatprep.mubr.bf16.mxu0 %v2533_v2  ;;  %v5489_v14 = vpack.c.bf16 %v5443_v27, %v5442_v13  ;;  %v5490_v24 = vpack.c.bf16 %v5445_v36, %v5444_v21  ;;  %v19470_v2 = vld [vmem:[#allocation46_spill] sm:$0xff]  ;;  %v12051_v27 = vld [vmem:[%s18827_s0 + $0xd48] sm:$0xff]  ;;  %v12048_v36 = vld [vmem:[%s18827_s0 + $0xd30] sm:$0xff] }
 0x23d   : > { %v2491_v37 = vmul.f32 %v11698_v18, %v19470_v2  ;;  %v2534_v15 = vpack.c.bf16 %v2490_v26, %v2489_v44  ;;  %v19471_v13 = vld [vmem:[#allocation60_spill] sm:$0xff]  ;;  %v11701_v18 = vld [vmem:[%s18827_s0 + $0x358] sm:$0xff]  ;;  %v19473_v16 = vld [vmem:[#allocation59_spill] sm:$0xff] }
 0x23e   : > { %v5447_v51 = vmul.f32 %v12049_v28, %v19471_v13  ;;  %v5449_v49 = vmul.f32 %v12051_v27, %v19473_v16  ;;  %v11703_v44 = vld [vmem:[%s18827_s0 + $0x368] sm:$0xff]  ;;  %v19474_v26 = vld [vmem:[#allocation58_spill] sm:$0xff]  ;;  %v19475_v28 = vld [vmem:[#allocation57_spill] sm:$0xff] }
 0x23f   : > { %v2535_v21 = vpack.c.bf16 %v2492_v8, %v2491_v37  ;;  %v11700_v8 = vld [vmem:[%s18827_s0 + $0x350] sm:$0xff]  ;;  %v2494_v37 = vmul.f32 %v11701_v18, %v19475_v28  ;;  %v19476_v13 = vld [vmem:[#allocation56_spill] sm:$0xff]  ;;  %v12054_v18 = vld [vmem:[%s18827_s0 + $0xd60] sm:$0xff] }
 0x240   : > { %v2496_v16 = vmul.f32 %v11703_v44, %v19476_v13 }
 0x241   : > { %13273 = vmatmul.mubr.bf16.gmra.mrb[28].mxu1 %v5489_v14  ;;  %v19472_v14 = vld [vmem:[#allocation61_spill] sm:$0xff] }
 0x242   : > { %13276 = vmatprep.mubr.bf16.mxu1 %v5490_v24  ;;  %v5448_v2 = vmul.f32 %v12050_v10, %v19472_v14  ;;  %v5446_v24 = vmul.f32 %v12048_v36, %v19474_v26  ;;  %v19477_v14 = vld [vmem:[#allocation55_spill] sm:$0xff]  ;;  %v12053_v36 = vld [vmem:[%s18827_s0 + $0xd58] sm:$0xff] }
 0x243   : > { %12957 = vmatmul.mubr.bf16.gmra.mrb[100].mxu0 %v2534_v15  ;;  %v11702_v15 = vld [vmem:[%s18827_s0 + $0x360] sm:$0xff]  ;;  %v2493_v58 = vmul.f32 %v11700_v8, %v19477_v14 }
 0x244   : > { %12960 = vmatprep.mubr.bf16.mxu0 %v2535_v21  ;;  %v5491_v10 = vpack.c.bf16 %v5447_v51, %v5446_v24  ;;  %v5492_v27 = vpack.c.bf16 %v5449_v49, %v5448_v2  ;;  %v19478_v21 = vld [vmem:[#allocation54_spill] sm:$0xff]  ;;  %v12055_v51 = vld [vmem:[%s18827_s0 + $0xd68] sm:$0xff]  ;;  %v12052_v49 = vld [vmem:[%s18827_s0 + $0xd50] sm:$0xff] }
 0x245   : > { %v2495_v26 = vmul.f32 %v11702_v15, %v19478_v21  ;;  %v2536_v44 = vpack.c.bf16 %v2494_v37, %v2493_v58  ;;  %v19479_v24 = vld [vmem:[#allocation68_spill] sm:$0xff]  ;;  %v11705_v15 = vld [vmem:[%s18827_s0 + $0x378] sm:$0xff]  ;;  %v19481_v14 = vld [vmem:[#allocation67_spill] sm:$0xff] }
 0x246   : > { %v5451_v8 = vmul.f32 %v12053_v36, %v19479_v24  ;;  %v5453_v13 = vmul.f32 %v12055_v51, %v19481_v14  ;;  %v11707_v58 = vld [vmem:[%s18827_s0 + $0x388] sm:$0xff]  ;;  %v19482_v37 = vld [vmem:[#allocation66_spill] sm:$0xff]  ;;  %v19483_v36 = vld [vmem:[#allocation65_spill] sm:$0xff] }
 0x247   : > { %v2537_v2 = vpack.c.bf16 %v2496_v16, %v2495_v26  ;;  %v11704_v16 = vld [vmem:[%s18827_s0 + $0x370] sm:$0xff]  ;;  %v2498_v26 = vmul.f32 %v11705_v15, %v19483_v36  ;;  %v19484_v24 = vld [vmem:[#allocation64_spill] sm:$0xff]  ;;  %v12058_v15 = vld [vmem:[%s18827_s0 + $0xd80] sm:$0xff] }
 0x248   : > { %v2500_v14 = vmul.f32 %v11707_v58, %v19484_v24 }
 0x249   : > { %13277 = vmatmul.mubr.bf16.gmra.mrb[32].mxu1 %v5491_v10  ;;  %v19480_v10 = vld [vmem:[#allocation69_spill] sm:$0xff] }
 0x24a   : > { %13280 = vmatprep.mubr.bf16.mxu1 %v5492_v27  ;;  %v5452_v21 = vmul.f32 %v12054_v18, %v19480_v10  ;;  %v5450_v27 = vmul.f32 %v12052_v49, %v19482_v37  ;;  %v19485_v10 = vld [vmem:[#allocation63_spill] sm:$0xff]  ;;  %v12057_v49 = vld [vmem:[%s18827_s0 + $0xd78] sm:$0xff] }
 0x24b   : > { %12961 = vmatmul.mubr.bf16.gmra.mrb[104].mxu0 %v2536_v44  ;;  %v11706_v44 = vld [vmem:[%s18827_s0 + $0x380] sm:$0xff]  ;;  %v2497_v28 = vmul.f32 %v11704_v16, %v19485_v10 }
 0x24c   : > { %12964 = vmatprep.mubr.bf16.mxu0 %v2537_v2  ;;  %v5493_v18 = vpack.c.bf16 %v5451_v8, %v5450_v27  ;;  %v5494_v51 = vpack.c.bf16 %v5453_v13, %v5452_v21  ;;  %v19486_v2 = vld [vmem:[#allocation62_spill] sm:$0xff]  ;;  %v12059_v8 = vld [vmem:[%s18827_s0 + $0xd88] sm:$0xff]  ;;  %v12056_v13 = vld [vmem:[%s18827_s0 + $0xd70] sm:$0xff] }
 0x24d   : > { %v2499_v37 = vmul.f32 %v11706_v44, %v19486_v2  ;;  %v2538_v58 = vpack.c.bf16 %v2498_v26, %v2497_v28  ;;  %v19487_v27 = vld [vmem:[#allocation76_spill] sm:$0xff]  ;;  %v11709_v44 = vld [vmem:[%s18827_s0 + $0x398] sm:$0xff]  ;;  %v19489_v10 = vld [vmem:[#allocation75_spill] sm:$0xff] }
 0x24e   : > { %v5455_v16 = vmul.f32 %v12057_v49, %v19487_v27  ;;  %v5457_v24 = vmul.f32 %v12059_v8, %v19489_v10  ;;  %v11711_v28 = vld [vmem:[%s18827_s0 + $0x3a8] sm:$0xff]  ;;  %v19490_v26 = vld [vmem:[#allocation74_spill] sm:$0xff]  ;;  %v19491_v49 = vld [vmem:[#allocation73_spill] sm:$0xff] }
 0x24f   : > { %v2539_v21 = vpack.c.bf16 %v2500_v14, %v2499_v37  ;;  %v11708_v14 = vld [vmem:[%s18827_s0 + $0x390] sm:$0xff]  ;;  %v2502_v37 = vmul.f32 %v11709_v44, %v19491_v49  ;;  %v19492_v27 = vld [vmem:[#allocation72_spill] sm:$0xff]  ;;  %v12062_v44 = vld [vmem:[%s18827_s0 + $0xda0] sm:$0xff] }
 0x250   : > { %v2504_v10 = vmul.f32 %v11711_v28, %v19492_v27 }
 0x251   : > { %13281 = vmatmul.mubr.bf16.gmra.mrb[36].mxu1 %v5493_v18  ;;  %v19488_v18 = vld [vmem:[#allocation77_spill] sm:$0xff] }
 0x252   : > { %13284 = vmatprep.mubr.bf16.mxu1 %v5494_v51  ;;  %v5456_v2 = vmul.f32 %v12058_v15, %v19488_v18  ;;  %v5454_v51 = vmul.f32 %v12056_v13, %v19490_v26  ;;  %v19493_v18 = vld [vmem:[#allocation71_spill] sm:$0xff]  ;;  %v12061_v13 = vld [vmem:[%s18827_s0 + $0xd98] sm:$0xff] }
 0x253   : > { %12965 = vmatmul.mubr.bf16.gmra.mrb[108].mxu0 %v2538_v58  ;;  %v11710_v58 = vld [vmem:[%s18827_s0 + $0x3a0] sm:$0xff]  ;;  %v2501_v36 = vmul.f32 %v11708_v14, %v19493_v18  ;;  %v11713_v14 = vld [vmem:[%s18827_s0 + $0x3b8] sm:$0xff] }
 0x254   : > { %12968 = vmatprep.mubr.bf16.mxu0 %v2539_v21  ;;  %v5495_v15 = vpack.c.bf16 %v5455_v16, %v5454_v51  ;;  %v5496_v8 = vpack.c.bf16 %v5457_v24, %v5456_v2  ;;  %v19494_v21 = vld [vmem:[#allocation70_spill] sm:$0xff]  ;;  %v12063_v16 = vld [vmem:[%s18827_s0 + $0xda8] sm:$0xff]  ;;  %v12060_v24 = vld [vmem:[%s18827_s0 + $0xd90] sm:$0xff]  ;;  %v5459_v51 = vmul.f32 %v12061_v13, %v19398_v63 }
 0x255   : > { %v2503_v26 = vmul.f32 %v11710_v58, %v19494_v21  ;;  %v2540_v28 = vpack.c.bf16 %v2502_v37, %v2501_v36  ;;  %v19495_v58 = vld [vmem:[#allocation85_spill] sm:$0xff]  ;;  %v19496_v21 = vld [vmem:[#allocation83_spill] sm:$0xff]  ;;  %v11715_v36 = vld [vmem:[%s18827_s0 + $0x3c8] sm:$0xff] }
 0x256   : > { %v5461_v18 = vmul.f32 %v12063_v16, %v19496_v21  ;;  %v19497_v37 = vld [vmem:[#allocation82_spill] sm:$0xff]  ;;  %v11712_v63 = vld [vmem:[%s18827_s0 + $0x3b0] sm:$0xff] }
 0x257   : > { %v2541_v2 = vpack.c.bf16 %v2504_v10, %v2503_v26  ;;  %v19498_v10 = vld [vmem:[#allocation81_spill] sm:$0xff]  ;;  %v11714_v26 = vld [vmem:[%s18827_s0 + $0x3c0] sm:$0xff] }
 0x258   : > { %v2506_v13 = vmul.f32 %v11713_v14, %v19498_v10  ;;  %v12066_v14 = vld [vmem:[%s18827_s0 + $0xdc0] sm:$0xff] }
 0x259   : > { %13285 = vmatmul.mubr.bf16.gmra.mrb[40].mxu1 %v5495_v15  ;;  %v5460_v15 = vmul.f32 %v12062_v44, %v19495_v58  ;;  %v19500_v58 = vld [vmem:[#allocation79_spill] sm:$0xff] }
 0x25a   : > { %13288 = vmatprep.mubr.bf16.mxu1 %v5496_v8  ;;  %v5458_v8 = vmul.f32 %v12060_v24, %v19497_v37  ;;  %v2505_v27 = vmul.f32 %v11712_v63, %v19500_v58  ;;  %v12065_v24 = vld [vmem:[%s18827_s0 + $0xdb8] sm:$0xff] }
 0x25b   : > { %12969 = vmatmul.mubr.bf16.gmra.mrb[112].mxu0 %v2540_v28  ;;  %v19499_v28 = vld [vmem:[#allocation80_spill] sm:$0xff]  ;;  %v5498_v16 = vpack.c.bf16 %v5461_v18, %v5460_v15  ;;  %v12064_v18 = vld [vmem:[%s18827_s0 + $0xdb0] sm:$0xff]  ;;  %v11717_v63 = vld [vmem:[%s18827_s0 + $0x3d8] sm:$0xff] }
 0x25c   : > { %12972 = vmatprep.mubr.bf16.mxu0 %v2541_v2  ;;  %v5497_v44 = vpack.c.bf16 %v5459_v51, %v5458_v8  ;;  %v2508_v21 = vmul.f32 %v11715_v36, %v19499_v28  ;;  %v19501_v2 = vld [vmem:[#allocation78_spill] sm:$0xff]  ;;  %v12067_v51 = vld [vmem:[%s18827_s0 + $0xdc8] sm:$0xff]  ;;  %v2542_v36 = vpack.c.bf16 %v2506_v13, %v2505_v27  ;;  %v5463_v8 = vmul.f32 %v12065_v24, %v19409_v3  ;;  %v11716_v3 = vld [vmem:[%s18827_s0 + $0x3d0] sm:$0xff] }
 0x25d   : > { %v2507_v37 = vmul.f32 %v11714_v26, %v19501_v2  ;;  %v5464_v26 = vmul.f32 %v12066_v14, %v19411_v62  ;;  %v11719_v27 = vld [vmem:[%s18827_s0 + $0x3e8] sm:$0xff]  ;;  %v5462_v13 = vmul.f32 %v12064_v18, %v19414_v47  ;;  %v11718_v24 = vld [vmem:[%s18827_s0 + $0x3e0] sm:$0xff]  ;;  %v12069_v47 = vld [vmem:[%s18827_s0 + $0xdd8] sm:$0xff] }
 0x25e   : > { %v19503_v14 = vld [vmem:[#allocation87_spill] sm:$0xff] }
 0x25f   : > { %v2543_v15 = vpack.c.bf16 %v2508_v21, %v2507_v37  ;;  %v19502_v21 = vld [vmem:[#allocation89_spill] sm:$0xff]  ;;  %v5499_v62 = vpack.c.bf16 %v5463_v8, %v5462_v13  ;;  %v12071_v8 = vld [vmem:[%s18827_s0 + $0xde8] sm:$0xff]  ;;  %v11721_v13 = vld [vmem:[%s18827_s0 + $0x3f8] sm:$0xff] }
 0x261   : > { %13289 = vmatmul.mubr.bf16.gmra.mrb[44].mxu1 %v5497_v44  ;;  %v5465_v44 = vmul.f32 %v12067_v51, %v19412_v6  ;;  %v2512_v6 = vmul.f32 %v11719_v27, %v19410_v19  ;;  %v2509_v51 = vmul.f32 %v11716_v3, %v19503_v14  ;;  %v5467_v27 = vmul.f32 %v12069_v47, %v15207_v30  ;;  %v19505_v3 = vld [vmem:[#allocation105_spill] sm:$0xff] }
 0x262   : > { %13292 = vmatprep.mubr.bf16.mxu1 %v5498_v16  ;;  %v2510_v16 = vmul.f32 %v11717_v63, %v19502_v21 }
 0x263   : > { %12973 = vmatmul.mubr.bf16.gmra.mrb[116].mxu0 %v2542_v36  ;;  %v5500_v37 = vpack.c.bf16 %v5465_v44, %v5464_v26  ;;  %v19504_v36 = vld [vmem:[#allocation86_spill] sm:$0xff]  ;;  %v12068_v26 = vld [vmem:[%s18827_s0 + $0xdd0] sm:$0xff] }
 0x264   : > { %12976 = vmatprep.mubr.bf16.mxu0 %v2543_v15  ;;  %v2511_v18 = vmul.f32 %v11718_v24, %v19504_v36  ;;  %v12070_v15 = vld [vmem:[%s18827_s0 + $0xde0] sm:$0xff]  ;;  %v2544_v63 = vpack.c.bf16 %v2510_v16, %v2509_v51  ;;  %v5466_v30 = vmul.f32 %v12068_v26, %v19420_v7  ;;  %v12099_v7 = vld [vmem:[%s18827_s0 + $0xe08] sm:$0xff] }
 0x265   : > { %v5468_v24 = vmul.f32 %v12070_v15, %v19505_v3  ;;  %v11746_v16 = vld [vmem:[%s18827_s0 + $0x400] sm:$0xff] }
 0x266   : > { %v2545_v44 = vpack.c.bf16 %v2512_v6, %v2511_v18  ;;  %v11720_v6 = vld [vmem:[%s18827_s0 + $0x3f0] sm:$0xff]  ;;  %v19507_v51 = vld [vmem:[#allocation99_spill] sm:$0xff]  ;;  %v5501_v18 = vpack.c.bf16 %v5467_v27, %v5466_v30  ;;  %v3287_v15 = vmul.f32 %v11746_v16, %v16038_v32  ;;  %v12073_v27 = vld [vmem:[%s18827_s0 + $0xdf8] sm:$0xff] }
 0x267   : > { %v2514_v47 = vmul.f32 %v11721_v13, %v19507_v51  ;;  %v19508_v3 = vld [vmem:[#allocation95_spill] sm:$0xff]  ;;  %v11749_v13 = vld [vmem:[%s18827_s0 + $0x418] sm:$0xff]  ;;  %v19509_v16 = vld [vmem:[#allocation104_spill] sm:$0xff] }
 0x268   : > { %v12098_v30 = vld [vmem:[%s18827_s0 + $0xe00] sm:$0xff]  ;;  %v19512_v32 = vld [vmem:[#allocation96_spill] sm:$0xff] }
 0x269   : > { %13293 = vmatmul.mubr.bf16.gmra.mrb[48].mxu1 %v5499_v62  ;;  %v19506_v62 = vld [vmem:[#allocation103_spill] sm:$0xff] }
 0x26a   : > { %13296 = vmatprep.mubr.bf16.mxu1 %v5500_v37  ;;  %v5469_v36 = vmul.f32 %v12071_v8, %v19506_v62  ;;  %v11747_v37 = vld [vmem:[%s18827_s0 + $0x408] sm:$0xff]  ;;  %v2513_v62 = vmul.f32 %v11720_v6, %v19508_v3  ;;  %v6116_v6 = vmul.f32 %v12099_v7, %v19426_v53  ;;  %v12101_v7 = vld [vmem:[%s18827_s0 + $0xe18] sm:$0xff] }
 0x26b   : > { %12977 = vmatmul.mubr.bf16.gmra.mrb[120].mxu0 %v2544_v63  ;;  %v3288_v8 = vmul.f32 %v11747_v37, %v16044_v35 }
 0x26c   : > { %12980 = vmatprep.mubr.bf16.mxu0 %v2545_v44  ;;  %v5502_v63 = vpack.c.bf16 %v5469_v36, %v5468_v24  ;;  %v12072_v44 = vld [vmem:[%s18827_s0 + $0xdf0] sm:$0xff]  ;;  %v2546_v26 = vpack.c.bf16 %v2514_v47, %v2513_v62  ;;  %v11751_v47 = vld [vmem:[%s18827_s0 + $0x428] sm:$0xff] }
 0x26d   : > { %v11748_v36 = vld [vmem:[%s18827_s0 + $0x410] sm:$0xff]  ;;  %v3351_v24 = vpack.c.bf16 %v3288_v8, %v3287_v15  ;;  %v5470_v37 = vmul.f32 %v12072_v44, %v19509_v16  ;;  %v3290_v15 = vmul.f32 %v11749_v13, %v19512_v32  ;;  %v6115_v8 = vmul.f32 %v12098_v30, %v14315_v1  ;;  %v11750_v44 = vld [vmem:[%s18827_s0 + $0x420] sm:$0xff]  ;;  %v14110_v32 = vld [vmem:[%s14221_s18 + $0x208] sm:$0xff]  }
 0x26e   : > { %v19511_v62 = vld [vmem:[#allocation97_spill] sm:$0xff]  ;;  %v19513_v16 = vld [vmem:[#allocation107_spill] sm:$0xff] }
 0x26f   : > { %v3289_v35 = vmul.f32 %v11748_v36, %v19511_v62  ;;  %v3292_v53 = vmul.f32 %v11751_v47, %v19513_v16  ;;  %v12103_v36 = vld [vmem:[%s18827_s0 + $0xe28] sm:$0xff]  ;;  %v12100_v1 = vld [vmem:[%s18827_s0 + $0xe10] sm:$0xff]  ;;  %v11786_v62 = vld [vmem:[%s18827_s0 + $0x540] sm:$0xff] }
 0x270   : > { %v11752_v47 = vld [vmem:[%s18827_s0 + $0x430] sm:$0xff] }
 0x271   : > { %13297 = vmatmul.mubr.bf16.gmra.mrb[52].mxu1 %v5501_v18  ;;  %v19510_v18 = vld [vmem:[#allocation106_spill] sm:$0xff]  ;;  %v3352_v13 = vpack.c.bf16 %v3290_v15, %v3289_v35  ;;  %v6120_v35 = vmul.f32 %v12103_v36, %v14333_v17  ;;  %v14119_v17 = vld [vmem:[%s14221_s18 + $0xc8] sm:$0xff]   ;;  %v19517_v36 = vld [vmem:[#allocation111_spill] sm:$0xff] }
 0x272   : > { %13300 = vmatprep.mubr.bf16.mxu1 %v5502_v63  ;;  %v5471_v63 = vmul.f32 %v12073_v27, %v19510_v18  ;;  %v19514_v27 = vld [vmem:[#allocation110_spill] sm:$0xff] }
 0x273   : > { %12981 = vmatmul.mubr.bf16.gmra.mrb[124].mxu0 %v2546_v26  ;;  %v3291_v18 = vmul.f32 %v11750_v44, %v19514_v27 }
 0x274   : > { %13000 = vmatprep.mubr.bf16.mxu0 %v3351_v24  ;;  %v5503_v26 = vpack.c.bf16 %v5471_v63, %v5470_v37  ;;  %v6179_v24 = vpack.c.bf16 %v6116_v6, %v6115_v8  ;;  %v6118_v37 = vmul.f32 %v12101_v7, %v19427_v55  ;;  %v12102_v6 = vld [vmem:[%s18827_s0 + $0xe20] sm:$0xff]  ;;  %v11753_v63 = vld [vmem:[%s18827_s0 + $0x438] sm:$0xff]  ;;  %v11755_v55 = vld [vmem:[%s18827_s0 + $0x448] sm:$0xff] }
 0x275   : > { %v3353_v30 = vpack.c.bf16 %v3292_v53, %v3291_v18  ;;  %v6117_v18 = vmul.f32 %v12100_v1, %v19428_v48  ;;  %v6119_v15 = vmul.f32 %v12102_v6, %v14324_v11  ;;  %v19515_v8 = vld [vmem:[#allocation109_spill] sm:$0xff]  ;;  %v11754_v7 = vld [vmem:[%s18827_s0 + $0x440] sm:$0xff]  ;;  %v12105_v11 = vld [vmem:[%s18827_s0 + $0xe38] sm:$0xff] }
 0x276   : > { %v3293_v44 = vmul.f32 %v11752_v47, %v19515_v8  ;;  %v12104_v6 = vld [vmem:[%s18827_s0 + $0xe30] sm:$0xff]  ;;  %v12106_v47 = vld [vmem:[%s18827_s0 + $0xe40] sm:$0xff] }
 0x277   : > { %v6181_v48 = vpack.c.bf16 %v6120_v35, %v6119_v15  ;;  %v6122_v35 = vmul.f32 %v12105_v11, %v14408_v60  ;;  %v14111_v15 = vld [vmem:[%s14221_s18 + $0x210] sm:$0xff]   ;;  %v11759_v60 = vld [vmem:[%s18827_s0 + $0x468] sm:$0xff]  ;;  %v11758_v11 = vld [vmem:[%s18827_s0 + $0x460] sm:$0xff] }
 0x279   : > { %13301 = vmatmul.mubr.bf16.gmra.mrb[56].mxu1 %v5503_v26  ;;  %v19516_v26 = vld [vmem:[#allocation108_spill] sm:$0xff] }
 0x27a   : > { %13320 = vmatprep.mubr.bf16.mxu1 %v6179_v24  ;;  %v3294_v53 = vmul.f32 %v11753_v63, %v19516_v26  ;;  %v6180_v24 = vpack.c.bf16 %v6118_v37, %v6117_v18  ;;  %v14120_v18 = vld [vmem:[%s14221_s18 + $0xd0] sm:$0xff]  }
 0x27b   : > { %13001 = vmatmul.mubr.bf16.vlgmr.msra.gmra.mrb[64].mxu0 %v3352_v13  ;;  %v3296_v13 = vmul.f32 %v11755_v55, %v19517_v36  ;;  %v11756_v55 = vld [vmem:[%s18827_s0 + $0x450] sm:$0xff] }
 0x27c   : > { %13004 = vmatprep.mubr.bf16.mxu0 %v3353_v30  ;;  %13065 = vmatpush3.bf16.msra.mxu0 %v16235_v12  ;;  %v19518_v12 = vld [vmem:[#allocation114_spill] sm:$0xff]  ;;  %v12107_v30 = vld [vmem:[%s18827_s0 + $0xe48] sm:$0xff]  ;;  %v3354_v37 = vpack.c.bf16 %v3294_v53, %v3293_v44  ;;  %v6121_v53 = vmul.f32 %v12104_v6, %v14399_v52 }
 0x27d   : > { %13066 = vmatprep.subr.bf16.mxu0 %v14119_v17  ;;  %v3295_v1 = vmul.f32 %v11754_v7, %v19518_v12  ;;  %v6124_v44 = vmul.f32 %v12107_v30, %v14403_v56  ;;  %v6123_v7 = vmul.f32 %v12106_v47, %v14392_v46  ;;  %v14121_v56 = vld [vmem:[%s14221_s18 + $0xd8] sm:$0xff]   ;;  %v19521_v30 = vld [vmem:[#allocation115_spill] sm:$0xff] }
 0x27e   : > { %v12109_v46 = vld [vmem:[%s18827_s0 + $0xe58] sm:$0xff] }
 0x27f   : > { %v3355_v63 = vpack.c.bf16 %v3296_v13, %v3295_v1  ;;  %v19520_v13 = vld [vmem:[#allocation112_spill] sm:$0xff]  ;;  %v6182_v1 = vpack.c.bf16 %v6122_v35, %v6121_v53  ;;  %v6183_v52 = vpack.c.bf16 %v6124_v44, %v6123_v7  ;;  %v19522_v6 = vld [vmem:[#allocation118_spill] sm:$0xff]  ;;  %v6126_v44 = vmul.f32 %v12109_v46, %v14465_v50  ;;  %v14122_v7 = vld [vmem:[%s14221_s18 + $0xe0] sm:$0xff]  }
 0x280   : > { %13067 = vmatpush3.bf16.msra.mxu0 %v14119_v17  ;;  %v19519_v17 = vld [vmem:[#allocation113_spill] sm:$0xff]  ;;  %v3299_v47 = vmul.f32 %v11758_v11, %v19522_v6  ;;  %v11761_v53 = vld [vmem:[%s18827_s0 + $0x478] sm:$0xff]  ;;  %v11763_v50 = vld [vmem:[%s18827_s0 + $0x488] sm:$0xff] }
 0x281   : > { %13321 = vmatmul.mubr.bf16.vlgmr.msra.gmra.mrb[60].mxu1 %v6180_v24  ;;  %13068 = vmatprep.subr.bf16.mxu0 %v14120_v18  ;;  %v3297_v24 = vmul.f32 %v11756_v55, %v19519_v17  ;;  %v12108_v55 = vld [vmem:[%s18827_s0 + $0xe50] sm:$0xff]  ;;  %v11762_v46 = vld [vmem:[%s18827_s0 + $0x480] sm:$0xff] }
 0x282   : > { %13385 = vmatpush3.bf16.msra.mxu1 %v16239_v59  ;;  %13324 = vmatprep.mubr.bf16.mxu1 %v6181_v48  ;;  %v11757_v59 = vld [vmem:[%s18827_s0 + $0x458] sm:$0xff] }
 0x283   : > { %13386 = vmatprep.subr.bf16.mxu1 %v14110_v32  ;;  %13005 = vmatmul.mubr.bf16.gmra.mrb[68].mxu0 %v3354_v37  ;;  %v3298_v48 = vmul.f32 %v11757_v59, %v19520_v13  ;;  %v3300_v37 = vmul.f32 %v11759_v60, %v19521_v30  ;;  %v12110_v59 = vld [vmem:[%s18827_s0 + $0xe60] sm:$0xff]  ;;  %v11760_v60 = vld [vmem:[%s18827_s0 + $0x470] sm:$0xff] }
 0x284   : > { %13008 = vmatprep.mubr.bf16.mxu0 %v3355_v63  ;;  %13069 = vmatpush3.bf16.msra.mxu0 %v14120_v18  ;;  %v14112_v63 = vld [vmem:[%s14221_s18 + $0x218] sm:$0xff]   ;;  %v6127_v11 = vmul.f32 %v12110_v59, %v14454_v33 }
 0x285   : > { %13070 = vmatprep.subr.bf16.mxu0 %v14121_v56  ;;  %v3356_v35 = vpack.c.bf16 %v3298_v48, %v3297_v24  ;;  %v3357_v18 = vpack.c.bf16 %v3300_v37, %v3299_v47  ;;  %v14113_v24 = vld [vmem:[%s14221_s18 + $0x220] sm:$0xff]   ;;  %v6125_v48 = vmul.f32 %v12108_v55, %v14459_v40  ;;  %v19524_v37 = vld [vmem:[#allocation116_spill] sm:$0xff]  ;;  %v12113_v33 = vld [vmem:[%s18827_s0 + $0xe78] sm:$0xff] }
 0x286   : > { %13387 = vmatpush3.bf16.msra.mxu1 %v14110_v32  ;;  %v12111_v32 = vld [vmem:[%s18827_s0 + $0xe68] sm:$0xff]  ;;  %v19526_v55 = vld [vmem:[#allocation122_spill] sm:$0xff] }
 0x287   : > { %13388 = vmatprep.subr.bf16.mxu1 %v14111_v15  ;;  %v6184_v47 = vpack.c.bf16 %v6126_v44, %v6125_v48  ;;  %v3303_v59 = vmul.f32 %v11762_v46, %v19526_v55  ;;  %v11765_v48 = vld [vmem:[%s18827_s0 + $0x498] sm:$0xff] }
 0x288   : > { %13071 = vmatpush3.bf16.msra.mxu0 %v14121_v56  ;;  %v19523_v56 = vld [vmem:[#allocation117_spill] sm:$0xff] }
 0x289   : > { %13325 = vmatmul.mubr.bf16.gmra.mrb[0].mxu1 %v6182_v1  ;;  %13072 = vmatprep.subr.bf16.mxu0 %v14122_v7  ;;  %v3301_v1 = vmul.f32 %v11760_v60, %v19523_v56  ;;  %v12112_v60 = vld [vmem:[%s18827_s0 + $0xe70] sm:$0xff] }
 0x28a   : > { %13328 = vmatprep.mubr.bf16.mxu1 %v6183_v52  ;;  %13389 = vmatpush3.bf16.msra.mxu1 %v14111_v15  ;;  %v6128_v15 = vmul.f32 %v12111_v32, %v14462_v42  ;;  %v3302_v52 = vmul.f32 %v11761_v53, %v19524_v37  ;;  %v14123_v42 = vld [vmem:[%s14221_s18 + $0xe8] sm:$0xff]   ;;  %v19525_v32 = vld [vmem:[#allocation119_spill] sm:$0xff] }
 0x28b   : > { %13390 = vmatprep.subr.bf16.mxu1 %v14112_v63  ;;  %13009 = vmatmul.mubr.bf16.gmra.mrb[72].mxu0 %v3356_v35  ;;  %v3304_v35 = vmul.f32 %v11763_v50, %v19525_v32  ;;  %v12114_v53 = vld [vmem:[%s18827_s0 + $0xe80] sm:$0xff]  ;;  %v11764_v50 = vld [vmem:[%s18827_s0 + $0x490] sm:$0xff] }
 0x28c   : > { %13012 = vmatprep.mubr.bf16.mxu0 %v3357_v18  ;;  %13073 = vmatpush3.bf16.msra.mxu0 %v14122_v7  ;;  %v14114_v18 = vld [vmem:[%s14221_s18 + $0x228] sm:$0xff]   ;;  %v6185_v40 = vpack.c.bf16 %v6128_v15, %v6127_v11  ;;  %v3358_v44 = vpack.c.bf16 %v3302_v52, %v3301_v1  ;;  %v6130_v15 = vmul.f32 %v12113_v33, %v14529_v5  ;;  %v14124_v11 = vld [vmem:[%s14221_s18 + $0xf0] sm:$0xff]   ;;  %v11766_v33 = vld [vmem:[%s18827_s0 + $0x4a0] sm:$0xff] }
 0x28d   : > { %13074 = vmatprep.subr.bf16.mxu0 %v14123_v42  ;;  %v3359_v7 = vpack.c.bf16 %v3304_v35, %v3303_v59  ;;  %v14115_v1 = vld [vmem:[%s14221_s18 + $0x230] sm:$0xff]   ;;  %v11767_v5 = vld [vmem:[%s18827_s0 + $0x4a8] sm:$0xff]  ;;  %v6129_v52 = vmul.f32 %v12112_v60, %v14515_v41  ;;  %v6131_v46 = vmul.f32 %v12114_v53, %v14510_v34  ;;  %v12117_v34 = vld [vmem:[%s18827_s0 + $0xe98] sm:$0xff] }
 0x28e   : > { %13391 = vmatpush3.bf16.msra.mxu1 %v14112_v63  ;;  %v12115_v63 = vld [vmem:[%s18827_s0 + $0xe88] sm:$0xff]  ;;  %v19530_v60 = vld [vmem:[#allocation123_spill] sm:$0xff] }
 0x28f   : > { %13392 = vmatprep.subr.bf16.mxu1 %v14113_v24  ;;  %v19528_v35 = vld [vmem:[#allocation120_spill] sm:$0xff]  ;;  %v6186_v59 = vpack.c.bf16 %v6130_v15, %v6129_v52  ;;  %v3307_v53 = vmul.f32 %v11766_v33, %v19530_v60  ;;  %v12116_v15 = vld [vmem:[%s18827_s0 + $0xe90] sm:$0xff]  ;;  %v11769_v52 = vld [vmem:[%s18827_s0 + $0x4b8] sm:$0xff] }
 0x290   : > { %13075 = vmatpush3.bf16.msra.mxu0 %v14123_v42  ;;  %v19527_v42 = vld [vmem:[#allocation121_spill] sm:$0xff] }
 0x291   : > { %13329 = vmatmul.mubr.bf16.gmra.mrb[4].mxu1 %v6184_v47  ;;  %13076 = vmatprep.subr.bf16.mxu0 %v14124_v11  ;;  %v3305_v47 = vmul.f32 %v11764_v50, %v19527_v42  ;;  %v12119_v50 = vld [vmem:[%s18827_s0 + $0xea8] sm:$0xff] }
 0x292   : > { %13332 = vmatprep.mubr.bf16.mxu1 %v6185_v40  ;;  %13393 = vmatpush3.bf16.msra.mxu1 %v14113_v24  ;;  %v6132_v24 = vmul.f32 %v12115_v63, %v14521_v54  ;;  %v3306_v40 = vmul.f32 %v11765_v48, %v19528_v35  ;;  %v14125_v54 = vld [vmem:[%s14221_s18 + $0xf8] sm:$0xff]   ;;  %v19529_v63 = vld [vmem:[#allocation13_spill] sm:$0xff] }
 0x293   : > { %13394 = vmatprep.subr.bf16.mxu1 %v14114_v18  ;;  %13013 = vmatmul.mubr.bf16.gmra.mrb[76].mxu0 %v3358_v44  ;;  %v3308_v44 = vmul.f32 %v11767_v5, %v19529_v63  ;;  %v11768_v5 = vld [vmem:[%s18827_s0 + $0x4b0] sm:$0xff] }
 0x294   : > { %13016 = vmatprep.mubr.bf16.mxu0 %v3359_v7  ;;  %13077 = vmatpush3.bf16.msra.mxu0 %v14124_v11  ;;  %v14116_v7 = vld [vmem:[%s14221_s18 + $0x238] sm:$0xff]   ;;  %v6187_v41 = vpack.c.bf16 %v6132_v24, %v6131_v46  ;;  %v6134_v11 = vmul.f32 %v12117_v34, %v19435_v39  ;;  %v12118_v24 = vld [vmem:[%s18827_s0 + $0xea0] sm:$0xff]  ;;  %v6136_v46 = vmul.f32 %v12119_v50, %v19436_v43  ;;  %v11771_v39 = vld [vmem:[%s18827_s0 + $0x4c8] sm:$0xff] }
 0x295   : > { %13078 = vmatprep.subr.bf16.mxu0 %v14125_v54  ;;  %v3361_v48 = vpack.c.bf16 %v3308_v44, %v3307_v53  ;;  %v11770_v44 = vld [vmem:[%s18827_s0 + $0x4c0] sm:$0xff]  ;;  %v19533_v43 = vld [vmem:[#allocation20_spill] sm:$0xff]  ;;  %v12121_v50 = vld [vmem:[%s18827_s0 + $0xeb8] sm:$0xff] }
 0x296   : > { %13395 = vmatpush3.bf16.msra.mxu1 %v14114_v18  ;;  %v3360_v18 = vpack.c.bf16 %v3306_v40, %v3305_v47  ;;  %v6135_v47 = vmul.f32 %v12118_v24, %v19438_v38  ;;  %v19531_v40 = vld [vmem:[#allocation11_spill] sm:$0xff]  ;;  %v3312_v34 = vmul.f32 %v11771_v39, %v19533_v43  ;;  %v11775_v39 = vld [vmem:[%s18827_s0 + $0x4e8] sm:$0xff] }
 0x297   : > { %13396 = vmatprep.subr.bf16.mxu1 %v14115_v1  ;;  %v3309_v33 = vmul.f32 %v11768_v5, %v19531_v40  ;;  %v12122_v24 = vld [vmem:[%s18827_s0 + $0xec0] sm:$0xff]  ;;  %v11772_v5 = vld [vmem:[%s18827_s0 + $0x4d0] sm:$0xff] }
 0x298   : > { %13079 = vmatpush3.bf16.msra.mxu0 %v14125_v54  ;;  %v19532_v54 = vld [vmem:[#allocation12_spill] sm:$0xff]  ;;  %v6189_v53 = vpack.c.bf16 %v6136_v46, %v6135_v47  ;;  %v19535_v47 = vld [vmem:[#allocation125_spill] sm:$0xff] }
 0x299   : > { %13333 = vmatmul.mubr.bf16.gmra.mrb[8].mxu1 %v6186_v59  ;;  %v3310_v59 = vmul.f32 %v11769_v52, %v19532_v54  ;;  %v11773_v52 = vld [vmem:[%s18827_s0 + $0x4d8] sm:$0xff] }
 0x29a   : > { %13336 = vmatprep.mubr.bf16.mxu1 %v6187_v41  ;;  %13397 = vmatpush3.bf16.msra.mxu1 %v14115_v1  ;;  %v6133_v1 = vmul.f32 %v12116_v15, %v19437_v20  ;;  %v19534_v20 = vld [vmem:[#allocation126_spill] sm:$0xff] }
 0x29b   : > { %13398 = vmatprep.subr.bf16.mxu1 %v14116_v7  ;;  %13017 = vmatmul.mubr.bf16.gmra.mrb[80].mxu0 %v3360_v18  ;;  %v3311_v38 = vmul.f32 %v11770_v44, %v19534_v20  ;;  %v12123_v18 = vld [vmem:[%s18827_s0 + $0xec8] sm:$0xff]  ;;  %v3362_v15 = vpack.c.bf16 %v3310_v59, %v3309_v33  ;;  %v3313_v33 = vmul.f32 %v11772_v5, %v19535_v47  ;;  %v11776_v5 = vld [vmem:[%s18827_s0 + $0x4f0] sm:$0xff] }
 0x29c   : > { %13020 = vmatprep.mubr.bf16.mxu0 %v3361_v48  ;;  %v6188_v41 = vpack.c.bf16 %v6134_v11, %v6133_v1  ;;  %v6138_v11 = vmul.f32 %v12121_v50, %v19443_v4  ;;  %v6140_v46 = vmul.f32 %v12123_v18, %v19444_v31  ;;  %v6139_v1 = vmul.f32 %v12122_v24, %v19446_v57  ;;  %v19536_v59 = vld [vmem:[#allocation124_spill] sm:$0xff]  ;;  %v12126_v24 = vld [vmem:[%s18827_s0 + $0xee0] sm:$0xff] }
 0x29d   : > { %v3363_v48 = vpack.c.bf16 %v3312_v34, %v3311_v38  ;;  %v3314_v44 = vmul.f32 %v11773_v52, %v19536_v59  ;;  %v12125_v38 = vld [vmem:[%s18827_s0 + $0xed8] sm:$0xff]  ;;  %v12127_v57 = vld [vmem:[%s18827_s0 + $0xee8] sm:$0xff] }
 0x29e   : > { %13399 = vmatpush3.bf16.msra.mxu1 %v14116_v7  ;;  %v12120_v7 = vld [vmem:[%s18827_s0 + $0xeb0] sm:$0xff]  ;;  %v6191_v50 = vpack.c.bf16 %v6140_v46, %v6139_v1  ;;  %v11777_v52 = vld [vmem:[%s18827_s0 + $0x4f8] sm:$0xff]  ;;  %v6144_v46 = vmul.f32 %v12127_v57, %v19452_v45 }
 0x29f   : > { %v6137_v4 = vmul.f32 %v12120_v7, %v19445_v61  ;;  %v19538_v61 = vld [vmem:[#allocation130_spill] sm:$0xff]  ;;  %v12124_v7 = vld [vmem:[%s18827_s0 + $0xed0] sm:$0xff] }
 0x2a0   : > { %v19539_v1 = vld [vmem:[#allocation129_spill] sm:$0xff] }
 0x2a1   : > { %13337 = vmatmul.mubr.bf16.gmra.mrb[12].mxu1 %v6188_v41  ;;  %v11774_v41 = vld [vmem:[%s18827_s0 + $0x4e0] sm:$0xff]  ;;  %v6190_v34 = vpack.c.bf16 %v6138_v11, %v6137_v4  ;;  %v6142_v11 = vmul.f32 %v12125_v38, %v19451_v0  ;;  %v6141_v0 = vmul.f32 %v12124_v7, %v19453_v22  ;;  %v6143_v4 = vmul.f32 %v12126_v24, %v19454_v9  ;;  %v19542_v22 = vld [vmem:[#allocation134_spill] sm:$0xff]  ;;  %v12131_v9 = vld [vmem:[%s18827_s0 + $0xf08] sm:$0xff] }
 0x2a2   : > { %13340 = vmatprep.mubr.bf16.mxu1 %v6189_v53  ;;  %v19537_v53 = vld [vmem:[#allocation127_spill] sm:$0xff]  ;;  %v3315_v18 = vmul.f32 %v11774_v41, %v19538_v61  ;;  %v12128_v7 = vld [vmem:[%s18827_s0 + $0xef0] sm:$0xff] }
 0x2a3   : > { %13021 = vmatmul.mubr.bf16.gmra.mrb[84].mxu0 %v3362_v15  ;;  %v3316_v31 = vmul.f32 %v11775_v39, %v19537_v53  ;;  %v3364_v15 = vpack.c.bf16 %v3314_v44, %v3313_v33  ;;  %v11779_v39 = vld [vmem:[%s18827_s0 + $0x508] sm:$0xff]  ;;  %v3317_v33 = vmul.f32 %v11776_v5, %v19539_v1  ;;  %v6193_v38 = vpack.c.bf16 %v6144_v46, %v6143_v4  ;;  %v12130_v24 = vld [vmem:[%s18827_s0 + $0xf00] sm:$0xff]  ;;  %v11780_v5 = vld [vmem:[%s18827_s0 + $0x510] sm:$0xff] }
 0x2a4   : > { %13024 = vmatprep.mubr.bf16.mxu0 %v3363_v48  ;;  %v19540_v44 = vld [vmem:[#allocation128_spill] sm:$0xff]  ;;  %v6148_v46 = vmul.f32 %v12131_v9, %v19460_v23  ;;  %v12133_v9 = vld [vmem:[%s18827_s0 + $0xf18] sm:$0xff] }
 0x2a5   : > { %v3365_v48 = vpack.c.bf16 %v3316_v31, %v3315_v18  ;;  %v3318_v41 = vmul.f32 %v11777_v52, %v19540_v44  ;;  %v6192_v31 = vpack.c.bf16 %v6142_v11, %v6141_v0  ;;  %v12129_v18 = vld [vmem:[%s18827_s0 + $0xef8] sm:$0xff] }
 0x2a6   : > { %v6146_v11 = vmul.f32 %v12129_v18, %v19459_v25  ;;  %v11781_v52 = vld [vmem:[%s18827_s0 + $0x518] sm:$0xff]  ;;  %v6145_v25 = vmul.f32 %v12128_v7, %v19461_v29  ;;  %v19546_v18 = vld [vmem:[#allocation135_spill] sm:$0xff]  ;;  %v12135_v7 = vld [vmem:[%s18827_s0 + $0xf28] sm:$0xff] }
 0x2a7   : > { %v19543_v0 = vld [vmem:[#allocation38_spill] sm:$0xff] }
 0x2a8   : > { %v6147_v4 = vmul.f32 %v12130_v24, %v19543_v0  ;;  %v19547_v29 = vld [vmem:[#allocation138_spill] sm:$0xff]  ;;  %v19549_v0 = vld [vmem:[#allocation48_spill] sm:$0xff] }
 0x2a9   : > { %13341 = vmatmul.mubr.bf16.gmra.mrb[16].mxu1 %v6190_v34  ;;  %v11778_v34 = vld [vmem:[%s18827_s0 + $0x500] sm:$0xff] }
 0x2aa   : > { %13344 = vmatprep.mubr.bf16.mxu1 %v6191_v50  ;;  %v19541_v50 = vld [vmem:[#allocation131_spill] sm:$0xff]  ;;  %v3319_v57 = vmul.f32 %v11778_v34, %v19542_v22  ;;  %v19545_v34 = vld [vmem:[#allocation132_spill] sm:$0xff] }
 0x2ab   : > { %13025 = vmatmul.mubr.bf16.gmra.mrb[88].mxu0 %v3364_v15  ;;  %v3320_v45 = vmul.f32 %v11779_v39, %v19541_v50  ;;  %v3366_v15 = vpack.c.bf16 %v3318_v41, %v3317_v33  ;;  %v11783_v39 = vld [vmem:[%s18827_s0 + $0x528] sm:$0xff]  ;;  %v19544_v33 = vld [vmem:[#allocation133_spill] sm:$0xff] }
 0x2ac   : > { %13028 = vmatprep.mubr.bf16.mxu0 %v3365_v48  ;;  %v3321_v41 = vmul.f32 %v11780_v5, %v19544_v33  ;;  %v3324_v23 = vmul.f32 %v11783_v39, %v19546_v18  ;;  %v19548_v5 = vld [vmem:[#allocation49_spill] sm:$0xff] }
 0x2ad   : > { %v3367_v48 = vpack.c.bf16 %v3320_v45, %v3319_v57  ;;  %v11782_v45 = vld [vmem:[%s18827_s0 + $0x520] sm:$0xff]  ;;  %v6195_v57 = vpack.c.bf16 %v6148_v46, %v6147_v4  ;;  %v11784_v39 = vld [vmem:[%s18827_s0 + $0x530] sm:$0xff]  ;;  %v6152_v4 = vmul.f32 %v12135_v7, %v19549_v0 }
 0x2ae   : > { %v12134_v46 = vld [vmem:[%s18827_s0 + $0xf20] sm:$0xff] }
 0x2b1   : > { %13345 = vmatmul.mubr.bf16.gmra.mrb[20].mxu1 %v6192_v31  ;;  %v3322_v31 = vmul.f32 %v11781_v52, %v19545_v34  ;;  %v6150_v52 = vmul.f32 %v12133_v9, %v19548_v5 }
 0x2b2   : > { %13348 = vmatprep.mubr.bf16.mxu1 %v6193_v38  ;;  %v6194_v38 = vpack.c.bf16 %v6146_v11, %v6145_v25  ;;  %v12132_v11 = vld [vmem:[%s18827_s0 + $0xf10] sm:$0xff]  ;;  %v11785_v25 = vld [vmem:[%s18827_s0 + $0x538] sm:$0xff] }
 0x2b3   : > { %13029 = vmatmul.mubr.bf16.gmra.mrb[92].mxu0 %v3366_v15  ;;  %v3323_v15 = vmul.f32 %v11782_v45, %v19547_v29  ;;  %v19554_v29 = vld [vmem:[#allocation139_spill] sm:$0xff] }
 0x2b4   : > { %13032 = vmatprep.mubr.bf16.mxu0 %v3367_v48  ;;  %v3368_v48 = vpack.c.bf16 %v3322_v31, %v3321_v41  ;;  %v11787_v41 = vld [vmem:[%s18827_s0 + $0x548] sm:$0xff]  ;;  %v19550_v31 = vld [vmem:[#allocation47_spill] sm:$0xff] }
 0x2b5   : > { %v3369_v24 = vpack.c.bf16 %v3324_v23, %v3323_v15  ;;  %v6149_v45 = vmul.f32 %v12132_v11, %v19550_v31  ;;  %v19553_v15 = vld [vmem:[#allocation136_spill] sm:$0xff]  ;;  %v3328_v7 = vmul.f32 %v11787_v41, %v19554_v29  ;;  %v19555_v11 = vld [vmem:[#allocation142_spill] sm:$0xff]  ;;  %v19556_v41 = vld [vmem:[#allocation57_spill] sm:$0xff] }
 0x2b6   : > { %v3326_v5 = vmul.f32 %v11785_v25, %v19553_v15  ;;  %v3327_v31 = vmul.f32 %v11786_v62, %v19555_v11  ;;  %v11788_v62 = vld [vmem:[%s18827_s0 + $0x550] sm:$0xff]  ;;  %v19561_v11 = vld [vmem:[#allocation140_spill] sm:$0xff]  ;;  %v11790_v15 = vld [vmem:[%s18827_s0 + $0x560] sm:$0xff] }
 0x2b8   : > { %v3371_v25 = vpack.c.bf16 %v3328_v7, %v3327_v31  ;;  %v19560_v31 = vld [vmem:[#allocation141_spill] sm:$0xff] }
 0x2b9   : > { %13349 = vmatmul.mubr.bf16.gmra.mrb[24].mxu1 %v6194_v38  ;;  %v19551_v38 = vld [vmem:[#allocation46_spill] sm:$0xff] }
 0x2ba   : > { %13352 = vmatprep.mubr.bf16.mxu1 %v6195_v57  ;;  %v6151_v23 = vmul.f32 %v12134_v46, %v19551_v38  ;;  %v19552_v57 = vld [vmem:[#allocation137_spill] sm:$0xff]  ;;  %v12139_v46 = vld [vmem:[%s18827_s0 + $0xf48] sm:$0xff]  ;;  %v11789_v38 = vld [vmem:[%s18827_s0 + $0x558] sm:$0xff] }
 0x2bb   : > { %13033 = vmatmul.mubr.bf16.gmra.mrb[96].mxu0 %v3368_v48  ;;  %v3325_v9 = vmul.f32 %v11784_v39, %v19552_v57  ;;  %v6196_v48 = vpack.c.bf16 %v6150_v52, %v6149_v45  ;;  %v12136_v52 = vld [vmem:[%s18827_s0 + $0xf30] sm:$0xff]  ;;  %v12138_v45 = vld [vmem:[%s18827_s0 + $0xf40] sm:$0xff]  ;;  %v3330_v29 = vmul.f32 %v11789_v38, %v19561_v11 }
 0x2bc   : > { %13036 = vmatprep.mubr.bf16.mxu0 %v3369_v24  ;;  %v6197_v0 = vpack.c.bf16 %v6152_v4, %v6151_v23  ;;  %v12137_v24 = vld [vmem:[%s18827_s0 + $0xf38] sm:$0xff]  ;;  %v19557_v23 = vld [vmem:[#allocation56_spill] sm:$0xff]  ;;  %v19562_v57 = vld [vmem:[#allocation143_spill] sm:$0xff] }
 0x2bd   : > { %v3370_v39 = vpack.c.bf16 %v3326_v5, %v3325_v9  ;;  %v6154_v4 = vmul.f32 %v12137_v24, %v19556_v41  ;;  %v6156_v9 = vmul.f32 %v12139_v46, %v19557_v23  ;;  %v11791_v5 = vld [vmem:[%s18827_s0 + $0x568] sm:$0xff]  ;;  %v3329_v41 = vmul.f32 %v11788_v62, %v19560_v31  ;;  %v11794_v11 = vld [vmem:[%s18827_s0 + $0x580] sm:$0xff] }
 0x2be   : > { %v3332_v46 = vmul.f32 %v11791_v5, %v19562_v57  ;;  %v19564_v5 = vld [vmem:[#allocation65_spill] sm:$0xff]  ;;  %v19570_v31 = vld [vmem:[#allocation147_spill] sm:$0xff] }
 0x2bf   : > { %v3372_v62 = vpack.c.bf16 %v3330_v29, %v3329_v41  ;;  %v19565_v29 = vld [vmem:[#allocation64_spill] sm:$0xff] }
 0x2c0   : > { %v11795_v41 = vld [vmem:[%s18827_s0 + $0x588] sm:$0xff] }
 0x2c1   : > { %13353 = vmatmul.mubr.bf16.gmra.mrb[28].mxu1 %v6196_v48  ;;  %v19558_v48 = vld [vmem:[#allocation55_spill] sm:$0xff] }
 0x2c2   : > { %13356 = vmatprep.mubr.bf16.mxu1 %v6197_v0  ;;  %v6153_v7 = vmul.f32 %v12136_v52, %v19558_v48  ;;  %v19559_v0 = vld [vmem:[#allocation54_spill] sm:$0xff] }
 0x2c3   : > { %13037 = vmatmul.mubr.bf16.gmra.mrb[100].mxu0 %v3370_v39  ;;  %v6155_v24 = vmul.f32 %v12138_v45, %v19559_v0  ;;  %v19563_v52 = vld [vmem:[#allocation146_spill] sm:$0xff]  ;;  %v12143_v45 = vld [vmem:[%s18827_s0 + $0xf68] sm:$0xff] }
 0x2c4   : > { %13040 = vmatprep.mubr.bf16.mxu0 %v3371_v25  ;;  %v6198_v39 = vpack.c.bf16 %v6154_v4, %v6153_v7  ;;  %v12141_v25 = vld [vmem:[%s18827_s0 + $0xf58] sm:$0xff]  ;;  %v3331_v48 = vmul.f32 %v11790_v15, %v19563_v52  ;;  %v12140_v4 = vld [vmem:[%s18827_s0 + $0xf50] sm:$0xff]  ;;  %v12142_v7 = vld [vmem:[%s18827_s0 + $0xf60] sm:$0xff] }
 0x2c5   : > { %v6199_v23 = vpack.c.bf16 %v6156_v9, %v6155_v24  ;;  %v6158_v9 = vmul.f32 %v12141_v25, %v19564_v5  ;;  %v11792_v15 = vld [vmem:[%s18827_s0 + $0x570] sm:$0xff]  ;;  %v11793_v0 = vld [vmem:[%s18827_s0 + $0x578] sm:$0xff]  ;;  %v6160_v24 = vmul.f32 %v12143_v45, %v19565_v29  ;;  %v19569_v52 = vld [vmem:[#allocation144_spill] sm:$0xff]  ;;  %v3336_v45 = vmul.f32 %v11795_v41, %v19570_v31 }
 0x2c6   : > { %v3373_v38 = vpack.c.bf16 %v3332_v46, %v3331_v48  ;;  %v19568_v48 = vld [vmem:[#allocation145_spill] sm:$0xff]  ;;  %v3334_v57 = vmul.f32 %v11793_v0, %v19569_v52  ;;  %v12146_v41 = vld [vmem:[%s18827_s0 + $0xf80] sm:$0xff] }
 0x2c7   : > { %v3333_v5 = vmul.f32 %v11792_v15, %v19568_v48  ;;  %v11798_v31 = vld [vmem:[%s18827_s0 + $0x5a0] sm:$0xff] }
 0x2c8   : > { %v19577_v52 = vld [vmem:[#allocation151_spill] sm:$0xff] }
 0x2c9   : > { %13357 = vmatmul.mubr.bf16.gmra.mrb[32].mxu1 %v6198_v39  ;;  %v19566_v39 = vld [vmem:[#allocation63_spill] sm:$0xff]  ;;  %v3374_v15 = vpack.c.bf16 %v3334_v57, %v3333_v5  ;;  %v19572_v57 = vld [vmem:[#allocation72_spill] sm:$0xff] }
 0x2ca   : > { %13360 = vmatprep.mubr.bf16.mxu1 %v6199_v23  ;;  %v6157_v46 = vmul.f32 %v12140_v4, %v19566_v39  ;;  %v19567_v23 = vld [vmem:[#allocation62_spill] sm:$0xff] }
 0x2cb   : > { %13041 = vmatmul.mubr.bf16.gmra.mrb[104].mxu0 %v3372_v62  ;;  %v6159_v25 = vmul.f32 %v12142_v7, %v19567_v23  ;;  %v19571_v4 = vld [vmem:[#allocation150_spill] sm:$0xff]  ;;  %v12147_v7 = vld [vmem:[%s18827_s0 + $0xf88] sm:$0xff] }
 0x2cc   : > { %13044 = vmatprep.mubr.bf16.mxu0 %v3373_v38  ;;  %v6200_v62 = vpack.c.bf16 %v6158_v9, %v6157_v46  ;;  %v12145_v38 = vld [vmem:[%s18827_s0 + $0xf78] sm:$0xff]  ;;  %v3335_v39 = vmul.f32 %v11794_v11, %v19571_v4  ;;  %v12144_v9 = vld [vmem:[%s18827_s0 + $0xf70] sm:$0xff]  ;;  %v6164_v23 = vmul.f32 %v12147_v7, %v19572_v57 }
 0x2cd   : > { %v6201_v29 = vpack.c.bf16 %v6160_v24, %v6159_v25  ;;  %v6162_v24 = vmul.f32 %v12145_v38, %v19491_v49  ;;  %v11796_v11 = vld [vmem:[%s18827_s0 + $0x590] sm:$0xff]  ;;  %v11797_v46 = vld [vmem:[%s18827_s0 + $0x598] sm:$0xff]  ;;  %v11799_v25 = vld [vmem:[%s18827_s0 + $0x5a8] sm:$0xff] }
 0x2ce   : > { %v3375_v0 = vpack.c.bf16 %v3336_v45, %v3335_v39  ;;  %v19573_v49 = vld [vmem:[#allocation71_spill] sm:$0xff]  ;;  %v19576_v39 = vld [vmem:[#allocation148_spill] sm:$0xff]  ;;  %v3340_v7 = vmul.f32 %v11799_v25, %v19577_v52 }
 0x2cf   : > { %v6161_v5 = vmul.f32 %v12144_v9, %v19573_v49  ;;  %v3338_v4 = vmul.f32 %v11797_v46, %v19576_v39  ;;  %v19578_v9 = vld [vmem:[#allocation154_spill] sm:$0xff]  ;;  %v12150_v25 = vld [vmem:[%s18827_s0 + $0xfa0] sm:$0xff] }
 0x2d0   : > { %v3339_v49 = vmul.f32 %v11798_v31, %v19578_v9  ;;  %v11800_v31 = vld [vmem:[%s18827_s0 + $0x5b0] sm:$0xff] }
 0x2d1   : > { %13361 = vmatmul.mubr.bf16.gmra.mrb[36].mxu1 %v6200_v62  ;;  %v19574_v62 = vld [vmem:[#allocation70_spill] sm:$0xff] }
 0x2d2   : > { %13364 = vmatprep.mubr.bf16.mxu1 %v6201_v29  ;;  %v6163_v45 = vmul.f32 %v12146_v41, %v19574_v62  ;;  %v19575_v29 = vld [vmem:[#allocation149_spill] sm:$0xff]  ;;  %v12151_v41 = vld [vmem:[%s18827_s0 + $0xfa8] sm:$0xff]  ;;  %v3377_v46 = vpack.c.bf16 %v3340_v7, %v3339_v49 }
 0x2d3   : > { %13045 = vmatmul.mubr.bf16.gmra.mrb[108].mxu0 %v3374_v15  ;;  %v3337_v38 = vmul.f32 %v11796_v11, %v19575_v29  ;;  %v6202_v15 = vpack.c.bf16 %v6162_v24, %v6161_v5  ;;  %v12148_v24 = vld [vmem:[%s18827_s0 + $0xf90] sm:$0xff]  ;;  %v11801_v5 = vld [vmem:[%s18827_s0 + $0x5b8] sm:$0xff]  ;;  %v11803_v62 = vld [vmem:[%s18827_s0 + $0x5c8] sm:$0xff] }
 0x2d4   : > { %13048 = vmatprep.mubr.bf16.mxu0 %v3375_v0  ;;  %v6203_v57 = vpack.c.bf16 %v6164_v23, %v6163_v45  ;;  %v12149_v0 = vld [vmem:[%s18827_s0 + $0xf98] sm:$0xff]  ;;  %v6167_v45 = vmul.f32 %v12150_v25, %v19501_v2  ;;  %v19580_v7 = vld [vmem:[#allocation152_spill] sm:$0xff] }
 0x2d5   : > { %v3376_v11 = vpack.c.bf16 %v3338_v4, %v3337_v38  ;;  %v6166_v23 = vmul.f32 %v12149_v0, %v19498_v10  ;;  %v6168_v4 = vmul.f32 %v12151_v41, %v19499_v28  ;;  %v6165_v10 = vmul.f32 %v12148_v24, %v19500_v58  ;;  %v19579_v38 = vld [vmem:[#allocation153_spill] sm:$0xff]  ;;  %v11802_v0 = vld [vmem:[%s18827_s0 + $0x5c0] sm:$0xff]  ;;  %v12155_v2 = vld [vmem:[%s18827_s0 + $0xfc8] sm:$0xff] }
 0x2d6   : > { %v19582_v58 = vld [vmem:[#allocation157_spill] sm:$0xff] }
 0x2d7   : > { %v6204_v49 = vpack.c.bf16 %v6166_v23, %v6165_v10  ;;  %v6205_v41 = vpack.c.bf16 %v6168_v4, %v6167_v45  ;;  %v3343_v24 = vmul.f32 %v11802_v0, %v19582_v58  ;;  %v12152_v23 = vld [vmem:[%s18827_s0 + $0xfb0] sm:$0xff]  ;;  %v12154_v4 = vld [vmem:[%s18827_s0 + $0xfc0] sm:$0xff]  ;;  %v11805_v10 = vld [vmem:[%s18827_s0 + $0x5d8] sm:$0xff]  ;;  %v6172_v45 = vmul.f32 %v12155_v2, %v19410_v19 }
 0x2d8   : > { %v19586_v58 = vld [vmem:[#allocation92_spill] sm:$0xff] }
 0x2d9   : > { %13365 = vmatmul.mubr.bf16.gmra.mrb[40].mxu1 %v6202_v15  ;;  %v3341_v15 = vmul.f32 %v11800_v31, %v19579_v38 }
 0x2da   : > { %13368 = vmatprep.mubr.bf16.mxu1 %v6203_v57  ;;  %v3342_v57 = vmul.f32 %v11801_v5, %v19580_v7 }
 0x2db   : > { %13049 = vmatmul.mubr.bf16.gmra.mrb[112].mxu0 %v3376_v11  ;;  %v19581_v11 = vld [vmem:[#allocation84_spill] sm:$0xff] }
 0x2dc   : > { %13052 = vmatprep.mubr.bf16.mxu0 %v3377_v46  ;;  %v3344_v28 = vmul.f32 %v11803_v62, %v19581_v11  ;;  %v12153_v46 = vld [vmem:[%s18827_s0 + $0xfb8] sm:$0xff]  ;;  %v3378_v25 = vpack.c.bf16 %v3342_v57, %v3341_v15  ;;  %v11804_v62 = vld [vmem:[%s18827_s0 + $0x5d0] sm:$0xff]  ;;  %v11807_v15 = vld [vmem:[%s18827_s0 + $0x5e8] sm:$0xff] }
 0x2dd   : > { %v6170_v5 = vmul.f32 %v12153_v46, %v19502_v21  ;;  %v6169_v21 = vmul.f32 %v12152_v23, %v19503_v14  ;;  %v19583_v57 = vld [vmem:[#allocation86_spill] sm:$0xff]  ;;  %v3348_v19 = vmul.f32 %v11807_v15, %v19586_v58  ;;  %v19587_v14 = vld [vmem:[#allocation91_spill] sm:$0xff]  ;;  %v19592_v58 = vld [vmem:[#allocation104_spill] sm:$0xff] }
 0x2de   : > { %v3379_v31 = vpack.c.bf16 %v3344_v28, %v3343_v24  ;;  %v6171_v0 = vmul.f32 %v12154_v4, %v19583_v57  ;;  %v11806_v24 = vld [vmem:[%s18827_s0 + $0x5e0] sm:$0xff]  ;;  %v12159_v4 = vld [vmem:[%s18827_s0 + $0xfe8] sm:$0xff]  ;;  %v11809_v57 = vld [vmem:[%s18827_s0 + $0x5f8] sm:$0xff] }
 0x2df   : > { %v3347_v23 = vmul.f32 %v11806_v24, %v19587_v14  ;;  %v12158_v15 = vld [vmem:[%s18827_s0 + $0xfe0] sm:$0xff]  ;;  %v19589_v24 = vld [vmem:[#allocation94_spill] sm:$0xff]  ;;  %v11835_v14 = vld [vmem:[%s18827_s0 + $0x608] sm:$0xff] }
 0x2e0   : > { %v6207_v2 = vpack.c.bf16 %v6172_v45, %v6171_v0  ;;  %v19588_v0 = vld [vmem:[#allocation98_spill] sm:$0xff] }
 0x2e1   : > { %13369 = vmatmul.mubr.bf16.gmra.mrb[44].mxu1 %v6204_v49  ;;  %v19584_v49 = vld [vmem:[#allocation156_spill] sm:$0xff] }
 0x2e2   : > { %13372 = vmatprep.mubr.bf16.mxu1 %v6205_v41  ;;  %v3345_v28 = vmul.f32 %v11804_v62, %v19584_v49  ;;  %v19585_v41 = vld [vmem:[#allocation155_spill] sm:$0xff] }
 0x2e3   : > { %13053 = vmatmul.mubr.bf16.gmra.mrb[116].mxu0 %v3378_v25  ;;  %v3346_v46 = vmul.f32 %v11805_v10, %v19585_v41  ;;  %v6206_v25 = vpack.c.bf16 %v6170_v5, %v6169_v21  ;;  %v12156_v5 = vld [vmem:[%s18827_s0 + $0xfd0] sm:$0xff]  ;;  %v3381_v10 = vpack.c.bf16 %v3348_v19, %v3347_v23 }
 0x2e4   : > { %13056 = vmatprep.mubr.bf16.mxu0 %v3379_v31  ;;  %v12157_v31 = vld [vmem:[%s18827_s0 + $0xfd8] sm:$0xff]  ;;  %v11808_v21 = vld [vmem:[%s18827_s0 + $0x5f0] sm:$0xff] }
 0x2e5   : > { %v3380_v62 = vpack.c.bf16 %v3346_v46, %v3345_v28  ;;  %v6174_v45 = vmul.f32 %v12157_v31, %v19507_v51  ;;  %v6176_v28 = vmul.f32 %v12159_v4, %v19588_v0  ;;  %v11834_v46 = vld [vmem:[%s18827_s0 + $0x600] sm:$0xff]  ;;  %v6173_v51 = vmul.f32 %v12156_v5, %v19508_v3  ;;  %v19590_v19 = vld [vmem:[#allocation93_spill] sm:$0xff]  ;;  %v19591_v31 = vld [vmem:[#allocation88_spill] sm:$0xff] }
 0x2e6   : > { %v3350_v23 = vmul.f32 %v11809_v57, %v19591_v31  ;;  %v3994_v4 = vmul.f32 %v11834_v46, %v19592_v58  ;;  %v19593_v3 = vld [vmem:[#allocation106_spill] sm:$0xff]  ;;  %v11836_v58 = vld [vmem:[%s18827_s0 + $0x610] sm:$0xff] }
 0x2e7   : > { %v3995_v5 = vmul.f32 %v11835_v14, %v19593_v3  ;;  %v11837_v57 = vld [vmem:[%s18827_s0 + $0x618] sm:$0xff]  ;;  %v19594_v14 = vld [vmem:[#allocation5_spill] sm:$0xff] }
 0x2e9   : > { %13373 = vmatmul.mubr.bf16.gmra.mrb[48].mxu1 %v6206_v25  ;;  %v6175_v25 = vmul.f32 %v12158_v15, %v19589_v24  ;;  %v12187_v15 = vld [vmem:[%s18827_s0 + $0x1008] sm:$0xff] }
 0x2ea   : > { %13376 = vmatprep.mubr.bf16.mxu1 %v6207_v2  ;;  %v3349_v2 = vmul.f32 %v11808_v21, %v19590_v19  ;;  %v6823_v24 = vmul.f32 %v12187_v15, %v19513_v16  ;;  %v12191_v16 = vld [vmem:[%s18827_s0 + $0x1028] sm:$0xff] }
 0x2eb   : > { %13057 = vmatmul.mubr.bf16.gmra.mrb[120].mxu0 %v3380_v62  ;;  %v6208_v62 = vpack.c.bf16 %v6174_v45, %v6173_v51  ;;  %v6209_v0 = vpack.c.bf16 %v6176_v28, %v6175_v25  ;;  %v12160_v45 = vld [vmem:[%s18827_s0 + $0xff0] sm:$0xff]  ;;  %v4058_v28 = vpack.c.bf16 %v3995_v5, %v3994_v4  ;;  %v12186_v51 = vld [vmem:[%s18827_s0 + $0x1000] sm:$0xff]  ;;  %v19595_v25 = vld [vmem:[#allocation4_spill] sm:$0xff] }
 0x2ec   : > { %13060 = vmatprep.mubr.bf16.mxu0 %v3381_v10  ;;  %v12161_v10 = vld [vmem:[%s18827_s0 + $0xff8] sm:$0xff]  ;;  %v3382_v21 = vpack.c.bf16 %v3350_v23, %v3349_v2  ;;  %v6177_v2 = vmul.f32 %v12160_v45, %v19595_v25  ;;  %v6822_v31 = vmul.f32 %v12186_v51, %v19514_v27  ;;  %v12188_v4 = vld [vmem:[%s18827_s0 + $0x1010] sm:$0xff]  ;;  %v12190_v45 = vld [vmem:[%s18827_s0 + $0x1020] sm:$0xff] }
 0x2ed   : > { %v6178_v46 = vmul.f32 %v12161_v10, %v19594_v14  ;;  %v19596_v23 = vld [vmem:[#allocation102_spill] sm:$0xff]  ;;  %v12194_v14 = vld [vmem:[%s18827_s0 + $0x1040] sm:$0xff] }
 0x2ee   : > { %v12189_v10 = vld [vmem:[%s18827_s0 + $0x1018] sm:$0xff]  ;;  %v6886_v5 = vpack.c.bf16 %v6823_v24, %v6822_v31  ;;  %v6826_v31 = vmul.f32 %v12190_v45, %v19518_v12  ;;  %v6830_v51 = vmul.f32 %v12194_v14, %v19522_v6  ;;  %v12204_v45 = vld [vmem:[%s18827_s0 + $0x1090] sm:$0xff] }
 0x2ef   : > { %v6210_v19 = vpack.c.bf16 %v6178_v46, %v6177_v2  ;;  %v6825_v27 = vmul.f32 %v12189_v10, %v19516_v26  ;;  %v12195_v26 = vld [vmem:[%s18827_s0 + $0x1048] sm:$0xff]  ;;  %v12196_v2 = vld [vmem:[%s18827_s0 + $0x1050] sm:$0xff] }
 0x2f0   : > { %v6831_v46 = vmul.f32 %v12195_v26, %v19521_v30  ;;  %v6832_v30 = vmul.f32 %v12196_v2, %v19523_v56  ;;  %v12200_v10 = vld [vmem:[%s18827_s0 + $0x1070] sm:$0xff]  ;;  %v12201_v56 = vld [vmem:[%s18827_s0 + $0x1078] sm:$0xff]  ;;  %v12210_v26 = vld [vmem:[%s18827_s0 + $0x10c0] sm:$0xff] }
 0x2f1   : > { %13377 = vmatmul.mubr.bf16.gmra.mrb[52].mxu1 %v6208_v62  ;;  %v3996_v62 = vmul.f32 %v11836_v58, %v19596_v23  ;;  %v6827_v58 = vmul.f32 %v12191_v16, %v19517_v36  ;;  %v12198_v23 = vld [vmem:[%s18827_s0 + $0x1060] sm:$0xff] }
 0x2f2   : > { %13380 = vmatprep.mubr.bf16.mxu1 %v6209_v0  ;;  %v19597_v0 = vld [vmem:[#allocation100_spill] sm:$0xff]  ;;  %v6890_v25 = vpack.c.bf16 %v6831_v46, %v6830_v51  ;;  %v12212_v51 = vld [vmem:[%s18827_s0 + $0x10d0] sm:$0xff] }
 0x2f3   : > { %13061 = vmatmul.mubr.bf16.gmra.mrb[124].mxu0 %v3382_v21  ;;  %v3997_v3 = vmul.f32 %v11837_v57, %v19597_v0  ;;  %v6824_v21 = vmul.f32 %v12188_v4, %v19515_v8  ;;  %v6888_v57 = vpack.c.bf16 %v6827_v58, %v6826_v31  ;;  %v12193_v8 = vld [vmem:[%s18827_s0 + $0x1038] sm:$0xff]  ;;  %v6834_v0 = vmul.f32 %v12198_v23, %v19526_v55  ;;  %v12206_v58 = vld [vmem:[%s18827_s0 + $0x10a0] sm:$0xff] }
 0x2f4   : > { %13080 = vmatprep.mubr.bf16.mxu0 %v4058_v28  ;;  %v12192_v28 = vld [vmem:[%s18827_s0 + $0x1030] sm:$0xff]  ;;  %v6829_v12 = vmul.f32 %v12193_v8, %v19520_v13  ;;  %v12199_v13 = vld [vmem:[%s18827_s0 + $0x1068] sm:$0xff]  ;;  %v6837_v55 = vmul.f32 %v12201_v56, %v19528_v35 }
 0x2f5   : > { %v4059_v15 = vpack.c.bf16 %v3997_v3, %v3996_v62  ;;  %v6828_v36 = vmul.f32 %v12192_v28, %v19519_v17  ;;  %v12197_v17 = vld [vmem:[%s18827_s0 + $0x1058] sm:$0xff]  ;;  %v6835_v62 = vmul.f32 %v12199_v13, %v19525_v32  ;;  %v6836_v32 = vmul.f32 %v12200_v10, %v19527_v42  ;;  %v12207_v35 = vld [vmem:[%s18827_s0 + $0x10a8] sm:$0xff]  ;;  %v12208_v8 = vld [vmem:[%s18827_s0 + $0x10b0] sm:$0xff] }
 0x2f6   : > { %v6833_v6 = vmul.f32 %v12197_v17, %v19524_v37  ;;  %v12203_v37 = vld [vmem:[%s18827_s0 + $0x1088] sm:$0xff]  ;;  %v12205_v42 = vld [vmem:[%s18827_s0 + $0x1098] sm:$0xff]  ;;  %v6843_v31 = vmul.f32 %v12207_v35, %v19533_v43  ;;  %v6844_v43 = vmul.f32 %v12208_v8, %v19535_v47  ;;  %v12220_v10 = vld [vmem:[%s18827_s0 + $0x1110] sm:$0xff] }
 0x2f7   : > { %v6889_v24 = vpack.c.bf16 %v6829_v12, %v6828_v36  ;;  %v6892_v4 = vpack.c.bf16 %v6835_v62, %v6834_v0  ;;  %v6839_v16 = vmul.f32 %v12203_v37, %v19529_v63  ;;  %v6840_v63 = vmul.f32 %v12204_v45, %v19531_v40  ;;  %v12209_v40 = vld [vmem:[%s18827_s0 + $0x10b8] sm:$0xff]  ;;  %v19600_v37 = vld [vmem:[#allocation136_spill] sm:$0xff]  ;;  %v12226_v8 = vld [vmem:[%s18827_s0 + $0x1140] sm:$0xff] }
 0x2f8   : > { %v6891_v3 = vpack.c.bf16 %v6833_v6, %v6832_v30  ;;  %v6846_v12 = vmul.f32 %v12210_v26, %v19538_v61  ;;  %v12213_v47 = vld [vmem:[%s18827_s0 + $0x10d8] sm:$0xff]  ;;  %v12216_v30 = vld [vmem:[%s18827_s0 + $0x10f0] sm:$0xff]  ;;  %v12218_v6 = vld [vmem:[%s18827_s0 + $0x1100] sm:$0xff] }
 0x2f9   : > { %13381 = vmatmul.mubr.bf16.gmra.mrb[56].mxu1 %v6210_v19  ;;  %v6887_v19 = vpack.c.bf16 %v6825_v27, %v6824_v21  ;;  %v6893_v21 = vpack.c.bf16 %v6837_v55, %v6836_v32  ;;  %v6849_v61 = vmul.f32 %v12213_v47, %v19540_v44  ;;  %v12219_v44 = vld [vmem:[%s18827_s0 + $0x1108] sm:$0xff]  ;;  %v19598_v62 = vld [vmem:[#allocation138_spill] sm:$0xff]  ;;  %v12222_v55 = vld [vmem:[%s18827_s0 + $0x1120] sm:$0xff] }
 0x2fa   : > { %13400 = vmatprep.mubr.bf16.mxu1 %v6886_v5  ;;  %v12202_v5 = vld [vmem:[%s18827_s0 + $0x1080] sm:$0xff]  ;;  %v6855_v23 = vmul.f32 %v12219_v44, %v19546_v18  ;;  %v6854_v0 = vmul.f32 %v12218_v6, %v19598_v62  ;;  %v19599_v18 = vld [vmem:[#allocation137_spill] sm:$0xff]  ;;  %v19607_v47 = vld [vmem:[#allocation144_spill] sm:$0xff] }
 0x2fb   : > { %13081 = vmatmul.mubr.bf16.vlgmr.msra.gmra.mrb[64].mxu0 %v4059_v15  ;;  %v6838_v15 = vmul.f32 %v12202_v5, %v19530_v60  ;;  %v6841_v60 = vmul.f32 %v12205_v42, %v19532_v54  ;;  %v12211_v54 = vld [vmem:[%s18827_s0 + $0x10c8] sm:$0xff]  ;;  %v6856_v56 = vmul.f32 %v12220_v10, %v19599_v18  ;;  %v14134_v5 = vmov 0   ;;  %v12238_v18 = vld [vmem:[%s18827_s0 + $0x11a0] sm:$0xff] }
 0x2fc   : > { %v6847_v36 = vmul.f32 %v12211_v54, %v19537_v53  ;;  %v6848_v53 = vmul.f32 %v12212_v51, %v19539_v1  ;;  %v12217_v1 = vld [vmem:[%s18827_s0 + $0x10f8] sm:$0xff]  ;;  %14009 = vset.pattern.permute.xlu0 %v14134_v5  ;;  %14010 = vset.pattern.permute.xlu1 %v14134_v5 }
 0x2fd   : > { %v6894_v27 = vpack.c.bf16 %v6839_v16, %v6838_v15  ;;  %v12276_v16 = vld [vmem:[%s396_s16] ss:$0 sm:$0xff]  ;;  %s393_s16 = scalar_lea.vmem %s18833_s6, %s19656_s28 }
 0x2fe   : > { %v6898_v46 = vpack.c.bf16 %v6847_v36, %v6846_v12  ;;  %v6899_v17 = vpack.c.bf16 %v6849_v61, %v6848_v53  ;;  %v19601_v15 = vld [vmem:[#allocation139_spill] sm:$0xff]  ;;  %7869 = vperm.xlu0 %14009, %v12276_v16   ;;  %v12228_v12 = vld [vmem:[%s18827_s0 + $0x1150] sm:$0xff] }
 0x2ff   : > { %v6864_v51 = vmul.f32 %v12228_v12, %v19568_v48  ;;  %v12230_v53 = vld [vmem:[%s18827_s0 + $0x1160] sm:$0xff]  ;;  %v12233_v48 = vld [vmem:[%s18827_s0 + $0x1178] sm:$0xff]  ;;  %v19614_v12 = vld [vmem:[#allocation88_spill] sm:$0xff] }
 0x300   : > { %v19608_v61 = vld [vmem:[#allocation147_spill] sm:$0xff] }
 0x301   : > { %13401 = vmatmul.mubr.bf16.vlgmr.msra.gmra.mrb[60].mxu1 %v6887_v19  ;;  %v6842_v19 = vmul.f32 %v12206_v58, %v19534_v20  ;;  %v6845_v20 = vmul.f32 %v12209_v40, %v19536_v59  ;;  %v12215_v59 = vld [vmem:[%s18827_s0 + $0x10e8] sm:$0xff]  ;;  %v19605_v40 = vld [vmem:[#allocation143_spill] sm:$0xff] }
 0x302   : > { %13404 = vmatprep.mubr.bf16.mxu1 %v6888_v57  ;;  %v6895_v57 = vpack.c.bf16 %v6841_v60, %v6840_v63  ;;  %v12224_v63 = vld [vmem:[%s18827_s0 + $0x1130] sm:$0xff]  ;;  %v12225_v60 = vld [vmem:[%s18827_s0 + $0x1138] sm:$0xff]  ;;  %v12227_v58 = vld [vmem:[%s18827_s0 + $0x1148] sm:$0xff] }
 0x303   : > { %v6896_v28 = vpack.c.bf16 %v6843_v31, %v6842_v19  ;;  %v6897_v14 = vpack.c.bf16 %v6845_v20, %v6844_v43  ;;  %v19603_v31 = vld [vmem:[#allocation141_spill] sm:$0xff]  ;;  %v6863_v54 = vmul.f32 %v12227_v58, %v19605_v40  ;;  %v19606_v43 = vld [vmem:[#allocation146_spill] sm:$0xff]  ;;  %v19612_v58 = vld [vmem:[#allocation91_spill] sm:$0xff] }
 0x304   : > { %v6860_v19 = vmul.f32 %v12224_v63, %v19603_v31  ;;  %v6862_v20 = vmul.f32 %v12226_v8, %v19606_v43  ;;  %v19611_v63 = vld [vmem:[#allocation92_spill] sm:$0xff] }
 0x305   : > { %v12247_v43 = vld [vmem:[%s18827_s0 + $0x11e8] sm:$0xff] }
 0x306   : > { %v6906_v36 = vpack.c.bf16 %v6863_v54, %v6862_v20  ;;  %v12246_v54 = vld [vmem:[%s18827_s0 + $0x11e0] sm:$0xff] }
 0x309   : > { %13405 = vmatmul.mubr.bf16.gmra.mrb[0].mxu1 %v6889_v24  ;;  %v12214_v24 = vld [vmem:[%s18827_s0 + $0x10e0] sm:$0xff] }
 0x30a   : > { %13408 = vmatprep.mubr.bf16.mxu1 %v6890_v25  ;;  %v6851_v25 = vmul.f32 %v12215_v59, %v19541_v50  ;;  %v6850_v2 = vmul.f32 %v12214_v24, %v19542_v22  ;;  %v6852_v50 = vmul.f32 %v12216_v30, %v19544_v33  ;;  %v6853_v22 = vmul.f32 %v12217_v1, %v19545_v34  ;;  %v12221_v33 = vld [vmem:[%s18827_s0 + $0x1118] sm:$0xff]  ;;  %v12223_v34 = vld [vmem:[%s18827_s0 + $0x1128] sm:$0xff]  ;;  %v12232_v30 = vld [vmem:[%s18827_s0 + $0x1170] sm:$0xff] }
 0x30b   : > { %v6857_v32 = vmul.f32 %v12221_v33, %v19600_v37  ;;  %v12235_v1 = vld [vmem:[%s18827_s0 + $0x1188] sm:$0xff]  ;;  %v6868_v44 = vmul.f32 %v12232_v30, %v19575_v29  ;;  %v12236_v29 = vld [vmem:[%s18827_s0 + $0x1190] sm:$0xff] }
 0x30c   : > { %v6900_v13 = vpack.c.bf16 %v6851_v25, %v6850_v2  ;;  %v19609_v25 = vld [vmem:[#allocation150_spill] sm:$0xff]  ;;  %v6871_v6 = vmul.f32 %v12235_v1, %v19577_v52  ;;  %v12239_v52 = vld [vmem:[%s18827_s0 + $0x11a8] sm:$0xff]  ;;  %v6872_v33 = vmul.f32 %v12236_v29, %v19579_v38  ;;  %v19610_v37 = vld [vmem:[#allocation157_spill] sm:$0xff] }
 0x30d   : > { %v6903_v42 = vpack.c.bf16 %v6857_v32, %v6856_v56  ;;  %v6866_v2 = vmul.f32 %v12230_v53, %v19609_v25  ;;  %v6875_v56 = vmul.f32 %v12239_v52, %v19581_v11  ;;  %v6874_v32 = vmul.f32 %v12238_v18, %v19610_v37  ;;  %v12240_v38 = vld [vmem:[%s18827_s0 + $0x11b0] sm:$0xff]  ;;  %v12243_v11 = vld [vmem:[%s18827_s0 + $0x11c8] sm:$0xff] }
 0x311   : > { %13409 = vmatmul.mubr.bf16.gmra.mrb[4].mxu1 %v6891_v3  ;;  %v6901_v3 = vpack.c.bf16 %v6853_v22, %v6852_v50  ;;  %v6869_v50 = vmul.f32 %v12233_v48, %v19576_v39  ;;  %v12234_v22 = vld [vmem:[%s18827_s0 + $0x1180] sm:$0xff]  ;;  %v12237_v39 = vld [vmem:[%s18827_s0 + $0x1198] sm:$0xff]  ;;  %v19617_v48 = vld [vmem:[#allocation97_spill] sm:$0xff] }
 0x312   : > { %13412 = vmatprep.mubr.bf16.mxu1 %v6892_v4  ;;  %v6902_v4 = vpack.c.bf16 %v6855_v23, %v6854_v0  ;;  %v6870_v23 = vmul.f32 %v12234_v22, %v19578_v9 }
 0x313   : > { %v6909_v0 = vpack.c.bf16 %v6869_v50, %v6868_v44  ;;  %v19618_v44 = vld [vmem:[#allocation96_spill] sm:$0xff] }
 0x319   : > { %13413 = vmatmul.mubr.bf16.gmra.mrb[8].mxu1 %v6893_v21  ;;  %v6859_v21 = vmul.f32 %v12223_v34, %v19601_v15  ;;  %v6873_v34 = vmul.f32 %v12237_v39, %v19580_v7  ;;  %v6912_v15 = vpack.c.bf16 %v6875_v56, %v6874_v32  ;;  %v12241_v7 = vld [vmem:[%s18827_s0 + $0x11b8] sm:$0xff] }
 0x31a   : > { %13416 = vmatprep.mubr.bf16.mxu1 %v6894_v27  ;;  %v19602_v27 = vld [vmem:[#allocation142_spill] sm:$0xff] }
 0x31b   : > { %v6858_v45 = vmul.f32 %v12222_v55, %v19602_v27  ;;  %v6911_v5 = vpack.c.bf16 %v6873_v34, %v6872_v33 }
 0x31d   : > { %v6904_v35 = vpack.c.bf16 %v6859_v21, %v6858_v45  ;;  %v6876_v45 = vmul.f32 %v12240_v38, %v19584_v49  ;;  %v12244_v49 = vld [vmem:[%s18827_s0 + $0x11d0] sm:$0xff] }
 0x321   : > { %13417 = vmatmul.mubr.bf16.gmra.mrb[12].mxu1 %v6895_v57  ;;  %v19604_v57 = vld [vmem:[#allocation140_spill] sm:$0xff] }
 0x322   : > { %13420 = vmatprep.mubr.bf16.mxu1 %v6896_v28  ;;  %v6861_v28 = vmul.f32 %v12225_v60, %v19604_v57  ;;  %v6879_v60 = vmul.f32 %v12243_v11, %v19611_v63 }
 0x324   : > { %v6905_v26 = vpack.c.bf16 %v6861_v28, %v6860_v19 }
 0x329   : > { %13421 = vmatmul.mubr.bf16.gmra.mrb[16].mxu1 %v6897_v14  ;;  %v12229_v14 = vld [vmem:[%s18827_s0 + $0x1158] sm:$0xff] }
 0x32a   : > { %13424 = vmatprep.mubr.bf16.mxu1 %v6898_v46  ;;  %v12231_v46 = vld [vmem:[%s18827_s0 + $0x1168] sm:$0xff]  ;;  %v6865_v59 = vmul.f32 %v12229_v14, %v19607_v47  ;;  %v19616_v47 = vld [vmem:[#allocation101_spill] sm:$0xff] }
 0x32b   : > { %v6867_v24 = vmul.f32 %v12231_v46, %v19608_v61  ;;  %v19615_v46 = vld [vmem:[#allocation90_spill] sm:$0xff] }
 0x331   : > { %13425 = vmatmul.mubr.bf16.gmra.mrb[20].mxu1 %v6899_v17  ;;  %v6907_v17 = vpack.c.bf16 %v6865_v59, %v6864_v51  ;;  %v6882_v51 = vmul.f32 %v12246_v54, %v19615_v46  ;;  %v6883_v59 = vmul.f32 %v12247_v43, %v19616_v47 }
 0x332   : > { %13428 = vmatprep.mubr.bf16.mxu1 %v6900_v13  ;;  %v6908_v13 = vpack.c.bf16 %v6867_v24, %v6866_v2  ;;  %v12248_v2 = vld [vmem:[%s18827_s0 + $0x11f0] sm:$0xff] }
 0x333   : > { %v6916_v25 = vpack.c.bf16 %v6883_v59, %v6882_v51  ;;  %v6884_v1 = vmul.f32 %v12248_v2, %v19617_v48 }
 0x339   : > { %13429 = vmatmul.mubr.bf16.gmra.mrb[24].mxu1 %v6901_v3 }
 0x33a   : > { %13432 = vmatprep.mubr.bf16.mxu1 %v6902_v4  ;;  %v6910_v4 = vpack.c.bf16 %v6871_v6, %v6870_v23 }
 0x341   : > { %13433 = vmatmul.mubr.bf16.gmra.mrb[28].mxu1 %v6903_v42  ;;  %v6877_v42 = vmul.f32 %v12241_v7, %v19585_v41  ;;  %v12245_v41 = vld [vmem:[%s18827_s0 + $0x11d8] sm:$0xff] }
 0x342   : > { %13436 = vmatprep.mubr.bf16.mxu1 %v6904_v35  ;;  %v12242_v35 = vld [vmem:[%s18827_s0 + $0x11c0] sm:$0xff]  ;;  %v6881_v14 = vmul.f32 %v12245_v41, %v19614_v12 }
 0x343   : > { %v6878_v31 = vmul.f32 %v12242_v35, %v19612_v58  ;;  %v6913_v57 = vpack.c.bf16 %v6877_v42, %v6876_v45 }
 0x345   : > { %v6914_v8 = vpack.c.bf16 %v6879_v60, %v6878_v31 }
 0x349   : > { %13437 = vmatmul.mubr.bf16.gmra.mrb[32].mxu1 %v6905_v26  ;;  %v19613_v26 = vld [vmem:[#allocation93_spill] sm:$0xff] }
 0x34a   : > { %13440 = vmatprep.mubr.bf16.mxu1 %v6906_v36  ;;  %v6880_v36 = vmul.f32 %v12244_v49, %v19613_v26 }
 0x34c   : > { %v6915_v61 = vpack.c.bf16 %v6881_v14, %v6880_v36 }
 0x351   : > { %13441 = vmatmul.mubr.bf16.gmra.mrb[36].mxu1 %v6907_v17  ;;  %v12249_v17 = vld [vmem:[%s18827_s0 + $0x11f8] sm:$0xff] }
 0x352   : > { %13444 = vmatprep.mubr.bf16.mxu1 %v6908_v13  ;;  %v6885_v50 = vmul.f32 %v12249_v17, %v19618_v44 }
 0x354   : > { %v6917_v6 = vpack.c.bf16 %v6885_v50, %v6884_v1 }
 0x356   : > { %v17326_v62 = vpop.f32.mrb[68].mxu0 }
 0x357   : > { %v17328_v3 = vpop.f32.mrb[69].mxu0 }
 0x358   : > { %v17336_v10 = vpop.f32.mrb[70].mxu0 }
 0x359   : > { %13445 = vmatmul.mubr.bf16.gmra.mrb[40].mxu1 %v6909_v0  ;;  %v17341_v9 = vpop.f32.mrb[71].mxu0 }
 0x35a   : > { %13448 = vmatprep.mubr.bf16.mxu1 %v6910_v4 }
 0x35e   : > { %v17350_v55 = vpop.f32.mrb[72].mxu0 }
 0x35f   : > { %v17352_v16 = vpop.f32.mrb[73].mxu0 }
 0x360   : > { %v17360_v21 = vpop.f32.mrb[74].mxu0 }
 0x361   : > { %13449 = vmatmul.mubr.bf16.gmra.mrb[44].mxu1 %v6911_v5  ;;  %v17365_v27 = vpop.f32.mrb[75].mxu0 }
 0x362   : > { %13452 = vmatprep.mubr.bf16.mxu1 %v6912_v15 }
 0x366   : > { %v17374_v19 = vpop.f32.mrb[76].mxu0 }
 0x367   : > { %v17376_v28 = vpop.f32.mrb[77].mxu0 }
 0x368   : > { %v17384_v40 = vpop.f32.mrb[78].mxu0 }
 0x369   : > { %13453 = vmatmul.mubr.bf16.gmra.mrb[48].mxu1 %v6913_v57  ;;  %v17392_v20 = vpop.f32.mrb[79].mxu0 }
 0x36a   : > { %13456 = vmatprep.mubr.bf16.mxu1 %v6914_v8 }
 0x36e   : > { %v17398_v53 = vpop.f32.mrb[80].mxu0 }
 0x36f   : > { %v17400_v24 = vpop.f32.mrb[81].mxu0 }
 0x370   : > { %v17408_v13 = vpop.f32.mrb[82].mxu0 }
 0x371   : > { %13457 = vmatmul.mubr.bf16.gmra.mrb[52].mxu1 %v6915_v61  ;;  %v17410_v30 = vpop.f32.mrb[83].mxu0 }
 0x372   : > { %13460 = vmatprep.mubr.bf16.mxu1 %v6916_v25 }
 0x376   : > { %v17414_v22 = vpop.f32.mrb[84].mxu0 }
 0x377   : > { %v17416_v23 = vpop.f32.mrb[85].mxu0 }
 0x378   : > { %v17418_v0 = vpop.f32.mrb[86].mxu0 }
 0x379   : > { %13461 = vmatmul.mubr.bf16.gmra.mrb[56].mxu1 %v6917_v6  ;;  %v17420_v4 = vpop.f32.mrb[87].mxu0 }
 0x37e   : > { %v17422_v29 = vpop.f32.mrb[88].mxu0 }
 0x37f   : > { %v17424_v39 = vpop.f32.mrb[89].mxu0 }
 0x380   : > { %v17426_v52 = vpop.f32.mrb[90].mxu0 }
 0x381   : > { %v17428_v33 = vpop.f32.mrb[91].mxu0 }
 0x386   : > { %v17430_v34 = vpop.f32.mrb[92].mxu0 }
 0x387   : > { %v17432_v18 = vpop.f32.mrb[93].mxu0 }
 0x388   : > { %v17434_v56 = vpop.f32.mrb[94].mxu0 }
 0x389   : > { %v17436_v37 = vpop.f32.mrb[95].mxu0 }
 0x38e   : > { %v17438_v32 = vpop.f32.mrb[96].mxu0 }
 0x38f   : > { %v17440_v5 = vpop.f32.mrb[97].mxu0 }
 0x390   : > { %v17442_v15 = vpop.f32.mrb[98].mxu0 }
 0x391   : > { %v17444_v38 = vpop.f32.mrb[99].mxu0 }
 0x396   : > { %v17446_v7 = vpop.f32.mrb[100].mxu0 }
 0x397   : > { %v17448_v11 = vpop.f32.mrb[101].mxu0 }
 0x398   : > { %v17450_v45 = vpop.f32.mrb[102].mxu0 }
 0x399   : > { %v17452_v42 = vpop.f32.mrb[103].mxu0 }
 0x39e   : > { %v17454_v35 = vpop.f32.mrb[104].mxu0 }
 0x39f   : > { %v17456_v63 = vpop.f32.mrb[105].mxu0 }
 0x3a0   : > { %v17458_v60 = vpop.f32.mrb[106].mxu0 }
 0x3a1   : > { %v17460_v58 = vpop.f32.mrb[107].mxu0 }
 0x3a6   : > { %v17462_v31 = vpop.f32.mrb[108].mxu0 }
 0x3a7   : > { %v17464_v57 = vpop.f32.mrb[109].mxu0 }
 0x3a8   : > { %v17466_v8 = vpop.f32.mrb[110].mxu0 }
 0x3a9   : > { %v17468_v49 = vpop.f32.mrb[111].mxu0 }
 0x3aa   : > { %19619 = vst [vmem:[#allocation3_spill] sm:$0xff] %v17468_v49 }
 0x3ae   : > { %v17470_v41 = vpop.f32.mrb[112].mxu0 }
 0x3af   : > { %19620 = vst [vmem:[#allocation8_spill] sm:$0xff] %v17470_v41  ;;  %v17472_v54 = vpop.f32.mrb[113].mxu0 }
 0x3b0   : > { %19621 = vst [vmem:[#allocation7_spill] sm:$0xff] %v17472_v54  ;;  %v17474_v43 = vpop.f32.mrb[114].mxu0 }
 0x3b1   : > { %19622 = vst [vmem:[#allocation10_spill] sm:$0xff] %v17474_v43  ;;  %v17476_v26 = vpop.f32.mrb[115].mxu0 }
 0x3b2   : > { %19623 = vst [vmem:[#allocation9_spill] sm:$0xff] %v17476_v26 }
 0x3b6   : > { %v17478_v36 = vpop.f32.mrb[116].mxu0 }
 0x3b7   : > { %19624 = vst [vmem:[#allocation21_spill] sm:$0xff] %v17478_v36  ;;  %v17480_v12 = vpop.f32.mrb[117].mxu0 }
 0x3b8   : > { %19625 = vst [vmem:[#allocation19_spill] sm:$0xff] %v17480_v12  ;;  %v17482_v14 = vpop.f32.mrb[118].mxu0 }
 0x3b9   : > { %19626 = vst [vmem:[#allocation18_spill] sm:$0xff] %v17482_v14  ;;  %v17484_v46 = vpop.f32.mrb[119].mxu0  ;;  %v17513_v14 = vld [vmem:[%s393_s16] ss:$0 sm:$0xff] }
 0x3ba   : > { %19627 = vst [vmem:[#allocation17_spill] sm:$0xff] %v17484_v46 }
 0x3be   : > { %v17486_v51 = vpop.f32.mrb[120].mxu0 }
 0x3bf   : > { %19628 = vst [vmem:[#allocation16_spill] sm:$0xff] %v17486_v51  ;;  %v17488_v47 = vpop.f32.mrb[121].mxu0 }
 0x3c0   : > { %19629 = vst [vmem:[#allocation15_spill] sm:$0xff] %v17488_v47  ;;  %v17490_v59 = vpop.f32.mrb[122].mxu0  ;;  %v17506_v47 = vld [vmem:[%s390_s13] ss:$0 sm:$0xff] }
 0x3c1   : > { %19630 = vst [vmem:[#allocation14_spill] sm:$0xff] %v17490_v59  ;;  %v17492_v61 = vpop.f32.mrb[123].mxu0 }
 0x3c2   : > { %19631 = vst [vmem:[#allocation28_spill] sm:$0xff] %v17492_v61 }
 0x3c6   : > { %v17494_v25 = vpop.f32.mrb[124].mxu0 }
 0x3c7   : > { %19632 = vst [vmem:[#allocation29_spill] sm:$0xff] %v17494_v25  ;;  %v17496_v2 = vpop.f32.mrb[125].mxu0 }
 0x3c8   : > { %19633 = vst [vmem:[#allocation27_spill] sm:$0xff] %v17496_v2  ;;  %v17498_v17 = vpop.f32.mrb[126].mxu0 }
 0x3c9   : > { %19634 = vst [vmem:[#allocation26_spill] sm:$0xff] %v17498_v17  ;;  %v17500_v48 = vpop.f32.mrb[127].mxu0 }
 0x3ca   : > { %19635 = vst [vmem:[#allocation25_spill] sm:$0xff] %v17500_v48 }
 0x3ce   : > { %v13082_v1 = vpop.f32.mrb[64].mxu0 }
 0x3cf   : > { %v4253_v44 = vpop.f32.mrb[65].mxu0 }
 0x3d0   : > { %v13083_v50 = vpop.f32.mrb[66].mxu0 }
 0x3d1   : > { %v4256_v6 = vpop.f32.mrb[67].mxu0 }
 0x3d4   : > { %v13402_v59 = vpop.f32.mrb[60].mxu1 }
 0x3d5   : > { %v13480_v2 = vadd.f32 %v13402_v59, %v13082_v1  ;;  %v7081_v25 = vpop.f32.mrb[61].mxu1 }
 0x3d6   : > { %v13481_v17 = vadd.f32 %v7081_v25, %v4253_v44  ;;  %v13403_v61 = vpop.f32.mrb[62].mxu1 }
 0x3d7   : > { %v13482_v48 = vadd.f32 %v13403_v61, %v13083_v50  ;;  %v7084_v51 = vpop.f32.mrb[63].mxu1  ;;  %v7537_v46 = vadd.f32 %v13480_v2, %v17506_v47 }
 0x3d8   : > { %v7535_v12 = vadd.f32 %v13481_v17, %v17506_v47  ;;  %v13483_v36 = vadd.f32 %v7084_v51, %v4256_v6 }
 0x3d9   : > { %v7538_v26 = vadd.f32 %v13482_v48, %v17506_v47  ;;  %v7601_v43 = vmax.f32 %v7537_v46, 0.0 }
 0x3da   : > { %v7599_v54 = vmax.f32 %v7535_v12, 0.0  ;;  %v7536_v41 = vadd.f32 %v13483_v36, %v17506_v47 }
 0x3db   : > { %v7602_v49 = vmax.f32 %v7538_v26, 0.0  ;;  %v7672_v59 = vmul.f32 %v17513_v14, %v7601_v43 }
 0x3dc   : > { %v7600_v25 = vmax.f32 %v7536_v41, 0.0  ;;  %v13406_v1 = vpop.f32.mrb[0].mxu1  ;;  %v7670_v61 = vmul.f32 %v17513_v14, %v7599_v54 }
 0x3dd   : > { %v13484_v2 = vadd.f32 %v13406_v1, %v17326_v62  ;;  %v7097_v44 = vpop.f32.mrb[1].mxu1  ;;  %7738 = vadd.xlane.f32.xlu1 %v7672_v59  ;;  %v7673_v26 = vmul.f32 %v17513_v14, %v7602_v49 }
 0x3de   : > { %v13485_v17 = vadd.f32 %v7097_v44, %v17328_v3  ;;  %v13407_v51 = vpop.f32.mrb[2].mxu1  ;;  %7734 = vadd.xlane.f32.xlu0 %v7670_v61  ;;  %v7671_v54 = vmul.f32 %v17513_v14, %v7600_v25 }
 0x3df   : > { %v7541_v46 = vadd.f32 %v13484_v2, %v17506_v47  ;;  %v13486_v12 = vadd.f32 %v13407_v51, %v17336_v10  ;;  %v7100_v36 = vpop.f32.mrb[3].mxu1 }
 0x3e0   : > { %v7539_v41 = vadd.f32 %v13485_v17, %v17506_v47  ;;  %v13487_v43 = vadd.f32 %v7100_v36, %v17341_v9 }
 0x3e1   : > { %v7605_v62 = vmax.f32 %v7541_v46, 0.0  ;;  %v7542_v48 = vadd.f32 %v13486_v12, %v17506_v47  ;;  %7740 = vadd.xlane.f32.xlu1 %v7673_v26 }
 0x3e2   : > { %v7540_v3 = vadd.f32 %v13487_v43, %v17506_v47  ;;  %7736 = vadd.xlane.f32.xlu0 %v7671_v54  ;;  %v7603_v10 = vmax.f32 %v7539_v41, 0.0 }
 0x3e3   : > { %v7606_v50 = vmax.f32 %v7542_v48, 0.0  ;;  %v7676_v6 = vmul.f32 %v17513_v14, %v7605_v62 }
 0x3e4   : > { %v13410_v59 = vpop.f32.mrb[4].mxu1  ;;  %v7604_v1 = vmax.f32 %v7540_v3, 0.0  ;;  %v7674_v36 = vmul.f32 %v17513_v14, %v7603_v10 }
 0x3e5   : > { %v13488_v49 = vadd.f32 %v13410_v59, %v17350_v55  ;;  %v7113_v61 = vpop.f32.mrb[5].mxu1  ;;  %v7677_v9 = vmul.f32 %v17513_v14, %v7606_v50 }
 0x3e6   : > { %v13489_v25 = vadd.f32 %v7113_v61, %v17352_v16  ;;  %v13411_v2 = vpop.f32.mrb[6].mxu1  ;;  %7746 = vadd.xlane.f32.xlu0 %v7676_v6  ;;  %v7675_v41 = vmul.f32 %v17513_v14, %v7604_v1 }
 0x3e7   : > { %v7545_v44 = vadd.f32 %v13488_v49, %v17506_v47  ;;  %v13490_v17 = vadd.f32 %v13411_v2, %v17360_v21  ;;  %v7116_v51 = vpop.f32.mrb[7].mxu1  ;;  %7748 = vadd.xlane.f32.xlu1 %v7677_v9 }
 0x3e8   : > { %v7543_v46 = vadd.f32 %v13489_v25, %v17506_v47  ;;  %v13491_v12 = vadd.f32 %v7116_v51, %v17365_v27 }
 0x3e9   : > { %v7609_v55 = vmax.f32 %v7545_v44, 0.0  ;;  %v7546_v26 = vadd.f32 %v13490_v17, %v17506_v47 }
 0x3ea   : > { %v7544_v16 = vadd.f32 %v13491_v12, %v17506_v47  ;;  %7742 = vadd.xlane.f32.xlu0 %v7674_v36  ;;  %v7607_v54 = vmax.f32 %v7543_v46, 0.0 }
 0x3eb   : > { %v7610_v43 = vmax.f32 %v7546_v26, 0.0  ;;  %7744 = vadd.xlane.f32.xlu1 %v7675_v41  ;;  %v7680_v21 = vmul.f32 %v17513_v14, %v7609_v55 }
 0x3ec   : > { %v13414_v62 = vpop.f32.mrb[8].mxu1  ;;  %v7608_v48 = vmax.f32 %v7544_v16, 0.0  ;;  %v7678_v25 = vmul.f32 %v17513_v14, %v7607_v54 }
 0x3ed   : > { %v13492_v3 = vadd.f32 %v13414_v62, %v17374_v19  ;;  %v7129_v27 = vpop.f32.mrb[9].mxu1  ;;  %v7681_v50 = vmul.f32 %v17513_v14, %v7610_v43 }
 0x3ee   : > { %v13493_v6 = vadd.f32 %v7129_v27, %v17376_v28  ;;  %v13415_v10 = vpop.f32.mrb[10].mxu1  ;;  %7754 = vadd.xlane.f32.xlu0 %v7680_v21  ;;  %v7679_v44 = vmul.f32 %v17513_v14, %v7608_v48 }
 0x3ef   : > { %v7549_v59 = vadd.f32 %v13492_v3, %v17506_v47  ;;  %v13494_v1 = vadd.f32 %v13415_v10, %v17384_v40  ;;  %v7132_v49 = vpop.f32.mrb[11].mxu1  ;;  %7756 = vadd.xlane.f32.xlu1 %v7681_v50 }
 0x3f0   : > { %v7547_v61 = vadd.f32 %v13493_v6, %v17506_v47  ;;  %v13495_v9 = vadd.f32 %v7132_v49, %v17392_v20 }
 0x3f1   : > { %v7613_v19 = vmax.f32 %v7549_v59, 0.0  ;;  %v7550_v2 = vadd.f32 %v13494_v1, %v17506_v47 }
 0x3f2   : > { %v7548_v28 = vadd.f32 %v13495_v9, %v17506_v47  ;;  %7750 = vadd.xlane.f32.xlu0 %v7678_v25  ;;  %v7611_v51 = vmax.f32 %v7547_v61, 0.0 }
 0x3f3   : > { %v7614_v17 = vmax.f32 %v7550_v2, 0.0  ;;  %7752 = vadd.xlane.f32.xlu1 %v7679_v44  ;;  %v7684_v40 = vmul.f32 %v17513_v14, %v7613_v19 }
 0x3f4   : > { %v13418_v46 = vpop.f32.mrb[12].mxu1  ;;  %v7612_v12 = vmax.f32 %v7548_v28, 0.0  ;;  %v7682_v48 = vmul.f32 %v17513_v14, %v7611_v51 }
 0x3f5   : > { %v13496_v36 = vadd.f32 %v13418_v46, %v17398_v53  ;;  %v7145_v20 = vpop.f32.mrb[13].mxu1  ;;  %v7685_v55 = vmul.f32 %v17513_v14, %v7614_v17 }
 0x3f6   : > { %v13497_v26 = vadd.f32 %v7145_v20, %v17400_v24  ;;  %v13419_v41 = vpop.f32.mrb[14].mxu1  ;;  %7762 = vadd.xlane.f32.xlu0 %v7684_v40  ;;  %v7683_v27 = vmul.f32 %v17513_v14, %v7612_v12 }
 0x3f7   : > { %v7553_v16 = vadd.f32 %v13496_v36, %v17506_v47  ;;  %v13498_v43 = vadd.f32 %v13419_v41, %v17408_v13  ;;  %v7148_v21 = vpop.f32.mrb[15].mxu1  ;;  %7764 = vadd.xlane.f32.xlu1 %v7685_v55 }
 0x3f8   : > { %v7551_v54 = vadd.f32 %v13497_v26, %v17506_v47  ;;  %v13499_v62 = vadd.f32 %v7148_v21, %v17410_v30 }
 0x3f9   : > { %v7617_v53 = vmax.f32 %v7553_v16, 0.0  ;;  %v7554_v3 = vadd.f32 %v13498_v43, %v17506_v47 }
 0x3fa   : > { %v7552_v24 = vadd.f32 %v13499_v62, %v17506_v47  ;;  %7758 = vadd.xlane.f32.xlu0 %v7682_v48  ;;  %v7615_v6 = vmax.f32 %v7551_v54, 0.0 }
 0x3fb   : > { %v7618_v50 = vmax.f32 %v7554_v3, 0.0  ;;  %7760 = vadd.xlane.f32.xlu1 %v7683_v27  ;;  %v7688_v13 = vmul.f32 %v17513_v14, %v7617_v53 }
 0x3fc   : > { %v13422_v10 = vpop.f32.mrb[16].mxu1  ;;  %v7616_v59 = vmax.f32 %v7552_v24, 0.0  ;;  %v7686_v17 = vmul.f32 %v17513_v14, %v7615_v6 }
 0x3fd   : > { %v13500_v1 = vadd.f32 %v13422_v10, %v17414_v22  ;;  %v7161_v30 = vpop.f32.mrb[17].mxu1  ;;  %v7689_v49 = vmul.f32 %v17513_v14, %v7618_v50 }
 0x3fe   : > { %v13501_v61 = vadd.f32 %v7161_v30, %v17416_v23  ;;  %v13423_v9 = vpop.f32.mrb[18].mxu1  ;;  %7770 = vadd.xlane.f32.xlu0 %v7688_v13  ;;  %v7687_v51 = vmul.f32 %v17513_v14, %v7616_v59 }
 0x3ff   : > { %v7557_v25 = vadd.f32 %v13500_v1, %v17506_v47  ;;  %v13502_v19 = vadd.f32 %v13423_v9, %v17418_v0  ;;  %v7164_v2 = vpop.f32.mrb[19].mxu1  ;;  %7772 = vadd.xlane.f32.xlu1 %v7689_v49 }
 0x400   : > { %v7555_v44 = vadd.f32 %v13501_v61, %v17506_v47  ;;  %v13503_v28 = vadd.f32 %v7164_v2, %v17420_v4 }
 0x401   : > { %v7621_v22 = vmax.f32 %v7557_v25, 0.0  ;;  %v7558_v40 = vadd.f32 %v13502_v19, %v17506_v47 }
 0x402   : > { %v7556_v23 = vadd.f32 %v13503_v28, %v17506_v47  ;;  %7766 = vadd.xlane.f32.xlu0 %v7686_v17  ;;  %v7619_v12 = vmax.f32 %v7555_v44, 0.0 }
 0x403   : > { %v7622_v46 = vmax.f32 %v7558_v40, 0.0  ;;  %7768 = vadd.xlane.f32.xlu1 %v7687_v51  ;;  %v7692_v0 = vmul.f32 %v17513_v14, %v7621_v22 }
 0x404   : > { %v13426_v36 = vpop.f32.mrb[20].mxu1  ;;  %v7620_v20 = vmax.f32 %v7556_v23, 0.0  ;;  %v7690_v53 = vmul.f32 %v17513_v14, %v7619_v12 }
 0x405   : > { %v13504_v55 = vadd.f32 %v13426_v36, %v17422_v29  ;;  %v7177_v4 = vpop.f32.mrb[21].mxu1  ;;  %v7693_v26 = vmul.f32 %v17513_v14, %v7622_v46 }
 0x406   : > { %v13505_v41 = vadd.f32 %v7177_v4, %v17424_v39  ;;  %v13427_v16 = vpop.f32.mrb[22].mxu1  ;;  %7778 = vadd.xlane.f32.xlu0 %v7692_v0  ;;  %v7691_v27 = vmul.f32 %v17513_v14, %v7620_v20 }
 0x407   : > { %v7561_v43 = vadd.f32 %v13504_v55, %v17506_v47  ;;  %v13506_v21 = vadd.f32 %v13427_v16, %v17426_v52  ;;  %v7180_v54 = vpop.f32.mrb[23].mxu1  ;;  %7780 = vadd.xlane.f32.xlu1 %v7693_v26 }
 0x408   : > { %v7559_v62 = vadd.f32 %v13505_v41, %v17506_v47  ;;  %v13507_v48 = vadd.f32 %v7180_v54, %v17428_v33 }
 0x409   : > { %v7625_v29 = vmax.f32 %v7561_v43, 0.0  ;;  %v7562_v3 = vadd.f32 %v13506_v21, %v17506_v47 }
 0x40a   : > { %v7560_v39 = vadd.f32 %v13507_v48, %v17506_v47  ;;  %7774 = vadd.xlane.f32.xlu0 %v7690_v53  ;;  %v7623_v50 = vmax.f32 %v7559_v62, 0.0 }
 0x40b   : > { %v7626_v24 = vmax.f32 %v7562_v3, 0.0  ;;  %7776 = vadd.xlane.f32.xlu1 %v7691_v27  ;;  %v7696_v52 = vmul.f32 %v17513_v14, %v7625_v29 }
 0x40c   : > { %v13430_v13 = vpop.f32.mrb[24].mxu1  ;;  %v7624_v6 = vmax.f32 %v7560_v39, 0.0  ;;  %v7694_v2 = vmul.f32 %v17513_v14, %v7623_v50 }
 0x40d   : > { %v13508_v10 = vadd.f32 %v13430_v13, %v17430_v34  ;;  %v7193_v33 = vpop.f32.mrb[25].mxu1  ;;  %v7697_v59 = vmul.f32 %v17513_v14, %v7626_v24 }
 0x40e   : > { %v13509_v1 = vadd.f32 %v7193_v33, %v17432_v18  ;;  %v13431_v30 = vpop.f32.mrb[26].mxu1  ;;  %7786 = vadd.xlane.f32.xlu0 %v7696_v52  ;;  %v7695_v28 = vmul.f32 %v17513_v14, %v7624_v6 }
 0x40f   : > { %v7565_v49 = vadd.f32 %v13508_v10, %v17506_v47  ;;  %v13510_v61 = vadd.f32 %v13431_v30, %v17434_v56  ;;  %v7196_v9 = vpop.f32.mrb[27].mxu1  ;;  %7788 = vadd.xlane.f32.xlu1 %v7697_v59 }
 0x410   : > { %v7563_v25 = vadd.f32 %v13509_v1, %v17506_v47  ;;  %v13511_v19 = vadd.f32 %v7196_v9, %v17436_v37 }
 0x411   : > { %v7629_v34 = vmax.f32 %v7565_v49, 0.0  ;;  %v7566_v44 = vadd.f32 %v13510_v61, %v17506_v47 }
 0x412   : > { %v7564_v18 = vadd.f32 %v13511_v19, %v17506_v47  ;;  %7782 = vadd.xlane.f32.xlu0 %v7694_v2  ;;  %v7627_v22 = vmax.f32 %v7563_v25, 0.0 }
 0x413   : > { %v7630_v17 = vmax.f32 %v7566_v44, 0.0  ;;  %7784 = vadd.xlane.f32.xlu1 %v7695_v28  ;;  %v7700_v56 = vmul.f32 %v17513_v14, %v7629_v34 }
 0x414   : > { %v13434_v40 = vpop.f32.mrb[28].mxu1  ;;  %v7628_v51 = vmax.f32 %v7564_v18, 0.0  ;;  %v7698_v41 = vmul.f32 %v17513_v14, %v7627_v22 }
 0x415   : > { %v13512_v23 = vadd.f32 %v13434_v40, %v17438_v32  ;;  %v7209_v37 = vpop.f32.mrb[29].mxu1  ;;  %v7701_v46 = vmul.f32 %v17513_v14, %v7630_v17 }
 0x416   : > { %v13513_v0 = vadd.f32 %v7209_v37, %v17440_v5  ;;  %v13435_v12 = vpop.f32.mrb[30].mxu1  ;;  %7794 = vadd.xlane.f32.xlu0 %v7700_v56  ;;  %v7699_v43 = vmul.f32 %v17513_v14, %v7628_v51 }
 0x417   : > { %v7569_v36 = vadd.f32 %v13512_v23, %v17506_v47  ;;  %v13514_v20 = vadd.f32 %v13435_v12, %v17442_v15  ;;  %v7212_v55 = vpop.f32.mrb[31].mxu1  ;;  %7796 = vadd.xlane.f32.xlu1 %v7701_v46 }
 0x418   : > { %v7567_v4 = vadd.f32 %v13513_v0, %v17506_v47  ;;  %v13515_v26 = vadd.f32 %v7212_v55, %v17444_v38 }
 0x419   : > { %v7633_v32 = vmax.f32 %v7569_v36, 0.0  ;;  %v7570_v16 = vadd.f32 %v13514_v20, %v17506_v47 }
 0x41a   : > { %v7568_v5 = vadd.f32 %v13515_v26, %v17506_v47  ;;  %7790 = vadd.xlane.f32.xlu0 %v7698_v41  ;;  %v7631_v54 = vmax.f32 %v7567_v4, 0.0  ;;  %v19636_v41 = vld [vmem:[#allocation3_spill] sm:$0xff] }
 0x41b   : > { %v7634_v21 = vmax.f32 %v7570_v16, 0.0  ;;  %7792 = vadd.xlane.f32.xlu1 %v7699_v43  ;;  %v7704_v15 = vmul.f32 %v17513_v14, %v7633_v32 }
 0x41c   : > { %v13438_v62 = vpop.f32.mrb[32].mxu1  ;;  %v7632_v48 = vmax.f32 %v7568_v5, 0.0  ;;  %v7702_v6 = vmul.f32 %v17513_v14, %v7631_v54 }
 0x41d   : > { %v13516_v53 = vadd.f32 %v13438_v62, %v17446_v7  ;;  %v7225_v38 = vpop.f32.mrb[33].mxu1  ;;  %v7705_v29 = vmul.f32 %v17513_v14, %v7634_v21 }
 0x41e   : > { %v13517_v3 = vadd.f32 %v7225_v38, %v17448_v11  ;;  %v13439_v27 = vpop.f32.mrb[34].mxu1  ;;  %7802 = vadd.xlane.f32.xlu0 %v7704_v15  ;;  %v7703_v33 = vmul.f32 %v17513_v14, %v7632_v48  ;;  %v19637_v48 = vld [vmem:[#allocation8_spill] sm:$0xff] }
 0x41f   : > { %v7573_v39 = vadd.f32 %v13516_v53, %v17506_v47  ;;  %v13518_v24 = vadd.f32 %v13439_v27, %v17450_v45  ;;  %v7228_v52 = vpop.f32.mrb[35].mxu1  ;;  %7804 = vadd.xlane.f32.xlu1 %v7705_v29 }
 0x420   : > { %v7571_v50 = vadd.f32 %v13517_v3, %v17506_v47  ;;  %v13519_v13 = vadd.f32 %v7228_v52, %v17452_v42  ;;  %v19638_v3 = vld [vmem:[#allocation7_spill] sm:$0xff]  ;;  %v19639_v52 = vld [vmem:[#allocation10_spill] sm:$0xff] }
 0x421   : > { %v7637_v7 = vmax.f32 %v7573_v39, 0.0  ;;  %v7574_v10 = vadd.f32 %v13518_v24, %v17506_v47 }
 0x422   : > { %v7572_v11 = vadd.f32 %v13519_v13, %v17506_v47  ;;  %7798 = vadd.xlane.f32.xlu0 %v7702_v6  ;;  %v7635_v1 = vmax.f32 %v7571_v50, 0.0 }
 0x423   : > { %v7638_v59 = vmax.f32 %v7574_v10, 0.0  ;;  %7800 = vadd.xlane.f32.xlu1 %v7703_v33  ;;  %v7708_v45 = vmul.f32 %v17513_v14, %v7637_v7  ;;  %v19640_v7 = vld [vmem:[#allocation9_spill] sm:$0xff] }
 0x424   : > { %v13442_v30 = vpop.f32.mrb[36].mxu1  ;;  %v7636_v49 = vmax.f32 %v7572_v11, 0.0  ;;  %v7706_v17 = vmul.f32 %v17513_v14, %v7635_v1 }
 0x425   : > { %v13520_v61 = vadd.f32 %v13442_v30, %v17454_v35  ;;  %v7241_v42 = vpop.f32.mrb[37].mxu1  ;;  %v7709_v9 = vmul.f32 %v17513_v14, %v7638_v59 }
 0x426   : > { %v13521_v25 = vadd.f32 %v7241_v42, %v17456_v63  ;;  %v13443_v19 = vpop.f32.mrb[38].mxu1  ;;  %7810 = vadd.xlane.f32.xlu0 %v7708_v45  ;;  %v7707_v22 = vmul.f32 %v17513_v14, %v7636_v49 }
 0x427   : > { %v7577_v2 = vadd.f32 %v13520_v61, %v17506_v47  ;;  %v13522_v34 = vadd.f32 %v13443_v19, %v17458_v60  ;;  %v7244_v44 = vpop.f32.mrb[39].mxu1  ;;  %7812 = vadd.xlane.f32.xlu1 %v7709_v9 }
 0x428   : > { %v7575_v28 = vadd.f32 %v13521_v25, %v17506_v47  ;;  %v13523_v18 = vadd.f32 %v7244_v44, %v17460_v58  ;;  %v19641_v25 = vld [vmem:[#allocation21_spill] sm:$0xff]  ;;  %v19642_v44 = vld [vmem:[#allocation19_spill] sm:$0xff] }
 0x429   : > { %v7641_v35 = vmax.f32 %v7577_v2, 0.0  ;;  %v7578_v56 = vadd.f32 %v13522_v34, %v17506_v47 }
 0x42a   : > { %v7576_v63 = vadd.f32 %v13523_v18, %v17506_v47  ;;  %7806 = vadd.xlane.f32.xlu0 %v7706_v17  ;;  %v7639_v51 = vmax.f32 %v7575_v28, 0.0 }
 0x42b   : > { %v7642_v40 = vmax.f32 %v7578_v56, 0.0  ;;  %7808 = vadd.xlane.f32.xlu1 %v7707_v22  ;;  %v7712_v60 = vmul.f32 %v17513_v14, %v7641_v35  ;;  %v19643_v35 = vld [vmem:[#allocation18_spill] sm:$0xff] }
 0x42c   : > { %v13446_v23 = vpop.f32.mrb[40].mxu1  ;;  %v7640_v37 = vmax.f32 %v7576_v63, 0.0  ;;  %v7710_v16 = vmul.f32 %v17513_v14, %v7639_v51 }
 0x42d   : > { %v13524_v46 = vadd.f32 %v13446_v23, %v17462_v31  ;;  %v7257_v58 = vpop.f32.mrb[41].mxu1  ;;  %v7713_v0 = vmul.f32 %v17513_v14, %v7642_v40  ;;  %v19644_v40 = vld [vmem:[#allocation17_spill] sm:$0xff] }
 0x42e   : > { %v13525_v12 = vadd.f32 %v7257_v58, %v17464_v57  ;;  %v13447_v36 = vpop.f32.mrb[42].mxu1  ;;  %7818 = vadd.xlane.f32.xlu0 %v7712_v60  ;;  %v7711_v5 = vmul.f32 %v17513_v14, %v7640_v37 }
 0x42f   : > { %v7581_v20 = vadd.f32 %v13524_v46, %v17506_v47  ;;  %v13526_v55 = vadd.f32 %v13447_v36, %v17466_v8  ;;  %v7260_v4 = vpop.f32.mrb[43].mxu1  ;;  %7820 = vadd.xlane.f32.xlu1 %v7713_v0 }
 0x430   : > { %v7579_v26 = vadd.f32 %v13525_v12, %v17506_v47  ;;  %v13527_v32 = vadd.f32 %v7260_v4, %v19636_v41  ;;  %v19645_v4 = vld [vmem:[#allocation16_spill] sm:$0xff] }
 0x431   : > { %v7645_v31 = vmax.f32 %v7581_v20, 0.0  ;;  %v7582_v43 = vadd.f32 %v13526_v55, %v17506_v47 }
 0x432   : > { %v7580_v57 = vadd.f32 %v13527_v32, %v17506_v47  ;;  %7814 = vadd.xlane.f32.xlu0 %v7710_v16  ;;  %v7643_v15 = vmax.f32 %v7579_v26, 0.0  ;;  %v19646_v16 = vld [vmem:[#allocation15_spill] sm:$0xff] }
 0x433   : > { %v7646_v21 = vmax.f32 %v7582_v43, 0.0  ;;  %7816 = vadd.xlane.f32.xlu1 %v7711_v5  ;;  %v7716_v8 = vmul.f32 %v17513_v14, %v7645_v31 }
 0x434   : > { %v13450_v54 = vpop.f32.mrb[44].mxu1  ;;  %v7644_v62 = vmax.f32 %v7580_v57, 0.0  ;;  %v7714_v33 = vmul.f32 %v17513_v14, %v7643_v15  ;;  %v19647_v57 = vld [vmem:[#allocation14_spill] sm:$0xff] }
 0x435   : > { %v13528_v53 = vadd.f32 %v13450_v54, %v19637_v48  ;;  %v7273_v38 = vpop.f32.mrb[45].mxu1  ;;  %v7717_v29 = vmul.f32 %v17513_v14, %v7646_v21  ;;  %v19648_v54 = vld [vmem:[#allocation28_spill] sm:$0xff] }
 0x436   : > { %v13529_v27 = vadd.f32 %v7273_v38, %v19638_v3  ;;  %v13451_v39 = vpop.f32.mrb[46].mxu1  ;;  %7826 = vadd.xlane.f32.xlu0 %v7716_v8  ;;  %v7715_v45 = vmul.f32 %v17513_v14, %v7644_v62 }
 0x437   : > { %v7585_v24 = vadd.f32 %v13528_v53, %v17506_v47  ;;  %v13530_v50 = vadd.f32 %v13451_v39, %v19639_v52  ;;  %v7276_v13 = vpop.f32.mrb[47].mxu1  ;;  %7828 = vadd.xlane.f32.xlu1 %v7717_v29 }
 0x438   : > { %v7583_v6 = vadd.f32 %v13529_v27, %v17506_v47  ;;  %v13531_v10 = vadd.f32 %v7276_v13, %v19640_v7  ;;  %v19649_v13 = vld [vmem:[#allocation29_spill] sm:$0xff] }
 0x439   : > { %v7649_v11 = vmax.f32 %v7585_v24, 0.0  ;;  %v7586_v59 = vadd.f32 %v13530_v50, %v17506_v47 }
 0x43a   : > { %v7584_v1 = vadd.f32 %v13531_v10, %v17506_v47  ;;  %7822 = vadd.xlane.f32.xlu0 %v7714_v33  ;;  %v7647_v61 = vmax.f32 %v7583_v6, 0.0  ;;  %v19650_v33 = vld [vmem:[#allocation27_spill] sm:$0xff] }
 0x43b   : > { %v7650_v30 = vmax.f32 %v7586_v59, 0.0  ;;  %7824 = vadd.xlane.f32.xlu1 %v7715_v45  ;;  %v7720_v49 = vmul.f32 %v17513_v14, %v7649_v11 }
 0x43c   : > { %v13454_v42 = vpop.f32.mrb[48].mxu1  ;;  %v7648_v9 = vmax.f32 %v7584_v1, 0.0  ;;  %v7718_v51 = vmul.f32 %v17513_v14, %v7647_v61  ;;  %v19651_v1 = vld [vmem:[#allocation26_spill] sm:$0xff] }
 0x43d   : > { %v13532_v19 = vadd.f32 %v13454_v42, %v19641_v25  ;;  %v7289_v2 = vpop.f32.mrb[49].mxu1  ;;  %v7721_v34 = vmul.f32 %v17513_v14, %v7650_v30  ;;  %v19652_v42 = vld [vmem:[#allocation25_spill] sm:$0xff] }
 0x43e   : > { %v13533_v28 = vadd.f32 %v7289_v2, %v19642_v44  ;;  %v13455_v18 = vpop.f32.mrb[50].mxu1  ;;  %7834 = vadd.xlane.f32.xlu0 %v7720_v49  ;;  %v7719_v46 = vmul.f32 %v17513_v14, %v7648_v9 }
 0x43f   : > { %v7589_v17 = vadd.f32 %v13532_v19, %v17506_v47  ;;  %v13534_v56 = vadd.f32 %v13455_v18, %v19643_v35  ;;  %v7292_v22 = vpop.f32.mrb[51].mxu1  ;;  %7836 = vadd.xlane.f32.xlu1 %v7721_v34 }
 0x440   : > { %v7587_v63 = vadd.f32 %v13533_v28, %v17506_v47  ;;  %v13535_v60 = vadd.f32 %v7292_v22, %v19644_v40  ;;  %v14135_v40 = vmov 269488144  }
 0x441   : > { %v7653_v23 = vmax.f32 %v7589_v17, 0.0  ;;  %v7590_v37 = vadd.f32 %v13534_v56, %v17506_v47 }
 0x442   : > { %v7588_v58 = vadd.f32 %v13535_v60, %v17506_v47  ;;  %7830 = vadd.xlane.f32.xlu0 %v7718_v51  ;;  %v7651_v36 = vmax.f32 %v7587_v63, 0.0  ;;  %v8001_v60 = vunpack.c.l.s4 %v14135_v40 }
 0x443   : > { %v7654_v0 = vmax.f32 %v7590_v37, 0.0  ;;  %7832 = vadd.xlane.f32.xlu1 %v7719_v46  ;;  %v7724_v12 = vmul.f32 %v17513_v14, %v7653_v23  ;;  %v14137_v23 = vmov 1414812756   ;;  %v14138_v46 = vmov 1987475062  }
 0x444   : > { %v13458_v20 = vpop.f32.mrb[52].mxu1  ;;  %v7652_v55 = vmax.f32 %v7588_v58, 0.0  ;;  %v7722_v48 = vmul.f32 %v17513_v14, %v7651_v36  ;;  %v8015_v37 = vunpack.c.l.s4 %v14137_v23  ;;  %v8022_v58 = vunpack.c.l.s4 %v14138_v46 }
 0x445   : > { %v13536_v26 = vadd.f32 %v13458_v20, %v19645_v4  ;;  %v7305_v41 = vpop.f32.mrb[53].mxu1  ;;  %v7725_v32 = vmul.f32 %v17513_v14, %v7654_v0  ;;  %v8002_v0 = vunpack.c.0.s8 %v8001_v60  ;;  %v14139_v4 = vmov 1983009808  }
 0x446   : > { %v13537_v31 = vadd.f32 %v7305_v41, %v19646_v16  ;;  %v13459_v43 = vpop.f32.mrb[54].mxu1  ;;  %7842 = vadd.xlane.f32.xlu0 %v7724_v12  ;;  %v7723_v29 = vmul.f32 %v17513_v14, %v7652_v55  ;;  %v8016_v36 = vunpack.c.0.s8 %v8015_v37  ;;  %v8023_v20 = vunpack.c.0.s8 %v8022_v58  ;;  %v17702_v55 = vpop.permute.xlu0 %7869  ;;  %v19653_v41 = vld [vmem:[#allocation6_spill] sm:$0xff] }
 0x447   : > { %v7593_v5 = vadd.f32 %v13536_v26, %v17506_v47  ;;  %v13538_v21 = vadd.f32 %v13459_v43, %v19647_v57  ;;  %v7308_v8 = vpop.f32.mrb[55].mxu1  ;;  %7844 = vadd.xlane.f32.xlu1 %v7725_v32  ;;  %v9795_v26 = vunpack.c.l.s4 %v14139_v4 }
 0x448   : > { %v7591_v15 = vadd.f32 %v13537_v31, %v17506_v47  ;;  %v13539_v62 = vadd.f32 %v7308_v8, %v19648_v54  ;;  %v17711_v16 = vsub.s32 %v8016_v36, %v19653_v41  ;;  %v17714_v31 = vsub.s32 %v8023_v20, %v19653_v41 }
 0x449   : > { %v7657_v53 = vmax.f32 %v7593_v5, 0.0  ;;  %v7594_v38 = vadd.f32 %v13538_v21, %v17506_v47  ;;  %v9796_v21 = vunpack.c.0.s8 %v9795_v26 }
 0x44a   : > { %v7592_v3 = vadd.f32 %v13539_v62, %v17506_v47  ;;  %7838 = vadd.xlane.f32.xlu0 %v7722_v48  ;;  %v7655_v24 = vmax.f32 %v7591_v15, 0.0 }
 0x44b   : > { %v7658_v27 = vmax.f32 %v7594_v38, 0.0  ;;  %7840 = vadd.xlane.f32.xlu1 %v7723_v29  ;;  %v7728_v39 = vmul.f32 %v17513_v14, %v7657_v53 }
 0x44c   : > { %v13462_v52 = vpop.f32.mrb[56].mxu1  ;;  %v7656_v50 = vmax.f32 %v7592_v3, 0.0  ;;  %v7726_v25 = vmul.f32 %v17513_v14, %v7655_v24 }
 0x44d   : > { %v13540_v6 = vadd.f32 %v13462_v52, %v19649_v13  ;;  %v7321_v7 = vpop.f32.mrb[57].mxu1  ;;  %v7729_v10 = vmul.f32 %v17513_v14, %v7658_v27  ;;  %v17728_v52 = vsub.s32 %v9796_v21, %v19653_v41 }
 0x44e   : > { %v13541_v11 = vadd.f32 %v7321_v7, %v19650_v33  ;;  %v13463_v59 = vpop.f32.mrb[58].mxu1  ;;  %7850 = vadd.xlane.f32.xlu0 %v7728_v39  ;;  %v7727_v34 = vmul.f32 %v17513_v14, %v7656_v50 }
 0x44f   : > { %v7597_v45 = vadd.f32 %v13540_v6, %v17506_v47  ;;  %v13542_v30 = vadd.f32 %v13463_v59, %v19651_v1  ;;  %v7324_v49 = vpop.f32.mrb[59].mxu1  ;;  %7852 = vadd.xlane.f32.xlu1 %v7729_v10 }
 0x450   : > { %v7595_v61 = vadd.f32 %v13541_v11, %v17506_v47  ;;  %v13543_v9 = vadd.f32 %v7324_v49, %v19652_v42 }
 0x451   : > { %v7661_v19 = vmax.f32 %v7597_v45, 0.0  ;;  %v7598_v2 = vadd.f32 %v13542_v30, %v17506_v47 }
 0x452   : > { %v7596_v44 = vadd.f32 %v13543_v9, %v17506_v47  ;;  %7846 = vadd.xlane.f32.xlu0 %v7726_v25  ;;  %v7659_v17 = vmax.f32 %v7595_v61, 0.0  ;;  %v14136_v47 = vmov 842150450  }
 0x453   : > { %v7662_v28 = vmax.f32 %v7598_v2, 0.0  ;;  %7848 = vadd.xlane.f32.xlu1 %v7727_v34  ;;  %v7732_v18 = vmul.f32 %v17513_v14, %v7661_v19  ;;  %v8008_v51 = vunpack.c.l.s4 %v14136_v47 }
 0x454   : > { %v7660_v35 = vmax.f32 %v7596_v44, 0.0  ;;  %v7730_v22 = vmul.f32 %v17513_v14, %v7659_v17 }
 0x455   : > { %v7733_v56 = vmul.f32 %v17513_v14, %v7662_v28  ;;  %v8009_v12 = vunpack.c.0.s8 %v8008_v51 }
 0x456   : > { %7858 = vadd.xlane.f32.xlu0 %v7732_v18  ;;  %v7731_v63 = vmul.f32 %v17513_v14, %v7660_v35  ;;  %v17705_v14 = vsub.s32 %v8002_v0, %v19653_v41 }
 0x457   : > { %7860 = vadd.xlane.f32.xlu1 %v7733_v56  ;;  %v17708_v32 = vsub.s32 %v8009_v12, %v19653_v41 }
 0x45a   : > { %7854 = vadd.xlane.f32.xlu0 %v7730_v22 }
 0x45b   : > { %7856 = vadd.xlane.f32.xlu1 %v7731_v63 }
 0x46a   : > { %v7739_v43 = vpop.xlane.xlu1 %7738 }
 0x46b   : > { %v7874_v5 = vadd.f32 %v17702_v55, %v7739_v43  ;;  %v7735_v57 = vpop.xlane.xlu0 %7734 }
 0x46c   : > { %v7872_v8 = vadd.f32 %v17702_v55, %v7735_v57 }
 0x46d   : > { %v8062_v15 = vrot.slane %v7874_v5, %v17705_v14  ;;  %v8069_v54 = vrot.slane %v7874_v5, %v17708_v32  ;;  %v8076_v62 = vrot.slane %v7874_v5, %v17711_v16  ;;  %v8083_v48 = vrot.slane %v7874_v5, %v17714_v31 }
 0x46e   : > { %v8006_v53 = vrot.slane %v7872_v8, %v17705_v14  ;;  %v8013_v38 = vrot.slane %v7872_v8, %v17708_v32  ;;  %v8020_v29 = vrot.slane %v7872_v8, %v17711_v16  ;;  %v8027_v3 = vrot.slane %v7872_v8, %v17714_v31  ;;  %v7741_v27 = vpop.xlane.xlu1 %7740 }
 0x46f   : > { %v7875_v39 = vadd.f32 %v17702_v55, %v7741_v27  ;;  %v7737_v24 = vpop.xlane.xlu0 %7736  ;;  %v9826_v50 = vcombine.low %v8062_v15, %v8069_v54  ;;  %v9827_v13 = vcombine.low %v8076_v62, %v8083_v48 }
 0x470   : > { %v7873_v6 = vadd.f32 %v17702_v55, %v7737_v24  ;;  %v9792_v7 = vcombine.low %v8006_v53, %v8013_v38  ;;  %v9793_v10 = vcombine.low %v8020_v29, %v8027_v3 }
 0x471   : > { %v8090_v33 = vrot.slane %v7875_v39, %v17705_v14  ;;  %v8097_v11 = vrot.slane %v7875_v39, %v17708_v32  ;;  %v8104_v59 = vrot.slane %v7875_v39, %v17711_v16  ;;  %v8111_v45 = vrot.slane %v7875_v39, %v17714_v31 }
 0x472   : > { %v8034_v1 = vrot.slane %v7873_v6, %v17705_v14  ;;  %v8041_v30 = vrot.slane %v7873_v6, %v17708_v32  ;;  %v9834_v61 = vrot.slane %v9826_v50, %v17728_v52  ;;  %v9841_v42 = vrot.slane %v9827_v13, %v17728_v52 }
 0x473   : > { %v7747_v49 = vpop.xlane.xlu0 %7746  ;;  %v8048_v9 = vrot.slane %v7873_v6, %v17711_v16  ;;  %v9800_v2 = vrot.slane %v9792_v7, %v17728_v52  ;;  %v9807_v34 = vrot.slane %v9793_v10, %v17728_v52  ;;  %v8055_v44 = vrot.slane %v7873_v6, %v17714_v31 }
 0x474   : > { %v7878_v25 = vadd.f32 %v17702_v55, %v7747_v49  ;;  %v7749_v19 = vpop.xlane.xlu1 %7748  ;;  %v9842_v28 = vcombine.low %v9834_v61, %v9841_v42  ;;  %v9843_v18 = vcombine.low %v8090_v33, %v8097_v11  ;;  %v9844_v17 = vcombine.low %v8104_v59, %v8111_v45 }
 0x475   : > { %v17745_v35 = vadd.f32 %v17702_v55, %v7749_v19  ;;  %v9808_v23 = vcombine.low %v9800_v2, %v9807_v34  ;;  %v9809_v37 = vcombine.low %v8034_v1, %v8041_v30  ;;  %v9810_v12 = vcombine.low %v8048_v9, %v8055_v44 }
 0x476   : > { %v8174_v56 = vrot.slane %v7878_v25, %v17705_v14  ;;  %v8181_v22 = vrot.slane %v7878_v25, %v17708_v32  ;;  %v8188_v63 = vrot.slane %v7878_v25, %v17711_v16  ;;  %v8195_v40 = vrot.slane %v7878_v25, %v17714_v31  ;;  %10887 = vperm.xlu1 %14010, %v9842_v28  }
 0x477   : > { %v7743_v60 = vpop.xlane.xlu0 %7742  ;;  %v9851_v58 = vrot.slane %v9843_v18, %v17728_v52  ;;  %v9858_v0 = vrot.slane %v9844_v17, %v17728_v52  ;;  %v8202_v36 = vrot.slane %v17745_v35, %v17705_v14  ;;  %v8209_v20 = vrot.slane %v17745_v35, %v17708_v32 }
 0x478   : > { %v7876_v47 = vadd.f32 %v17702_v55, %v7743_v60  ;;  %v7745_v51 = vpop.xlane.xlu1 %7744  ;;  %v8216_v4 = vrot.slane %v17745_v35, %v17711_v16  ;;  %v9894_v57 = vcombine.low %v8174_v56, %v8181_v22  ;;  %v9895_v21 = vcombine.low %v8188_v63, %v8195_v40 }
 0x479   : > { %v17753_v46 = vadd.f32 %v17702_v55, %v7745_v51  ;;  %v8223_v8 = vrot.slane %v17745_v35, %v17714_v31  ;;  %v9859_v38 = vcombine.low %v9851_v58, %v9858_v0  ;;  %v9817_v29 = vrot.slane %v9809_v37, %v17728_v52 }
 0x47a   : > { %v8118_v26 = vrot.slane %v7876_v47, %v17705_v14  ;;  %v8125_v43 = vrot.slane %v7876_v47, %v17708_v32  ;;  %10881 = vperm.xlu1 %14010, %v9808_v23   ;;  %v8132_v15 = vrot.slane %v7876_v47, %v17711_v16  ;;  %v8139_v54 = vrot.slane %v7876_v47, %v17714_v31 }
 0x47b   : > { %v7755_v5 = vpop.xlane.xlu0 %7754  ;;  %v8146_v53 = vrot.slane %v17753_v46, %v17705_v14  ;;  %v9824_v3 = vrot.slane %v9810_v12, %v17728_v52  ;;  %v9902_v7 = vrot.slane %v9894_v57, %v17728_v52  ;;  %v9909_v10 = vrot.slane %v9895_v21, %v17728_v52 }
 0x47c   : > { %v7882_v62 = vadd.f32 %v17702_v55, %v7755_v5  ;;  %v7757_v48 = vpop.xlane.xlu1 %7756  ;;  %v9860_v33 = vcombine.low %v8118_v26, %v8125_v43  ;;  %v9861_v30 = vcombine.low %v8132_v15, %v8139_v54  ;;  %v8153_v49 = vrot.slane %v17753_v46, %v17708_v32 }
 0x47d   : > { %v17779_v13 = vadd.f32 %v17702_v55, %v7757_v48  ;;  %v8160_v61 = vrot.slane %v17753_v46, %v17711_v16  ;;  %v8167_v42 = vrot.slane %v17753_v46, %v17714_v31  ;;  %v9825_v9 = vcombine.low %v9817_v29, %v9824_v3 }
 0x47e   : > { %v8286_v27 = vrot.slane %v7882_v62, %v17705_v14  ;;  %v8293_v39 = vrot.slane %v7882_v62, %v17708_v32  ;;  %v8300_v24 = vrot.slane %v7882_v62, %v17711_v16  ;;  %v8307_v50 = vrot.slane %v7882_v62, %v17714_v31  ;;  %10890 = vperm.xlu1 %14010, %v9859_v38  }
 0x47f   : > { %v7751_v6 = vpop.xlane.xlu0 %7750  ;;  %v8314_v44 = vrot.slane %v17779_v13, %v17705_v14  ;;  %v9910_v17 = vcombine.low %v9902_v7, %v9909_v10  ;;  %v9868_v35 = vrot.slane %v9860_v33, %v17728_v52  ;;  %v9875_v60 = vrot.slane %v9861_v30, %v17728_v52 }
 0x480   : > { %v7880_v11 = vadd.f32 %v17702_v55, %v7751_v6  ;;  %v7753_v59 = vpop.xlane.xlu1 %7752  ;;  %v9962_v45 = vcombine.low %v8286_v27, %v8293_v39  ;;  %v9963_v1 = vcombine.low %v8300_v24, %v8307_v50  ;;  %v9911_v23 = vcombine.low %v8202_v36, %v8209_v20 }
 0x481   : > { %v17797_v28 = vadd.f32 %v17702_v55, %v7753_v59  ;;  %v9912_v37 = vcombine.low %v8216_v4, %v8223_v8  ;;  %v8321_v58 = vrot.slane %v17779_v13, %v17708_v32  ;;  %v8328_v0 = vrot.slane %v17779_v13, %v17711_v16 }
 0x482   : > { %v8230_v25 = vrot.slane %v7880_v11, %v17705_v14  ;;  %v8237_v19 = vrot.slane %v7880_v11, %v17708_v32  ;;  %v8244_v2 = vrot.slane %v7880_v11, %v17711_v16  ;;  %v8251_v34 = vrot.slane %v7880_v11, %v17714_v31  ;;  %10884 = vperm.xlu1 %14010, %v9825_v9  }
 0x483   : > { %v7763_v18 = vpop.xlane.xlu0 %7762  ;;  %v9970_v63 = vrot.slane %v9962_v45, %v17728_v52  ;;  %v9977_v40 = vrot.slane %v9963_v1, %v17728_v52  ;;  %v8335_v43 = vrot.slane %v17779_v13, %v17714_v31  ;;  %v8258_v62 = vrot.slane %v17797_v28, %v17705_v14 }
 0x484   : > { %v7886_v56 = vadd.f32 %v17702_v55, %v7763_v18  ;;  %v7765_v22 = vpop.xlane.xlu1 %7764  ;;  %v9928_v47 = vcombine.low %v8230_v25, %v8237_v19  ;;  %v9929_v51 = vcombine.low %v8244_v2, %v8251_v34  ;;  %v9876_v48 = vcombine.low %v9868_v35, %v9875_v60 }
 0x485   : > { %v17815_v36 = vadd.f32 %v17702_v55, %v7765_v22  ;;  %v9978_v4 = vcombine.low %v9970_v63, %v9977_v40  ;;  %v9919_v38 = vrot.slane %v9911_v23, %v17728_v52  ;;  %v9926_v29 = vrot.slane %v9912_v37, %v17728_v52 }
 0x486   : > { %v8398_v12 = vrot.slane %v7886_v56, %v17705_v14  ;;  %v8405_v26 = vrot.slane %v7886_v56, %v17708_v32  ;;  %v8412_v5 = vrot.slane %v7886_v56, %v17711_v16  ;;  %v8419_v57 = vrot.slane %v7886_v56, %v17714_v31  ;;  %10899 = vperm.xlu1 %14010, %v9910_v17  }
 0x487   : > { %v7759_v20 = vpop.xlane.xlu0 %7758  ;;  %v9936_v15 = vrot.slane %v9928_v47, %v17728_v52  ;;  %v9943_v54 = vrot.slane %v9929_v51, %v17728_v52  ;;  %v8265_v3 = vrot.slane %v17797_v28, %v17708_v32  ;;  %v8272_v27 = vrot.slane %v17797_v28, %v17711_v16  ;;  %10911 = vperm.xlu0 %14009, %v9978_v4  }
 0x488   : > { %v7884_v21 = vadd.f32 %v17702_v55, %v7759_v20  ;;  %v7761_v8 = vpop.xlane.xlu1 %7760  ;;  %v8279_v39 = vrot.slane %v17797_v28, %v17714_v31  ;;  %v10030_v24 = vcombine.low %v8398_v12, %v8405_v26  ;;  %v8426_v50 = vrot.slane %v17815_v36, %v17705_v14 }
 0x489   : > { %v17835_v10 = vadd.f32 %v17702_v55, %v7761_v8  ;;  %v9944_v45 = vcombine.low %v9936_v15, %v9943_v54  ;;  %v10031_v30 = vcombine.low %v8412_v5, %v8419_v57  ;;  %v9927_v25 = vcombine.low %v9919_v38, %v9926_v29 }
 0x48a   : > { %v8342_v6 = vrot.slane %v7884_v21, %v17705_v14  ;;  %v8349_v7 = vrot.slane %v7884_v21, %v17708_v32  ;;  %10893 = vperm.xlu1 %14010, %v9876_v48   ;;  %v8356_v11 = vrot.slane %v7884_v21, %v17711_v16  ;;  %v8363_v59 = vrot.slane %v7884_v21, %v17714_v31 }
 0x48b   : > { %v7771_v33 = vpop.xlane.xlu0 %7770  ;;  %v9877_v19 = vcombine.low %v8146_v53, %v8153_v49  ;;  %v9878_v2 = vcombine.low %v8160_v61, %v8167_v42  ;;  %v8433_v34 = vrot.slane %v17815_v36, %v17708_v32  ;;  %v8440_v18 = vrot.slane %v17815_v36, %v17711_v16  ;;  %10905 = vperm.xlu0 %14009, %v9944_v45  }
 0x48c   : > { %v7773_v1 = vpop.xlane.xlu1 %7772  ;;  %v7890_v9 = vadd.f32 %v17702_v55, %v7771_v33  ;;  %v8447_v17 = vrot.slane %v17815_v36, %v17714_v31  ;;  %v10038_v35 = vrot.slane %v10030_v24, %v17728_v52  ;;  %v8370_v56 = vrot.slane %v17835_v10, %v17705_v14 }
 0x48d   : > { %v8377_v46 = vrot.slane %v17835_v10, %v17708_v32  ;;  %v8384_v53 = vrot.slane %v17835_v10, %v17711_v16  ;;  %v17857_v49 = vadd.f32 %v17702_v55, %v7773_v1  ;;  %v8391_v42 = vrot.slane %v17835_v10, %v17714_v31 }
 0x48e   : > { %10902 = vperm.xlu1 %14010, %v9927_v25   ;;  %v10045_v22 = vrot.slane %v10031_v30, %v17728_v52  ;;  %v9885_v40 = vrot.slane %v9877_v19, %v17728_v52  ;;  %v9892_v60 = vrot.slane %v9878_v2, %v17728_v52  ;;  %v8510_v47 = vrot.slane %v7890_v9, %v17705_v14 }
 0x48f   : > { %v7767_v61 = vpop.xlane.xlu0 %7766  ;;  %v9996_v23 = vcombine.low %v8342_v6, %v8349_v7  ;;  %v9997_v37 = vcombine.low %v8356_v11, %v8363_v59  ;;  %v8517_v12 = vrot.slane %v7890_v9, %v17708_v32  ;;  %v8524_v26 = vrot.slane %v7890_v9, %v17711_v16 }
 0x490   : > { %v7769_v63 = vpop.xlane.xlu1 %7768  ;;  %v17866_v51 = vadd.f32 %v17702_v55, %v7767_v61  ;;  %v8531_v5 = vrot.slane %v7890_v9, %v17714_v31  ;;  %v10046_v57 = vcombine.low %v10038_v35, %v10045_v22  ;;  %v8538_v20 = vrot.slane %v17857_v49, %v17705_v14 }
 0x491   : > { %v8545_v4 = vrot.slane %v17857_v49, %v17708_v32  ;;  %v8552_v21 = vrot.slane %v17857_v49, %v17711_v16  ;;  %v9979_v15 = vcombine.low %v8314_v44, %v8321_v58  ;;  %v17884_v54 = vadd.f32 %v17702_v55, %v7769_v63 }
 0x492   : > { %10923 = vperm.xlu0 %14009, %v10046_v57   ;;  %v9893_v48 = vcombine.low %v9885_v40, %v9892_v60  ;;  %v10004_v38 = vrot.slane %v9996_v23, %v17728_v52  ;;  %v10011_v29 = vrot.slane %v9997_v37, %v17728_v52  ;;  %v8559_v6 = vrot.slane %v17857_v49, %v17714_v31 }
 0x493   : > { %v7779_v8 = vpop.xlane.xlu0 %7778  ;;  %v8454_v7 = vrot.slane %v17866_v51, %v17705_v14  ;;  %v8461_v33 = vrot.slane %v17866_v51, %v17708_v32  ;;  %v9980_v44 = vcombine.low %v8328_v0, %v8335_v43  ;;  %v10098_v59 = vcombine.low %v8510_v47, %v8517_v12 }
 0x494   : > { %v7781_v24 = vpop.xlane.xlu1 %7780  ;;  %10896 = vperm.xlu1 %14010, %v9893_v48   ;;  %v10012_v58 = vcombine.low %v10004_v38, %v10011_v29  ;;  %v7894_v11 = vadd.f32 %v17702_v55, %v7779_v8  ;;  %v10099_v45 = vcombine.low %v8524_v26, %v8531_v5  ;;  %v8468_v1 = vrot.slane %v17866_v51, %v17711_v16 }
 0x495   : > { %v8475_v30 = vrot.slane %v17866_v51, %v17714_v31  ;;  %v9987_v9 = vrot.slane %v9979_v15, %v17728_v52  ;;  %v9945_v13 = vcombine.low %v8258_v62, %v8265_v3  ;;  %v8482_v0 = vrot.slane %v17884_v54, %v17705_v14 }
 0x496   : > { %v8489_v43 = vrot.slane %v17884_v54, %v17708_v32  ;;  %v8496_v19 = vrot.slane %v17884_v54, %v17711_v16  ;;  %10917 = vperm.xlu0 %14009, %v10012_v58   ;;  %v17919_v2 = vadd.f32 %v17702_v55, %v7781_v24  ;;  %v8503_v61 = vrot.slane %v17884_v54, %v17714_v31 }
 0x497   : > { %v7775_v25 = vpop.xlane.xlu0 %7774  ;;  %v9994_v22 = vrot.slane %v9980_v44, %v17728_v52  ;;  %v10106_v62 = vrot.slane %v10098_v59, %v17728_v52  ;;  %v10113_v3 = vrot.slane %v10099_v45, %v17728_v52  ;;  %v8622_v63 = vrot.slane %v7894_v11, %v17705_v14 }
 0x498   : > { %v7777_v35 = vpop.xlane.xlu1 %7776  ;;  %v17928_v40 = vadd.f32 %v17702_v55, %v7775_v25  ;;  %v9946_v60 = vcombine.low %v8272_v27, %v8279_v39  ;;  %v10064_v47 = vcombine.low %v8454_v7, %v8461_v33  ;;  %v8629_v51 = vrot.slane %v7894_v11, %v17708_v32 }
 0x499   : > { %v9995_v23 = vcombine.low %v9987_v9, %v9994_v22  ;;  %v10114_v37 = vcombine.low %v10106_v62, %v10113_v3  ;;  %v9953_v12 = vrot.slane %v9945_v13, %v17728_v52  ;;  %v8636_v5 = vrot.slane %v7894_v11, %v17711_v16 }
 0x49a   : > { %v8643_v57 = vrot.slane %v7894_v11, %v17714_v31  ;;  %v8650_v8 = vrot.slane %v17919_v2, %v17705_v14  ;;  %v8657_v15 = vrot.slane %v17919_v2, %v17708_v32  ;;  %v8664_v27 = vrot.slane %v17919_v2, %v17711_v16 }
 0x49b   : > { %v7787_v26 = vpop.xlane.xlu0 %7786  ;;  %10914 = vperm.xlu1 %14010, %v9995_v23   ;;  %10935 = vperm.xlu0 %14009, %v10114_v37   ;;  %v17947_v39 = vadd.f32 %v17702_v55, %v7777_v35  ;;  %v9960_v48 = vrot.slane %v9946_v60, %v17728_v52  ;;  %v8671_v38 = vrot.slane %v17919_v2, %v17714_v31  ;;  %v19654_v60 = vlaneseq }
 0x49c   : > { %v7789_v28 = vpop.xlane.xlu1 %7788  ;;  %v8566_v29 = vrot.slane %v17928_v40, %v17705_v14  ;;  %v10065_v24 = vcombine.low %v8468_v1, %v8475_v30  ;;  %v10072_v7 = vrot.slane %v10064_v47, %v17728_v52  ;;  %v10047_v44 = vcombine.low %v8426_v50, %v8433_v34 }
 0x49d   : > { %v9961_v33 = vcombine.low %v9953_v12, %v9960_v48  ;;  %v10048_v58 = vcombine.low %v8440_v18, %v8447_v17  ;;  %v10166_v11 = vcombine.low %v8622_v63, %v8629_v51  ;;  %v8573_v45 = vrot.slane %v17928_v40, %v17708_v32 }
 0x49e   : > { %v8580_v1 = vrot.slane %v17928_v40, %v17711_v16  ;;  %v8587_v30 = vrot.slane %v17928_v40, %v17714_v31  ;;  %v10079_v50 = vrot.slane %v10065_v24, %v17728_v52  ;;  %v8594_v9 = vrot.slane %v17947_v39, %v17705_v14 }
 0x49f   : > { %v7783_v59 = vpop.xlane.xlu0 %7782  ;;  %v8601_v36 = vrot.slane %v17947_v39, %v17708_v32  ;;  %v8608_v18 = vrot.slane %v17947_v39, %v17711_v16  ;;  %10908 = vperm.xlu1 %14010, %v9961_v33   ;;  %v7898_v17 = vadd.f32 %v17702_v55, %v7787_v26  ;;  %v17982_v13 = vadd.f32 %v17702_v55, %v7789_v28 }
 0x4a0   : > { %v7785_v34 = vpop.xlane.xlu1 %7784  ;;  %v10080_v25 = vcombine.low %v10072_v7, %v10079_v50  ;;  %v10055_v35 = vrot.slane %v10047_v44, %v17728_v52  ;;  %v10062_v22 = vrot.slane %v10048_v58, %v17728_v52  ;;  %v8615_v62 = vrot.slane %v17947_v39, %v17714_v31 }
 0x4a1   : > { %v10167_v3 = vcombine.low %v8636_v5, %v8643_v57  ;;  %v10174_v63 = vrot.slane %v10166_v11, %v17728_v52  ;;  %v17990_v47 = vand.u32 127, %v19654_v60  ;;  %v10013_v23 = vcombine.low %v8370_v56, %v8377_v46 }
 0x4a2   : > { %10929 = vperm.xlu0 %14009, %v10080_v25   ;;  %v10063_v51 = vcombine.low %v10055_v35, %v10062_v22  ;;  %v10014_v37 = vcombine.low %v8384_v53, %v8391_v42  ;;  %v10132_v12 = vcombine.low %v8566_v29, %v8573_v45  ;;  %v8734_v5 = vrot.slane %v7898_v17, %v17705_v14 }
 0x4a3   : > { %v7795_v40 = vpop.xlane.xlu0 %7794  ;;  %v8741_v57 = vrot.slane %v7898_v17, %v17708_v32  ;;  %v8748_v28 = vrot.slane %v7898_v17, %v17711_v16  ;;  %v10181_v48 = vrot.slane %v10167_v3, %v17728_v52  ;;  %v8755_v24 = vrot.slane %v7898_v17, %v17714_v31 }
 0x4a4   : > { %v7797_v26 = vpop.xlane.xlu1 %7796  ;;  %v8762_v56 = vrot.slane %v17982_v13, %v17705_v14  ;;  %v8769_v46 = vrot.slane %v17982_v13, %v17708_v32  ;;  %10926 = vperm.xlu1 %14010, %v10063_v51   ;;  %v7896_v10 = vadd.f32 %v17702_v55, %v7783_v59  ;;  %v18015_v42 = vadd.f32 %v17702_v55, %v7785_v34 }
 0x4a5   : > { %v10182_v53 = vcombine.low %v10174_v63, %v10181_v48  ;;  %v10021_v29 = vrot.slane %v10013_v23, %v17728_v52  ;;  %v10028_v7 = vrot.slane %v10014_v37, %v17728_v52  ;;  %v8776_v44 = vrot.slane %v17982_v13, %v17711_v16 }
 0x4a6   : > { %v8783_v58 = vrot.slane %v17982_v13, %v17714_v31  ;;  %v10133_v11 = vcombine.low %v8580_v1, %v8587_v30  ;;  %v10140_v45 = vrot.slane %v10132_v12, %v17728_v52  ;;  %v10115_v34 = vcombine.low %v8538_v20, %v8545_v4 }
 0x4a7   : > { %v7791_v33 = vpop.xlane.xlu0 %7790  ;;  %10947 = vperm.xlu0 %14009, %v10182_v53   ;;  %v10029_v59 = vcombine.low %v10021_v29, %v10028_v7  ;;  %v10116_v17 = vcombine.low %v8552_v21, %v8559_v6  ;;  %v10234_v1 = vcombine.low %v8734_v5, %v8741_v57  ;;  %v8678_v30 = vrot.slane %v7896_v10, %v17705_v14 }
 0x4a8   : > { %v7793_v50 = vpop.xlane.xlu1 %7792  ;;  %v8685_v25 = vrot.slane %v7896_v10, %v17708_v32  ;;  %v8692_v35 = vrot.slane %v7896_v10, %v17711_v16  ;;  %v10147_v22 = vrot.slane %v10133_v11, %v17728_v52  ;;  %v8699_v3 = vrot.slane %v7896_v10, %v17714_v31 }
 0x4a9   : > { %v8706_v20 = vrot.slane %v18015_v42, %v17705_v14  ;;  %v8713_v4 = vrot.slane %v18015_v42, %v17708_v32  ;;  %10920 = vperm.xlu1 %14010, %v10029_v59   ;;  %v7902_v49 = vadd.f32 %v17702_v55, %v7795_v40  ;;  %v18047_v63 = vadd.f32 %v17702_v55, %v7797_v26 }
 0x4aa   : > { %v10148_v6 = vcombine.low %v10140_v45, %v10147_v22  ;;  %v10123_v60 = vrot.slane %v10115_v34, %v17728_v52  ;;  %v10130_v51 = vrot.slane %v10116_v17, %v17728_v52  ;;  %v8720_v37 = vrot.slane %v18015_v42, %v17711_v16 }
 0x4ab   : > { %v7803_v21 = vpop.xlane.xlu0 %7802  ;;  %v8727_v12 = vrot.slane %v18015_v42, %v17714_v31  ;;  %v10235_v5 = vcombine.low %v8748_v28, %v8755_v24  ;;  %v10242_v57 = vrot.slane %v10234_v1, %v17728_v52  ;;  %v10081_v26 = vcombine.low %v8482_v0, %v8489_v43 }
 0x4ac   : > { %v7805_v23 = vpop.xlane.xlu1 %7804  ;;  %10941 = vperm.xlu0 %14009, %v10148_v6   ;;  %v10131_v40 = vcombine.low %v10123_v60, %v10130_v51  ;;  %v10082_v48 = vcombine.low %v8496_v19, %v8503_v61  ;;  %v10200_v10 = vcombine.low %v8678_v30, %v8685_v25  ;;  %v8846_v28 = vrot.slane %v7902_v49, %v17705_v14 }
 0x4ad   : > { %v8853_v24 = vrot.slane %v7902_v49, %v17708_v32  ;;  %v8860_v53 = vrot.slane %v7902_v49, %v17711_v16  ;;  %v10249_v29 = vrot.slane %v10235_v5, %v17728_v52  ;;  %v8867_v11 = vrot.slane %v7902_v49, %v17714_v31 }
 0x4ae   : > { %v8874_v0 = vrot.slane %v18047_v63, %v17705_v14  ;;  %v8881_v43 = vrot.slane %v18047_v63, %v17708_v32  ;;  %10938 = vperm.xlu1 %14010, %v10131_v40   ;;  %v7900_v54 = vadd.f32 %v17702_v55, %v7791_v33  ;;  %v18079_v45 = vadd.f32 %v17702_v55, %v7793_v50 }
 0x4af   : > { %v7799_v7 = vpop.xlane.xlu0 %7798  ;;  %v10250_v61 = vcombine.low %v10242_v57, %v10249_v29  ;;  %v10089_v59 = vrot.slane %v10081_v26, %v17728_v52  ;;  %v10096_v34 = vrot.slane %v10082_v48, %v17728_v52  ;;  %v8888_v17 = vrot.slane %v18047_v63, %v17711_v16 }
 0x4b0   : > { %v7801_v19 = vpop.xlane.xlu1 %7800  ;;  %v8895_v1 = vrot.slane %v18047_v63, %v17714_v31  ;;  %v10201_v30 = vcombine.low %v8692_v35, %v8699_v3  ;;  %v10208_v25 = vrot.slane %v10200_v10, %v17728_v52  ;;  %v10183_v50 = vcombine.low %v8650_v8, %v8657_v15 }
 0x4b1   : > { %10959 = vperm.xlu0 %14009, %v10250_v61   ;;  %v10097_v33 = vcombine.low %v10089_v59, %v10096_v34  ;;  %v10184_v22 = vcombine.low %v8664_v27, %v8671_v38  ;;  %v10302_v49 = vcombine.low %v8846_v28, %v8853_v24  ;;  %v8790_v3 = vrot.slane %v7900_v54, %v17705_v14 }
 0x4b2   : > { %v8797_v6 = vrot.slane %v7900_v54, %v17708_v32  ;;  %v8804_v60 = vrot.slane %v7900_v54, %v17711_v16  ;;  %v10215_v51 = vrot.slane %v10201_v30, %v17728_v52  ;;  %v8811_v8 = vrot.slane %v7900_v54, %v17714_v31 }
 0x4b3   : > { %v7811_v35 = vpop.xlane.xlu0 %7810  ;;  %v8818_v15 = vrot.slane %v18079_v45, %v17705_v14  ;;  %v8825_v2 = vrot.slane %v18079_v45, %v17708_v32  ;;  %10932 = vperm.xlu1 %14010, %v10097_v33   ;;  %v7906_v27 = vadd.f32 %v17702_v55, %v7803_v21  ;;  %v18111_v57 = vadd.f32 %v17702_v55, %v7805_v23 }
 0x4b4   : > { %v7813_v5 = vpop.xlane.xlu1 %7812  ;;  %v10216_v38 = vcombine.low %v10208_v25, %v10215_v51  ;;  %v10191_v40 = vrot.slane %v10183_v50, %v17728_v52  ;;  %v10198_v26 = vrot.slane %v10184_v22, %v17728_v52  ;;  %v8832_v48 = vrot.slane %v18079_v45, %v17711_v16 }
 0x4b5   : > { %v8839_v10 = vrot.slane %v18079_v45, %v17714_v31  ;;  %v10303_v28 = vcombine.low %v8860_v53, %v8867_v11  ;;  %v10310_v24 = vrot.slane %v10302_v49, %v17728_v52  ;;  %v10149_v23 = vcombine.low %v8594_v9, %v8601_v36 }
 0x4b6   : > { %10953 = vperm.xlu0 %14009, %v10216_v38   ;;  %v10199_v21 = vcombine.low %v10191_v40, %v10198_v26  ;;  %v10150_v54 = vcombine.low %v8608_v18, %v8615_v62  ;;  %v10268_v53 = vcombine.low %v8790_v3, %v8797_v6  ;;  %v8958_v61 = vrot.slane %v7906_v27, %v17705_v14 }
 0x4b7   : > { %v7807_v29 = vpop.xlane.xlu0 %7806  ;;  %v8965_v59 = vrot.slane %v7906_v27, %v17708_v32  ;;  %v8972_v34 = vrot.slane %v7906_v27, %v17711_v16  ;;  %v10317_v30 = vrot.slane %v10303_v28, %v17728_v52  ;;  %v8979_v25 = vrot.slane %v7906_v27, %v17714_v31 }
 0x4b8   : > { %v7809_v11 = vpop.xlane.xlu1 %7808  ;;  %v8986_v9 = vrot.slane %v18111_v57, %v17705_v14  ;;  %v8993_v36 = vrot.slane %v18111_v57, %v17708_v32  ;;  %10950 = vperm.xlu1 %14010, %v10199_v21   ;;  %v7904_v39 = vadd.f32 %v17702_v55, %v7799_v7  ;;  %v18143_v62 = vadd.f32 %v17702_v55, %v7801_v19 }
 0x4b9   : > { %v10318_v18 = vcombine.low %v10310_v24, %v10317_v30  ;;  %v10157_v33 = vrot.slane %v10149_v23, %v17728_v52  ;;  %v10164_v50 = vrot.slane %v10150_v54, %v17728_v52  ;;  %v9000_v22 = vrot.slane %v18111_v57, %v17711_v16 }
 0x4ba   : > { %v9007_v49 = vrot.slane %v18111_v57, %v17714_v31  ;;  %v10269_v3 = vcombine.low %v8804_v60, %v8811_v8  ;;  %v10276_v6 = vrot.slane %v10268_v53, %v17728_v52  ;;  %v10251_v19 = vcombine.low %v8762_v56, %v8769_v46 }
 0x4bb   : > { %v7819_v51 = vpop.xlane.xlu0 %7818  ;;  %10971 = vperm.xlu0 %14009, %v10318_v18   ;;  %v10165_v7 = vcombine.low %v10157_v33, %v10164_v50  ;;  %v10252_v60 = vcombine.low %v8776_v44, %v8783_v58  ;;  %v10370_v8 = vcombine.low %v8958_v61, %v8965_v59  ;;  %v8902_v38 = vrot.slane %v7904_v39, %v17705_v14 }
 0x4bc   : > { %v18152_v27 = vpop.xlane.xlu1 %7820  ;;  %v8909_v40 = vrot.slane %v7904_v39, %v17708_v32  ;;  %v8916_v26 = vrot.slane %v7904_v39, %v17711_v16  ;;  %v10283_v28 = vrot.slane %v10269_v3, %v17728_v52  ;;  %v8923_v24 = vrot.slane %v7904_v39, %v17714_v31 }
 0x4bd   : > { %v8930_v56 = vrot.slane %v18143_v62, %v17705_v14  ;;  %v8937_v46 = vrot.slane %v18143_v62, %v17708_v32  ;;  %10944 = vperm.xlu1 %14010, %v10165_v7   ;;  %v7910_v13 = vadd.f32 %v17702_v55, %v7811_v35  ;;  %v18177_v58 = vadd.f32 %v17702_v55, %v7813_v5 }
 0x4be   : > { %v10284_v44 = vcombine.low %v10276_v6, %v10283_v28  ;;  %v10259_v21 = vrot.slane %v10251_v19, %v17728_v52  ;;  %v10266_v23 = vrot.slane %v10252_v60, %v17728_v52  ;;  %v8944_v53 = vrot.slane %v18143_v62, %v17711_v16 }
 0x4bf   : > { %v8951_v61 = vrot.slane %v18143_v62, %v17714_v31  ;;  %v10371_v59 = vcombine.low %v8972_v34, %v8979_v25  ;;  %v10378_v30 = vrot.slane %v10370_v8, %v17728_v52  ;;  %v10217_v5 = vcombine.low %v8706_v20, %v8713_v4  ;;  %v7815_v34 = vpop.xlane.xlu0 %7814 }
 0x4c0   : > { %v18181_v54 = vpop.xlane.xlu1 %7816  ;;  %10965 = vperm.xlu0 %14009, %v10284_v44   ;;  %v10267_v35 = vcombine.low %v10259_v21, %v10266_v23  ;;  %v10218_v39 = vcombine.low %v8720_v37, %v8727_v12  ;;  %v10336_v18 = vcombine.low %v8902_v38, %v8909_v40  ;;  %v9070_v25 = vrot.slane %v7910_v13, %v17705_v14 }
 0x4c1   : > { %v9077_v33 = vrot.slane %v7910_v13, %v17708_v32  ;;  %v10385_v50 = vrot.slane %v10371_v59, %v17728_v52  ;;  %v18204_v3 = vadd.f32 %v17702_v55, %v7807_v29  ;;  %v9084_v20 = vrot.slane %v7910_v13, %v17711_v16 }
 0x4c2   : > { %v9091_v4 = vrot.slane %v7910_v13, %v17714_v31  ;;  %v9098_v6 = vrot.slane %v18177_v58, %v17705_v14  ;;  %v9105_v42 = vrot.slane %v18177_v58, %v17708_v32  ;;  %10962 = vperm.xlu1 %14010, %v10267_v35   ;;  %v18215_v7 = vadd.f32 %v17702_v55, %v7809_v11 }
 0x4c3   : > { %v10386_v12 = vcombine.low %v10378_v30, %v10385_v50  ;;  %v10225_v29 = vrot.slane %v10217_v5, %v17728_v52  ;;  %v10232_v19 = vrot.slane %v10218_v39, %v17728_v52  ;;  %v9112_v60 = vrot.slane %v18177_v58, %v17711_v16  ;;  %v7827_v23 = vpop.xlane.xlu0 %7826 }
 0x4c4   : > { %v18212_v37 = vpop.xlane.xlu1 %7828  ;;  %v10337_v8 = vcombine.low %v8916_v26, %v8923_v24  ;;  %v10344_v38 = vrot.slane %v10336_v18, %v17728_v52  ;;  %v7914_v40 = vadd.f32 %v17702_v55, %v7819_v51  ;;  %v9119_v28 = vrot.slane %v18177_v58, %v17714_v31 }
 0x4c5   : > { %10983 = vperm.xlu0 %14009, %v10386_v12   ;;  %v9014_v11 = vrot.slane %v18204_v3, %v17705_v14  ;;  %v10233_v13 = vcombine.low %v10225_v29, %v10232_v19  ;;  %v10319_v44 = vcombine.low %v8874_v0, %v8881_v43  ;;  %v9021_v26 = vrot.slane %v18204_v3, %v17708_v32 }
 0x4c6   : > { %v9028_v51 = vrot.slane %v18204_v3, %v17711_v16  ;;  %v9035_v24 = vrot.slane %v18204_v3, %v17714_v31  ;;  %v10351_v21 = vrot.slane %v10337_v8, %v17728_v52  ;;  %v9042_v30 = vrot.slane %v18215_v7, %v17705_v14 }
 0x4c7   : > { %v9049_v0 = vrot.slane %v18215_v7, %v17708_v32  ;;  %v9056_v43 = vrot.slane %v18215_v7, %v17711_v16  ;;  %v9063_v35 = vrot.slane %v18215_v7, %v17714_v31  ;;  %10956 = vperm.xlu1 %14010, %v10233_v13   ;;  %v9182_v39 = vrot.slane %v7914_v40, %v17705_v14 }
 0x4c8   : > { %v18240_v59 = vpop.xlane.xlu1 %7824  ;;  %v10352_v5 = vcombine.low %v10344_v38, %v10351_v21  ;;  %v7915_v18 = vadd.f32 %v17702_v55, %v18152_v27  ;;  %v10320_v50 = vcombine.low %v8888_v17, %v8895_v1  ;;  %v9189_v3 = vrot.slane %v7914_v40, %v17708_v32 }
 0x4c9   : > { %v9196_v12 = vrot.slane %v7914_v40, %v17711_v16  ;;  %v10327_v7 = vrot.slane %v10319_v44, %v17728_v52  ;;  %v10438_v29 = vcombine.low %v9070_v25, %v9077_v33  ;;  %v9203_v19 = vrot.slane %v7914_v40, %v17714_v31 }
 0x4ca   : > { %10977 = vperm.xlu0 %14009, %v10352_v5   ;;  %v10334_v8 = vrot.slane %v10320_v50, %v17728_v52  ;;  %v10439_v27 = vcombine.low %v9084_v20, %v9091_v4  ;;  %v7912_v38 = vadd.f32 %v17702_v55, %v7815_v34  ;;  %v18267_v21 = vcombine.low %v9042_v30, %v9049_v0  ;;  %v7823_v4 = vpop.xlane.xlu0 %7822 }
 0x4cb   : > { %v10446_v63 = vrot.slane %v10438_v29, %v17728_v52  ;;  %v10285_v17 = vcombine.low %v8818_v15, %v8825_v2  ;;  %v10286_v1 = vcombine.low %v8832_v48, %v8839_v10  ;;  %v9210_v34 = vrot.slane %v7915_v18, %v17705_v14 }
 0x4cc   : > { %v18265_v13 = vpop.xlane.xlu1 %7836  ;;  %v10335_v25 = vcombine.low %v10327_v7, %v10334_v8  ;;  %v10453_v33 = vrot.slane %v10439_v27, %v17728_v52  ;;  %v7913_v20 = vadd.f32 %v17702_v55, %v18181_v54  ;;  %v10506_v40 = vcombine.low %v9182_v39, %v9189_v3 }
 0x4cd   : > { %v9217_v44 = vrot.slane %v7915_v18, %v17708_v32  ;;  %v9224_v15 = vrot.slane %v7915_v18, %v17711_v16  ;;  %v9231_v2 = vrot.slane %v7915_v18, %v17714_v31  ;;  %v10507_v30 = vcombine.low %v9196_v12, %v9203_v19 }
 0x4ce   : > { %10974 = vperm.xlu1 %14010, %v10335_v25   ;;  %v10454_v45 = vcombine.low %v10446_v63, %v10453_v33  ;;  %v9126_v48 = vrot.slane %v7912_v38, %v17705_v14  ;;  %v9133_v10 = vrot.slane %v7912_v38, %v17708_v32  ;;  %v9140_v5 = vrot.slane %v7912_v38, %v17711_v16 }
 0x4cf   : > { %v9147_v54 = vrot.slane %v7912_v38, %v17714_v31  ;;  %v10293_v39 = vrot.slane %v10285_v17, %v17728_v52  ;;  %v10300_v50 = vrot.slane %v10286_v1, %v17728_v52  ;;  %v9154_v18 = vrot.slane %v7913_v20, %v17705_v14 }
 0x4d0   : > { %v18291_v0 = vpop.xlane.xlu1 %7832  ;;  %10995 = vperm.xlu0 %14009, %v10454_v45   ;;  %v9161_v3 = vrot.slane %v7913_v20, %v17708_v32  ;;  %v10404_v12 = vcombine.low %v9014_v11, %v9021_v26  ;;  %v10405_v7 = vcombine.low %v9028_v51, %v9035_v24  ;;  %v7918_v19 = vadd.f32 %v17702_v55, %v7827_v23  ;;  %v7835_v23 = vpop.xlane.xlu0 %7834 }
 0x4d1   : > { %v10301_v29 = vcombine.low %v10293_v39, %v10300_v50  ;;  %v10387_v8 = vcombine.low %v8986_v9, %v8993_v36  ;;  %v10388_v27 = vcombine.low %v9000_v22, %v9007_v49  ;;  %v9168_v11 = vrot.slane %v7913_v20, %v17711_v16 }
 0x4d2   : > { %v9175_v26 = vrot.slane %v7913_v20, %v17714_v31  ;;  %v10412_v51 = vrot.slane %v10404_v12, %v17728_v52  ;;  %v10419_v24 = vrot.slane %v10405_v7, %v17728_v52  ;;  %v18318_v63 = vcombine.low %v9056_v43, %v9063_v35 }
 0x4d3   : > { %v18320_v9 = vcombine.low %v9210_v34, %v9217_v44  ;;  %v18322_v36 = vcombine.low %v9224_v15, %v9231_v2  ;;  %v10472_v17 = vcombine.low %v9126_v48, %v9133_v10  ;;  %10968 = vperm.xlu1 %14010, %v10301_v29   ;;  %v10473_v57 = vcombine.low %v9140_v5, %v9147_v54 }
 0x4d4   : > { %v18316_v38 = vpop.xlane.xlu1 %7844  ;;  %v18324_v22 = vcombine.low %v9154_v18, %v9161_v3  ;;  %v10420_v49 = vcombine.low %v10412_v51, %v10419_v24  ;;  %v18328_v1 = vadd.f32 %v17702_v55, %v18212_v37  ;;  %v9294_v25 = vrot.slane %v7918_v19, %v17705_v14  ;;  %v7831_v10 = vpop.xlane.xlu0 %7830 }
 0x4d5   : > { %v9301_v33 = vrot.slane %v7918_v19, %v17708_v32  ;;  %v10395_v43 = vrot.slane %v10387_v8, %v17728_v52  ;;  %v10402_v35 = vrot.slane %v10388_v27, %v17728_v52  ;;  %v18334_v34 = vcombine.low %v9168_v11, %v9175_v26 }
 0x4d6   : > { %10989 = vperm.xlu0 %14009, %v10420_v49   ;;  %v10514_v20 = vrot.slane %v10506_v40, %v17728_v52  ;;  %v10521_v44 = vrot.slane %v10507_v30, %v17728_v52  ;;  %v7916_v15 = vadd.f32 %v17702_v55, %v7823_v4  ;;  %v18341_v37 = vadd.f32 %v17702_v55, %v18240_v59 }
 0x4d7   : > { %v10403_v2 = vcombine.low %v10395_v43, %v10402_v35  ;;  %v10353_v45 = vcombine.low %v8930_v56, %v8937_v46  ;;  %v10354_v40 = vcombine.low %v8944_v53, %v8951_v61  ;;  %v9308_v4 = vrot.slane %v7918_v19, %v17711_v16 }
 0x4d8   : > { %v9315_v30 = vrot.slane %v7918_v19, %v17714_v31  ;;  %v9322_v59 = vrot.slane %v18328_v1, %v17705_v14  ;;  %v10522_v48 = vcombine.low %v10514_v20, %v10521_v44  ;;  %v18359_v5 = vpop.xlane.xlu1 %7840  ;;  %v18361_v54 = vcombine.low %v9294_v25, %v9301_v33  ;;  %v7843_v25 = vpop.xlane.xlu0 %7842 }
 0x4d9   : > { %v9329_v56 = vrot.slane %v18328_v1, %v17708_v32  ;;  %10986 = vperm.xlu1 %14010, %v10403_v2   ;;  %v9238_v62 = vrot.slane %v7916_v15, %v17705_v14  ;;  %v9245_v46 = vrot.slane %v7916_v15, %v17708_v32  ;;  %v9252_v53 = vrot.slane %v7916_v15, %v17711_v16 }
 0x4da   : > { %11007 = vperm.xlu0 %14009, %v10522_v48   ;;  %v9259_v61 = vrot.slane %v7916_v15, %v17714_v31  ;;  %v10361_v39 = vrot.slane %v10353_v45, %v17728_v52  ;;  %v10368_v50 = vrot.slane %v10354_v40, %v17728_v52  ;;  %v9266_v18 = vrot.slane %v18341_v37, %v17705_v14 }
 0x4db   : > { %v9273_v3 = vrot.slane %v18341_v37, %v17708_v32  ;;  %v10480_v12 = vrot.slane %v10472_v17, %v17728_v52  ;;  %v10487_v7 = vrot.slane %v10473_v57, %v17728_v52  ;;  %v9336_v29 = vrot.slane %v18328_v1, %v17711_v16 }
 0x4dc   : > { %v9343_v19 = vrot.slane %v18328_v1, %v17714_v31  ;;  %v10369_v8 = vcombine.low %v10361_v39, %v10368_v50  ;;  %v7922_v27 = vadd.f32 %v17702_v55, %v7835_v23  ;;  %v18382_v11 = vcombine.low %v9308_v4, %v9315_v30  ;;  %v18402_v33 = vpop.xlane.xlu1 %7852 }
 0x4dd   : > { %v10488_v26 = vcombine.low %v10480_v12, %v10487_v7  ;;  %v10455_v51 = vcombine.low %v9098_v6, %v9105_v42  ;;  %v10456_v24 = vcombine.low %v9112_v60, %v9119_v28  ;;  %v18396_v17 = vcombine.low %v9322_v59, %v9329_v56 }
 0x4de   : > { %v10540_v23 = vcombine.low %v9238_v62, %v9245_v46  ;;  %v9280_v57 = vrot.slane %v18341_v37, %v17711_v16  ;;  %v9287_v49 = vrot.slane %v18341_v37, %v17714_v31  ;;  %10980 = vperm.xlu1 %14010, %v10369_v8   ;;  %v10541_v6 = vcombine.low %v9252_v53, %v9259_v61 }
 0x4df   : > { %v18404_v42 = vcombine.low %v9266_v18, %v9273_v3  ;;  %11001 = vperm.xlu0 %14009, %v10488_v26   ;;  %v7923_v58 = vadd.f32 %v17702_v55, %v18265_v13  ;;  %v10531_v60 = vrot.slane %v18320_v9, %v17728_v52  ;;  %v9406_v28 = vrot.slane %v7922_v27, %v17705_v14 }
 0x4e0   : > { %v9413_v43 = vrot.slane %v7922_v27, %v17708_v32  ;;  %v10463_v35 = vrot.slane %v10455_v51, %v17728_v52  ;;  %v10470_v20 = vrot.slane %v10456_v24, %v17728_v52  ;;  %v9420_v44 = vrot.slane %v7922_v27, %v17711_v16  ;;  %v18432_v62 = vpop.xlane.xlu1 %7848 }
 0x4e1   : > { %v9427_v15 = vrot.slane %v7922_v27, %v17714_v31  ;;  %v10538_v2 = vrot.slane %v18322_v36, %v17728_v52  ;;  %v7920_v13 = vadd.f32 %v17702_v55, %v7831_v10  ;;  %v7921_v9 = vadd.f32 %v17702_v55, %v18291_v0 }
 0x4e2   : > { %v10471_v37 = vcombine.low %v10463_v35, %v10470_v20  ;;  %v10429_v45 = vrot.slane %v18267_v21, %v17728_v52  ;;  %v10436_v40 = vrot.slane %v18318_v63, %v17728_v52  ;;  %v9434_v4 = vrot.slane %v7923_v58, %v17705_v14  ;;  %v7839_v21 = vpop.xlane.xlu0 %7838 }
 0x4e3   : > { %v9441_v30 = vrot.slane %v7923_v58, %v17708_v32  ;;  %v9448_v59 = vrot.slane %v7923_v58, %v17711_v16  ;;  %v10539_v48 = vcombine.low %v10531_v60, %v10538_v2  ;;  %v9455_v36 = vrot.slane %v7923_v58, %v17714_v31 }
 0x4e4   : > { %10998 = vperm.xlu1 %14010, %v10471_v37   ;;  %v9350_v10 = vrot.slane %v7920_v13, %v17705_v14  ;;  %v9357_v0 = vrot.slane %v7920_v13, %v17708_v32  ;;  %v9364_v56 = vrot.slane %v7920_v13, %v17711_v16  ;;  %v9371_v63 = vrot.slane %v7920_v13, %v17714_v31 }
 0x4e5   : > { %11010 = vperm.xlu0 %14009, %v10539_v48   ;;  %v9378_v46 = vrot.slane %v7921_v9, %v17705_v14  ;;  %v9385_v53 = vrot.slane %v7921_v9, %v17708_v32  ;;  %v10548_v61 = vrot.slane %v10540_v23, %v17728_v52  ;;  %v9392_v39 = vrot.slane %v7921_v9, %v17711_v16 }
 0x4e6   : > { %v9399_v50 = vrot.slane %v7921_v9, %v17714_v31  ;;  %v10437_v18 = vcombine.low %v10429_v45, %v10436_v40  ;;  %v10555_v3 = vrot.slane %v10541_v6, %v17728_v52  ;;  %v10558_v12 = vcombine.low %v9280_v57, %v9287_v49 }
 0x4e7   : > { %v7926_v7 = vadd.f32 %v17702_v55, %v7843_v25  ;;  %v10497_v8 = vrot.slane %v18324_v22, %v17728_v52  ;;  %v10504_v27 = vrot.slane %v18334_v34, %v17728_v52  ;;  %v10642_v26 = vcombine.low %v9406_v28, %v9413_v43  ;;  %v7851_v25 = vpop.xlane.xlu0 %7850  ;;  %v18454_v28 = vpop.xlane.xlu1 %7860 }
 0x4e8   : > { %v10643_v51 = vcombine.low %v9420_v44, %v9427_v15  ;;  %v10659_v24 = vcombine.low %v9434_v4, %v9441_v30  ;;  %10992 = vperm.xlu1 %14010, %v10437_v18   ;;  %v10556_v23 = vcombine.low %v10548_v61, %v10555_v3  ;;  %v10660_v58 = vcombine.low %v9448_v59, %v9455_v36 }
 0x4e9   : > { %v10608_v60 = vcombine.low %v9350_v10, %v9357_v0  ;;  %v10609_v35 = vcombine.low %v9364_v56, %v9371_v63  ;;  %v7927_v6 = vadd.f32 %v17702_v55, %v18316_v38  ;;  %v18448_v57 = vcombine.low %v9378_v46, %v9385_v53 }
 0x4ea   : > { %v18450_v49 = vcombine.low %v9392_v39, %v9399_v50  ;;  %11013 = vperm.xlu0 %14009, %v10556_v23   ;;  %v10505_v22 = vcombine.low %v10497_v8, %v10504_v27  ;;  %v10565_v34 = vrot.slane %v18404_v42, %v17728_v52  ;;  %v9518_v43 = vrot.slane %v7926_v7, %v17705_v14 }
 0x4eb   : > { %v9525_v20 = vrot.slane %v7926_v7, %v17708_v32  ;;  %v10572_v44 = vrot.slane %v10558_v12, %v17728_v52  ;;  %v7924_v38 = vadd.f32 %v17702_v55, %v7839_v21  ;;  %v9532_v15 = vrot.slane %v7926_v7, %v17711_v16  ;;  %v7847_v61 = vpop.xlane.xlu0 %7846  ;;  %v18477_v39 = vpop.xlane.xlu1 %7856 }
 0x4ec   : > { %v9539_v2 = vrot.slane %v7926_v7, %v17714_v31  ;;  %11004 = vperm.xlu1 %14010, %v10505_v22   ;;  %v10650_v13 = vrot.slane %v10642_v26, %v17728_v52  ;;  %v10657_v42 = vrot.slane %v10643_v51, %v17728_v52  ;;  %v9546_v37 = vrot.slane %v7927_v6, %v17705_v14 }
 0x4ed   : > { %v9553_v9 = vrot.slane %v7927_v6, %v17708_v32  ;;  %v9560_v45 = vrot.slane %v7927_v6, %v17711_v16  ;;  %v10573_v40 = vcombine.low %v10565_v34, %v10572_v44  ;;  %v9567_v4 = vrot.slane %v7927_v6, %v17714_v31 }
 0x4ee   : > { %v9462_v30 = vrot.slane %v7924_v38, %v17705_v14  ;;  %v9469_v59 = vrot.slane %v7924_v38, %v17708_v32  ;;  %v7925_v48 = vadd.f32 %v17702_v55, %v18359_v5  ;;  %v9476_v36 = vrot.slane %v7924_v38, %v17711_v16 }
 0x4ef   : > { %11016 = vperm.xlu0 %14009, %v10573_v40   ;;  %v9483_v10 = vrot.slane %v7924_v38, %v17714_v31  ;;  %v10658_v0 = vcombine.low %v10650_v13, %v10657_v42  ;;  %v10667_v56 = vrot.slane %v10659_v24, %v17728_v52  ;;  %v10710_v21 = vcombine.low %v9518_v43, %v9525_v20 }
 0x4f0   : > { %v10711_v63 = vcombine.low %v9532_v15, %v9539_v2  ;;  %v10674_v46 = vrot.slane %v10660_v58, %v17728_v52  ;;  %v7930_v53 = vadd.f32 %v17702_v55, %v7851_v25  ;;  %v10727_v50 = vcombine.low %v9546_v37, %v9553_v9  ;;  %v7859_v15 = vpop.xlane.xlu0 %7858 }
 0x4f1   : > { %11031 = vperm.xlu1 %14010, %v10658_v0   ;;  %v7931_v5 = vadd.f32 %v17702_v55, %v18402_v33  ;;  %v10616_v18 = vrot.slane %v10608_v60, %v17728_v52  ;;  %v10623_v3 = vrot.slane %v10609_v35, %v17728_v52  ;;  %v10728_v12 = vcombine.low %v9560_v45, %v9567_v4 }
 0x4f2   : > { %v9490_v7 = vrot.slane %v7925_v48, %v17705_v14  ;;  %v9497_v8 = vrot.slane %v7925_v48, %v17708_v32  ;;  %v10675_v27 = vcombine.low %v10667_v56, %v10674_v46  ;;  %v10676_v26 = vcombine.low %v9462_v30, %v9469_v59 }
 0x4f3   : > { %v10677_v51 = vcombine.low %v9476_v36, %v9483_v10  ;;  %v9504_v24 = vrot.slane %v7925_v48, %v17711_v16  ;;  %v9511_v23 = vrot.slane %v7925_v48, %v17714_v31  ;;  %v9630_v58 = vrot.slane %v7930_v53, %v17705_v14 }
 0x4f4   : > { %11034 = vperm.xlu0 %14009, %v10675_v27   ;;  %v9637_v33 = vrot.slane %v7930_v53, %v17708_v32  ;;  %v10624_v60 = vcombine.low %v10616_v18, %v10623_v3  ;;  %v10633_v35 = vrot.slane %v18448_v57, %v17728_v52  ;;  %v9644_v22 = vrot.slane %v7930_v53, %v17711_v16 }
 0x4f5   : > { %v18491_v6 = vpop.permute.xlu1 %10887  ;;  %v9651_v34 = vrot.slane %v7930_v53, %v17714_v31  ;;  %v9658_v25 = vrot.slane %v7931_v5, %v17705_v14  ;;  %v10640_v43 = vrot.slane %v18450_v49, %v17728_v52  ;;  %v9665_v20 = vrot.slane %v7931_v5, %v17708_v32 }
 0x4f6   : > { %11025 = vperm.xlu1 %14010, %v10624_v60   ;;  %v7929_v44 = vadd.f32 %v17702_v55, %v18432_v62  ;;  %v10718_v38 = vrot.slane %v10710_v21, %v17728_v52  ;;  %v10725_v57 = vrot.slane %v10711_v63, %v17728_v52  ;;  %v9672_v2 = vrot.slane %v7931_v5, %v17711_v16 }
 0x4f7   : > { %v9679_v13 = vrot.slane %v7931_v5, %v17714_v31  ;;  %v10641_v42 = vcombine.low %v10633_v35, %v10640_v43  ;;  %v7928_v37 = vadd.f32 %v17702_v55, %v7847_v61  ;;  %v18512_v49 = vcombine.low %v9336_v29, %v9343_v19 }
 0x4f8   : > { %v10693_v62 = vcombine.low %v9490_v7, %v9497_v8  ;;  %v10694_v9 = vcombine.low %v9504_v24, %v9511_v23  ;;  %v10778_v45 = vcombine.low %v9630_v58, %v9637_v33  ;;  %v9602_v4 = vrot.slane %v7929_v44, %v17705_v14 }
 0x4f9   : > { %v18514_v40 = vpop.permute.xlu1 %10881  ;;  %11028 = vperm.xlu0 %14009, %v10641_v42   ;;  %v9609_v30 = vrot.slane %v7929_v44, %v17708_v32  ;;  %v10726_v59 = vcombine.low %v10718_v38, %v10725_v57  ;;  %v10735_v48 = vrot.slane %v10727_v50, %v17728_v52  ;;  %v10779_v36 = vcombine.low %v9644_v22, %v9651_v34  ;;  %v7855_v50 = vpop.xlane.xlu0 %7854 }
 0x4fa   : > { %v18519_v10 = vcombine.low %v9658_v25, %v9665_v20  ;;  %v10742_v1 = vrot.slane %v10728_v12, %v17728_v52  ;;  %v7934_v29 = vadd.f32 %v17702_v55, %v7859_v15  ;;  %v18523_v19 = vcombine.low %v9672_v2, %v9679_v13 }
 0x4fb   : > { %v9574_v0 = vrot.slane %v7928_v37, %v17705_v14  ;;  %11043 = vperm.xlu1 %14010, %v10726_v59   ;;  %v10684_v56 = vrot.slane %v10676_v26, %v17728_v52  ;;  %v10691_v21 = vrot.slane %v10677_v51, %v17728_v52  ;;  %v9581_v63 = vrot.slane %v7928_v37, %v17708_v32 }
 0x4fc   : > { %v9616_v46 = vrot.slane %v7929_v44, %v17711_v16  ;;  %v9623_v53 = vrot.slane %v7929_v44, %v17714_v31  ;;  %v10743_v61 = vcombine.low %v10735_v48, %v10742_v1  ;;  %v9588_v18 = vrot.slane %v7928_v37, %v17711_v16 }
 0x4fd   : > { %v18531_v5 = vpop.permute.xlu1 %10890  ;;  %v9595_v3 = vrot.slane %v7928_v37, %v17714_v31  ;;  %v10761_v12 = vcombine.low %v9602_v4, %v9609_v30  ;;  %v18537_v7 = vadd.f32 %v17702_v55, %v18454_v28  ;;  %v9742_v8 = vrot.slane %v7934_v29, %v17705_v14 }
 0x4fe   : > { %11046 = vperm.xlu0 %14009, %v10743_v61   ;;  %v9749_v27 = vrot.slane %v7934_v29, %v17708_v32  ;;  %v10692_v26 = vcombine.low %v10684_v56, %v10691_v21  ;;  %v10701_v51 = vrot.slane %v10693_v62, %v17728_v52  ;;  %v9756_v24 = vrot.slane %v7934_v29, %v17711_v16 }
 0x4ff   : > { %v9763_v23 = vrot.slane %v7934_v29, %v17714_v31  ;;  %v10708_v58 = vrot.slane %v10694_v9, %v17728_v52  ;;  %v7932_v33 = vadd.f32 %v17702_v55, %v7855_v50  ;;  %v10744_v60 = vcombine.low %v9574_v0, %v9581_v63 }
 0x500   : > { %v10762_v35 = vcombine.low %v9616_v46, %v9623_v53  ;;  %11037 = vperm.xlu1 %14010, %v10692_v26   ;;  %v10786_v28 = vrot.slane %v10778_v45, %v17728_v52  ;;  %v10793_v22 = vrot.slane %v10779_v36, %v17728_v52  ;;  %v10745_v25 = vcombine.low %v9588_v18, %v9595_v3 }
 0x501   : > { %v18548_v34 = vpop.permute.xlu1 %10884  ;;  %v9770_v43 = vrot.slane %v18537_v7, %v17705_v14  ;;  %v10709_v20 = vcombine.low %v10701_v51, %v10708_v58  ;;  %v7933_v44 = vadd.f32 %v17702_v55, %v18477_v39  ;;  %v10846_v38 = vcombine.low %v9742_v8, %v9749_v27 }
 0x502   : > { %v9777_v57 = vrot.slane %v18537_v7, %v17708_v32  ;;  %v9784_v15 = vrot.slane %v18537_v7, %v17711_v16  ;;  %v9791_v2 = vrot.slane %v18537_v7, %v17714_v31  ;;  %v10847_v13 = vcombine.low %v9756_v24, %v9763_v23 }
 0x503   : > { %11040 = vperm.xlu0 %14009, %v10709_v20   ;;  %v9686_v42 = vrot.slane %v7932_v33, %v17705_v14  ;;  %v10794_v37 = vcombine.low %v10786_v28, %v10793_v22  ;;  %v10769_v62 = vrot.slane %v10761_v12, %v17728_v52  ;;  %v9693_v9 = vrot.slane %v7932_v33, %v17708_v32 }
 0x504   : > { %v9700_v55 = vrot.slane %v7932_v33, %v17711_v16  ;;  %v10776_v39 = vrot.slane %v10762_v35, %v17728_v52  ;;  %v10752_v45 = vrot.slane %v10744_v60, %v17728_v52  ;;  %v9707_v30 = vrot.slane %v7932_v33, %v17714_v31 }
 0x505   : > { %v18566_v4 = vpop.permute.xlu1 %10899  ;;  %v9714_v59 = vrot.slane %v7933_v44, %v17705_v14  ;;  %v9721_v48 = vrot.slane %v7933_v44, %v17708_v32  ;;  %11055 = vperm.xlu1 %14010, %v10794_v37   ;;  %v10759_v36 = vrot.slane %v10745_v25, %v17728_v52  ;;  %v9728_v1 = vrot.slane %v7933_v44, %v17711_v16 }
 0x506   : > { %v10777_v29 = vcombine.low %v10769_v62, %v10776_v39  ;;  %v10582_v0 = vrot.slane %v18361_v54, %v17728_v52  ;;  %v10589_v56 = vrot.slane %v18382_v11, %v17728_v52  ;;  %v10803_v63 = vrot.slane %v18519_v10, %v17728_v52  ;;  %v18582_v46 = vpop.permute.xlu0 %10911 }
 0x507   : > { %v10760_v21 = vcombine.low %v10752_v45, %v10759_v36  ;;  %v10810_v14 = vrot.slane %v18523_v19, %v17728_v52  ;;  %v11085_v32 = vadd.s32 4294967280, %v17990_v47  ;;  %v10812_v53 = vcombine.low %v9686_v42, %v9693_v9 }
 0x508   : > { %v9735_v16 = vrot.slane %v7933_v44, %v17714_v31  ;;  %11052 = vperm.xlu0 %14009, %v10777_v29   ;;  %v10599_v54 = vrot.slane %v18396_v17, %v17728_v52  ;;  %v10606_v11 = vrot.slane %v18512_v49, %v17728_v52  ;;  %v10813_v50 = vcombine.low %v9700_v55, %v9707_v30 }
 0x509   : > { %v10894_v61 = vpop.permute.xlu1 %10893  ;;  %11049 = vperm.xlu1 %14010, %v10760_v21   ;;  %v10854_v10 = vrot.slane %v10846_v38, %v17728_v52  ;;  %v10861_v19 = vrot.slane %v10847_v13, %v17728_v52  ;;  %v18591_v18 = vcombine.low %v9770_v43, %v9777_v57  ;;  %v10590_v3 = vcombine.low %v10582_v0, %v10589_v56 }
 0x50a   : > { %v18595_v31 = vsub.s32 %v17990_v47, %v19653_v41  ;;  %v11092_v12 = vadd.s32 4294967272, %v17990_v47  ;;  %v10829_v17 = vcombine.low %v9714_v59, %v9721_v48  ;;  %v10811_v7 = vcombine.low %v10803_v63, %v10810_v14  ;;  %v18602_v27 = vpop.permute.xlu0 %10905 }
 0x50b   : > { %v18599_v49 = vsub.s32 %v11085_v32, %v19653_v41  ;;  %v11078_v8 = vadd.s32 4294967288, %v17990_v47  ;;  %v18604_v26 = vcombine.low %v9784_v15, %v9791_v2  ;;  %v10830_v51 = vcombine.low %v9728_v1, %v9735_v16 }
 0x50c   : > { %11019 = vperm.xlu0 %14009, %v10590_v3   ;;  %v10607_v24 = vcombine.low %v10599_v54, %v10606_v11  ;;  %v10820_v23 = vrot.slane %v10812_v53, %v17728_v52  ;;  %v10862_v58 = vcombine.low %v10854_v10, %v10861_v19  ;;  %v10827_v33 = vrot.slane %v10813_v50, %v17728_v52 }
 0x50d   : > { %11058 = vperm.xlu1 %14010, %v10811_v7   ;;  %v18609_v60 = vsub.s32 %v11092_v12, %v19653_v41  ;;  %v18612_v35 = vsub.s32 %v11078_v8, %v19653_v41  ;;  %v10903_v28 = vpop.permute.xlu1 %10902  ;;  %v11077_v22 = vrot.slane %v18514_v40, %v18595_v31  ;;  %v11113_v25 = vadd.s32 4294967248, %v17990_v47 }
 0x50e   : > { %v11099_v43 = vadd.s32 4294967264, %v17990_v47  ;;  %v11089_v20 = vrot.slane %v18491_v6, %v18599_v49  ;;  %v10837_v44 = vrot.slane %v10829_v17, %v17728_v52  ;;  %v11127_v40 = vadd.s32 4294967232, %v17990_v47 }
 0x50f   : > { %v11082_v38 = vrot.slane %v18548_v34, %v18612_v35  ;;  %v11120_v15 = vadd.s32 4294967240, %v17990_v47  ;;  %v11096_v2 = vrot.slane %v18531_v5, %v18609_v60  ;;  %v11106_v34 = vadd.s32 4294967256, %v17990_v47 }
 0x510   : > { %11022 = vperm.xlu0 %14009, %v10607_v24   ;;  %v18624_v57 = vsub.s32 %v11099_v43, %v19653_v41  ;;  %v10844_v42 = vrot.slane %v10830_v51, %v17728_v52  ;;  %v18637_v62 = vsub.s32 %v11113_v25, %v19653_v41  ;;  %v10828_v55 = vcombine.low %v10820_v23, %v10827_v33 }
 0x511   : > { %11067 = vperm.xlu1 %14010, %v10862_v58   ;;  %v11084_v6 = vsel %vm11083_vm4, %v11082_v38, %v11077_v22  ;;  %v18631_v13 = vpop.permute.xlu0 %10923  ;;  %v18642_v5 = vsub.s32 %v11120_v15, %v19653_v41  ;;  %v18645_v45 = vsub.s32 %v11106_v34, %v19653_v41  ;;  %v18649_v48 = vsub.s32 %v11127_v40, %v19653_v41 }
 0x512   : > { %v11091_v37 = vsel %vm11090_vm5, %v11089_v20, %v11084_v6  ;;  %v11103_v9 = vrot.slane %v10894_v61, %v18624_v57  ;;  %v10871_v36 = vrot.slane %v18591_v18, %v17728_v52  ;;  %v10845_v0 = vcombine.low %v10837_v44, %v10844_v42 }
 0x513   : > { %v11098_v39 = vsel %vm11097_vm6, %v11096_v2, %v11091_v37  ;;  %v10897_v30 = vpop.permute.xlu1 %10896  ;;  %v10878_v56 = vrot.slane %v18604_v26, %v17728_v52  ;;  %v11117_v21 = vrot.slane %v18566_v4, %v18637_v62  ;;  %v11124_v63 = vrot.slane %v10903_v28, %v18642_v5 }
 0x514   : > { %v11105_v59 = vsel %vm11104_vm7, %v11103_v9, %v11098_v39  ;;  %v11110_v1 = vrot.slane %v10897_v30, %v18645_v45  ;;  %v11134_v32 = vadd.s32 4294967224, %v17990_v47  ;;  %v11141_v53 = vadd.s32 4294967216, %v17990_v47 }
 0x515   : > { %11061 = vperm.xlu1 %14010, %v10828_v55   ;;  %v10918_v29 = vpop.permute.xlu0 %10917  ;;  %v11131_v16 = vrot.slane %v18602_v27, %v18649_v48  ;;  %v11148_v52 = vadd.s32 4294967208, %v17990_v47  ;;  %v11155_v11 = vadd.s32 4294967200, %v17990_v47  ;;  %v10879_v10 = vcombine.low %v10871_v36, %v10878_v56 }
 0x516   : > { %v11112_v14 = vsel %vm11111_vm8, %v11110_v1, %v11105_v59  ;;  %v18670_v18 = vsub.s32 %v11134_v32, %v19653_v41  ;;  %v18673_v3 = vsub.s32 %v11141_v53, %v19653_v41  ;;  %v11162_v23 = vadd.s32 4294967192, %v17990_v47 }
 0x517   : > { %v11119_v54 = vsel %vm11118_vm9, %v11117_v21, %v11112_v14  ;;  %v18676_v12 = vsub.s32 %v11148_v52, %v19653_v41  ;;  %v18679_v17 = vsub.s32 %v11155_v11, %v19653_v41  ;;  %v11169_v58 = vadd.s32 4294967184, %v17990_v47 }
 0x518   : > { %v11126_v4 = vsel %vm11125_vm10, %v11124_v63, %v11119_v54  ;;  %v11145_v27 = vrot.slane %v18582_v46, %v18673_v3  ;;  %v11176_v22 = vadd.s32 4294967176, %v17990_v47  ;;  %v18694_v20 = vsub.s32 %v11162_v23, %v19653_v41 }
 0x519   : > { %11064 = vperm.xlu1 %14010, %v10845_v0   ;;  %v11133_v50 = vsel %vm11132_vm11, %v11131_v16, %v11126_v4  ;;  %v11159_v33 = vrot.slane %v10918_v29, %v18679_v17  ;;  %v18697_v44 = vsub.s32 %v11169_v58, %v19653_v41 }
 0x51a   : > { %v10915_v61 = vpop.permute.xlu1 %10914  ;;  %v10936_v19 = vpop.permute.xlu0 %10935  ;;  %v18700_v40 = vsub.s32 %v11176_v22, %v19653_v41 }
 0x51b   : > { %v11152_v26 = vrot.slane %v10915_v61, %v18676_v12  ;;  %v11173_v2 = vrot.slane %v18631_v13, %v18697_v44  ;;  %v11195_v13 = vrot.slane %v10936_v19, %v18599_v49 }
 0x51d   : > { %11070 = vperm.xlu1 %14010, %v10879_v10  }
 0x51e   : > { %v10909_v7 = vpop.permute.xlu1 %10908 }
 0x51f   : > { %v11138_v8 = vrot.slane %v10909_v7, %v18670_v18 }
 0x521   : > { %v11140_v51 = vsel %vm11139_vm12, %v11138_v8, %v11133_v50  ;;  %v10930_v24 = vpop.permute.xlu0 %10929 }
 0x522   : > { %v11147_v28 = vsel %vm11146_vm13, %v11145_v27, %v11140_v51  ;;  %v11186_v30 = vrot.slane %v10930_v24, %v18595_v31 }
 0x523   : > { %v10927_v25 = vpop.permute.xlu1 %10926  ;;  %v11154_v46 = vsel %vm11153_vm14, %v11152_v26, %v11147_v28 }
 0x524   : > { %v11161_v43 = vsel %vm11160_vm15, %v11159_v33, %v11154_v46  ;;  %v11180_v6 = vrot.slane %v10927_v25, %v18700_v40 }
 0x526   : > { %v10948_v38 = vpop.permute.xlu0 %10947 }
 0x527   : > { %v11215_v54 = vrot.slane %v10948_v38, %v18637_v62 }
 0x528   : > { %v10921_v15 = vpop.permute.xlu1 %10920 }
 0x529   : > { %v11166_v47 = vrot.slane %v10921_v15, %v18694_v20 }
 0x52b   : > { %v11168_v34 = vsel %vm11167_vm0, %v11166_v47, %v11161_v43  ;;  %v10942_v42 = vpop.permute.xlu0 %10941 }
 0x52c   : > { %v11175_v37 = vsel %vm11174_vm1, %v11173_v2, %v11168_v34  ;;  %v11205_v0 = vrot.slane %v10942_v42, %v18624_v57 }
 0x52d   : > { %v10939_v9 = vpop.permute.xlu1 %10938  ;;  %v18709_v41 = vsel %vm11181_vm2, %v11180_v6, %v11175_v37 }
 0x52e   : > { %v11200_v36 = vrot.slane %v10939_v9, %v18609_v60 }
 0x530   : > { %v10960_v55 = vpop.permute.xlu0 %10959 }
 0x531   : > { %v11235_v51 = vrot.slane %v10960_v55, %v18673_v3 }
 0x532   : > { %v10933_v39 = vpop.permute.xlu1 %10932 }
 0x533   : > { %v11190_v59 = vrot.slane %v10933_v39, %v18612_v35 }
 0x535   : > { %v11191_v1 = vsel %vm11083_vm4, %v11190_v59, %v11186_v30  ;;  %v10954_v29 = vpop.permute.xlu0 %10953 }
 0x536   : > { %v11196_v56 = vsel %vm11090_vm5, %v11195_v13, %v11191_v1  ;;  %v11225_v61 = vrot.slane %v10954_v29, %v18649_v48 }
 0x537   : > { %v10951_v21 = vpop.permute.xlu1 %10950  ;;  %v11201_v63 = vsel %vm11097_vm6, %v11200_v36, %v11196_v56 }
 0x538   : > { %v11206_v14 = vsel %vm11104_vm7, %v11205_v0, %v11201_v63  ;;  %v11220_v52 = vrot.slane %v10951_v21, %v18642_v5 }
 0x53a   : > { %v10972_v32 = vpop.permute.xlu0 %10971 }
 0x53b   : > { %v11255_v15 = vrot.slane %v10972_v32, %v18697_v44 }
 0x53c   : > { %v10945_v53 = vpop.permute.xlu1 %10944 }
 0x53d   : > { %v11210_v16 = vrot.slane %v10945_v53, %v18645_v45 }
 0x53f   : > { %v11211_v4 = vsel %vm11111_vm8, %v11210_v16, %v11206_v14  ;;  %v10966_v11 = vpop.permute.xlu0 %10965 }
 0x540   : > { %v11216_v50 = vsel %vm11118_vm9, %v11215_v54, %v11211_v4  ;;  %v11245_v46 = vrot.slane %v10966_v11, %v18679_v17 }
 0x541   : > { %v10963_v10 = vpop.permute.xlu1 %10962  ;;  %v11221_v19 = vsel %vm11125_vm10, %v11220_v52, %v11216_v50 }
 0x542   : > { %v11226_v7 = vsel %vm11132_vm11, %v11225_v61, %v11221_v19  ;;  %v11240_v24 = vrot.slane %v10963_v10, %v18676_v12 }
 0x544   : > { %v10984_v8 = vpop.permute.xlu0 %10983 }
 0x545   : > { %v11274_v54 = vrot.slane %v10984_v8, %v18599_v49 }
 0x546   : > { %v10957_v27 = vpop.permute.xlu1 %10956 }
 0x547   : > { %v11230_v26 = vrot.slane %v10957_v27, %v18670_v18 }
 0x549   : > { %v11231_v23 = vsel %vm11139_vm12, %v11230_v26, %v11226_v7  ;;  %v10978_v58 = vpop.permute.xlu0 %10977 }
 0x54a   : > { %v11236_v33 = vsel %vm11146_vm13, %v11235_v51, %v11231_v23  ;;  %v11265_v32 = vrot.slane %v10978_v58, %v18595_v31 }
 0x54b   : > { %v11241_v28 = vsel %vm11153_vm14, %v11240_v24, %v11236_v33 }
 0x54c   : > { %v11246_v47 = vsel %vm11160_vm15, %v11245_v46, %v11241_v28 }
 0x54d   : > { %v10975_v22 = vpop.permute.xlu1 %10974 }
 0x54e   : > { %v11260_v2 = vrot.slane %v10975_v22, %v18700_v40 }
 0x54f   : > { %v10996_v25 = vpop.permute.xlu0 %10995 }
 0x550   : > { %v11294_v28 = vrot.slane %v10996_v25, %v18637_v62 }
 0x552   : > { %v10969_v43 = vpop.permute.xlu1 %10968 }
 0x553   : > { %v11250_v38 = vrot.slane %v10969_v43, %v18694_v20 }
 0x555   : > { %v11251_v6 = vsel %vm11167_vm0, %v11250_v38, %v11246_v47  ;;  %v10990_v34 = vpop.permute.xlu0 %10989 }
 0x556   : > { %v11256_v42 = vsel %vm11174_vm1, %v11255_v15, %v11251_v6  ;;  %v11284_v51 = vrot.slane %v10990_v34, %v18624_v57 }
 0x557   : > { %v18742_v37 = vsel %vm11181_vm2, %v11260_v2, %v11256_v42 }
 0x558   : > { %v10987_v9 = vpop.permute.xlu1 %10986 }
 0x559   : > { %v18744_v55 = vpop.permute.xlu0 %11007  ;;  %v11279_v50 = vrot.slane %v10987_v9, %v18609_v60 }
 0x55d   : > { %v10981_v39 = vpop.permute.xlu1 %10980 }
 0x55e   : > { %v11002_v30 = vpop.permute.xlu0 %11001  ;;  %v11269_v63 = vrot.slane %v10981_v39, %v18612_v35 }
 0x560   : > { %v11270_v16 = vsel %vm11083_vm4, %v11269_v63, %v11265_v32 }
 0x561   : > { %v11275_v61 = vsel %vm11090_vm5, %v11274_v54, %v11270_v16 }
 0x562   : > { %v11280_v19 = vsel %vm11097_vm6, %v11279_v50, %v11275_v61 }
 0x563   : > { %v10999_v59 = vpop.permute.xlu1 %10998 }
 0x564   : > { %v18746_v13 = vpop.permute.xlu0 %11010  ;;  %v11299_v15 = vrot.slane %v10999_v59, %v18642_v5 }
 0x567   : > { %v10993_v36 = vpop.permute.xlu1 %10992 }
 0x568   : > { %v11289_v7 = vrot.slane %v10993_v36, %v18645_v45 }
 0x569   : > { %v18748_v1 = vpop.permute.xlu0 %11013 }
 0x56a   : > { %v11324_v54 = vrot.slane %v18748_v1, %v18679_v17 }
 0x56b   : > { %v11005_v29 = vpop.permute.xlu1 %11004 }
 0x56c   : > { %v11309_v34 = vrot.slane %v11005_v29, %v18670_v18 }
 0x56e   : > { %v18750_v0 = vpop.permute.xlu0 %11016 }
 0x570   : > { %v11032_v56 = vpop.permute.xlu1 %11031 }
 0x571   : > { %v11353_v8 = vrot.slane %v11032_v56, %v18599_v49 }
 0x573   : > { %v11035_v21 = vpop.permute.xlu0 %11034 }
 0x574   : > { %v11358_v33 = vrot.slane %v11035_v21, %v18609_v60  ;;  %v11304_v60 = vrot.slane %v11002_v30, %v18649_v48  ;;  %v11314_v30 = vrot.slane %v18744_v55, %v18673_v3 }
 0x575   : > { %v11026_v14 = vpop.permute.xlu1 %11025 }
 0x576   : > { %v11344_v4 = vrot.slane %v11026_v14, %v18595_v31  ;;  %v11285_v31 = vsel %vm11104_vm7, %v11284_v51, %v11280_v19 }
 0x577   : > { %v11290_v58 = vsel %vm11111_vm8, %v11289_v7, %v11285_v31 }
 0x578   : > { %v11029_v53 = vpop.permute.xlu0 %11028  ;;  %v11295_v49 = vsel %vm11118_vm9, %v11294_v28, %v11290_v58 }
 0x579   : > { %v11348_v11 = vrot.slane %v11029_v53, %v18612_v35 }
 0x57a   : > { %v11044_v52 = vpop.permute.xlu1 %11043 }
 0x57b   : > { %v11349_v27 = vsel %vm11083_vm4, %v11348_v11, %v11344_v4  ;;  %v11373_v25 = vrot.slane %v11044_v52, %v18637_v62 }
 0x57c   : > { %v11354_v35 = vsel %vm11090_vm5, %v11353_v8, %v11349_v27 }
 0x57d   : > { %v11047_v10 = vpop.permute.xlu0 %11046  ;;  %v11359_v46 = vsel %vm11097_vm6, %v11358_v33, %v11354_v35 }
 0x57e   : > { %v11378_v59 = vrot.slane %v11047_v10, %v18642_v5 }
 0x57f   : > { %v11038_v26 = vpop.permute.xlu1 %11037 }
 0x580   : > { %v11363_v24 = vrot.slane %v11038_v26, %v18624_v57  ;;  %v11300_v57 = vsel %vm11125_vm10, %v11299_v15, %v11295_v49 }
 0x582   : > { %v11041_v23 = vpop.permute.xlu0 %11040  ;;  %v11364_v38 = vsel %vm11104_vm7, %v11363_v24, %v11359_v46 }
 0x583   : > { %v11368_v43 = vrot.slane %v11041_v23, %v18645_v45  ;;  %v11305_v45 = vsel %vm11132_vm11, %v11304_v60, %v11300_v57 }
 0x584   : > { %v11056_v22 = vpop.permute.xlu1 %11055  ;;  %v11310_v36 = vsel %vm11139_vm12, %v11309_v34, %v11305_v45 }
 0x585   : > { %v11369_v2 = vsel %vm11111_vm8, %v11368_v43, %v11364_v38  ;;  %v11315_v14 = vsel %vm11146_vm13, %v11314_v30, %v11310_v36  ;;  %v11393_v32 = vrot.slane %v11056_v22, %v18673_v3  ;;  %v11329_v3 = vrot.slane %v18750_v0, %v18694_v20 }
 0x586   : > { %v11374_v42 = vsel %vm11118_vm9, %v11373_v25, %v11369_v2 }
 0x587   : > { %v11053_v6 = vpop.permute.xlu0 %11052  ;;  %v11379_v56 = vsel %vm11125_vm10, %v11378_v59, %v11374_v42 }
 0x588   : > { %v11050_v47 = vpop.permute.xlu1 %11049  ;;  %v11388_v63 = vrot.slane %v11053_v6, %v18670_v18 }
 0x589   : > { %v11383_v9 = vrot.slane %v11050_v47, %v18649_v48  ;;  %v11319_v48 = vrot.slane %v18746_v13, %v18676_v12 }
 0x58b   : > { %v11384_v62 = vsel %vm11132_vm11, %v11383_v9, %v11379_v56  ;;  %v11020_v21 = vpop.permute.xlu0 %11019  ;;  %v11320_v16 = vsel %vm11153_vm14, %v11319_v48, %v11315_v14 }
 0x58c   : > { %v11059_v39 = vpop.permute.xlu1 %11058  ;;  %v11389_v5 = vsel %vm11139_vm12, %v11388_v63, %v11384_v62  ;;  %v11325_v13 = vsel %vm11160_vm15, %v11324_v54, %v11320_v16  ;;  %v11334_v11 = vrot.slane %v11020_v21, %v18697_v44 }
 0x58d   : > { %v11398_v55 = vrot.slane %v11059_v39, %v18676_v12  ;;  %v11394_v52 = vsel %vm11146_vm13, %v11393_v32, %v11389_v5  ;;  %v11330_v19 = vsel %vm11167_vm0, %v11329_v3, %v11325_v13 }
 0x58e   : > { %v11335_v7 = vsel %vm11174_vm1, %v11334_v11, %v11330_v19 }
 0x58f   : > { %v11023_v18 = vpop.permute.xlu0 %11022  ;;  %v11399_v50 = vsel %vm11153_vm14, %v11398_v55, %v11394_v52 }
 0x590   : > { %v11068_v29 = vpop.permute.xlu1 %11067  ;;  %v11339_v12 = vrot.slane %v11023_v18, %v18700_v40 }
 0x591   : > { %v11413_v27 = vrot.slane %v11068_v29, %v18697_v44 }
 0x592   : > { %v11340_v0 = vsel %vm11181_vm2, %v11339_v12, %v11335_v7 }
 0x593   : > { %v11421_v31 = vsel %vm11420_vm3, %v11340_v0, %v18709_v41 }
 0x594   : > { %v11062_v53 = vpop.permute.xlu1 %11061 }
 0x595   : > { %v11403_v4 = vrot.slane %v11062_v53, %v18679_v17 }
 0x597   : > { %v11404_v10 = vsel %vm11160_vm15, %v11403_v4, %v11399_v50 }
 0x598   : > { %v11065_v61 = vpop.permute.xlu1 %11064 }
 0x599   : > { %v11408_v1 = vrot.slane %v11065_v61, %v18694_v20 }
 0x59b   : > { %v11409_v17 = vsel %vm11167_vm0, %v11408_v1, %v11404_v10 }
 0x59c   : > { %v11071_v26 = vpop.permute.xlu1 %11070  ;;  %v11414_v8 = vsel %vm11174_vm1, %v11413_v27, %v11409_v17 }
 0x59d   : > { %v11418_v51 = vrot.slane %v11071_v26, %v18700_v40 }
 0x59f   : > { %v11419_v20 = vsel %vm11181_vm2, %v11418_v51, %v11414_v8 }
 0x5a0   : > { %v11422_v35 = vsel %vm11420_vm3, %v11419_v20, %v18742_v37 }
 0x5a1   : > { %v11423_v44 = vcombine.low %v11421_v31, %v11422_v35 }
 0x5a3   : > { %12277 = vst.sshfl [vmem:[%s401_s20] sm:$0x33 pattern:$0x76325410] %v11423_v44 }
 0x5a4 PF: > { %s18_s27 = sadd.s32 1, %s14132_s27  }
 0x5a5   : > { %p15_p4 = scmp.ge.s32.totalorder %s18_s27, 6  }
 0x5a7   :  { %17 = sbr.rel (!%p15_p4) target bundleno = 1 (0x1), region = 115 }

</bundles_post_ra>
